<compile_context>
chip_gen: v6e
topology: v6e:2x2x1
jax: 0.10.0
libtpu: 0.0.40
codegen_flags: <defaults>
</compile_context>

<pallas_src>
import functools

import jax
import jax.numpy as jnp
from jax.experimental import pallas as pl
from jax.experimental.pallas import tpu as pltpu

LANE = 128
SUB = 8
_VMEM_LIMIT = 32 * 1024 * 1024


# ----------------------------------------------------------------------------- helpers
def _round_up(x, m):
    return ((x + m - 1) // m) * m


def _pad2(a, r, c):
    a = a.astype(jnp.float32)
    return jnp.pad(a, ((0, r - a.shape[0]), (0, c - a.shape[1])))


# ----------------------------------------------------------------------------- kernel A:
# fused y = x @ W + b  (whole problem fits a single tile at these sizes)
def _linear_kernel(x_ref, w_ref, b_ref, o_ref):
    o_ref[...] = (jnp.dot(x_ref[...], w_ref[...], preferred_element_type=jnp.float32)
                  + b_ref[...])


def pallas_linear(x, w, b):
    M, K = x.shape
    _, N = w.shape
    Mp, Kp, Np = _round_up(M, SUB), _round_up(K, LANE), _round_up(N, LANE)
    out = pl.pallas_call(
        _linear_kernel,
        out_shape=jax.ShapeDtypeStruct((Mp, Np), jnp.float32),
        grid=(1,),
        in_specs=[pl.BlockSpec((Mp, Kp), lambda i: (0, 0)),
                  pl.BlockSpec((Kp, Np), lambda i: (0, 0)),
                  pl.BlockSpec((1, Np), lambda i: (0, 0))],
        out_specs=pl.BlockSpec((Mp, Np), lambda i: (0, 0)),
        compiler_params=pltpu.CompilerParams(dimension_semantics=("arbitrary",),
                                             vmem_limit_bytes=_VMEM_LIMIT),
    )(_pad2(x, Mp, Kp), _pad2(w, Kp, Np), _pad2(b[None, :], 1, Np))
    return out[:M, :N]


# ----------------------------------------------------------------------------- kernel B:
# EdgeConv (aggr='max'): out_i = max_{(j->i)} MLP([x_i, x_j - x_i]) with a chunked
# running segment-max (grid over edge tiles, [N, C] accumulator lives in out_ref).
def _edgeconv_kernel(cat_ref, w1_ref, b1_ref, w2_ref, b2_ref, idx_ref, out_ref):
    t = pl.program_id(0)

    @pl.when(t == 0)
    def _():
        out_ref[...] = jnp.full(out_ref.shape, -1e30, jnp.float32)

    h = jnp.dot(cat_ref[...], w1_ref[...], preferred_element_type=jnp.float32) + b1_ref[...]
    h = jnp.maximum(h, 0.0)
    msg = jnp.dot(h, w2_ref[...], preferred_element_type=jnp.float32) + b2_ref[...]   # [TE, C]

    n_nodes = out_ref.shape[0]
    te = msg.shape[0]
    rows = jax.lax.broadcasted_iota(jnp.int32, (n_nodes, te, 1), 0)
    mask3 = rows == idx_ref[...]                                        # [Np, TE, 1]
    masked = jnp.where(mask3, msg[None, :, :], jnp.float32(-1e30))      # [Np, TE, C]
    out_ref[...] = jnp.maximum(out_ref[...], jnp.max(masked, axis=1))

    @pl.when(t == pl.num_programs(0) - 1)
    def _():
        # nodes with no incoming edge -> 0 (matches PyG 'max' aggregation fill value)
        out_ref[...] = jnp.where(out_ref[...] > jnp.float32(-1e29), out_ref[...], 0.0)


def pallas_edgeconv(cat, tgt_idx3, w1, b1, w2, b2, num_nodes, *, edge_tile=32):
    """cat: per-edge MLP input [x_i, x_j - x_i] of shape [E, 2*hid];
    tgt_idx3: int32 [1, Ep, 1] target indices (padding rows = -1, never matched)."""
    E, Hcat = cat.shape
    Ep = tgt_idx3.shape[1]
    Cmid, Cout = w1.shape[1], w2.shape[1]
    Npad = _round_up(num_nodes, SUB)
    Hcatp, Cmidp, Coutp = _round_up(Hcat, LANE), _round_up(Cmid, LANE), _round_up(Cout, LANE)
    te = min(edge_tile, Ep)
    assert Ep % te == 0

    flops = 2 * Ep * (Hcatp * Cmidp + Cmidp * Coutp) + Npad * Ep * Coutp
    bytes_accessed = 4 * (Ep * Hcatp + Hcatp * Cmidp + Cmidp * Coutp + Ep + Npad * Coutp)

    out = pl.pallas_call(
        _edgeconv_kernel,
        out_shape=jax.ShapeDtypeStruct((Npad, Coutp), jnp.float32),
        grid=(Ep // te,),
        in_specs=[pl.BlockSpec((te, Hcatp), lambda t: (t, 0)),
                  pl.BlockSpec((Hcatp, Cmidp), lambda t: (0, 0)),
                  pl.BlockSpec((1, Cmidp), lambda t: (0, 0)),
                  pl.BlockSpec((Cmidp, Coutp), lambda t: (0, 0)),
                  pl.BlockSpec((1, Coutp), lambda t: (0, 0)),
                  pl.BlockSpec((1, te, 1), lambda t: (0, t, 0))],
        out_specs=pl.BlockSpec((Npad, Coutp), lambda t: (0, 0)),
        compiler_params=pltpu.CompilerParams(dimension_semantics=("arbitrary",),
                                             vmem_limit_bytes=_VMEM_LIMIT),
        cost_estimate=pl.CostEstimate(flops=flops, transcendentals=0,
                                      bytes_accessed=bytes_accessed),
    )(_pad2(cat, Ep, Hcatp),
      _pad2(w1, Hcatp, Cmidp), _pad2(b1[None, :], 1, Cmidp),
      _pad2(w2, Cmidp, Coutp), _pad2(b2[None, :], 1, Coutp),
      tgt_idx3)
    return out[:num_nodes, :Cout]


# ----------------------------------------------------------------------------- kernel C:
# MultiKernelConvGlobalAlphaWithEdgeConv, fully fused per layer:
#   h_all  = edge_attr @ [W_0 | ... | W_{P-1}]                (one wide MXU matmul)
#   hp_i   = pow(LeakyReLU_0.1(h_i), i)  (identity for i=0)
#   big    = [hp_0 | ... | hp_{P-1}] @ [alpha[k,i].T blocks]  (one wide MXU matmul)
#   norm   = sum_k (mask_k / deg_src) * big[:, k-block]       (disjoint cluster masks)
#   out    += onehot(tgt) @ norm                              (fused propagate aggr='add')
def _multikernel_agg_kernel(n_powers, n_kernels, co, neg_slope,
                            ea_ref, wall_ref, aall_ref, mask_ref, onehot_ref,
                            out_ref, norm_ref, hp_ref):
    t = pl.program_id(0)

    h_all = jnp.dot(ea_ref[...], wall_ref[...], preferred_element_type=jnp.float32)

    for i in range(n_powers):
        h = h_all[:, i * co:(i + 1) * co]
        if i == 0:
            hp = h                                       # power branch 0: no act, no pow
        else:
            h = jnp.where(h > 0, h, neg_slope * h)       # LeakyReLU(0.1)
            hp = h
            for _ in range(i - 1):                       # pow(h, i)
                hp = hp * h
        hp_ref[:, i * co:(i + 1) * co] = hp

    big = jnp.dot(hp_ref[...], aall_ref[...], preferred_element_type=jnp.float32)

    m = mask_ref[...]
    norm = m[:, 0:co] * big[:, 0:co]
    for k in range(1, n_kernels):
        norm = norm + m[:, k * co:(k + 1) * co] * big[:, k * co:(k + 1) * co]
    norm_ref[...] = norm

    @pl.when(t == 0)
    def _():
        out_ref[...] = jnp.zeros(out_ref.shape, jnp.float32)

    out_ref[...] = out_ref[...] + jnp.dot(onehot_ref[...], norm,
                                          preferred_element_type=jnp.float32)


def pallas_multikernel_conv(conv_params, edge_attr, mask_scaled, onehot_tgt, num_nodes,
                            *, edge_tile=128, neg_slope=0.1):
    W = conv_params["W"]          # [P, Cin, Cout]
    alpha = conv_params["alpha"]  # [K, P, Cout, Cout]
    E, Cin = edge_attr.shape
    P, _, Cout = W.shape
    K = alpha.shape[0]
    Npad, Ep = onehot_tgt.shape
    Cinp, Coutp = _round_up(Cin, LANE), _round_up(Cout, LANE)
    assert mask_scaled.shape == (Ep, K * Coutp)
    te = min(edge_tile, Ep)
    assert Ep % te == 0

    ea = _pad2(edge_attr, Ep, Cinp)
    w_all = jnp.concatenate([_pad2(W[i], Cinp, Coutp) for i in range(P)], axis=1)
    a_all = jnp.concatenate(
        [jnp.concatenate([_pad2(alpha[k, i].T, Coutp, Coutp) for k in range(K)], axis=1)
         for i in range(P)], axis=0)

    flops = (2 * Ep * Cinp * P * Coutp + 2 * Ep * P * Coutp * K * Coutp
             + 2 * Npad * Ep * Coutp)
    bytes_accessed = 4 * (Ep * Cinp + Cinp * P * Coutp + P * Coutp * K * Coutp
                          + Ep * K * Coutp + Npad * Ep + Npad * Coutp + Ep * Coutp)

    kernel = functools.partial(_multikernel_agg_kernel, P, K, Coutp, neg_slope)
    out_nodes, norm = pl.pallas_call(
        kernel,
        out_shape=(jax.ShapeDtypeStruct((Npad, Coutp), jnp.float32),
                   jax.ShapeDtypeStruct((Ep, Coutp), jnp.float32)),
        grid=(Ep // te,),
        in_specs=[pl.BlockSpec((te, Cinp), lambda t: (t, 0)),
                  pl.BlockSpec((Cinp, P * Coutp), lambda t: (0, 0)),
                  pl.BlockSpec((P * Coutp, K * Coutp), lambda t: (0, 0)),
                  pl.BlockSpec((te, K * Coutp), lambda t: (t, 0)),
                  pl.BlockSpec((Npad, te), lambda t: (0, t))],
        out_specs=(pl.BlockSpec((Npad, Coutp), lambda t: (0, 0)),
                   pl.BlockSpec((te, Coutp), lambda t: (t, 0))),
        scratch_shapes=[pltpu.VMEM((te, P * Coutp), jnp.float32)],
        compiler_params=pltpu.CompilerParams(dimension_semantics=("arbitrary",),
                                             vmem_limit_bytes=_VMEM_LIMIT),
        cost_estimate=pl.CostEstimate(flops=flops, transcendentals=0,
                                      bytes_accessed=bytes_accessed),
    )(ea, w_all, a_all, mask_scaled, onehot_tgt)
    return out_nodes[:num_nodes, :Cout], norm[:E, :Cout]


# ----------------------------------------------------------------------------- kmeans
def kmeans(x_feat, n_clusters, key, iters=25):
    # TODO(synk): torch kmeans uses unseeded torch.randint init + tol-based early stop
    #             (data-dependent break); here: seeded init + fixed iteration count, and
    #             empty clusters keep their previous centroid instead of producing NaN.
    # Per perf review: the [N, D] x [D, K] distance matmul is tiny, so it stays in plain
    # jnp inside one lax.fori_loop (no per-iteration Pallas launches / HBM round trips).
    n_points = x_feat.shape[0]
    init_idx = jax.random.randint(key, (n_clusters,), 0, n_points)
    centroids = x_feat[init_idx]
    x_sq = jnp.sum(x_feat * x_feat, axis=1, keepdims=True)

    def dists(cent):
        return x_sq - 2.0 * x_feat @ cent.T + jnp.sum(cent * cent, axis=1)[None, :]

    def body(_, cent):
        assign = jnp.argmin(dists(cent), axis=1)
        onehot = jax.nn.one_hot(assign, n_clusters, dtype=jnp.float32)
        counts = onehot.sum(axis=0)
        sums = onehot.T @ x_feat
        new_cent = sums / jnp.maximum(counts, 1.0)[:, None]
        return jnp.where(counts[:, None] > 0, new_cent, cent)

    centroids = jax.lax.fori_loop(0, iters, body, centroids)
    return jnp.argmin(dists(centroids), axis=1)


# ----------------------------------------------------------------------------- forward
def heat_transfer_forward(params, x, edge_index, pos, num_kernels, kmeans_key):
    # x: [N, in_ch], pos: [N, 2], edge_index: int32 [2, E]
    N = x.shape[0]
    src, tgt = edge_index[0], edge_index[1]
    E = src.shape[0]
    hid = params["lin_x"]["w"].shape[1]
    out_ch = params["conv5"]["W"].shape[2]
    coutp = _round_up(max(hid, out_ch), LANE)      # common padded channel width

    # ---- graph-static precompute, done ONCE and reused by EdgeConv + all 4 conv layers
    Npad = _round_up(N, SUB)
    Ep = _round_up(E, LANE)                        # 128-aligned contraction dim
    onehot_tgt = (jnp.arange(Npad, dtype=jnp.int32)[:, None] == tgt[None, :]
                  ).astype(jnp.float32)
    onehot_tgt = jnp.pad(onehot_tgt, ((0, 0), (0, Ep - E)))            # [Npad, Ep]
    tgt_idx3 = jnp.pad(tgt.astype(jnp.int32), (0, Ep - E),
                       constant_values=-1)[None, :, None]              # [1, Ep, 1]
    deg = jnp.zeros((N,), jnp.float32).at[src].add(1.0)                # out-degree of src
    inv_deg_e = 1.0 / deg[src]                                         # [E]

    # ---- lin_x and lin_similar fused into a single MXU launch
    xin = jnp.concatenate([x, pos], axis=1).astype(jnp.float32)        # [N, in_ch + 2]
    wx_aug = jnp.concatenate([params["lin_x"]["w"],
                              jnp.zeros((2, hid), jnp.float32)], axis=0)
    w_fused = jnp.concatenate([wx_aug, params["lin_similar"]["w"]], axis=1)
    b_fused = jnp.concatenate([params["lin_x"]["b"], params["lin_similar"]["b"]])
    fused = pallas_linear(xin, w_fused, b_fused)                       # [N, 2*hid]
    x_lin = fused[:, :hid]                                             # (value-unused by convs)
    x_similar = jax.nn.relu(fused[:, hid:])

    # ---- EdgeConv (aggr='max'): per-edge MLP input built once, chunked segment-max kernel
    cat = jnp.concatenate([x_similar[tgt], x_similar[src] - x_similar[tgt]], axis=1)
    x_similar = pallas_edgeconv(cat, tgt_idx3,
                                params["ec"]["w1"], params["ec"]["b1"],
                                params["ec"]["w2"], params["ec"]["b2"], N)
    x_similar = jax.nn.relu(x_similar)
    cluster = kmeans(x_similar, num_kernels, kmeans_key)

    # ---- per-kernel disjoint edge masks, pre-scaled by 1/out-degree and broadcast to
    #      lane width; identical across conv1/conv2/conv4/conv5 so built once
    node_onehot = cluster[:, None] == jnp.arange(num_kernels, dtype=cluster.dtype)[None, :]
    edge_mask = (node_onehot[src] & node_onehot[tgt]).astype(jnp.float32)     # [E, K]
    mask_scaled = edge_mask * inv_deg_e[:, None]
    mask_scaled = jnp.pad(mask_scaled, ((0, Ep - E), (0, 0)))
    mask_scaled = jnp.repeat(mask_scaled, coutp, axis=1)                      # [Ep, K*coutp]

    # ---- edge geometry -> lin_edge (first conv layer's edge_attr)
    edge_attr = pallas_linear(pos[tgt] - pos[src],
                              params["lin_edge"]["w"], params["lin_edge"]["b"])

    # ---- four multi-kernel conv layers, each a single fused Pallas launch (incl. the
    #      propagate/scatter-add).  NOTE: the node-feature argument of the torch conv
    #      layers is only used for its row count, so e / e + x_lin never feed arithmetic.
    e, edge_attr = pallas_multikernel_conv(params["conv1"], edge_attr, mask_scaled, onehot_tgt, N)
    e, edge_attr = pallas_multikernel_conv(params["conv2"], edge_attr, mask_scaled, onehot_tgt, N)
    e, edge_attr = pallas_multikernel_conv(params["conv4"], edge_attr, mask_scaled, onehot_tgt, N)
    e, edge_attr = pallas_multikernel_conv(params["conv5"], edge_attr, mask_scaled, onehot_tgt, N)
    # NOTE: self.lin, KernelNN neural_operator, dropout and self.act are unused in the
    # torch forward, so they are not materialized here.
    return e


# ----------------------------------------------------------------------------- params
def init_params(key, in_ch, hid, out_ch, num_kernels, num_powers=4, ec_mid=64):
    ks = iter(jax.random.split(key, 32))

    def lin(i, o):
        bound = 1.0 / (i ** 0.5)
        return {"w": jax.random.uniform(next(ks), (i, o), jnp.float32, -bound, bound),
                "b": jax.random.uniform(next(ks), (o,), jnp.float32, -bound, bound)}

    def mkconv(i, o):
        bound = 1.0 / (i ** 0.5)
        return {"W": jax.random.uniform(next(ks), (num_powers, i, o), jnp.float32, -bound, bound),
                "alpha": 0.05 * jax.random.normal(next(ks), (num_kernels, num_powers, o, o),
                                                  jnp.float32)}

    ec_l1 = lin(2 * hid, ec_mid)
    ec_l2 = lin(ec_mid, ec_mid)
    return {
        "lin_similar": lin(in_ch + 2, hid),
        "lin_x": lin(in_ch, hid),
        "lin_edge": lin(2, hid),
        "ec": {"w1": ec_l1["w"], "b1": ec_l1["b"], "w2": ec_l2["w"], "b2": ec_l2["b"]},
        "conv1": mkconv(hid, hid),
        "conv2": mkconv(hid, hid),
        "conv4": mkconv(hid, hid),
        "conv5": mkconv(hid, out_ch),
    }


# ----------------------------------------------------------------------------- main
if __name__ == "__main__":
    in_ch, hid, out_ch, num_kernels = 4, 32, 8, 3
    N = 48

    key = jax.random.PRNGKey(0)
    kx, kpos, kparams, kmeans_key = jax.random.split(key, 4)

    x = 0.5 * jax.random.normal(kx, (N, in_ch), jnp.float32)
    pos = jax.random.uniform(kpos, (N, 2), jnp.float32)

    idx = jnp.arange(N, dtype=jnp.int32)
    src = jnp.concatenate([idx, idx, idx, idx])
    tgt = jnp.concatenate([(idx + 1) % N, (idx + N - 1) % N, (idx + 2) % N, (idx + N - 2) % N])
    edge_index = jnp.stack([src, tgt]).astype(jnp.int32)     # [2, E], E = 192

    params = init_params(kparams, in_ch, hid, out_ch, num_kernels)

    fwd = jax.jit(heat_transfer_forward, static_argnames=("num_kernels",))
    e = fwd(params, x, edge_index, pos, num_kernels=num_kernels, kmeans_key=kmeans_key)
    e = jax.block_until_ready(e)

    assert e.shape == (N, out_ch), e.shape
    assert bool(jnp.isfinite(e).all())
    print("KERNEL_OK")
</pallas_src>

<mosaic_0001>
module attributes {stable_mosaic.version = 11 : i64} {
  func.func private @main(%arg0: i32) attributes {dimension_semantics = [#tpu.dimension_semantics<core_parallel>], iteration_bounds = array<i64: 2>, tpu.core_type = #tpu.core_type<sc_scalar_subcore>, window_params = []} {
    return
  }
}

module attributes {stable_mosaic.version = 11 : i64} {
  func.func private @main(%arg0: i32) attributes {dimension_semantics = [#tpu.dimension_semantics<core_parallel>], iteration_bounds = array<i64: 2>, tpu.core_type = #tpu.core_type<sc_scalar_subcore>, window_params = []} {
    return
  }
}

module attributes {stable_mosaic.version = 11 : i64} {
  func.func @_linear_kernel(%arg0: i32, %arg1: memref<48x128xf32, #tpu.memory_space<vmem>>, %arg2: memref<128x128xf32, #tpu.memory_space<vmem>>, %arg3: memref<1x128xf32, #tpu.memory_space<vmem>>, %arg4: memref<48x128xf32, #tpu.memory_space<vmem>>) attributes {dimension_semantics = [#tpu.dimension_semantics<arbitrary>], iteration_bounds = array<i64: 1>, scalar_prefetch = 0 : i64, scratch_operands = 0 : i64, tpu.core_type = #tpu.core_type<tc>, window_params = [{pipeline_mode = #tpu.pipeline_mode<synchronous>, transform_indices = @transform_0, window_bounds = array<i64: 48, 128>}, {pipeline_mode = #tpu.pipeline_mode<synchronous>, transform_indices = @transform_1, window_bounds = array<i64: 128, 128>}, {pipeline_mode = #tpu.pipeline_mode<synchronous>, transform_indices = @transform_2, window_bounds = array<i64: 1, 128>}, {pipeline_mode = #tpu.pipeline_mode<synchronous>, transform_indices = @transform_3, window_bounds = array<i64: 48, 128>}]} {
    %c0 = arith.constant 0 : index
    %c0_0 = arith.constant 0 : index
    %0 = vector.load %arg1[%c0, %c0_0] : memref<48x128xf32, #tpu.memory_space<vmem>>, vector<48x128xf32>
    %c0_1 = arith.constant 0 : index
    %c0_2 = arith.constant 0 : index
    %1 = vector.load %arg2[%c0_1, %c0_2] : memref<128x128xf32, #tpu.memory_space<vmem>>, vector<128x128xf32>
    %cst = arith.constant dense<0.000000e+00> : vector<48x128xf32>
    %2 = tpu.matmul %0, %1, %cst {dimension_numbers = #tpu.dot_dimension_numbers<[1], [0], [0], [1], [0, 0, 1, 1], [], []>} : vector<48x128xf32>, vector<128x128xf32>, vector<48x128xf32> -> vector<48x128xf32>
    %c0_3 = arith.constant 0 : index
    %c0_4 = arith.constant 0 : index
    %3 = vector.load %arg3[%c0_3, %c0_4] : memref<1x128xf32, #tpu.memory_space<vmem>>, vector<1x128xf32>
    %4 = vector.broadcast %3 : vector<1x128xf32> to vector<48x128xf32>
    %5 = arith.addf %2, %4 : vector<48x128xf32>
    %c0_5 = arith.constant 0 : index
    %c0_6 = arith.constant 0 : index
    %6 = vector.load %arg4[%c0_5, %c0_6] : memref<48x128xf32, #tpu.memory_space<vmem>>, vector<48x128xf32>
    tpu.vector_store %arg4[%c0_5, %c0_6], %5 {strides = array<i32>} : memref<48x128xf32, #tpu.memory_space<vmem>>, vector<48x128xf32>,
    return
  }
  func.func @transform_0(%arg0: i32) -> (i32, i32) {
    %c0_i32 = arith.constant 0 : i32
    %c0_i32_0 = arith.constant 0 : i32
    %c0_i32_1 = arith.constant 0 : i32
    return %c0_i32, %c0_i32_0 : i32, i32
  }
  func.func @transform_1(%arg0: i32) -> (i32, i32) {
    %c0_i32 = arith.constant 0 : i32
    %c0_i32_0 = arith.constant 0 : i32
    %c0_i32_1 = arith.constant 0 : i32
    return %c0_i32, %c0_i32_0 : i32, i32
  }
  func.func @transform_2(%arg0: i32) -> (i32, i32) {
    %c0_i32 = arith.constant 0 : i32
    %c0_i32_0 = arith.constant 0 : i32
    %c0_i32_1 = arith.constant 0 : i32
    return %c0_i32, %c0_i32_0 : i32, i32
  }
  func.func @transform_3(%arg0: i32) -> (i32, i32) {
    %c0_i32 = arith.constant 0 : i32
    %c0_i32_0 = arith.constant 0 : i32
    %c0_i32_1 = arith.constant 0 : i32
    return %c0_i32, %c0_i32_0 : i32, i32
  }
}

module attributes {stable_mosaic.version = 11 : i64} {
  func.func @_edgeconv_kernel(%arg0: i32, %arg1: memref<32x128xf32, #tpu.memory_space<vmem>>, %arg2: memref<128x128xf32, #tpu.memory_space<vmem>>, %arg3: memref<1x128xf32, #tpu.memory_space<vmem>>, %arg4: memref<128x128xf32, #tpu.memory_space<vmem>>, %arg5: memref<1x128xf32, #tpu.memory_space<vmem>>, %arg6: memref<1x32x1xi32, #tpu.memory_space<vmem>>, %arg7: memref<48x128xf32, #tpu.memory_space<vmem>>) attributes {dimension_semantics = [#tpu.dimension_semantics<arbitrary>], iteration_bounds = array<i64: 8>, scalar_prefetch = 0 : i64, scratch_operands = 0 : i64, tpu.core_type = #tpu.core_type<tc>, window_params = [{transform_indices = @transform_0, window_bounds = array<i64: 32, 128>}, {pipeline_mode = #tpu.pipeline_mode<synchronous>, transform_indices = @transform_1, window_bounds = array<i64: 128, 128>}, {pipeline_mode = #tpu.pipeline_mode<synchronous>, transform_indices = @transform_2, window_bounds = array<i64: 1, 128>}, {pipeline_mode = #tpu.pipeline_mode<synchronous>, transform_indices = @transform_3, window_bounds = array<i64: 128, 128>}, {pipeline_mode = #tpu.pipeline_mode<synchronous>, transform_indices = @transform_4, window_bounds = array<i64: 1, 128>}, {transform_indices = @transform_5, window_bounds = array<i64: 1, 32, 1>}, {pipeline_mode = #tpu.pipeline_mode<synchronous>, transform_indices = @transform_6, window_bounds = array<i64: 48, 128>}]} {
    %c0_i32 = arith.constant 0 : i32
    %0 = arith.cmpi eq, %arg0, %c0_i32 : i32
    %1 = arith.extui %0 : i1 to i32
    %c0_i32_0 = arith.constant 0 : i32
    %2 = arith.cmpi ne, %1, %c0_i32_0 : i32
    scf.if %2 {
      %cst_22 = arith.constant -1.000000e+30 : f32
      %34 = vector.broadcast %cst_22 : f32 to vector<48x128xf32>
      %c0_23 = arith.constant 0 : index
      %c0_24 = arith.constant 0 : index
      %35 = vector.load %arg7[%c0_23, %c0_24] : memref<48x128xf32, #tpu.memory_space<vmem>>, vector<48x128xf32>
      tpu.vector_store %arg7[%c0_23, %c0_24], %34 {strides = array<i32>} : memref<48x128xf32, #tpu.memory_space<vmem>>, vector<48x128xf32>,
    } else {
    }
    %c0 = arith.constant 0 : index
    %c0_1 = arith.constant 0 : index
    %3 = vector.load %arg1[%c0, %c0_1] : memref<32x128xf32, #tpu.memory_space<vmem>>, vector<32x128xf32>
    %c0_2 = arith.constant 0 : index
    %c0_3 = arith.constant 0 : index
    %4 = vector.load %arg2[%c0_2, %c0_3] : memref<128x128xf32, #tpu.memory_space<vmem>>, vector<128x128xf32>
    %cst = arith.constant dense<0.000000e+00> : vector<32x128xf32>
    %5 = tpu.matmul %3, %4, %cst {dimension_numbers = #tpu.dot_dimension_numbers<[1], [0], [0], [1], [0, 0, 1, 1], [], []>} : vector<32x128xf32>, vector<128x128xf32>, vector<32x128xf32> -> vector<32x128xf32>
    %c0_4 = arith.constant 0 : index
    %c0_5 = arith.constant 0 : index
    %6 = vector.load %arg3[%c0_4, %c0_5] : memref<1x128xf32, #tpu.memory_space<vmem>>, vector<1x128xf32>
    %7 = vector.broadcast %6 : vector<1x128xf32> to vector<32x128xf32>
    %8 = arith.addf %5, %7 : vector<32x128xf32>
    %cst_6 = arith.constant 0.000000e+00 : f32
    %9 = vector.broadcast %cst_6 : f32 to vector<32x128xf32>
    %10 = arith.maximumf %8, %9 : vector<32x128xf32>
    %c0_7 = arith.constant 0 : index
    %c0_8 = arith.constant 0 : index
    %11 = vector.load %arg4[%c0_7, %c0_8] : memref<128x128xf32, #tpu.memory_space<vmem>>, vector<128x128xf32>
    %cst_9 = arith.constant dense<0.000000e+00> : vector<32x128xf32>
    %12 = tpu.matmul %10, %11, %cst_9 {dimension_numbers = #tpu.dot_dimension_numbers<[1], [0], [0], [1], [0, 0, 1, 1], [], []>} : vector<32x128xf32>, vector<128x128xf32>, vector<32x128xf32> -> vector<32x128xf32>
    %c0_10 = arith.constant 0 : index
    %c0_11 = arith.constant 0 : index
    %13 = vector.load %arg5[%c0_10, %c0_11] : memref<1x128xf32, #tpu.memory_space<vmem>>, vector<1x128xf32>
    %14 = vector.broadcast %13 : vector<1x128xf32> to vector<32x128xf32>
    %15 = arith.addf %12, %14 : vector<32x128xf32>
    %16 = tpu.iota {dimensions = array<i32: 0>} : vector<48x32x1xi32>
    %c0_12 = arith.constant 0 : index
    %c0_13 = arith.constant 0 : index
    %c0_14 = arith.constant 0 : index
    %17 = vector.load %arg6[%c0_12, %c0_13, %c0_14] : memref<1x32x1xi32, #tpu.memory_space<vmem>>, vector<1x32x1xi32>
    %18 = vector.broadcast %17 : vector<1x32x1xi32> to vector<48x32x1xi32>
    %19 = arith.cmpi eq, %16, %18 : vector<48x32x1xi32>
    %20 = vector.shape_cast %15 : vector<32x128xf32> to vector<1x32x128xf32>
    %cst_15 = arith.constant -1.000000e+30 : f32
    %21 = vector.shape_cast %19 : vector<48x32x1xi1> to vector<48x32x1xi1>
    %22 = vector.broadcast %21 : vector<48x32x1xi1> to vector<48x32x128xi1>
    %23 = vector.shape_cast %20 : vector<1x32x128xf32> to vector<1x32x128xf32>
    %24 = vector.broadcast %23 : vector<1x32x128xf32> to vector<48x32x128xf32>
    %25 = vector.broadcast %cst_15 : f32 to vector<48x32x128xf32>
    %26 = arith.select %22, %24, %25 : vector<48x32x128xi1>, vector<48x32x128xf32>
    %c0_16 = arith.constant 0 : index
    %c0_17 = arith.constant 0 : index
    %27 = vector.load %arg7[%c0_16, %c0_17] : memref<48x128xf32, #tpu.memory_space<vmem>>, vector<48x128xf32>
    %cst_18 = arith.constant dense<0xFF800000> : vector<48x128xf32>
    %28 = vector.multi_reduction <maximumf>, %26, %cst_18 [1] : vector<48x32x128xf32> to vector<48x128xf32>
    %29 = arith.maximumf %27, %28 : vector<48x128xf32>
    %c0_19 = arith.constant 0 : index
    %c0_20 = arith.constant 0 : index
    %30 = vector.load %arg7[%c0_19, %c0_20] : memref<48x128xf32, #tpu.memory_space<vmem>>, vector<48x128xf32>
    tpu.vector_store %arg7[%c0_19, %c0_20], %29 {strides = array<i32>} : memref<48x128xf32, #tpu.memory_space<vmem>>, vector<48x128xf32>,
    %c7_i32 = arith.constant 7 : i32
    %31 = arith.cmpi eq, %arg0, %c7_i32 : i32
    %32 = arith.extui %31 : i1 to i32
    %c0_i32_21 = arith.constant 0 : i32
    %33 = arith.cmpi ne, %32, %c0_i32_21 : i32
    scf.if %33 {
      %c0_22 = arith.constant 0 : index
      %c0_23 = arith.constant 0 : index
      %34 = vector.load %arg7[%c0_22, %c0_23] : memref<48x128xf32, #tpu.memory_space<vmem>>, vector<48x128xf32>
      %cst_24 = arith.constant -1.000000e+29 : f32
      %35 = vector.broadcast %cst_24 : f32 to vector<48x128xf32>
      %36 = arith.cmpf ogt, %34, %35 : vector<48x128xf32>
      %c0_25 = arith.constant 0 : index
      %c0_26 = arith.constant 0 : index
      %37 = vector.load %arg7[%c0_25, %c0_26] : memref<48x128xf32, #tpu.memory_space<vmem>>, vector<48x128xf32>
      %cst_27 = arith.constant 0.000000e+00 : f32
      %38 = vector.broadcast %cst_27 : f32 to vector<48x128xf32>
      %39 = arith.select %36, %37, %38 : vector<48x128xi1>, vector<48x128xf32>
      %c0_28 = arith.constant 0 : index
      %c0_29 = arith.constant 0 : index
      %40 = vector.load %arg7[%c0_28, %c0_29] : memref<48x128xf32, #tpu.memory_space<vmem>>, vector<48x128xf32>
      tpu.vector_store %arg7[%c0_28, %c0_29], %39 {strides = array<i32>} : memref<48x128xf32, #tpu.memory_space<vmem>>, vector<48x128xf32>,
    } else {
    }
    return
  }
  func.func @transform_0(%arg0: i32) -> (i32, i32) {
    %c0_i32 = arith.constant 0 : i32
    %c0_i32_0 = arith.constant 0 : i32
    return %arg0, %c0_i32 : i32, i32
  }
  func.func @transform_1(%arg0: i32) -> (i32, i32) {
    %c0_i32 = arith.constant 0 : i32
    %c0_i32_0 = arith.constant 0 : i32
    %c0_i32_1 = arith.constant 0 : i32
    return %c0_i32, %c0_i32_0 : i32, i32
  }
  func.func @transform_2(%arg0: i32) -> (i32, i32) {
    %c0_i32 = arith.constant 0 : i32
    %c0_i32_0 = arith.constant 0 : i32
    %c0_i32_1 = arith.constant 0 : i32
    return %c0_i32, %c0_i32_0 : i32, i32
  }
  func.func @transform_3(%arg0: i32) -> (i32, i32) {
    %c0_i32 = arith.constant 0 : i32
    %c0_i32_0 = arith.constant 0 : i32
    %c0_i32_1 = arith.constant 0 : i32
    return %c0_i32, %c0_i32_0 : i32, i32
  }
  func.func @transform_4(%arg0: i32) -> (i32, i32) {
    %c0_i32 = arith.constant 0 : i32
    %c0_i32_0 = arith.constant 0 : i32
    %c0_i32_1 = arith.constant 0 : i32
    return %c0_i32, %c0_i32_0 : i32, i32
  }
  func.func @transform_5(%arg0: i32) -> (i32, i32, i32) {
    %c0_i32 = arith.constant 0 : i32
    %c0_i32_0 = arith.constant 0 : i32
    %c0_i32_1 = arith.constant 0 : i32
    return %c0_i32, %arg0, %c0_i32_0 : i32, i32, i32
  }
  func.func @transform_6(%arg0: i32) -> (i32, i32) {
    %c0_i32 = arith.constant 0 : i32
    %c0_i32_0 = arith.constant 0 : i32
    %c0_i32_1 = arith.constant 0 : i32
    return %c0_i32, %c0_i32_0 : i32, i32
  }
}

module attributes {stable_mosaic.version = 11 : i64} {
  func.func @_linear_kernel(%arg0: i32, %arg1: memref<192x128xf32, #tpu.memory_space<vmem>>, %arg2: memref<128x128xf32, #tpu.memory_space<vmem>>, %arg3: memref<1x128xf32, #tpu.memory_space<vmem>>, %arg4: memref<192x128xf32, #tpu.memory_space<vmem>>) attributes {dimension_semantics = [#tpu.dimension_semantics<arbitrary>], iteration_bounds = array<i64: 1>, scalar_prefetch = 0 : i64, scratch_operands = 0 : i64, tpu.core_type = #tpu.core_type<tc>, window_params = [{pipeline_mode = #tpu.pipeline_mode<synchronous>, transform_indices = @transform_0, window_bounds = array<i64: 192, 128>}, {pipeline_mode = #tpu.pipeline_mode<synchronous>, transform_indices = @transform_1, window_bounds = array<i64: 128, 128>}, {pipeline_mode = #tpu.pipeline_mode<synchronous>, transform_indices = @transform_2, window_bounds = array<i64: 1, 128>}, {pipeline_mode = #tpu.pipeline_mode<synchronous>, transform_indices = @transform_3, window_bounds = array<i64: 192, 128>}]} {
    %c0 = arith.constant 0 : index
    %c0_0 = arith.constant 0 : index
    %0 = vector.load %arg1[%c0, %c0_0] : memref<192x128xf32, #tpu.memory_space<vmem>>, vector<192x128xf32>
    %c0_1 = arith.constant 0 : index
    %c0_2 = arith.constant 0 : index
    %1 = vector.load %arg2[%c0_1, %c0_2] : memref<128x128xf32, #tpu.memory_space<vmem>>, vector<128x128xf32>
    %cst = arith.constant dense<0.000000e+00> : vector<192x128xf32>
    %2 = tpu.matmul %0, %1, %cst {dimension_numbers = #tpu.dot_dimension_numbers<[1], [0], [0], [1], [0, 0, 1, 1], [], []>} : vector<192x128xf32>, vector<128x128xf32>, vector<192x128xf32> -> vector<192x128xf32>
    %c0_3 = arith.constant 0 : index
    %c0_4 = arith.constant 0 : index
    %3 = vector.load %arg3[%c0_3, %c0_4] : memref<1x128xf32, #tpu.memory_space<vmem>>, vector<1x128xf32>
    %4 = vector.broadcast %3 : vector<1x128xf32> to vector<192x128xf32>
    %5 = arith.addf %2, %4 : vector<192x128xf32>
    %c0_5 = arith.constant 0 : index
    %c0_6 = arith.constant 0 : index
    %6 = vector.load %arg4[%c0_5, %c0_6] : memref<192x128xf32, #tpu.memory_space<vmem>>, vector<192x128xf32>
    tpu.vector_store %arg4[%c0_5, %c0_6], %5 {strides = array<i32>} : memref<192x128xf32, #tpu.memory_space<vmem>>, vector<192x128xf32>,
    return
  }
  func.func @transform_0(%arg0: i32) -> (i32, i32) {
    %c0_i32 = arith.constant 0 : i32
    %c0_i32_0 = arith.constant 0 : i32
    %c0_i32_1 = arith.constant 0 : i32
    return %c0_i32, %c0_i32_0 : i32, i32
  }
  func.func @transform_1(%arg0: i32) -> (i32, i32) {
    %c0_i32 = arith.constant 0 : i32
    %c0_i32_0 = arith.constant 0 : i32
    %c0_i32_1 = arith.constant 0 : i32
    return %c0_i32, %c0_i32_0 : i32, i32
  }
  func.func @transform_2(%arg0: i32) -> (i32, i32) {
    %c0_i32 = arith.constant 0 : i32
    %c0_i32_0 = arith.constant 0 : i32
    %c0_i32_1 = arith.constant 0 : i32
    return %c0_i32, %c0_i32_0 : i32, i32
  }
  func.func @transform_3(%arg0: i32) -> (i32, i32) {
    %c0_i32 = arith.constant 0 : i32
    %c0_i32_0 = arith.constant 0 : i32
    %c0_i32_1 = arith.constant 0 : i32
    return %c0_i32, %c0_i32_0 : i32, i32
  }
}

module attributes {stable_mosaic.version = 11 : i64} {
  func.func @_multikernel_agg_kernel(%arg0: i32, %arg1: memref<128x128xf32, #tpu.memory_space<vmem>>, %arg2: memref<128x512xf32, #tpu.memory_space<vmem>>, %arg3: memref<512x384xf32, #tpu.memory_space<vmem>>, %arg4: memref<128x384xf32, #tpu.memory_space<vmem>>, %arg5: memref<48x128xf32, #tpu.memory_space<vmem>>, %arg6: memref<48x128xf32, #tpu.memory_space<vmem>>, %arg7: memref<128x128xf32, #tpu.memory_space<vmem>>, %arg8: memref<128x512xf32, #tpu.memory_space<vmem>>) attributes {dimension_semantics = [#tpu.dimension_semantics<arbitrary>], iteration_bounds = array<i64: 2>, scalar_prefetch = 0 : i64, scratch_operands = 1 : i64, tpu.core_type = #tpu.core_type<tc>, window_params = [{transform_indices = @transform_0, window_bounds = array<i64: 128, 128>}, {pipeline_mode = #tpu.pipeline_mode<synchronous>, transform_indices = @transform_1, window_bounds = array<i64: 128, 512>}, {pipeline_mode = #tpu.pipeline_mode<synchronous>, transform_indices = @transform_2, window_bounds = array<i64: 512, 384>}, {transform_indices = @transform_3, window_bounds = array<i64: 128, 384>}, {transform_indices = @transform_4, window_bounds = array<i64: 48, 128>}, {pipeline_mode = #tpu.pipeline_mode<synchronous>, transform_indices = @transform_5, window_bounds = array<i64: 48, 128>}, {transform_indices = @transform_6, window_bounds = array<i64: 128, 128>}]} {
    %c0 = arith.constant 0 : index
    %c0_0 = arith.constant 0 : index
    %0 = vector.load %arg1[%c0, %c0_0] : memref<128x128xf32, #tpu.memory_space<vmem>>, vector<128x128xf32>
    %c0_1 = arith.constant 0 : index
    %c0_2 = arith.constant 0 : index
    %1 = vector.load %arg2[%c0_1, %c0_2] : memref<128x512xf32, #tpu.memory_space<vmem>>, vector<128x512xf32>
    %cst = arith.constant dense<0.000000e+00> : vector<128x512xf32>
    %2 = tpu.matmul %0, %1, %cst {dimension_numbers = #tpu.dot_dimension_numbers<[1], [0], [0], [1], [0, 0, 1, 1], [], []>} : vector<128x128xf32>, vector<128x512xf32>, vector<128x512xf32> -> vector<128x512xf32>
    %3 = vector.extract_strided_slice %2 {offsets = [0, 0], sizes = [128, 128], strides = [1, 1]} : vector<128x512xf32> to vector<128x128xf32>
    %c0_3 = arith.constant 0 : index
    %c0_4 = arith.constant 0 : index
    %4 = vector.load %arg8[%c0_3, %c0_4] : memref<128x512xf32, #tpu.memory_space<vmem>>, vector<128x128xf32>
    tpu.vector_store %arg8[%c0_3, %c0_4], %3 {strides = array<i32>} : memref<128x512xf32, #tpu.memory_space<vmem>>, vector<128x128xf32>,
    %5 = vector.extract_strided_slice %2 {offsets = [0, 128], sizes = [128, 128], strides = [1, 1]} : vector<128x512xf32> to vector<128x128xf32>
    %cst_5 = arith.constant 0.000000e+00 : f32
    %6 = vector.broadcast %cst_5 : f32 to vector<128x128xf32>
    %7 = arith.cmpf ogt, %5, %6 : vector<128x128xf32>
    %cst_6 = arith.constant 1.000000e-01 : f32
    %8 = vector.broadcast %cst_6 : f32 to vector<128x128xf32>
    %9 = arith.mulf %8, %5 : vector<128x128xf32>
    %10 = arith.select %7, %5, %9 : vector<128x128xi1>, vector<128x128xf32>
    %c0_7 = arith.constant 0 : index
    %c128 = arith.constant 128 : index
    %11 = vector.load %arg8[%c0_7, %c128] : memref<128x512xf32, #tpu.memory_space<vmem>>, vector<128x128xf32>
    tpu.vector_store %arg8[%c0_7, %c128], %10 {strides = array<i32>} : memref<128x512xf32, #tpu.memory_space<vmem>>, vector<128x128xf32>,
    %12 = vector.extract_strided_slice %2 {offsets = [0, 256], sizes = [128, 128], strides = [1, 1]} : vector<128x512xf32> to vector<128x128xf32>
    %cst_8 = arith.constant 0.000000e+00 : f32
    %13 = vector.broadcast %cst_8 : f32 to vector<128x128xf32>
    %14 = arith.cmpf ogt, %12, %13 : vector<128x128xf32>
    %cst_9 = arith.constant 1.000000e-01 : f32
    %15 = vector.broadcast %cst_9 : f32 to vector<128x128xf32>
    %16 = arith.mulf %15, %12 : vector<128x128xf32>
    %17 = arith.select %14, %12, %16 : vector<128x128xi1>, vector<128x128xf32>
    %18 = arith.mulf %17, %17 : vector<128x128xf32>
    %c0_10 = arith.constant 0 : index
    %c256 = arith.constant 256 : index
    %19 = vector.load %arg8[%c0_10, %c256] : memref<128x512xf32, #tpu.memory_space<vmem>>, vector<128x128xf32>
    tpu.vector_store %arg8[%c0_10, %c256], %18 {strides = array<i32>} : memref<128x512xf32, #tpu.memory_space<vmem>>, vector<128x128xf32>,
    %20 = vector.extract_strided_slice %2 {offsets = [0, 384], sizes = [128, 128], strides = [1, 1]} : vector<128x512xf32> to vector<128x128xf32>
    %cst_11 = arith.constant 0.000000e+00 : f32
    %21 = vector.broadcast %cst_11 : f32 to vector<128x128xf32>
    %22 = arith.cmpf ogt, %20, %21 : vector<128x128xf32>
    %cst_12 = arith.constant 1.000000e-01 : f32
    %23 = vector.broadcast %cst_12 : f32 to vector<128x128xf32>
    %24 = arith.mulf %23, %20 : vector<128x128xf32>
    %25 = arith.select %22, %20, %24 : vector<128x128xi1>, vector<128x128xf32>
    %26 = arith.mulf %25, %25 : vector<128x128xf32>
    %27 = arith.mulf %26, %25 : vector<128x128xf32>
    %c0_13 = arith.constant 0 : index
    %c384 = arith.constant 384 : index
    %28 = vector.load %arg8[%c0_13, %c384] : memref<128x512xf32, #tpu.memory_space<vmem>>, vector<128x128xf32>
    tpu.vector_store %arg8[%c0_13, %c384], %27 {strides = array<i32>} : memref<128x512xf32, #tpu.memory_space<vmem>>, vector<128x128xf32>,
    %c0_14 = arith.constant 0 : index
    %c0_15 = arith.constant 0 : index
    %29 = vector.load %arg8[%c0_14, %c0_15] : memref<128x512xf32, #tpu.memory_space<vmem>>, vector<128x512xf32>
    %c0_16 = arith.constant 0 : index
    %c0_17 = arith.constant 0 : index
    %30 = vector.load %arg3[%c0_16, %c0_17] : memref<512x384xf32, #tpu.memory_space<vmem>>, vector<512x384xf32>
    %cst_18 = arith.constant dense<0.000000e+00> : vector<128x384xf32>
    %31 = tpu.matmul %29, %30, %cst_18 {dimension_numbers = #tpu.dot_dimension_numbers<[1], [0], [0], [1], [0, 0, 1, 1], [], []>} : vector<128x512xf32>, vector<512x384xf32>, vector<128x384xf32> -> vector<128x384xf32>
    %c0_19 = arith.constant 0 : index
    %c0_20 = arith.constant 0 : index
    %32 = vector.load %arg4[%c0_19, %c0_20] : memref<128x384xf32, #tpu.memory_space<vmem>>, vector<128x384xf32>
    %33 = vector.extract_strided_slice %32 {offsets = [0, 0], sizes = [128, 128], strides = [1, 1]} : vector<128x384xf32> to vector<128x128xf32>
    %34 = vector.extract_strided_slice %31 {offsets = [0, 0], sizes = [128, 128], strides = [1, 1]} : vector<128x384xf32> to vector<128x128xf32>
    %35 = arith.mulf %33, %34 : vector<128x128xf32>
    %36 = vector.extract_strided_slice %32 {offsets = [0, 128], sizes = [128, 128], strides = [1, 1]} : vector<128x384xf32> to vector<128x128xf32>
    %37 = vector.extract_strided_slice %31 {offsets = [0, 128], sizes = [128, 128], strides = [1, 1]} : vector<128x384xf32> to vector<128x128xf32>
    %38 = arith.mulf %36, %37 : vector<128x128xf32>
    %39 = arith.addf %35, %38 : vector<128x128xf32>
    %40 = vector.extract_strided_slice %32 {offsets = [0, 256], sizes = [128, 128], strides = [1, 1]} : vector<128x384xf32> to vector<128x128xf32>
    %41 = vector.extract_strided_slice %31 {offsets = [0, 256], sizes = [128, 128], strides = [1, 1]} : vector<128x384xf32> to vector<128x128xf32>
    %42 = arith.mulf %40, %41 : vector<128x128xf32>
    %43 = arith.addf %39, %42 : vector<128x128xf32>
    %c0_21 = arith.constant 0 : index
    %c0_22 = arith.constant 0 : index
    %44 = vector.load %arg7[%c0_21, %c0_22] : memref<128x128xf32, #tpu.memory_space<vmem>>, vector<128x128xf32>
    tpu.vector_store %arg7[%c0_21, %c0_22], %43 {strides = array<i32>} : memref<128x128xf32, #tpu.memory_space<vmem>>, vector<128x128xf32>,
    %c0_i32 = arith.constant 0 : i32
    %45 = arith.cmpi eq, %arg0, %c0_i32 : i32
    %46 = arith.extui %45 : i1 to i32
    %c0_i32_23 = arith.constant 0 : i32
    %47 = arith.cmpi ne, %46, %c0_i32_23 : i32
    scf.if %47 {
      %cst_31 = arith.constant 0.000000e+00 : f32
      %53 = vector.broadcast %cst_31 : f32 to vector<48x128xf32>
      %c0_32 = arith.constant 0 : index
      %c0_33 = arith.constant 0 : index
      %54 = vector.load %arg6[%c0_32, %c0_33] : memref<48x128xf32, #tpu.memory_space<vmem>>, vector<48x128xf32>
      tpu.vector_store %arg6[%c0_32, %c0_33], %53 {strides = array<i32>} : memref<48x128xf32, #tpu.memory_space<vmem>>, vector<48x128xf32>,
    } else {
    }
    %c0_24 = arith.constant 0 : index
    %c0_25 = arith.constant 0 : index
    %48 = vector.load %arg6[%c0_24, %c0_25] : memref<48x128xf32, #tpu.memory_space<vmem>>, vector<48x128xf32>
    %c0_26 = arith.constant 0 : index
    %c0_27 = arith.constant 0 : index
    %49 = vector.load %arg5[%c0_26, %c0_27] : memref<48x128xf32, #tpu.memory_space<vmem>>, vector<48x128xf32>
    %cst_28 = arith.constant dense<0.000000e+00> : vector<48x128xf32>
    %50 = tpu.matmul %49, %43, %cst_28 {dimension_numbers = #tpu.dot_dimension_numbers<[1], [0], [0], [1], [0, 0, 1, 1], [], []>} : vector<48x128xf32>, vector<128x128xf32>, vector<48x128xf32> -> vector<48x128xf32>
    %51 = arith.addf %48, %50 : vector<48x128xf32>
    %c0_29 = arith.constant 0 : index
    %c0_30 = arith.constant 0 : index
    %52 = vector.load %arg6[%c0_29, %c0_30] : memref<48x128xf32, #tpu.memory_space<vmem>>, vector<48x128xf32>
    tpu.vector_store %arg6[%c0_29, %c0_30], %51 {strides = array<i32>} : memref<48x128xf32, #tpu.memory_space<vmem>>, vector<48x128xf32>,
    return
  }
  func.func @transform_0(%arg0: i32) -> (i32, i32) {
    %c0_i32 = arith.constant 0 : i32
    %c0_i32_0 = arith.constant 0 : i32
    return %arg0, %c0_i32 : i32, i32
  }
  func.func @transform_1(%arg0: i32) -> (i32, i32) {
    %c0_i32 = arith.constant 0 : i32
    %c0_i32_0 = arith.constant 0 : i32
    %c0_i32_1 = arith.constant 0 : i32
    return %c0_i32, %c0_i32_0 : i32, i32
  }
  func.func @transform_2(%arg0: i32) -> (i32, i32) {
    %c0_i32 = arith.constant 0 : i32
    %c0_i32_0 = arith.constant 0 : i32
    %c0_i32_1 = arith.constant 0 : i32
    return %c0_i32, %c0_i32_0 : i32, i32
  }
  func.func @transform_3(%arg0: i32) -> (i32, i32) {
    %c0_i32 = arith.constant 0 : i32
    %c0_i32_0 = arith.constant 0 : i32
    return %arg0, %c0_i32 : i32, i32
  }
  func.func @transform_4(%arg0: i32) -> (i32, i32) {
    %c0_i32 = arith.constant 0 : i32
    %c0_i32_0 = arith.constant 0 : i32
    return %c0_i32, %arg0 : i32, i32
  }
  func.func @transform_5(%arg0: i32) -> (i32, i32) {
    %c0_i32 = arith.constant 0 : i32
    %c0_i32_0 = arith.constant 0 : i32
    %c0_i32_1 = arith.constant 0 : i32
    return %c0_i32, %c0_i32_0 : i32, i32
  }
  func.func @transform_6(%arg0: i32) -> (i32, i32) {
    %c0_i32 = arith.constant 0 : i32
    %c0_i32_0 = arith.constant 0 : i32
    return %arg0, %c0_i32 : i32, i32
  }
}

module attributes {stable_mosaic.version = 11 : i64} {
  func.func @_multikernel_agg_kernel(%arg0: i32, %arg1: memref<128x128xf32, #tpu.memory_space<vmem>>, %arg2: memref<128x512xf32, #tpu.memory_space<vmem>>, %arg3: memref<512x384xf32, #tpu.memory_space<vmem>>, %arg4: memref<128x384xf32, #tpu.memory_space<vmem>>, %arg5: memref<48x128xf32, #tpu.memory_space<vmem>>, %arg6: memref<48x128xf32, #tpu.memory_space<vmem>>, %arg7: memref<128x128xf32, #tpu.memory_space<vmem>>, %arg8: memref<128x512xf32, #tpu.memory_space<vmem>>) attributes {dimension_semantics = [#tpu.dimension_semantics<arbitrary>], iteration_bounds = array<i64: 2>, scalar_prefetch = 0 : i64, scratch_operands = 1 : i64, tpu.core_type = #tpu.core_type<tc>, window_params = [{transform_indices = @transform_0, window_bounds = array<i64: 128, 128>}, {pipeline_mode = #tpu.pipeline_mode<synchronous>, transform_indices = @transform_1, window_bounds = array<i64: 128, 512>}, {pipeline_mode = #tpu.pipeline_mode<synchronous>, transform_indices = @transform_2, window_bounds = array<i64: 512, 384>}, {transform_indices = @transform_3, window_bounds = array<i64: 128, 384>}, {transform_indices = @transform_4, window_bounds = array<i64: 48, 128>}, {pipeline_mode = #tpu.pipeline_mode<synchronous>, transform_indices = @transform_5, window_bounds = array<i64: 48, 128>}, {transform_indices = @transform_6, window_bounds = array<i64: 128, 128>}]} {
    %c0 = arith.constant 0 : index
    %c0_0 = arith.constant 0 : index
    %0 = vector.load %arg1[%c0, %c0_0] : memref<128x128xf32, #tpu.memory_space<vmem>>, vector<128x128xf32>
    %c0_1 = arith.constant 0 : index
    %c0_2 = arith.constant 0 : index
    %1 = vector.load %arg2[%c0_1, %c0_2] : memref<128x512xf32, #tpu.memory_space<vmem>>, vector<128x512xf32>
    %cst = arith.constant dense<0.000000e+00> : vector<128x512xf32>
    %2 = tpu.matmul %0, %1, %cst {dimension_numbers = #tpu.dot_dimension_numbers<[1], [0], [0], [1], [0, 0, 1, 1], [], []>} : vector<128x128xf32>, vector<128x512xf32>, vector<128x512xf32> -> vector<128x512xf32>
    %3 = vector.extract_strided_slice %2 {offsets = [0, 0], sizes = [128, 128], strides = [1, 1]} : vector<128x512xf32> to vector<128x128xf32>
    %c0_3 = arith.constant 0 : index
    %c0_4 = arith.constant 0 : index
    %4 = vector.load %arg8[%c0_3, %c0_4] : memref<128x512xf32, #tpu.memory_space<vmem>>, vector<128x128xf32>
    tpu.vector_store %arg8[%c0_3, %c0_4], %3 {strides = array<i32>} : memref<128x512xf32, #tpu.memory_space<vmem>>, vector<128x128xf32>,
    %5 = vector.extract_strided_slice %2 {offsets = [0, 128], sizes = [128, 128], strides = [1, 1]} : vector<128x512xf32> to vector<128x128xf32>
    %cst_5 = arith.constant 0.000000e+00 : f32
    %6 = vector.broadcast %cst_5 : f32 to vector<128x128xf32>
    %7 = arith.cmpf ogt, %5, %6 : vector<128x128xf32>
    %cst_6 = arith.constant 1.000000e-01 : f32
    %8 = vector.broadcast %cst_6 : f32 to vector<128x128xf32>
    %9 = arith.mulf %8, %5 : vector<128x128xf32>
    %10 = arith.select %7, %5, %9 : vector<128x128xi1>, vector<128x128xf32>
    %c0_7 = arith.constant 0 : index
    %c128 = arith.constant 128 : index
    %11 = vector.load %arg8[%c0_7, %c128] : memref<128x512xf32, #tpu.memory_space<vmem>>, vector<128x128xf32>
    tpu.vector_store %arg8[%c0_7, %c128], %10 {strides = array<i32>} : memref<128x512xf32, #tpu.memory_space<vmem>>, vector<128x128xf32>,
    %12 = vector.extract_strided_slice %2 {offsets = [0, 256], sizes = [128, 128], strides = [1, 1]} : vector<128x512xf32> to vector<128x128xf32>
    %cst_8 = arith.constant 0.000000e+00 : f32
    %13 = vector.broadcast %cst_8 : f32 to vector<128x128xf32>
    %14 = arith.cmpf ogt, %12, %13 : vector<128x128xf32>
    %cst_9 = arith.constant 1.000000e-01 : f32
    %15 = vector.broadcast %cst_9 : f32 to vector<128x128xf32>
    %16 = arith.mulf %15, %12 : vector<128x128xf32>
    %17 = arith.select %14, %12, %16 : vector<128x128xi1>, vector<128x128xf32>
    %18 = arith.mulf %17, %17 : vector<128x128xf32>
    %c0_10 = arith.constant 0 : index
    %c256 = arith.constant 256 : index
    %19 = vector.load %arg8[%c0_10, %c256] : memref<128x512xf32, #tpu.memory_space<vmem>>, vector<128x128xf32>
    tpu.vector_store %arg8[%c0_10, %c256], %18 {strides = array<i32>} : memref<128x512xf32, #tpu.memory_space<vmem>>, vector<128x128xf32>,
    %20 = vector.extract_strided_slice %2 {offsets = [0, 384], sizes = [128, 128], strides = [1, 1]} : vector<128x512xf32> to vector<128x128xf32>
    %cst_11 = arith.constant 0.000000e+00 : f32
    %21 = vector.broadcast %cst_11 : f32 to vector<128x128xf32>
    %22 = arith.cmpf ogt, %20, %21 : vector<128x128xf32>
    %cst_12 = arith.constant 1.000000e-01 : f32
    %23 = vector.broadcast %cst_12 : f32 to vector<128x128xf32>
    %24 = arith.mulf %23, %20 : vector<128x128xf32>
    %25 = arith.select %22, %20, %24 : vector<128x128xi1>, vector<128x128xf32>
    %26 = arith.mulf %25, %25 : vector<128x128xf32>
    %27 = arith.mulf %26, %25 : vector<128x128xf32>
    %c0_13 = arith.constant 0 : index
    %c384 = arith.constant 384 : index
    %28 = vector.load %arg8[%c0_13, %c384] : memref<128x512xf32, #tpu.memory_space<vmem>>, vector<128x128xf32>
    tpu.vector_store %arg8[%c0_13, %c384], %27 {strides = array<i32>} : memref<128x512xf32, #tpu.memory_space<vmem>>, vector<128x128xf32>,
    %c0_14 = arith.constant 0 : index
    %c0_15 = arith.constant 0 : index
    %29 = vector.load %arg8[%c0_14, %c0_15] : memref<128x512xf32, #tpu.memory_space<vmem>>, vector<128x512xf32>
    %c0_16 = arith.constant 0 : index
    %c0_17 = arith.constant 0 : index
    %30 = vector.load %arg3[%c0_16, %c0_17] : memref<512x384xf32, #tpu.memory_space<vmem>>, vector<512x384xf32>
    %cst_18 = arith.constant dense<0.000000e+00> : vector<128x384xf32>
    %31 = tpu.matmul %29, %30, %cst_18 {dimension_numbers = #tpu.dot_dimension_numbers<[1], [0], [0], [1], [0, 0, 1, 1], [], []>} : vector<128x512xf32>, vector<512x384xf32>, vector<128x384xf32> -> vector<128x384xf32>
    %c0_19 = arith.constant 0 : index
    %c0_20 = arith.constant 0 : index
    %32 = vector.load %arg4[%c0_19, %c0_20] : memref<128x384xf32, #tpu.memory_space<vmem>>, vector<128x384xf32>
    %33 = vector.extract_strided_slice %32 {offsets = [0, 0], sizes = [128, 128], strides = [1, 1]} : vector<128x384xf32> to vector<128x128xf32>
    %34 = vector.extract_strided_slice %31 {offsets = [0, 0], sizes = [128, 128], strides = [1, 1]} : vector<128x384xf32> to vector<128x128xf32>
    %35 = arith.mulf %33, %34 : vector<128x128xf32>
    %36 = vector.extract_strided_slice %32 {offsets = [0, 128], sizes = [128, 128], strides = [1, 1]} : vector<128x384xf32> to vector<128x128xf32>
    %37 = vector.extract_strided_slice %31 {offsets = [0, 128], sizes = [128, 128], strides = [1, 1]} : vector<128x384xf32> to vector<128x128xf32>
    %38 = arith.mulf %36, %37 : vector<128x128xf32>
    %39 = arith.addf %35, %38 : vector<128x128xf32>
    %40 = vector.extract_strided_slice %32 {offsets = [0, 256], sizes = [128, 128], strides = [1, 1]} : vector<128x384xf32> to vector<128x128xf32>
    %41 = vector.extract_strided_slice %31 {offsets = [0, 256], sizes = [128, 128], strides = [1, 1]} : vector<128x384xf32> to vector<128x128xf32>
    %42 = arith.mulf %40, %41 : vector<128x128xf32>
    %43 = arith.addf %39, %42 : vector<128x128xf32>
    %c0_21 = arith.constant 0 : index
    %c0_22 = arith.constant 0 : index
    %44 = vector.load %arg7[%c0_21, %c0_22] : memref<128x128xf32, #tpu.memory_space<vmem>>, vector<128x128xf32>
    tpu.vector_store %arg7[%c0_21, %c0_22], %43 {strides = array<i32>} : memref<128x128xf32, #tpu.memory_space<vmem>>, vector<128x128xf32>,
    %c0_i32 = arith.constant 0 : i32
    %45 = arith.cmpi eq, %arg0, %c0_i32 : i32
    %46 = arith.extui %45 : i1 to i32
    %c0_i32_23 = arith.constant 0 : i32
    %47 = arith.cmpi ne, %46, %c0_i32_23 : i32
    scf.if %47 {
      %cst_31 = arith.constant 0.000000e+00 : f32
      %53 = vector.broadcast %cst_31 : f32 to vector<48x128xf32>
      %c0_32 = arith.constant 0 : index
      %c0_33 = arith.constant 0 : index
      %54 = vector.load %arg6[%c0_32, %c0_33] : memref<48x128xf32, #tpu.memory_space<vmem>>, vector<48x128xf32>
      tpu.vector_store %arg6[%c0_32, %c0_33], %53 {strides = array<i32>} : memref<48x128xf32, #tpu.memory_space<vmem>>, vector<48x128xf32>,
    } else {
    }
    %c0_24 = arith.constant 0 : index
    %c0_25 = arith.constant 0 : index
    %48 = vector.load %arg6[%c0_24, %c0_25] : memref<48x128xf32, #tpu.memory_space<vmem>>, vector<48x128xf32>
    %c0_26 = arith.constant 0 : index
    %c0_27 = arith.constant 0 : index
    %49 = vector.load %arg5[%c0_26, %c0_27] : memref<48x128xf32, #tpu.memory_space<vmem>>, vector<48x128xf32>
    %cst_28 = arith.constant dense<0.000000e+00> : vector<48x128xf32>
    %50 = tpu.matmul %49, %43, %cst_28 {dimension_numbers = #tpu.dot_dimension_numbers<[1], [0], [0], [1], [0, 0, 1, 1], [], []>} : vector<48x128xf32>, vector<128x128xf32>, vector<48x128xf32> -> vector<48x128xf32>
    %51 = arith.addf %48, %50 : vector<48x128xf32>
    %c0_29 = arith.constant 0 : index
    %c0_30 = arith.constant 0 : index
    %52 = vector.load %arg6[%c0_29, %c0_30] : memref<48x128xf32, #tpu.memory_space<vmem>>, vector<48x128xf32>
    tpu.vector_store %arg6[%c0_29, %c0_30], %51 {strides = array<i32>} : memref<48x128xf32, #tpu.memory_space<vmem>>, vector<48x128xf32>,
    return
  }
  func.func @transform_0(%arg0: i32) -> (i32, i32) {
    %c0_i32 = arith.constant 0 : i32
    %c0_i32_0 = arith.constant 0 : i32
    return %arg0, %c0_i32 : i32, i32
  }
  func.func @transform_1(%arg0: i32) -> (i32, i32) {
    %c0_i32 = arith.constant 0 : i32
    %c0_i32_0 = arith.constant 0 : i32
    %c0_i32_1 = arith.constant 0 : i32
    return %c0_i32, %c0_i32_0 : i32, i32
  }
  func.func @transform_2(%arg0: i32) -> (i32, i32) {
    %c0_i32 = arith.constant 0 : i32
    %c0_i32_0 = arith.constant 0 : i32
    %c0_i32_1 = arith.constant 0 : i32
    return %c0_i32, %c0_i32_0 : i32, i32
  }
  func.func @transform_3(%arg0: i32) -> (i32, i32) {
    %c0_i32 = arith.constant 0 : i32
    %c0_i32_0 = arith.constant 0 : i32
    return %arg0, %c0_i32 : i32, i32
  }
  func.func @transform_4(%arg0: i32) -> (i32, i32) {
    %c0_i32 = arith.constant 0 : i32
    %c0_i32_0 = arith.constant 0 : i32
    return %c0_i32, %arg0 : i32, i32
  }
  func.func @transform_5(%arg0: i32) -> (i32, i32) {
    %c0_i32 = arith.constant 0 : i32
    %c0_i32_0 = arith.constant 0 : i32
    %c0_i32_1 = arith.constant 0 : i32
    return %c0_i32, %c0_i32_0 : i32, i32
  }
  func.func @transform_6(%arg0: i32) -> (i32, i32) {
    %c0_i32 = arith.constant 0 : i32
    %c0_i32_0 = arith.constant 0 : i32
    return %arg0, %c0_i32 : i32, i32
  }
}

</mosaic_0001>

<bundles_post_ra>
// kernel: sub.16
= control target key start
LH: loop header
LB: loop body
LE: loop exit
PB: predicated region body
PF: predicated region fallthrough
CT: control target
= control target key end

     0   :  { %s540_s0 = inlined_call_operand.vmem [shape: f32[192,32], index: 0, kind: input, shape index: {}]   ;;  %s541_s1 = inlined_call_operand.vmem [shape: f32[192,32], index: 1, kind: input, shape index: {}]   ;;  %s542_s2 = inlined_call_operand.vmem [shape: f32[192,32], index: 2, kind: output, shape index: {}]  }
   0x1   :  { %v3_v0 = vld [vmem:[%s540_s0] sm:$0xff]  ;;  %v240_v2 = vld [vmem:[%s540_s0 + $0x8] sm:$0xff]  ;;  %v243_v5 = vld [vmem:[%s540_s0 + $0x10] sm:$0xff] }
   0x2   :  { %v4_v1 = vld [vmem:[%s541_s1] sm:$0xff]  ;;  %v241_v4 = vld [vmem:[%s541_s1 + $0x8] sm:$0xff]  ;;  %v244_v6 = vld [vmem:[%s541_s1 + $0x10] sm:$0xff] }
   0x3   :  { %v7_v3 = vsub.f32 %v3_v0, %v4_v1  ;;  %v16_v7 = vsub.f32 %v240_v2, %v241_v4  ;;  %v26_v8 = vsub.f32 %v243_v5, %v244_v6  ;;  %v246_v9 = vld [vmem:[%s540_s0 + $0x18] sm:$0xff]  ;;  %v249_v11 = vld [vmem:[%s540_s0 + $0x20] sm:$0xff]  ;;  %v252_v14 = vld [vmem:[%s540_s0 + $0x28] sm:$0xff] }
   0x4   :  { %v247_v10 = vld [vmem:[%s541_s1 + $0x18] sm:$0xff]  ;;  %v250_v13 = vld [vmem:[%s541_s1 + $0x20] sm:$0xff]  ;;  %v253_v15 = vld [vmem:[%s541_s1 + $0x28] sm:$0xff] }
   0x5   :  { %9 = vst [vmem:[%s542_s2] sm:$0xff] %v7_v3  ;;  %v36_v12 = vsub.f32 %v246_v9, %v247_v10  ;;  %242 = vst [vmem:[%s542_s2 + $0x8] sm:$0xff] %v16_v7  ;;  %v46_v16 = vsub.f32 %v249_v11, %v250_v13  ;;  %v56_v17 = vsub.f32 %v252_v14, %v253_v15  ;;  %v255_v18 = vld [vmem:[%s540_s0 + $0x30] sm:$0xff]  ;;  %v258_v20 = vld [vmem:[%s540_s0 + $0x38] sm:$0xff] }
   0x6   :  { %245 = vst [vmem:[%s542_s2 + $0x10] sm:$0xff] %v26_v8  ;;  %v256_v19 = vld [vmem:[%s541_s1 + $0x30] sm:$0xff]  ;;  %v259_v22 = vld [vmem:[%s541_s1 + $0x38] sm:$0xff]  ;;  %v261_v23 = vld [vmem:[%s540_s0 + $0x40] sm:$0xff] }
   0x7   :  { %248 = vst [vmem:[%s542_s2 + $0x18] sm:$0xff] %v36_v12  ;;  %v66_v21 = vsub.f32 %v255_v18, %v256_v19  ;;  %v262_v24 = vld [vmem:[%s541_s1 + $0x40] sm:$0xff]  ;;  %251 = vst [vmem:[%s542_s2 + $0x20] sm:$0xff] %v46_v16  ;;  %v76_v25 = vsub.f32 %v258_v20, %v259_v22  ;;  %v264_v27 = vld [vmem:[%s540_s0 + $0x48] sm:$0xff] }
   0x8   :  { %254 = vst [vmem:[%s542_s2 + $0x28] sm:$0xff] %v56_v17  ;;  %v86_v26 = vsub.f32 %v261_v23, %v262_v24  ;;  %v265_v28 = vld [vmem:[%s541_s1 + $0x48] sm:$0xff]  ;;  %v267_v29 = vld [vmem:[%s540_s0 + $0x50] sm:$0xff]  ;;  %v270_v32 = vld [vmem:[%s540_s0 + $0x58] sm:$0xff] }
   0x9   :  { %257 = vst [vmem:[%s542_s2 + $0x30] sm:$0xff] %v66_v21  ;;  %v96_v30 = vsub.f32 %v264_v27, %v265_v28  ;;  %v268_v31 = vld [vmem:[%s541_s1 + $0x50] sm:$0xff]  ;;  %v271_v33 = vld [vmem:[%s541_s1 + $0x58] sm:$0xff]  ;;  %260 = vst [vmem:[%s542_s2 + $0x38] sm:$0xff] %v76_v25 }
   0xa   :  { %263 = vst [vmem:[%s542_s2 + $0x40] sm:$0xff] %v86_v26  ;;  %v106_v34 = vsub.f32 %v267_v29, %v268_v31  ;;  %v116_v35 = vsub.f32 %v270_v32, %v271_v33  ;;  %v273_v36 = vld [vmem:[%s540_s0 + $0x60] sm:$0xff]  ;;  %v276_v38 = vld [vmem:[%s540_s0 + $0x68] sm:$0xff]  ;;  %v279_v41 = vld [vmem:[%s540_s0 + $0x70] sm:$0xff] }
   0xb   :  { %v274_v37 = vld [vmem:[%s541_s1 + $0x60] sm:$0xff]  ;;  %266 = vst [vmem:[%s542_s2 + $0x48] sm:$0xff] %v96_v30  ;;  %v277_v40 = vld [vmem:[%s541_s1 + $0x68] sm:$0xff]  ;;  %v280_v42 = vld [vmem:[%s541_s1 + $0x70] sm:$0xff] }
   0xc   :  { %v126_v39 = vsub.f32 %v273_v36, %v274_v37  ;;  %269 = vst [vmem:[%s542_s2 + $0x50] sm:$0xff] %v106_v34  ;;  %272 = vst [vmem:[%s542_s2 + $0x58] sm:$0xff] %v116_v35  ;;  %v136_v43 = vsub.f32 %v276_v38, %v277_v40  ;;  %v146_v44 = vsub.f32 %v279_v41, %v280_v42  ;;  %v282_v45 = vld [vmem:[%s540_s0 + $0x78] sm:$0xff]  ;;  %v285_v47 = vld [vmem:[%s540_s0 + $0x80] sm:$0xff] }
   0xd   :  { %v283_v46 = vld [vmem:[%s541_s1 + $0x78] sm:$0xff]  ;;  %v286_v49 = vld [vmem:[%s541_s1 + $0x80] sm:$0xff]  ;;  %v288_v50 = vld [vmem:[%s540_s0 + $0x88] sm:$0xff] }
   0xe   :  { %275 = vst [vmem:[%s542_s2 + $0x60] sm:$0xff] %v126_v39  ;;  %v156_v48 = vsub.f32 %v282_v45, %v283_v46  ;;  %v289_v51 = vld [vmem:[%s541_s1 + $0x88] sm:$0xff]  ;;  %278 = vst [vmem:[%s542_s2 + $0x68] sm:$0xff] %v136_v43  ;;  %v166_v52 = vsub.f32 %v285_v47, %v286_v49  ;;  %v291_v54 = vld [vmem:[%s540_s0 + $0x90] sm:$0xff] }
   0xf   :  { %281 = vst [vmem:[%s542_s2 + $0x70] sm:$0xff] %v146_v44  ;;  %v176_v53 = vsub.f32 %v288_v50, %v289_v51  ;;  %v292_v55 = vld [vmem:[%s541_s1 + $0x90] sm:$0xff]  ;;  %v294_v56 = vld [vmem:[%s540_s0 + $0x98] sm:$0xff]  ;;  %v297_v59 = vld [vmem:[%s540_s0 + $0xa0] sm:$0xff] }
  0x10   :  { %284 = vst [vmem:[%s542_s2 + $0x78] sm:$0xff] %v156_v48  ;;  %v186_v57 = vsub.f32 %v291_v54, %v292_v55  ;;  %v295_v58 = vld [vmem:[%s541_s1 + $0x98] sm:$0xff]  ;;  %v298_v60 = vld [vmem:[%s541_s1 + $0xa0] sm:$0xff]  ;;  %287 = vst [vmem:[%s542_s2 + $0x80] sm:$0xff] %v166_v52 }
  0x11   :  { %290 = vst [vmem:[%s542_s2 + $0x88] sm:$0xff] %v176_v53  ;;  %v196_v61 = vsub.f32 %v294_v56, %v295_v58  ;;  %v206_v62 = vsub.f32 %v297_v59, %v298_v60  ;;  %v300_v63 = vld [vmem:[%s540_s0 + $0xa8] sm:$0xff]  ;;  %v303_v1 = vld [vmem:[%s540_s0 + $0xb0] sm:$0xff]  ;;  %v306_v4 = vld [vmem:[%s540_s0 + $0xb8] sm:$0xff] }
  0x12   :  { %v301_v0 = vld [vmem:[%s541_s1 + $0xa8] sm:$0xff]  ;;  %293 = vst [vmem:[%s542_s2 + $0x90] sm:$0xff] %v186_v57  ;;  %v304_v3 = vld [vmem:[%s541_s1 + $0xb0] sm:$0xff]  ;;  %v307_v5 = vld [vmem:[%s541_s1 + $0xb8] sm:$0xff] }
  0x13   :  { %v216_v2 = vsub.f32 %v300_v63, %v301_v0  ;;  %296 = vst [vmem:[%s542_s2 + $0x98] sm:$0xff] %v196_v61  ;;  %299 = vst [vmem:[%s542_s2 + $0xa0] sm:$0xff] %v206_v62  ;;  %v226_v6 = vsub.f32 %v303_v1, %v304_v3  ;;  %v236_v7 = vsub.f32 %v306_v4, %v307_v5 }
  0x15   :  { %302 = vst [vmem:[%s542_s2 + $0xa8] sm:$0xff] %v216_v2  ;;  %305 = vst [vmem:[%s542_s2 + $0xb0] sm:$0xff] %v226_v6 }
  0x16   :  { %308 = vst [vmem:[%s542_s2 + $0xb8] sm:$0xff] %v236_v7 }

// kernel: heat_transfer_forward.8
= control target key start
LH: loop header
LB: loop body
LE: loop exit
PB: predicated region body
PF: predicated region fallthrough
CT: control target
= control target key end

     0   :  { %s351_s1 = inlined_call_operand.vmem [shape: f32[128,128], index: 1, kind: input, shape index: {}]   ;;  %s352_s0 = inlined_call_operand.vmem [shape: f32[48,128], index: 0, kind: input, shape index: {}]   ;;  %s353_s2 = inlined_call_operand.vmem [shape: f32[1,128], index: 2, kind: input, shape index: {}]   ;;  %s354_s3 = inlined_call_operand.vmem [shape: f32[48,128], index: 3, kind: output, shape index: {}]  }
   0x1   :  { %v35_v0 = vld [vmem:[%s351_s1 + $0x78] sm:$0xff]  ;;  %v34_v1 = vld [vmem:[%s351_s1 + $0x70] sm:$0xff]  ;;  %v33_v2 = vld [vmem:[%s351_s1 + $0x68] sm:$0xff] }
   0x2   :  { %212 = vmatprep.subr.mxu1 %v35_v0  ;;  %171 = vmatprep.subr.mxu0 %v35_v0  ;;  %v32_v3 = vld [vmem:[%s351_s1 + $0x60] sm:$0xff]  ;;  %v31_v4 = vld [vmem:[%s351_s1 + $0x58] sm:$0xff]  ;;  %v30_v5 = vld [vmem:[%s351_s1 + $0x50] sm:$0xff] }
   0x3   :  { %228 = vmatpush3.msra.mxu1 %v35_v0  ;;  %172 = vmatpush3.msra.mxu0 %v35_v0  ;;  %v29_v6 = vld [vmem:[%s351_s1 + $0x48] sm:$0xff]  ;;  %v28_v7 = vld [vmem:[%s351_s1 + $0x40] sm:$0xff]  ;;  %v27_v8 = vld [vmem:[%s351_s1 + $0x38] sm:$0xff] }
   0x4   :  { %213 = vmatprep.subr.mxu1 %v34_v1  ;;  %173 = vmatprep.subr.mxu0 %v34_v1  ;;  %v26_v9 = vld [vmem:[%s351_s1 + $0x30] sm:$0xff]  ;;  %v25_v10 = vld [vmem:[%s351_s1 + $0x28] sm:$0xff]  ;;  %v24_v11 = vld [vmem:[%s351_s1 + $0x20] sm:$0xff] }
   0x5   :  { %229 = vmatpush3.msra.mxu1 %v34_v1  ;;  %174 = vmatpush3.msra.mxu0 %v34_v1  ;;  %v23_v12 = vld [vmem:[%s351_s1 + $0x18] sm:$0xff]  ;;  %v22_v13 = vld [vmem:[%s351_s1 + $0x10] sm:$0xff]  ;;  %v21_v14 = vld [vmem:[%s351_s1 + $0x8] sm:$0xff] }
   0x6   :  { %214 = vmatprep.subr.mxu1 %v33_v2  ;;  %175 = vmatprep.subr.mxu0 %v33_v2  ;;  %v20_v15 = vld [vmem:[%s351_s1] sm:$0xff]  ;;  %v16_v16 = vld [vmem:[%s352_s0 + $0x10] sm:$0xff]  ;;  %v17_v17 = vld [vmem:[%s352_s0 + $0x18] sm:$0xff] }
   0x7   :  { %230 = vmatpush3.msra.mxu1 %v33_v2  ;;  %176 = vmatpush3.msra.mxu0 %v33_v2  ;;  %v14_v18 = vld [vmem:[%s352_s0] sm:$0xff]  ;;  %v15_v20 = vld [vmem:[%s352_s0 + $0x8] sm:$0xff] }
   0x8   :  { %215 = vmatprep.subr.mxu1 %v32_v3  ;;  %177 = vmatprep.subr.mxu0 %v32_v3  ;;  %v18_v19 = vld [vmem:[%s352_s0 + $0x20] sm:$0xff]  ;;  %v19_v21 = vld [vmem:[%s352_s0 + $0x28] sm:$0xff] }
   0x9   :  { %231 = vmatpush3.msra.mxu1 %v32_v3  ;;  %178 = vmatpush3.msra.mxu0 %v32_v3  ;;  %v148_v22 = vld [vmem:[%s353_s2] ss:$0 sm:$0xff] }
   0xa   :  { %216 = vmatprep.subr.mxu1 %v31_v4  ;;  %179 = vmatprep.subr.mxu0 %v31_v4 }
   0xb   :  { %232 = vmatpush3.msra.mxu1 %v31_v4  ;;  %180 = vmatpush3.msra.mxu0 %v31_v4 }
   0xc   :  { %217 = vmatprep.subr.mxu1 %v30_v5  ;;  %181 = vmatprep.subr.mxu0 %v30_v5 }
   0xd   :  { %233 = vmatpush3.msra.mxu1 %v30_v5  ;;  %182 = vmatpush3.msra.mxu0 %v30_v5 }
   0xe   :  { %218 = vmatprep.subr.mxu1 %v29_v6  ;;  %183 = vmatprep.subr.mxu0 %v29_v6 }
   0xf   :  { %234 = vmatpush3.msra.mxu1 %v29_v6  ;;  %184 = vmatpush3.msra.mxu0 %v29_v6 }
  0x10   :  { %219 = vmatprep.subr.mxu1 %v28_v7  ;;  %185 = vmatprep.subr.mxu0 %v28_v7 }
  0x11   :  { %235 = vmatpush3.msra.mxu1 %v28_v7  ;;  %186 = vmatpush3.msra.mxu0 %v28_v7 }
  0x12   :  { %220 = vmatprep.subr.mxu1 %v27_v8  ;;  %187 = vmatprep.subr.mxu0 %v27_v8 }
  0x13   :  { %236 = vmatpush3.msra.mxu1 %v27_v8  ;;  %188 = vmatpush3.msra.mxu0 %v27_v8 }
  0x14   :  { %221 = vmatprep.subr.mxu1 %v26_v9  ;;  %189 = vmatprep.subr.mxu0 %v26_v9 }
  0x15   :  { %237 = vmatpush3.msra.mxu1 %v26_v9  ;;  %190 = vmatpush3.msra.mxu0 %v26_v9 }
  0x16   :  { %222 = vmatprep.subr.mxu1 %v25_v10  ;;  %191 = vmatprep.subr.mxu0 %v25_v10 }
  0x17   :  { %238 = vmatpush3.msra.mxu1 %v25_v10  ;;  %192 = vmatpush3.msra.mxu0 %v25_v10 }
  0x18   :  { %223 = vmatprep.subr.mxu1 %v24_v11  ;;  %193 = vmatprep.subr.mxu0 %v24_v11 }
  0x19   :  { %239 = vmatpush3.msra.mxu1 %v24_v11  ;;  %194 = vmatpush3.msra.mxu0 %v24_v11 }
  0x1a   :  { %224 = vmatprep.subr.mxu1 %v23_v12  ;;  %195 = vmatprep.subr.mxu0 %v23_v12 }
  0x1b   :  { %240 = vmatpush3.msra.mxu1 %v23_v12  ;;  %196 = vmatpush3.msra.mxu0 %v23_v12 }
  0x1c   :  { %225 = vmatprep.subr.mxu1 %v22_v13  ;;  %197 = vmatprep.subr.mxu0 %v22_v13 }
  0x1d   :  { %241 = vmatpush3.msra.mxu1 %v22_v13  ;;  %198 = vmatpush3.msra.mxu0 %v22_v13 }
  0x1e   :  { %226 = vmatprep.subr.mxu1 %v21_v14  ;;  %199 = vmatprep.subr.mxu0 %v21_v14 }
  0x1f   :  { %242 = vmatpush3.msra.mxu1 %v21_v14  ;;  %200 = vmatpush3.msra.mxu0 %v21_v14 }
  0x20   :  { %227 = vmatprep.subr.mxu1 %v20_v15  ;;  %206 = vmatprep.mubr.f32.mxu1 %v16_v16 }
  0x21   :  { %243 = vmatpush3.msra.mxu1 %v20_v15  ;;  %201 = vmatprep.subr.mxu0 %v20_v15 }
  0x22   :  { %207 = vmatmul.mubr.f32.vlgmr.msra.gmra.mxu1 %v17_v17  ;;  %202 = vmatpush3.msra.mxu0 %v20_v15 }
  0x23   :  { %203 = vmatprep.mubr.f32.mxu0 %v14_v18  ;;  %209 = vmatprep.mubr.f32.mxu1 %v18_v19 }
  0x24   :  { %204 = vmatmul.mubr.f32.vlgmr.msra.gmra.mxu0 %v15_v20 }
  0x26   :  { %210 = vmatmul.mubr.f32.gmra.mxu1 %v19_v21 }
  0xe2   :  { %v208_v23 = vpop.f32.mrf.mxu1 }
  0xe3   :  { %v125_v24 = vadd.f32 %v208_v23, %v148_v22 }
  0xe4   :  { %v205_v25 = vpop.f32.mrf.mxu0  ;;  %v119_v26 = vpop.f32.mrf.mxu1 }
  0xe5   :  { %141 = vst [vmem:[%s354_s3 + $0x18] sm:$0xff] %v125_v24  ;;  %v115_v27 = vadd.f32 %v205_v25, %v148_v22  ;;  %v120_v28 = vadd.f32 %v148_v22, %v119_v26 }
  0xe6   :  { %v109_v29 = vpop.f32.mrf.mxu0  ;;  %v211_v30 = vpop.f32.mrf.mxu1 }
  0xe7   :  { %139 = vst [vmem:[%s354_s3 + $0x8] sm:$0xff] %v115_v27  ;;  %140 = vst [vmem:[%s354_s3 + $0x10] sm:$0xff] %v120_v28  ;;  %v110_v31 = vadd.f32 %v148_v22, %v109_v29  ;;  %v135_v32 = vadd.f32 %v211_v30, %v148_v22 }
  0xe8   :  { %v129_v33 = vpop.f32.mrf.mxu1 }
  0xe9   :  { %138 = vst [vmem:[%s354_s3] sm:$0xff] %v110_v31  ;;  %143 = vst [vmem:[%s354_s3 + $0x28] sm:$0xff] %v135_v32  ;;  %v130_v34 = vadd.f32 %v148_v22, %v129_v33 }
  0xeb   :  { %142 = vst [vmem:[%s354_s3 + $0x20] sm:$0xff] %v130_v34 }

// kernel: sub.21
= control target key start
LH: loop header
LB: loop body
LE: loop exit
PB: predicated region body
PF: predicated region fallthrough
CT: control target
= control target key end

     0   :  { %s540_s0 = inlined_call_operand.vmem [shape: f32[192,2], index: 0, kind: input, shape index: {}]   ;;  %s541_s1 = inlined_call_operand.vmem [shape: f32[192,2], index: 1, kind: input, shape index: {}]   ;;  %s542_s2 = inlined_call_operand.vmem [shape: f32[192,2], index: 2, kind: output, shape index: {}]  }
   0x1   :  { %v3_v0 = vld [vmem:[%s540_s0] sm:$0xff]  ;;  %v240_v2 = vld [vmem:[%s540_s0 + $0x8] sm:$0xff]  ;;  %v243_v5 = vld [vmem:[%s540_s0 + $0x10] sm:$0xff] }
   0x2   :  { %v4_v1 = vld [vmem:[%s541_s1] sm:$0xff]  ;;  %v241_v4 = vld [vmem:[%s541_s1 + $0x8] sm:$0xff]  ;;  %v244_v6 = vld [vmem:[%s541_s1 + $0x10] sm:$0xff] }
   0x3   :  { %v7_v3 = vsub.f32 %v3_v0, %v4_v1  ;;  %v16_v7 = vsub.f32 %v240_v2, %v241_v4  ;;  %v26_v8 = vsub.f32 %v243_v5, %v244_v6  ;;  %v246_v9 = vld [vmem:[%s540_s0 + $0x18] sm:$0xff]  ;;  %v249_v11 = vld [vmem:[%s540_s0 + $0x20] sm:$0xff]  ;;  %v252_v14 = vld [vmem:[%s540_s0 + $0x28] sm:$0xff] }
   0x4   :  { %v247_v10 = vld [vmem:[%s541_s1 + $0x18] sm:$0xff]  ;;  %v250_v13 = vld [vmem:[%s541_s1 + $0x20] sm:$0xff]  ;;  %v253_v15 = vld [vmem:[%s541_s1 + $0x28] sm:$0xff] }
   0x5   :  { %9 = vst [vmem:[%s542_s2] sm:$0xff] %v7_v3  ;;  %v36_v12 = vsub.f32 %v246_v9, %v247_v10  ;;  %242 = vst [vmem:[%s542_s2 + $0x8] sm:$0xff] %v16_v7  ;;  %v46_v16 = vsub.f32 %v249_v11, %v250_v13  ;;  %v56_v17 = vsub.f32 %v252_v14, %v253_v15  ;;  %v255_v18 = vld [vmem:[%s540_s0 + $0x30] sm:$0xff]  ;;  %v258_v20 = vld [vmem:[%s540_s0 + $0x38] sm:$0xff] }
   0x6   :  { %245 = vst [vmem:[%s542_s2 + $0x10] sm:$0xff] %v26_v8  ;;  %v256_v19 = vld [vmem:[%s541_s1 + $0x30] sm:$0xff]  ;;  %v259_v22 = vld [vmem:[%s541_s1 + $0x38] sm:$0xff]  ;;  %v261_v23 = vld [vmem:[%s540_s0 + $0x40] sm:$0xff] }
   0x7   :  { %248 = vst [vmem:[%s542_s2 + $0x18] sm:$0xff] %v36_v12  ;;  %v66_v21 = vsub.f32 %v255_v18, %v256_v19  ;;  %v262_v24 = vld [vmem:[%s541_s1 + $0x40] sm:$0xff]  ;;  %251 = vst [vmem:[%s542_s2 + $0x20] sm:$0xff] %v46_v16  ;;  %v76_v25 = vsub.f32 %v258_v20, %v259_v22  ;;  %v264_v27 = vld [vmem:[%s540_s0 + $0x48] sm:$0xff] }
   0x8   :  { %254 = vst [vmem:[%s542_s2 + $0x28] sm:$0xff] %v56_v17  ;;  %v86_v26 = vsub.f32 %v261_v23, %v262_v24  ;;  %v265_v28 = vld [vmem:[%s541_s1 + $0x48] sm:$0xff]  ;;  %v267_v29 = vld [vmem:[%s540_s0 + $0x50] sm:$0xff]  ;;  %v270_v32 = vld [vmem:[%s540_s0 + $0x58] sm:$0xff] }
   0x9   :  { %257 = vst [vmem:[%s542_s2 + $0x30] sm:$0xff] %v66_v21  ;;  %v96_v30 = vsub.f32 %v264_v27, %v265_v28  ;;  %v268_v31 = vld [vmem:[%s541_s1 + $0x50] sm:$0xff]  ;;  %v271_v33 = vld [vmem:[%s541_s1 + $0x58] sm:$0xff]  ;;  %260 = vst [vmem:[%s542_s2 + $0x38] sm:$0xff] %v76_v25 }
   0xa   :  { %263 = vst [vmem:[%s542_s2 + $0x40] sm:$0xff] %v86_v26  ;;  %v106_v34 = vsub.f32 %v267_v29, %v268_v31  ;;  %v116_v35 = vsub.f32 %v270_v32, %v271_v33  ;;  %v273_v36 = vld [vmem:[%s540_s0 + $0x60] sm:$0xff]  ;;  %v276_v38 = vld [vmem:[%s540_s0 + $0x68] sm:$0xff]  ;;  %v279_v41 = vld [vmem:[%s540_s0 + $0x70] sm:$0xff] }
   0xb   :  { %v274_v37 = vld [vmem:[%s541_s1 + $0x60] sm:$0xff]  ;;  %266 = vst [vmem:[%s542_s2 + $0x48] sm:$0xff] %v96_v30  ;;  %v277_v40 = vld [vmem:[%s541_s1 + $0x68] sm:$0xff]  ;;  %v280_v42 = vld [vmem:[%s541_s1 + $0x70] sm:$0xff] }
   0xc   :  { %v126_v39 = vsub.f32 %v273_v36, %v274_v37  ;;  %269 = vst [vmem:[%s542_s2 + $0x50] sm:$0xff] %v106_v34  ;;  %272 = vst [vmem:[%s542_s2 + $0x58] sm:$0xff] %v116_v35  ;;  %v136_v43 = vsub.f32 %v276_v38, %v277_v40  ;;  %v146_v44 = vsub.f32 %v279_v41, %v280_v42  ;;  %v282_v45 = vld [vmem:[%s540_s0 + $0x78] sm:$0xff]  ;;  %v285_v47 = vld [vmem:[%s540_s0 + $0x80] sm:$0xff] }
   0xd   :  { %v283_v46 = vld [vmem:[%s541_s1 + $0x78] sm:$0xff]  ;;  %v286_v49 = vld [vmem:[%s541_s1 + $0x80] sm:$0xff]  ;;  %v288_v50 = vld [vmem:[%s540_s0 + $0x88] sm:$0xff] }
   0xe   :  { %275 = vst [vmem:[%s542_s2 + $0x60] sm:$0xff] %v126_v39  ;;  %v156_v48 = vsub.f32 %v282_v45, %v283_v46  ;;  %v289_v51 = vld [vmem:[%s541_s1 + $0x88] sm:$0xff]  ;;  %278 = vst [vmem:[%s542_s2 + $0x68] sm:$0xff] %v136_v43  ;;  %v166_v52 = vsub.f32 %v285_v47, %v286_v49  ;;  %v291_v54 = vld [vmem:[%s540_s0 + $0x90] sm:$0xff] }
   0xf   :  { %281 = vst [vmem:[%s542_s2 + $0x70] sm:$0xff] %v146_v44  ;;  %v176_v53 = vsub.f32 %v288_v50, %v289_v51  ;;  %v292_v55 = vld [vmem:[%s541_s1 + $0x90] sm:$0xff]  ;;  %v294_v56 = vld [vmem:[%s540_s0 + $0x98] sm:$0xff]  ;;  %v297_v59 = vld [vmem:[%s540_s0 + $0xa0] sm:$0xff] }
  0x10   :  { %284 = vst [vmem:[%s542_s2 + $0x78] sm:$0xff] %v156_v48  ;;  %v186_v57 = vsub.f32 %v291_v54, %v292_v55  ;;  %v295_v58 = vld [vmem:[%s541_s1 + $0x98] sm:$0xff]  ;;  %v298_v60 = vld [vmem:[%s541_s1 + $0xa0] sm:$0xff]  ;;  %287 = vst [vmem:[%s542_s2 + $0x80] sm:$0xff] %v166_v52 }
  0x11   :  { %290 = vst [vmem:[%s542_s2 + $0x88] sm:$0xff] %v176_v53  ;;  %v196_v61 = vsub.f32 %v294_v56, %v295_v58  ;;  %v206_v62 = vsub.f32 %v297_v59, %v298_v60  ;;  %v300_v63 = vld [vmem:[%s540_s0 + $0xa8] sm:$0xff]  ;;  %v303_v1 = vld [vmem:[%s540_s0 + $0xb0] sm:$0xff]  ;;  %v306_v4 = vld [vmem:[%s540_s0 + $0xb8] sm:$0xff] }
  0x12   :  { %v301_v0 = vld [vmem:[%s541_s1 + $0xa8] sm:$0xff]  ;;  %293 = vst [vmem:[%s542_s2 + $0x90] sm:$0xff] %v186_v57  ;;  %v304_v3 = vld [vmem:[%s541_s1 + $0xb0] sm:$0xff]  ;;  %v307_v5 = vld [vmem:[%s541_s1 + $0xb8] sm:$0xff] }
  0x13   :  { %v216_v2 = vsub.f32 %v300_v63, %v301_v0  ;;  %296 = vst [vmem:[%s542_s2 + $0x98] sm:$0xff] %v196_v61  ;;  %299 = vst [vmem:[%s542_s2 + $0xa0] sm:$0xff] %v206_v62  ;;  %v226_v6 = vsub.f32 %v303_v1, %v304_v3  ;;  %v236_v7 = vsub.f32 %v306_v4, %v307_v5 }
  0x15   :  { %302 = vst [vmem:[%s542_s2 + $0xa8] sm:$0xff] %v216_v2  ;;  %305 = vst [vmem:[%s542_s2 + $0xb0] sm:$0xff] %v226_v6 }
  0x16   :  { %308 = vst [vmem:[%s542_s2 + $0xb8] sm:$0xff] %v236_v7 }

// kernel: heat_transfer_forward.9
= control target key start
LH: loop header
LB: loop body
LE: loop exit
PB: predicated region body
PF: predicated region fallthrough
CT: control target
= control target key end

     0   :  { %s2655_s21 = smov 0   ;;  %s4988_s0 = inlined_call_operand.vmem [shape: f32[256,128], index: 0, kind: input, shape index: {}]   ;;  %s4989_s1 = inlined_call_operand.vmem [shape: f32[128,128], index: 1, kind: input, shape index: {}]   ;;  %s4990_s2 = inlined_call_operand.vmem [shape: f32[1,128], index: 2, kind: input, shape index: {}]   ;;  %s4991_s3 = inlined_call_operand.vmem [shape: f32[128,128], index: 3, kind: input, shape index: {}]   ;;  %s4992_s4 = inlined_call_operand.vmem [shape: f32[1,128], index: 4, kind: input, shape index: {}]   ;;  %s4993_s5 = inlined_call_operand.vmem [shape: s32[1,256,1], index: 5, kind: input, shape index: {}]   ;;  %s4994_s6 = inlined_call_operand.vmem [shape: f32[48,128], index: 6, kind: output, shape index: {}]  }
   0x1 LB: > { %s2661_s22 = sadd.s32 4294967295, %s2616_s21   ;;  %p2467_p0 = scmp.ge.s32.totalorder %s2616_s21, 1  ;;  %s2616_s21 = sphi %s2655_s21, %s16_s21  }
   0x2   : > { %p219_p1 = scmp.lt.s32.totalorder %s2616_s21, 9 }
   0x4   : > { %p220_p2 = pnand %p2467_p0, %p219_p1 }
   0x6   : > { %223 = sbr.rel (%p220_p2) target bundleno = 704 (0x2c0), region = 44 }
   0xb   : > { %s2468_s23 = sshll.u32 %s2661_s22, 2  ;;  %p2472_p4 = scmp.ne.s32.totalorder %s2661_s22, 0 }
   0xc   : > { %p250_p3 = scmp.lt.s32.totalorder %s2468_s23, 31 }
   0xd   : > { %264 = sbr.rel (%p2472_p4) target bundleno = 22 (0x16), region = 48 }
   0xe   : > { %s5585_s23 = smov (!%p250_p3, %s2468_s23), 31 }
   0xf   : > { %s2469_s24 = sshll.u32 %s5585_s23, 3 }
  0x10   : > { %s2669_s27 = scalar_lea.vmem %s4988_s0, %s2469_s24  ;;  %s2674_s30 = scalar_lea.vmem %s4993_s5, %s2469_s24 }
  0x12   : > { %v2618_v0 = vmov -1e+30  }
  0x13   : > { %265 = vst [vmem:[%s4994_s6] sm:$0xff] %v2618_v0  ;;  %266 = vst [vmem:[%s4994_s6 + $0x8] sm:$0xff] %v2618_v0 }
  0x14   : > { %267 = vst [vmem:[%s4994_s6 + $0x10] sm:$0xff] %v2618_v0  ;;  %268 = vst [vmem:[%s4994_s6 + $0x18] sm:$0xff] %v2618_v0 }
  0x15   : > { %269 = vst [vmem:[%s4994_s6 + $0x20] sm:$0xff] %v2618_v0  ;;  %270 = vst [vmem:[%s4994_s6 + $0x28] sm:$0xff] %v2618_v0 }
  0x16 PF: > { %v290_v1 = vld [vmem:[%s4989_s1 + $0x78] sm:$0xff]  ;;  %v2699_v2 = vld [vmem:[%s2674_s30 + $0x10] sm:$0xff]  ;;  %v2702_v3 = vld [vmem:[%s2674_s30] sm:$0xff]  ;;  %v2619_v4 = vmov 0   ;;  %p2475_p5 = scmp.ne.s32.totalorder %s2661_s22, 7 }
  0x17   : > { %2518 = vmatprep.subr.mxu0 %v290_v1  ;;  %2605 = vset.pattern.permute.xlu1 %v2619_v4  ;;  %vm501_vm0 = vcmp.eq.s32.totalorder %v2699_v2, 0  ;;  %vm499_vm1 = vcmp.eq.s32.totalorder %v2702_v3, 0  ;;  %v289_v5 = vld [vmem:[%s4989_s1 + $0x70] sm:$0xff]  ;;  %v2711_v6 = vld [vmem:[%s2674_s30 + $0x18] sm:$0xff]  ;;  %v2718_v9 = vld [vmem:[%s2674_s30 + $0x8] sm:$0xff]  ;;  %vm503_vm5 = vcmp.eq.s32.totalorder %v2702_v3, 1 }
  0x18   : > { %2604 = vset.pattern.permute.xlu0 %v2619_v4  ;;  %2519 = vmatpush3.msra.mxu0 %v290_v1  ;;  %v693_v7 = vsel %vm501_vm0, 1, %v2619_v4  ;;  %v691_v8 = vsel %vm499_vm1, 1, %v2619_v4  ;;  %vm502_vm2 = vcmp.eq.s32.totalorder %v2711_v6, 0  ;;  %v288_v10 = vld [vmem:[%s4989_s1 + $0x68] sm:$0xff]  ;;  %vm500_vm3 = vcmp.eq.s32.totalorder %v2718_v9, 0  ;;  %v287_v13 = vld [vmem:[%s4989_s1 + $0x60] sm:$0xff] }
  0x19   : > { %890 = vperm.xlu1 %2605, %v693_v7   ;;  %884 = vperm.xlu0 %2604, %v691_v8   ;;  %v694_v11 = vsel %vm502_vm2, 1, %v2619_v4  ;;  %v692_v12 = vsel %vm500_vm3, 1, %v2619_v4  ;;  %vm504_vm4 = vcmp.eq.s32.totalorder %v2718_v9, 1  ;;  %v286_v14 = vld [vmem:[%s4989_s1 + $0x58] sm:$0xff]  ;;  %v271_v16 = vld [vmem:[%s2669_s27] sm:$0xff]  ;;  %v695_v17 = vsel %vm503_vm5, 1, %v2619_v4 }
  0x1a   : > { %2520 = vmatprep.subr.mxu0 %v289_v5  ;;  %v696_v15 = vsel %vm504_vm4, 1, %v2619_v4  ;;  %v285_v18 = vld [vmem:[%s4989_s1 + $0x50] sm:$0xff]  ;;  %vm506_vm6 = vcmp.eq.s32.totalorder %v2711_v6, 1  ;;  %2550 = vmatprep.mubr.f32.mxu0 %v271_v16  ;;  %vm505_vm7 = vcmp.eq.s32.totalorder %v2699_v2, 1  ;;  %v284_v19 = vld [vmem:[%s4989_s1 + $0x48] sm:$0xff]  ;;  %v283_v22 = vld [vmem:[%s4989_s1 + $0x40] sm:$0xff] }
  0x1b   : > { %2521 = vmatpush3.msra.mxu0 %v289_v5  ;;  %v698_v20 = vsel %vm506_vm6, 1, %v2619_v4  ;;  %v697_v21 = vsel %vm505_vm7, 1, %v2619_v4  ;;  %vm508_vm8 = vcmp.eq.s32.totalorder %v2718_v9, 2  ;;  %vm507_vm9 = vcmp.eq.s32.totalorder %v2702_v3, 2  ;;  %v282_v23 = vld [vmem:[%s4989_s1 + $0x38] sm:$0xff]  ;;  %v281_v26 = vld [vmem:[%s4989_s1 + $0x30] sm:$0xff] }
  0x1c   : > { %2522 = vmatprep.subr.mxu0 %v288_v10  ;;  %v700_v24 = vsel %vm508_vm8, 1, %v2619_v4  ;;  %v699_v25 = vsel %vm507_vm9, 1, %v2619_v4  ;;  %vm510_vm10 = vcmp.eq.s32.totalorder %v2711_v6, 2  ;;  %vm509_vm11 = vcmp.eq.s32.totalorder %v2699_v2, 2  ;;  %v280_v27 = vld [vmem:[%s4989_s1 + $0x28] sm:$0xff]  ;;  %v279_v30 = vld [vmem:[%s4989_s1 + $0x20] sm:$0xff] }
  0x1d   : > { %2523 = vmatpush3.msra.mxu0 %v288_v10  ;;  %893 = vperm.xlu1 %2605, %v694_v11   ;;  %v702_v28 = vsel %vm510_vm10, 1, %v2619_v4  ;;  %v701_v29 = vsel %vm509_vm11, 1, %v2619_v4  ;;  %vm512_vm12 = vcmp.eq.s32.totalorder %v2718_v9, 3  ;;  %vm511_vm13 = vcmp.eq.s32.totalorder %v2702_v3, 3  ;;  %v278_v31 = vld [vmem:[%s4989_s1 + $0x18] sm:$0xff]  ;;  %v277_v34 = vld [vmem:[%s4989_s1 + $0x10] sm:$0xff] }
  0x1e   : > { %887 = vperm.xlu0 %2604, %v692_v12   ;;  %2524 = vmatprep.subr.mxu0 %v287_v13  ;;  %v704_v32 = vsel %vm512_vm12, 1, %v2619_v4  ;;  %v703_v33 = vsel %vm511_vm13, 1, %v2619_v4  ;;  %vm514_vm14 = vcmp.eq.s32.totalorder %v2711_v6, 3  ;;  %vm513_vm15 = vcmp.eq.s32.totalorder %v2699_v2, 3  ;;  %v276_v35 = vld [vmem:[%s4989_s1 + $0x8] sm:$0xff]  ;;  %v275_v38 = vld [vmem:[%s4989_s1] sm:$0xff] }
  0x1f   : > { %2525 = vmatpush3.msra.mxu0 %v287_v13  ;;  %v706_v36 = vsel %vm514_vm14, 1, %v2619_v4  ;;  %v705_v37 = vsel %vm513_vm15, 1, %v2619_v4  ;;  %vm516_vm0 = vcmp.eq.s32.totalorder %v2718_v9, 4  ;;  %vm515_vm1 = vcmp.eq.s32.totalorder %v2702_v3, 4  ;;  %v272_v39 = vld [vmem:[%s2669_s27 + $0x8] sm:$0xff]  ;;  %v273_v41 = vld [vmem:[%s2669_s27 + $0x10] sm:$0xff] }
  0x20   : > { %2526 = vmatprep.subr.mxu0 %v286_v14  ;;  %v708_v40 = vsel %vm516_vm0, 1, %v2619_v4  ;;  %v707_v42 = vsel %vm515_vm1, 1, %v2619_v4  ;;  %vm518_vm2 = vcmp.eq.s32.totalorder %v2711_v6, 4  ;;  %vm517_vm3 = vcmp.eq.s32.totalorder %v2699_v2, 4  ;;  %v274_v43 = vld [vmem:[%s2669_s27 + $0x18] sm:$0xff]  ;;  %v401_v1 = vld [vmem:[%s4991_s3 + $0x70] sm:$0xff] }
  0x21   : > { %2527 = vmatpush3.msra.mxu0 %v286_v14  ;;  %899 = vperm.xlu1 %2605, %v696_v15   ;;  %v710_v44 = vsel %vm518_vm2, 1, %v2619_v4  ;;  %v709_v45 = vsel %vm517_vm3, 1, %v2619_v4  ;;  %vm520_vm4 = vcmp.eq.s32.totalorder %v2718_v9, 5  ;;  %vm519_vm5 = vcmp.eq.s32.totalorder %v2702_v3, 5  ;;  %v402_v63 = vld [vmem:[%s4991_s3 + $0x78] sm:$0xff]  ;;  %v400_v7 = vld [vmem:[%s4991_s3 + $0x68] sm:$0xff] }
  0x22   : > { %896 = vperm.xlu0 %2604, %v695_v17   ;;  %2528 = vmatprep.subr.mxu0 %v285_v18  ;;  %v712_v46 = vsel %vm520_vm4, 1, %v2619_v4  ;;  %v711_v47 = vsel %vm519_vm5, 1, %v2619_v4  ;;  %vm522_vm6 = vcmp.eq.s32.totalorder %v2711_v6, 5  ;;  %vm521_vm7 = vcmp.eq.s32.totalorder %v2699_v2, 5  ;;  %v399_v10 = vld [vmem:[%s4991_s3 + $0x60] sm:$0xff]  ;;  %v398_v12 = vld [vmem:[%s4991_s3 + $0x58] sm:$0xff] }
  0x23   : > { %2529 = vmatpush3.msra.mxu0 %v285_v18  ;;  %v714_v48 = vsel %vm522_vm6, 1, %v2619_v4  ;;  %v713_v49 = vsel %vm521_vm7, 1, %v2619_v4  ;;  %vm524_vm8 = vcmp.eq.s32.totalorder %v2718_v9, 6  ;;  %vm523_vm9 = vcmp.eq.s32.totalorder %v2702_v3, 6  ;;  %2556 = vmatprep.subr.mxu1 %v402_v63  ;;  %v397_v14 = vld [vmem:[%s4991_s3 + $0x50] sm:$0xff]  ;;  %v396_v16 = vld [vmem:[%s4991_s3 + $0x48] sm:$0xff] }
  0x24   : > { %2530 = vmatprep.subr.mxu0 %v284_v19  ;;  %v716_v50 = vsel %vm524_vm8, 1, %v2619_v4  ;;  %v715_v51 = vsel %vm523_vm9, 1, %v2619_v4  ;;  %vm526_vm10 = vcmp.eq.s32.totalorder %v2711_v6, 6  ;;  %vm525_vm11 = vcmp.eq.s32.totalorder %v2699_v2, 6  ;;  %2557 = vmatpush3.msra.mxu1 %v402_v63  ;;  %v395_v18 = vld [vmem:[%s4991_s3 + $0x40] sm:$0xff] }
  0x25   : > { %2531 = vmatpush3.msra.mxu0 %v284_v19  ;;  %905 = vperm.xlu1 %2605, %v698_v20   ;;  %v718_v52 = vsel %vm526_vm10, 1, %v2619_v4  ;;  %v717_v53 = vsel %vm525_vm11, 1, %v2619_v4  ;;  %vm528_vm12 = vcmp.eq.s32.totalorder %v2718_v9, 7  ;;  %vm527_vm13 = vcmp.eq.s32.totalorder %v2702_v3, 7  ;;  %v394_v20 = vld [vmem:[%s4991_s3 + $0x38] sm:$0xff] }
  0x26   : > { %902 = vperm.xlu0 %2604, %v697_v21   ;;  %2532 = vmatprep.subr.mxu0 %v283_v22  ;;  %v720_v54 = vsel %vm528_vm12, 1, %v2619_v4  ;;  %v719_v55 = vsel %vm527_vm13, 1, %v2619_v4  ;;  %vm530_vm14 = vcmp.eq.s32.totalorder %v2711_v6, 7  ;;  %vm529_vm15 = vcmp.eq.s32.totalorder %v2699_v2, 7 }
  0x27   : > { %2533 = vmatpush3.msra.mxu0 %v283_v22  ;;  %v722_v56 = vsel %vm530_vm14, 1, %v2619_v4  ;;  %v721_v57 = vsel %vm529_vm15, 1, %v2619_v4  ;;  %vm532_vm0 = vcmp.eq.s32.totalorder %v2718_v9, 8  ;;  %vm531_vm1 = vcmp.eq.s32.totalorder %v2702_v3, 8  ;;  %2558 = vmatprep.subr.mxu1 %v401_v1  ;;  %v393_v22 = vld [vmem:[%s4991_s3 + $0x30] sm:$0xff] }
  0x28   : > { %2534 = vmatprep.subr.mxu0 %v282_v23  ;;  %v724_v58 = vsel %vm532_vm0, 1, %v2619_v4  ;;  %v723_v59 = vsel %vm531_vm1, 1, %v2619_v4  ;;  %vm534_vm2 = vcmp.eq.s32.totalorder %v2711_v6, 8  ;;  %vm533_vm3 = vcmp.eq.s32.totalorder %v2699_v2, 8  ;;  %2559 = vmatpush3.msra.mxu1 %v401_v1 }
  0x29   : > { %2535 = vmatpush3.msra.mxu0 %v282_v23  ;;  %911 = vperm.xlu1 %2605, %v700_v24   ;;  %v726_v60 = vsel %vm534_vm2, 1, %v2619_v4  ;;  %v725_v61 = vsel %vm533_vm3, 1, %v2619_v4  ;;  %vm536_vm4 = vcmp.eq.s32.totalorder %v2718_v9, 9  ;;  %vm535_vm5 = vcmp.eq.s32.totalorder %v2702_v3, 9  ;;  %v392_v24 = vld [vmem:[%s4991_s3 + $0x28] sm:$0xff] }
  0x2a   : > { %908 = vperm.xlu0 %2604, %v699_v25   ;;  %2536 = vmatprep.subr.mxu0 %v281_v26  ;;  %v728_v62 = vsel %vm536_vm4, 1, %v2619_v4  ;;  %v727_v0 = vsel %vm535_vm5, 1, %v2619_v4  ;;  %vm538_vm6 = vcmp.eq.s32.totalorder %v2711_v6, 9  ;;  %vm537_vm7 = vcmp.eq.s32.totalorder %v2699_v2, 9 }
  0x2b   : > { %2537 = vmatpush3.msra.mxu0 %v281_v26  ;;  %v730_v5 = vsel %vm538_vm6, 1, %v2619_v4  ;;  %v729_v8 = vsel %vm537_vm7, 1, %v2619_v4  ;;  %vm540_vm8 = vcmp.eq.s32.totalorder %v2718_v9, 10  ;;  %vm539_vm9 = vcmp.eq.s32.totalorder %v2702_v3, 10  ;;  %2560 = vmatprep.subr.mxu1 %v400_v7  ;;  %v391_v26 = vld [vmem:[%s4991_s3 + $0x20] sm:$0xff] }
  0x2c   : > { %2538 = vmatprep.subr.mxu0 %v280_v27  ;;  %2561 = vmatpush3.msra.mxu1 %v400_v7  ;;  %v732_v11 = vsel %vm540_vm8, 1, %v2619_v4  ;;  %v731_v13 = vsel %vm539_vm9, 1, %v2619_v4  ;;  %vm542_vm10 = vcmp.eq.s32.totalorder %v2711_v6, 10  ;;  %vm541_vm11 = vcmp.eq.s32.totalorder %v2699_v2, 10 }
  0x2d   : > { %2539 = vmatpush3.msra.mxu0 %v280_v27  ;;  %917 = vperm.xlu1 %2605, %v702_v28   ;;  %v734_v15 = vsel %vm542_vm10, 1, %v2619_v4  ;;  %v733_v17 = vsel %vm541_vm11, 1, %v2619_v4  ;;  %vm544_vm12 = vcmp.eq.s32.totalorder %v2718_v9, 11  ;;  %vm543_vm13 = vcmp.eq.s32.totalorder %v2702_v3, 11 }
  0x2e   : > { %914 = vperm.xlu0 %2604, %v701_v29   ;;  %2540 = vmatprep.subr.mxu0 %v279_v30  ;;  %v736_v19 = vsel %vm544_vm12, 1, %v2619_v4  ;;  %v735_v21 = vsel %vm543_vm13, 1, %v2619_v4  ;;  %vm546_vm14 = vcmp.eq.s32.totalorder %v2711_v6, 11  ;;  %vm545_vm15 = vcmp.eq.s32.totalorder %v2699_v2, 11  ;;  %v390_v29 = vld [vmem:[%s4991_s3 + $0x18] sm:$0xff] }
  0x2f   : > { %2541 = vmatpush3.msra.mxu0 %v279_v30  ;;  %2562 = vmatprep.subr.mxu1 %v399_v10  ;;  %v738_v23 = vsel %vm546_vm14, 1, %v2619_v4  ;;  %v737_v25 = vsel %vm545_vm15, 1, %v2619_v4  ;;  %vm548_vm0 = vcmp.eq.s32.totalorder %v2718_v9, 12  ;;  %vm547_vm1 = vcmp.eq.s32.totalorder %v2702_v3, 12  ;;  %v389_v30 = vld [vmem:[%s4991_s3 + $0x10] sm:$0xff] }
  0x30   : > { %2542 = vmatprep.subr.mxu0 %v278_v31  ;;  %2563 = vmatpush3.msra.mxu1 %v399_v10  ;;  %v740_v27 = vsel %vm548_vm0, 1, %v2619_v4  ;;  %v739_v28 = vsel %vm547_vm1, 1, %v2619_v4  ;;  %vm550_vm2 = vcmp.eq.s32.totalorder %v2711_v6, 12  ;;  %vm549_vm3 = vcmp.eq.s32.totalorder %v2699_v2, 12 }
  0x31   : > { %2543 = vmatpush3.msra.mxu0 %v278_v31  ;;  %923 = vperm.xlu1 %2605, %v704_v32   ;;  %v742_v31 = vsel %vm550_vm2, 1, %v2619_v4  ;;  %v741_v32 = vsel %vm549_vm3, 1, %v2619_v4  ;;  %vm552_vm4 = vcmp.eq.s32.totalorder %v2718_v9, 13  ;;  %vm551_vm5 = vcmp.eq.s32.totalorder %v2702_v3, 13 }
  0x32   : > { %920 = vperm.xlu0 %2604, %v703_v33   ;;  %2544 = vmatprep.subr.mxu0 %v277_v34  ;;  %v388_v33 = vld [vmem:[%s4991_s3 + $0x8] sm:$0xff]  ;;  %vm554_vm6 = vcmp.eq.s32.totalorder %v2711_v6, 13  ;;  %vm553_vm7 = vcmp.eq.s32.totalorder %v2699_v2, 13  ;;  %vm556_vm8 = vcmp.eq.s32.totalorder %v2718_v9, 14  ;;  %vm555_vm9 = vcmp.eq.s32.totalorder %v2702_v3, 14 }
  0x33   : > { %2545 = vmatpush3.msra.mxu0 %v277_v34  ;;  %2564 = vmatprep.subr.mxu1 %v398_v12  ;;  %v387_v34 = vld [vmem:[%s4991_s3] sm:$0xff]  ;;  %vm558_vm10 = vcmp.eq.s32.totalorder %v2711_v6, 14  ;;  %vm557_vm11 = vcmp.eq.s32.totalorder %v2699_v2, 14  ;;  %vm560_vm12 = vcmp.eq.s32.totalorder %v2718_v9, 15  ;;  %vm559_vm13 = vcmp.eq.s32.totalorder %v2702_v3, 15 }
  0x34   : > { %2546 = vmatprep.subr.mxu0 %v276_v35  ;;  %2565 = vmatpush3.msra.mxu1 %v398_v12  ;;  %vm562_vm14 = vcmp.eq.s32.totalorder %v2711_v6, 15  ;;  %vm561_vm15 = vcmp.eq.s32.totalorder %v2699_v2, 15  ;;  %vm564_vm0 = vcmp.eq.s32.totalorder %v2718_v9, 16  ;;  %vm563_vm1 = vcmp.eq.s32.totalorder %v2702_v3, 16 }
  0x35   : > { %2547 = vmatpush3.msra.mxu0 %v276_v35  ;;  %929 = vperm.xlu1 %2605, %v706_v36   ;;  %v744_v35 = vsel %vm552_vm4, 1, %v2619_v4  ;;  %v743_v36 = vsel %vm551_vm5, 1, %v2619_v4  ;;  %vm566_vm2 = vcmp.eq.s32.totalorder %v2711_v6, 16  ;;  %vm565_vm3 = vcmp.eq.s32.totalorder %v2699_v2, 16 }
  0x36   : > { %926 = vperm.xlu0 %2604, %v705_v37   ;;  %2548 = vmatprep.subr.mxu0 %v275_v38  ;;  %v746_v37 = vsel %vm554_vm6, 1, %v2619_v4  ;;  %vm568_vm4 = vcmp.eq.s32.totalorder %v2718_v9, 17  ;;  %vm567_vm5 = vcmp.eq.s32.totalorder %v2702_v3, 17  ;;  %vm570_vm6 = vcmp.eq.s32.totalorder %v2711_v6, 17 }
  0x37   : > { %2549 = vmatpush3.msra.mxu0 %v275_v38  ;;  %2566 = vmatprep.subr.mxu1 %v397_v14  ;;  %v745_v38 = vsel %vm553_vm7, 1, %v2619_v4  ;;  %vm569_vm7 = vcmp.eq.s32.totalorder %v2699_v2, 17 }
  0x38   : > { %2551 = vmatmul.mubr.f32.vlgmr.msra.gmra.mxu0 %v272_v39  ;;  %2567 = vmatpush3.msra.mxu1 %v397_v14  ;;  %v748_v39 = vsel %vm556_vm8, 1, %v2619_v4  ;;  %vm572_vm8 = vcmp.eq.s32.totalorder %v2718_v9, 18 }
  0x39   : > { %935 = vperm.xlu1 %2605, %v708_v40   ;;  %2553 = vmatprep.mubr.f32.mxu0 %v273_v41  ;;  %v747_v40 = vsel %vm555_vm9, 1, %v2619_v4  ;;  %v750_v41 = vsel %vm558_vm10, 1, %v2619_v4  ;;  %vm571_vm9 = vcmp.eq.s32.totalorder %v2702_v3, 18  ;;  %v764_v1 = vsel %vm572_vm8, 1, %v2619_v4 }
  0x3a   : > { %932 = vperm.xlu0 %2604, %v707_v42   ;;  %2568 = vmatprep.subr.mxu1 %v396_v16  ;;  %v749_v42 = vsel %vm557_vm11, 1, %v2619_v4  ;;  %vm574_vm10 = vcmp.eq.s32.totalorder %v2711_v6, 18  ;;  %vm573_vm11 = vcmp.eq.s32.totalorder %v2699_v2, 18  ;;  %vm588_vm8 = vcmp.eq.s32.totalorder %v2718_v9, 22 }
  0x3b   : > { %2569 = vmatpush3.msra.mxu1 %v396_v16  ;;  %v766_v10 = vsel %vm574_vm10, 1, %v2619_v4  ;;  %vm590_vm10 = vcmp.eq.s32.totalorder %v2711_v6, 22 }
  0x3c   : > { %2554 = vmatmul.mubr.f32.gmra.mxu0 %v274_v43  ;;  %2570 = vmatprep.subr.mxu1 %v395_v18  ;;  %v752_v43 = vsel %vm560_vm12, 1, %v2619_v4  ;;  %vm576_vm12 = vcmp.eq.s32.totalorder %v2718_v9, 19 }
  0x3d   : > { %941 = vperm.xlu1 %2605, %v710_v44   ;;  %2571 = vmatpush3.msra.mxu1 %v395_v18  ;;  %v751_v44 = vsel %vm559_vm13, 1, %v2619_v4  ;;  %vm575_vm13 = vcmp.eq.s32.totalorder %v2702_v3, 19  ;;  %v768_v14 = vsel %vm576_vm12, 1, %v2619_v4  ;;  %vm592_vm12 = vcmp.eq.s32.totalorder %v2718_v9, 23 }
  0x3e   : > { %938 = vperm.xlu0 %2604, %v709_v45   ;;  %2572 = vmatprep.subr.mxu1 %v394_v20  ;;  %v754_v45 = vsel %vm562_vm14, 1, %v2619_v4  ;;  %vm578_vm14 = vcmp.eq.s32.totalorder %v2711_v6, 19 }
  0x3f   : > { %2573 = vmatpush3.msra.mxu1 %v394_v20  ;;  %v770_v18 = vsel %vm578_vm14, 1, %v2619_v4  ;;  %vm594_vm14 = vcmp.eq.s32.totalorder %v2711_v6, 23 }
  0x40   : > { %2574 = vmatprep.subr.mxu1 %v393_v22 }
  0x41   : > { %947 = vperm.xlu1 %2605, %v712_v46   ;;  %2575 = vmatpush3.msra.mxu1 %v393_v22  ;;  %v753_v46 = vsel %vm561_vm15, 1, %v2619_v4  ;;  %vm577_vm15 = vcmp.eq.s32.totalorder %v2699_v2, 19 }
  0x42   : > { %944 = vperm.xlu0 %2604, %v711_v47   ;;  %2576 = vmatprep.subr.mxu1 %v392_v24 }
  0x43   : > { %2577 = vmatpush3.msra.mxu1 %v392_v24 }
  0x44   : > { %2578 = vmatprep.subr.mxu1 %v391_v26 }
  0x45   : > { %953 = vperm.xlu1 %2605, %v714_v48   ;;  %2579 = vmatpush3.msra.mxu1 %v391_v26 }
  0x46   : > { %950 = vperm.xlu0 %2604, %v713_v49   ;;  %2580 = vmatprep.subr.mxu1 %v390_v29  ;;  %v756_v49 = vsel %vm564_vm0, 1, %v2619_v4  ;;  %vm580_vm0 = vcmp.eq.s32.totalorder %v2718_v9, 20 }
  0x47   : > { %2581 = vmatpush3.msra.mxu1 %v390_v29  ;;  %v772_v22 = vsel %vm580_vm0, 1, %v2619_v4  ;;  %vm596_vm0 = vcmp.eq.s32.totalorder %v2718_v9, 24 }
  0x48   : > { %2582 = vmatprep.subr.mxu1 %v389_v30 }
  0x49   : > { %959 = vperm.xlu1 %2605, %v716_v50   ;;  %2583 = vmatpush3.msra.mxu1 %v389_v30  ;;  %v755_v50 = vsel %vm563_vm1, 1, %v2619_v4  ;;  %vm579_vm1 = vcmp.eq.s32.totalorder %v2702_v3, 20 }
  0x4a   : > { %956 = vperm.xlu0 %2604, %v715_v51   ;;  %2584 = vmatprep.subr.mxu1 %v388_v33 }
  0x4b   : > { %2585 = vmatpush3.msra.mxu1 %v388_v33 }
  0x4c   : > { %2586 = vmatprep.subr.mxu1 %v387_v34 }
  0x4d   : > { %965 = vperm.xlu1 %2605, %v718_v52   ;;  %2587 = vmatpush3.msra.mxu1 %v387_v34 }
  0x4e   : > { %962 = vperm.xlu0 %2604, %v717_v53   ;;  %v758_v53 = vsel %vm566_vm2, 1, %v2619_v4  ;;  %vm582_vm2 = vcmp.eq.s32.totalorder %v2711_v6, 20 }
  0x4f   : > { %v774_v26 = vsel %vm582_vm2, 1, %v2619_v4  ;;  %vm598_vm2 = vcmp.eq.s32.totalorder %v2711_v6, 24 }
  0x51   : > { %971 = vperm.xlu1 %2605, %v720_v54   ;;  %v757_v54 = vsel %vm565_vm3, 1, %v2619_v4  ;;  %vm581_vm3 = vcmp.eq.s32.totalorder %v2699_v2, 20 }
  0x52   : > { %968 = vperm.xlu0 %2604, %v719_v55  }
  0x55   : > { %977 = vperm.xlu1 %2605, %v722_v56  }
  0x56   : > { %974 = vperm.xlu0 %2604, %v721_v57   ;;  %v760_v57 = vsel %vm568_vm4, 1, %v2619_v4  ;;  %vm584_vm4 = vcmp.eq.s32.totalorder %v2718_v9, 21 }
  0x57   : > { %v776_v30 = vsel %vm584_vm4, 1, %v2619_v4  ;;  %vm600_vm4 = vcmp.eq.s32.totalorder %v2718_v9, 25 }
  0x59   : > { %983 = vperm.xlu1 %2605, %v724_v58   ;;  %v759_v58 = vsel %vm567_vm5, 1, %v2619_v4  ;;  %vm583_vm5 = vcmp.eq.s32.totalorder %v2702_v3, 21 }
  0x5a   : > { %980 = vperm.xlu0 %2604, %v723_v59  }
  0x5d   : > { %989 = vperm.xlu1 %2605, %v726_v60  }
  0x5e   : > { %986 = vperm.xlu0 %2604, %v725_v61   ;;  %v762_v61 = vsel %vm570_vm6, 1, %v2619_v4  ;;  %vm586_vm6 = vcmp.eq.s32.totalorder %v2711_v6, 21 }
  0x5f   : > { %v778_v34 = vsel %vm586_vm6, 1, %v2619_v4  ;;  %vm602_vm6 = vcmp.eq.s32.totalorder %v2711_v6, 25 }
  0x61   : > { %995 = vperm.xlu1 %2605, %v728_v62   ;;  %v761_v62 = vsel %vm569_vm7, 1, %v2619_v4  ;;  %vm585_vm7 = vcmp.eq.s32.totalorder %v2699_v2, 21 }
  0x62   : > { %992 = vperm.xlu0 %2604, %v727_v0  }
  0x65   : > { %1001 = vperm.xlu1 %2605, %v730_v5   ;;  %v763_v5 = vsel %vm571_vm9, 1, %v2619_v4  ;;  %vm587_vm9 = vcmp.eq.s32.totalorder %v2702_v3, 22 }
  0x66   : > { %998 = vperm.xlu0 %2604, %v729_v8  }
  0x69   : > { %1007 = vperm.xlu1 %2605, %v732_v11   ;;  %v765_v11 = vsel %vm573_vm11, 1, %v2619_v4  ;;  %vm589_vm11 = vcmp.eq.s32.totalorder %v2699_v2, 22 }
  0x6a   : > { %1004 = vperm.xlu0 %2604, %v731_v13  }
  0x6d   : > { %1013 = vperm.xlu1 %2605, %v734_v15   ;;  %v767_v15 = vsel %vm575_vm13, 1, %v2619_v4  ;;  %vm591_vm13 = vcmp.eq.s32.totalorder %v2702_v3, 23 }
  0x6e   : > { %1010 = vperm.xlu0 %2604, %v733_v17  }
  0x71   : > { %1019 = vperm.xlu1 %2605, %v736_v19   ;;  %v769_v19 = vsel %vm577_vm15, 1, %v2619_v4  ;;  %vm593_vm15 = vcmp.eq.s32.totalorder %v2699_v2, 23 }
  0x72   : > { %1016 = vperm.xlu0 %2604, %v735_v21  }
  0x75   : > { %1025 = vperm.xlu1 %2605, %v738_v23   ;;  %v771_v23 = vsel %vm579_vm1, 1, %v2619_v4  ;;  %vm595_vm1 = vcmp.eq.s32.totalorder %v2702_v3, 24 }
  0x76   : > { %1022 = vperm.xlu0 %2604, %v737_v25  }
  0x79   : > { %1031 = vperm.xlu1 %2605, %v740_v27   ;;  %v773_v27 = vsel %vm581_vm3, 1, %v2619_v4  ;;  %vm597_vm3 = vcmp.eq.s32.totalorder %v2699_v2, 24 }
  0x7a   : > { %1028 = vperm.xlu0 %2604, %v739_v28  }
  0x7d   : > { %1037 = vperm.xlu1 %2605, %v742_v31   ;;  %v775_v31 = vsel %vm583_vm5, 1, %v2619_v4  ;;  %vm599_vm5 = vcmp.eq.s32.totalorder %v2702_v3, 25 }
  0x7e   : > { %1034 = vperm.xlu0 %2604, %v741_v32  }
  0x81   : > { %1043 = vperm.xlu1 %2605, %v744_v35   ;;  %v777_v35 = vsel %vm585_vm7, 1, %v2619_v4  ;;  %vm601_vm7 = vcmp.eq.s32.totalorder %v2699_v2, 25 }
  0x82   : > { %1040 = vperm.xlu0 %2604, %v743_v36  }
  0x85   : > { %1049 = vperm.xlu1 %2605, %v746_v37  }
  0x86   : > { %1046 = vperm.xlu0 %2604, %v745_v38   ;;  %v780_v38 = vsel %vm588_vm8, 1, %v2619_v4  ;;  %vm604_vm8 = vcmp.eq.s32.totalorder %v2718_v9, 26 }
  0x89   : > { %1055 = vperm.xlu1 %2605, %v748_v39   ;;  %v779_v39 = vsel %vm587_vm9, 1, %v2619_v4  ;;  %vm603_vm9 = vcmp.eq.s32.totalorder %v2702_v3, 26 }
  0x8a   : > { %1052 = vperm.xlu0 %2604, %v747_v40  }
  0x8d   : > { %1061 = vperm.xlu1 %2605, %v750_v41  }
  0x8e   : > { %1058 = vperm.xlu0 %2604, %v749_v42   ;;  %v782_v42 = vsel %vm590_vm10, 1, %v2619_v4  ;;  %vm606_vm10 = vcmp.eq.s32.totalorder %v2711_v6, 26 }
  0x91   : > { %1067 = vperm.xlu1 %2605, %v752_v43   ;;  %v781_v43 = vsel %vm589_vm11, 1, %v2619_v4  ;;  %vm605_vm11 = vcmp.eq.s32.totalorder %v2699_v2, 26 }
  0x92   : > { %1064 = vperm.xlu0 %2604, %v751_v44  }
  0x94   : > { %v2938_v47 = vpop.permute.xlu1 %890  ;;  %v2940_v48 = vpop.permute.xlu0 %884 }
  0x95   : > { %1073 = vperm.xlu1 %2605, %v754_v45  }
  0x96   : > { %1070 = vperm.xlu0 %2604, %v753_v46   ;;  %v784_v46 = vsel %vm592_vm12, 1, %v2619_v4  ;;  %vm608_vm12 = vcmp.eq.s32.totalorder %v2718_v9, 27 }
  0x98   : > { %v2946_v51 = vpop.permute.xlu1 %893 }
  0x99   : > { %v2949_v52 = vpop.permute.xlu0 %887  ;;  %1079 = vperm.xlu1 %2605, %v756_v49   ;;  %v783_v49 = vsel %vm591_vm13, 1, %v2619_v4  ;;  %vm607_vm13 = vcmp.eq.s32.totalorder %v2702_v3, 27 }
  0x9a   : > { %1076 = vperm.xlu0 %2604, %v755_v50  }
  0x9c   : > { %v2954_v55 = vpop.permute.xlu1 %899 }
  0x9d   : > { %v2957_v56 = vpop.permute.xlu0 %896  ;;  %1085 = vperm.xlu1 %2605, %v758_v53  }
  0x9e   : > { %1082 = vperm.xlu0 %2604, %v757_v54   ;;  %v786_v54 = vsel %vm594_vm14, 1, %v2619_v4  ;;  %vm610_vm14 = vcmp.eq.s32.totalorder %v2711_v6, 27 }
  0xa0   : > { %v2962_v59 = vpop.permute.xlu1 %905 }
  0xa1   : > { %v2965_v60 = vpop.permute.xlu0 %902  ;;  %1091 = vperm.xlu1 %2605, %v760_v57   ;;  %v785_v57 = vsel %vm593_vm15, 1, %v2619_v4  ;;  %vm609_vm15 = vcmp.eq.s32.totalorder %v2699_v2, 27 }
  0xa2   : > { %1088 = vperm.xlu0 %2604, %v759_v58  }
  0xa4   : > { %v2970_v63 = vpop.permute.xlu1 %911 }
  0xa5   : > { %v2973_v0 = vpop.permute.xlu0 %908  ;;  %1097 = vperm.xlu1 %2605, %v762_v61  }
  0xa6   : > { %1094 = vperm.xlu0 %2604, %v761_v62   ;;  %v788_v62 = vsel %vm596_vm0, 1, %v2619_v4  ;;  %vm612_vm0 = vcmp.eq.s32.totalorder %v2718_v9, 28 }
  0xa8   : > { %v2978_v7 = vpop.permute.xlu1 %917 }
  0xa9   : > { %v2981_v8 = vpop.permute.xlu0 %914  ;;  %1103 = vperm.xlu1 %2605, %v764_v1   ;;  %v787_v1 = vsel %vm595_vm1, 1, %v2619_v4  ;;  %vm611_vm1 = vcmp.eq.s32.totalorder %v2702_v3, 28 }
  0xaa   : > { %1100 = vperm.xlu0 %2604, %v763_v5  }
  0xac   : > { %v2986_v12 = vpop.permute.xlu1 %923 }
  0xad   : > { %v2989_v13 = vpop.permute.xlu0 %920  ;;  %1109 = vperm.xlu1 %2605, %v766_v10  }
  0xae   : > { %1106 = vperm.xlu0 %2604, %v765_v11   ;;  %v790_v11 = vsel %vm598_vm2, 1, %v2619_v4  ;;  %vm614_vm2 = vcmp.eq.s32.totalorder %v2711_v6, 28 }
  0xb0   : > { %v2994_v16 = vpop.permute.xlu1 %929 }
  0xb1   : > { %v2997_v17 = vpop.permute.xlu0 %926  ;;  %1115 = vperm.xlu1 %2605, %v768_v14   ;;  %v789_v14 = vsel %vm597_vm3, 1, %v2619_v4  ;;  %vm613_vm3 = vcmp.eq.s32.totalorder %v2699_v2, 28 }
  0xb2   : > { %1112 = vperm.xlu0 %2604, %v767_v15  }
  0xb4   : > { %v3002_v20 = vpop.permute.xlu1 %935 }
  0xb5   : > { %v3005_v21 = vpop.permute.xlu0 %932  ;;  %1121 = vperm.xlu1 %2605, %v770_v18  }
  0xb6   : > { %1118 = vperm.xlu0 %2604, %v769_v19   ;;  %v792_v19 = vsel %vm600_vm4, 1, %v2619_v4  ;;  %vm616_vm4 = vcmp.eq.s32.totalorder %v2718_v9, 29 }
  0xb8   : > { %v3010_v24 = vpop.permute.xlu1 %941 }
  0xb9   : > { %v3013_v25 = vpop.permute.xlu0 %938  ;;  %1127 = vperm.xlu1 %2605, %v772_v22   ;;  %v791_v22 = vsel %vm599_vm5, 1, %v2619_v4 }
  0xba   : > { %1124 = vperm.xlu0 %2604, %v771_v23  }
  0xbc   : > { %v3018_v28 = vpop.permute.xlu1 %947 }
  0xbd   : > { %v3021_v29 = vpop.permute.xlu0 %944  ;;  %1133 = vperm.xlu1 %2605, %v774_v26  }
  0xbe   : > { %1130 = vperm.xlu0 %2604, %v773_v27   ;;  %v794_v27 = vsel %vm602_vm6, 1, %v2619_v4 }
  0xc0   : > { %v3026_v32 = vpop.permute.xlu1 %953 }
  0xc1   : > { %v3029_v33 = vpop.permute.xlu0 %950  ;;  %1139 = vperm.xlu1 %2605, %v776_v30   ;;  %v793_v30 = vsel %vm601_vm7, 1, %v2619_v4 }
  0xc2   : > { %1136 = vperm.xlu0 %2604, %v775_v31  }
  0xc4   : > { %v3034_v36 = vpop.permute.xlu1 %959 }
  0xc5   : > { %v3037_v37 = vpop.permute.xlu0 %956  ;;  %1145 = vperm.xlu1 %2605, %v778_v34  }
  0xc6   : > { %1142 = vperm.xlu0 %2604, %v777_v35   ;;  %v796_v35 = vsel %vm604_vm8, 1, %v2619_v4 }
  0xc8   : > { %v3042_v40 = vpop.permute.xlu1 %965 }
  0xc9   : > { %v3045_v41 = vpop.permute.xlu0 %962  ;;  %1151 = vperm.xlu1 %2605, %v780_v38   ;;  %v795_v38 = vsel %vm603_vm9, 1, %v2619_v4 }
  0xca   : > { %1148 = vperm.xlu0 %2604, %v779_v39  }
  0xcc   : > { %v3050_v44 = vpop.permute.xlu1 %971 }
  0xcd   : > { %5115 = vst [vmem:[#allocation2_spill] sm:$0xff] %v3050_v44  ;;  %v3053_v45 = vpop.permute.xlu0 %968  ;;  %1157 = vperm.xlu1 %2605, %v782_v42   ;;  %v3152_v44 = vld [vmem:[%s2674_s30] sm:$0xff] }
  0xce   : > { %5116 = vst [vmem:[#allocation3_spill] sm:$0xff] %v3053_v45  ;;  %1154 = vperm.xlu0 %2604, %v781_v43   ;;  %v798_v43 = vsel %vm606_vm10, 1, %v2619_v4  ;;  %vm615_vm5 = vcmp.eq.s32.totalorder %v3152_v44, 29  ;;  %vm619_vm9 = vcmp.eq.s32.totalorder %v3152_v44, 30 }
  0xd0   : > { %v3058_v50 = vpop.permute.xlu1 %977 }
  0xd1   : > { %5117 = vst [vmem:[#allocation4_spill] sm:$0xff] %v3058_v50  ;;  %v3061_v53 = vpop.permute.xlu0 %974  ;;  %1163 = vperm.xlu1 %2605, %v784_v46   ;;  %v797_v46 = vsel %vm605_vm11, 1, %v2619_v4 }
  0xd2   : > { %5118 = vst [vmem:[#allocation5_spill] sm:$0xff] %v3061_v53  ;;  %1160 = vperm.xlu0 %2604, %v783_v49  }
  0xd4   : > { %v3066_v58 = vpop.permute.xlu1 %983 }
  0xd5   : > { %v3069_v61 = vpop.permute.xlu0 %980  ;;  %1169 = vperm.xlu1 %2605, %v786_v54  }
  0xd6   : > { %1166 = vperm.xlu0 %2604, %v785_v57   ;;  %v800_v57 = vsel %vm608_vm12, 1, %v2619_v4 }
  0xd8   : > { %v3074_v5 = vpop.permute.xlu1 %989 }
  0xd9   : > { %v3077_v10 = vpop.permute.xlu0 %986  ;;  %1175 = vperm.xlu1 %2605, %v788_v62   ;;  %v799_v62 = vsel %vm607_vm13, 1, %v2619_v4  ;;  %vm623_vm13 = vcmp.eq.s32.totalorder %v3152_v44, 31 }
  0xda   : > { %1172 = vperm.xlu0 %2604, %v787_v1  }
  0xdc   : > { %v3082_v15 = vpop.permute.xlu1 %995 }
  0xdd   : > { %v3085_v18 = vpop.permute.xlu0 %992  ;;  %1181 = vperm.xlu1 %2605, %v790_v11  }
  0xde   : > { %1178 = vperm.xlu0 %2604, %v789_v14   ;;  %v802_v14 = vsel %vm610_vm14, 1, %v2619_v4 }
  0xe0   : > { %v3090_v23 = vpop.permute.xlu1 %1001 }
  0xe1   : > { %v3093_v26 = vpop.permute.xlu0 %998  ;;  %1187 = vperm.xlu1 %2605, %v792_v19   ;;  %v801_v19 = vsel %vm609_vm15, 1, %v2619_v4 }
  0xe2   : > { %1184 = vperm.xlu0 %2604, %v791_v22  }
  0xe4   : > { %v3098_v31 = vpop.permute.xlu1 %1007 }
  0xe5   : > { %v3101_v34 = vpop.permute.xlu0 %1004  ;;  %1193 = vperm.xlu1 %2605, %v794_v27  }
  0xe6   : > { %1190 = vperm.xlu0 %2604, %v793_v30   ;;  %v2473_v30 = vld [vmem:[%s4990_s2] ss:$0 sm:$0xff] }
  0xe8   : > { %v3106_v39 = vpop.permute.xlu1 %1013 }
  0xe9   : > { %v3109_v42 = vpop.permute.xlu0 %1010  ;;  %1199 = vperm.xlu1 %2605, %v796_v35   ;;  %v804_v35 = vsel %vm612_vm0, 1, %v2619_v4 }
  0xea   : > { %1196 = vperm.xlu0 %2604, %v795_v38   ;;  %v803_v38 = vsel %vm611_vm1, 1, %v2619_v4  ;;  %vm627_vm1 = vcmp.eq.s32.totalorder %v3152_v44, 32 }
  0xec   : > { %v3114_v49 = vpop.permute.xlu1 %1019 }
  0xed   : > { %v3117_v54 = vpop.permute.xlu0 %1016  ;;  %1205 = vperm.xlu1 %2605, %v798_v43  }
  0xee   : > { %1202 = vperm.xlu0 %2604, %v797_v46  }
  0xf0   : > { %v3122_v1 = vpop.permute.xlu1 %1025 }
  0xf1   : > { %v3125_v11 = vpop.permute.xlu0 %1022  ;;  %1211 = vperm.xlu1 %2605, %v800_v57  }
  0xf2   : > { %1208 = vperm.xlu0 %2604, %v799_v62  }
  0xf4   : > { %v3130_v22 = vpop.permute.xlu1 %1031 }
  0xf5   : > { %v3133_v27 = vpop.permute.xlu0 %1028  ;;  %1217 = vperm.xlu1 %2605, %v802_v14   ;;  %v806_v14 = vsel %vm614_vm2, 1, %v2619_v4 }
  0xf6   : > { %1214 = vperm.xlu0 %2604, %v801_v19   ;;  %v805_v19 = vsel %vm613_vm3, 1, %v2619_v4 }
  0xf8   : > { %v2552_v43 = vpop.f32.mrf.mxu0  ;;  %v3141_v46 = vpop.permute.xlu1 %1037 }
  0xf9   : > { %v370_v3 = vadd.f32 %v2552_v43, %v2473_v30  ;;  %v3144_v57 = vpop.permute.xlu0 %1034  ;;  %1223 = vperm.xlu1 %2605, %v804_v35  }
  0xfa   : > { %5119 = vst [vmem:[#allocation6_spill] sm:$0xff] %v3144_v57  ;;  %1220 = vperm.xlu0 %2604, %v803_v38   ;;  %v364_v62 = vpop.f32.mrf.mxu0 }
  0xfb   : > { %v365_v50 = vadd.f32 %v2473_v30, %v364_v62  ;;  %v384_v6 = vmax.f32 %v370_v3, 0.0  ;;  %v808_v62 = vsel %vm616_vm4, 1, %v2619_v4  ;;  %v807_v3 = vsel %vm615_vm5, 1, %v2619_v4 }
  0xfc   : > { %v2555_v53 = vpop.f32.mrf.mxu0  ;;  %v3149_v45 = vpop.permute.xlu1 %1043  ;;  %vm631_vm5 = vcmp.eq.s32.totalorder %v3152_v44, 33 }
  0xfd   : > { %5120 = vst [vmem:[#allocation7_spill] sm:$0xff] %v3149_v45  ;;  %v380_v2 = vadd.f32 %v2555_v53, %v2473_v30  ;;  %v3155_v35 = vpop.permute.xlu0 %1040  ;;  %1229 = vperm.xlu1 %2605, %v806_v14   ;;  %v383_v38 = vmax.f32 %v365_v50, 0.0  ;;  %v3160_v45 = vld [vmem:[%s2674_s30 + $0x18] sm:$0xff] }
  0xfe   : > { %5121 = vst [vmem:[#allocation8_spill] sm:$0xff] %v3155_v35  ;;  %1226 = vperm.xlu0 %2604, %v805_v19   ;;  %v374_v43 = vpop.f32.mrf.mxu0  ;;  %vm618_vm6 = vcmp.eq.s32.totalorder %v3160_v45, 29  ;;  %v3166_v35 = vld [vmem:[%s2674_s30 + $0x10] sm:$0xff]  ;;  %vm622_vm10 = vcmp.eq.s32.totalorder %v3160_v45, 30  ;;  %vm626_vm14 = vcmp.eq.s32.totalorder %v3160_v45, 31  ;;  %vm630_vm2 = vcmp.eq.s32.totalorder %v3160_v45, 32 }
  0xff   : > { %v375_v9 = vadd.f32 %v2473_v30, %v374_v43  ;;  %2588 = vmatprep.mubr.f32.mxu1 %v383_v38  ;;  %v386_v57 = vmax.f32 %v380_v2, 0.0  ;;  %vm617_vm7 = vcmp.eq.s32.totalorder %v3166_v35, 29  ;;  %v810_v30 = vsel %vm618_vm6, 1, %v2619_v4  ;;  %v3174_v38 = vld [vmem:[%s2674_s30 + $0x8] sm:$0xff] }
 0x100   : > { %2589 = vmatmul.mubr.f32.vlgmr.msra.gmra.mxu1 %v384_v6  ;;  %v3163_v53 = vpop.permute.xlu1 %1049  ;;  %v809_v19 = vsel %vm617_vm7, 1, %v2619_v4  ;;  %vm620_vm8 = vcmp.eq.s32.totalorder %v3174_v38, 30  ;;  %vm621_vm11 = vcmp.eq.s32.totalorder %v3166_v35, 30  ;;  %vm624_vm12 = vcmp.eq.s32.totalorder %v3174_v38, 31 }
 0x101   : > { %v385_v50 = vmax.f32 %v375_v9, 0.0  ;;  %v3169_v14 = vpop.permute.xlu0 %1046  ;;  %1235 = vperm.xlu1 %2605, %v808_v62   ;;  %v812_v43 = vsel %vm620_vm8, 1, %v2619_v4  ;;  %v811_v62 = vsel %vm619_vm9, 1, %v2619_v4  ;;  %vm625_vm15 = vcmp.eq.s32.totalorder %v3166_v35, 31 }
 0x102   : > { %1232 = vperm.xlu0 %2604, %v807_v3   ;;  %vm628_vm0 = vcmp.eq.s32.totalorder %v3174_v38, 32  ;;  %vm629_vm3 = vcmp.eq.s32.totalorder %v3166_v35, 32  ;;  %vm632_vm4 = vcmp.eq.s32.totalorder %v3174_v38, 33  ;;  %vm634_vm6 = vcmp.eq.s32.totalorder %v3160_v45, 33 }
 0x103   : > { %2591 = vmatprep.mubr.f32.mxu1 %v385_v50  ;;  %v813_v50 = vsel %vm621_vm11, 1, %v2619_v4  ;;  %vm633_vm7 = vcmp.eq.s32.totalorder %v3166_v35, 33  ;;  %vm636_vm8 = vcmp.eq.s32.totalorder %v3174_v38, 34  ;;  %vm635_vm9 = vcmp.eq.s32.totalorder %v3152_v44, 34 }
 0x104   : > { %2592 = vmatmul.mubr.f32.gmra.mxu1 %v386_v57  ;;  %v3177_v6 = vpop.permute.xlu1 %1055  ;;  %v814_v57 = vsel %vm622_vm10, 1, %v2619_v4  ;;  %vm638_vm10 = vcmp.eq.s32.totalorder %v3160_v45, 34  ;;  %vm637_vm11 = vcmp.eq.s32.totalorder %v3166_v35, 34 }
 0x105   : > { %v3180_v2 = vpop.permute.xlu0 %1052  ;;  %1241 = vperm.xlu1 %2605, %v810_v30  }
 0x106   : > { %1238 = vperm.xlu0 %2604, %v809_v19  }
 0x108   : > { %v3185_v9 = vpop.permute.xlu1 %1061 }
 0x109   : > { %5122 = vst [vmem:[#allocation9_spill] sm:$0xff] %v3185_v9  ;;  %v3188_v3 = vpop.permute.xlu0 %1058  ;;  %1247 = vperm.xlu1 %2605, %v812_v43   ;;  %v816_v9 = vsel %vm624_vm12, 1, %v2619_v4  ;;  %vm640_vm12 = vcmp.eq.s32.totalorder %v3174_v38, 35 }
 0x10a   : > { %5123 = vst [vmem:[#allocation10_spill] sm:$0xff] %v3188_v3  ;;  %1244 = vperm.xlu0 %2604, %v811_v62   ;;  %v815_v3 = vsel %vm623_vm13, 1, %v2619_v4  ;;  %vm639_vm13 = vcmp.eq.s32.totalorder %v3152_v44, 35 }
 0x10c   : > { %v3193_v30 = vpop.permute.xlu1 %1067 }
 0x10d   : > { %5124 = vst [vmem:[#allocation11_spill] sm:$0xff] %v3193_v30  ;;  %v3196_v19 = vpop.permute.xlu0 %1064  ;;  %1253 = vperm.xlu1 %2605, %v814_v57   ;;  %v818_v30 = vsel %vm626_vm14, 1, %v2619_v4  ;;  %vm642_vm14 = vcmp.eq.s32.totalorder %v3160_v45, 35 }
 0x10e   : > { %5125 = vst [vmem:[#allocation12_spill] sm:$0xff] %v3196_v19  ;;  %1250 = vperm.xlu0 %2604, %v813_v50   ;;  %v817_v19 = vsel %vm625_vm15, 1, %v2619_v4  ;;  %vm641_vm15 = vcmp.eq.s32.totalorder %v3166_v35, 35 }
 0x110   : > { %v3201_v43 = vpop.permute.xlu1 %1073 }
 0x111   : > { %5126 = vst [vmem:[#allocation13_spill] sm:$0xff] %v3201_v43  ;;  %v3204_v62 = vpop.permute.xlu0 %1070  ;;  %1259 = vperm.xlu1 %2605, %v816_v9   ;;  %v820_v43 = vsel %vm628_vm0, 1, %v2619_v4  ;;  %vm644_vm0 = vcmp.eq.s32.totalorder %v3174_v38, 36 }
 0x112   : > { %5127 = vst [vmem:[#allocation14_spill] sm:$0xff] %v3204_v62  ;;  %1256 = vperm.xlu0 %2604, %v815_v3   ;;  %v819_v62 = vsel %vm627_vm1, 1, %v2619_v4  ;;  %vm643_vm1 = vcmp.eq.s32.totalorder %v3152_v44, 36 }
 0x114   : > { %v3209_v57 = vpop.permute.xlu1 %1079 }
 0x115   : > { %5128 = vst [vmem:[#allocation15_spill] sm:$0xff] %v3209_v57  ;;  %v3212_v50 = vpop.permute.xlu0 %1076  ;;  %1265 = vperm.xlu1 %2605, %v818_v30   ;;  %v822_v57 = vsel %vm630_vm2, 1, %v2619_v4  ;;  %vm646_vm2 = vcmp.eq.s32.totalorder %v3160_v45, 36 }
 0x116   : > { %5129 = vst [vmem:[#allocation16_spill] sm:$0xff] %v3212_v50  ;;  %1262 = vperm.xlu0 %2604, %v817_v19   ;;  %v821_v50 = vsel %vm629_vm3, 1, %v2619_v4  ;;  %vm645_vm3 = vcmp.eq.s32.totalorder %v3166_v35, 36 }
 0x118   : > { %v3217_v9 = vpop.permute.xlu1 %1085 }
 0x119   : > { %5130 = vst [vmem:[#allocation17_spill] sm:$0xff] %v3217_v9  ;;  %v3220_v3 = vpop.permute.xlu0 %1082  ;;  %1271 = vperm.xlu1 %2605, %v820_v43   ;;  %v824_v9 = vsel %vm632_vm4, 1, %v2619_v4  ;;  %vm648_vm4 = vcmp.eq.s32.totalorder %v3174_v38, 37 }
 0x11a   : > { %5131 = vst [vmem:[#allocation18_spill] sm:$0xff] %v3220_v3  ;;  %1268 = vperm.xlu0 %2604, %v819_v62   ;;  %v823_v3 = vsel %vm631_vm5, 1, %v2619_v4  ;;  %vm647_vm5 = vcmp.eq.s32.totalorder %v3152_v44, 37 }
 0x11c   : > { %v3225_v30 = vpop.permute.xlu1 %1091 }
 0x11d   : > { %5132 = vst [vmem:[#allocation19_spill] sm:$0xff] %v3225_v30  ;;  %v3228_v19 = vpop.permute.xlu0 %1088  ;;  %1277 = vperm.xlu1 %2605, %v822_v57   ;;  %v826_v30 = vsel %vm634_vm6, 1, %v2619_v4  ;;  %vm650_vm6 = vcmp.eq.s32.totalorder %v3160_v45, 37 }
 0x11e   : > { %5133 = vst [vmem:[#allocation20_spill] sm:$0xff] %v3228_v19  ;;  %1274 = vperm.xlu0 %2604, %v821_v50   ;;  %v825_v19 = vsel %vm633_vm7, 1, %v2619_v4  ;;  %vm649_vm7 = vcmp.eq.s32.totalorder %v3166_v35, 37 }
 0x120   : > { %v3233_v43 = vpop.permute.xlu1 %1097 }
 0x121   : > { %5134 = vst [vmem:[#allocation21_spill] sm:$0xff] %v3233_v43  ;;  %v3236_v62 = vpop.permute.xlu0 %1094  ;;  %1283 = vperm.xlu1 %2605, %v824_v9   ;;  %v828_v43 = vsel %vm636_vm8, 1, %v2619_v4  ;;  %vm652_vm8 = vcmp.eq.s32.totalorder %v3174_v38, 38 }
 0x122   : > { %5135 = vst [vmem:[#allocation22_spill] sm:$0xff] %v3236_v62  ;;  %1280 = vperm.xlu0 %2604, %v823_v3   ;;  %v827_v62 = vsel %vm635_vm9, 1, %v2619_v4  ;;  %vm651_vm9 = vcmp.eq.s32.totalorder %v3152_v44, 38 }
 0x124   : > { %v3241_v57 = vpop.permute.xlu1 %1103 }
 0x125   : > { %5136 = vst [vmem:[#allocation23_spill] sm:$0xff] %v3241_v57  ;;  %v3244_v50 = vpop.permute.xlu0 %1100  ;;  %1289 = vperm.xlu1 %2605, %v826_v30   ;;  %v830_v57 = vsel %vm638_vm10, 1, %v2619_v4  ;;  %vm654_vm10 = vcmp.eq.s32.totalorder %v3160_v45, 38 }
 0x126   : > { %5137 = vst [vmem:[#allocation24_spill] sm:$0xff] %v3244_v50  ;;  %1286 = vperm.xlu0 %2604, %v825_v19   ;;  %v829_v50 = vsel %vm637_vm11, 1, %v2619_v4  ;;  %vm653_vm11 = vcmp.eq.s32.totalorder %v3166_v35, 38 }
 0x128   : > { %v3249_v9 = vpop.permute.xlu1 %1109 }
 0x129   : > { %5138 = vst [vmem:[#allocation25_spill] sm:$0xff] %v3249_v9  ;;  %v3252_v3 = vpop.permute.xlu0 %1106  ;;  %1295 = vperm.xlu1 %2605, %v828_v43   ;;  %v832_v9 = vsel %vm640_vm12, 1, %v2619_v4  ;;  %vm656_vm12 = vcmp.eq.s32.totalorder %v3174_v38, 39 }
 0x12a   : > { %5139 = vst [vmem:[#allocation26_spill] sm:$0xff] %v3252_v3  ;;  %1292 = vperm.xlu0 %2604, %v827_v62   ;;  %v831_v3 = vsel %vm639_vm13, 1, %v2619_v4  ;;  %vm655_vm13 = vcmp.eq.s32.totalorder %v3152_v44, 39 }
 0x12c   : > { %v3257_v30 = vpop.permute.xlu1 %1115 }
 0x12d   : > { %5140 = vst [vmem:[#allocation27_spill] sm:$0xff] %v3257_v30  ;;  %v3260_v19 = vpop.permute.xlu0 %1112  ;;  %1301 = vperm.xlu1 %2605, %v830_v57   ;;  %v834_v30 = vsel %vm642_vm14, 1, %v2619_v4  ;;  %vm658_vm14 = vcmp.eq.s32.totalorder %v3160_v45, 39 }
 0x12e   : > { %5141 = vst [vmem:[#allocation28_spill] sm:$0xff] %v3260_v19  ;;  %1298 = vperm.xlu0 %2604, %v829_v50   ;;  %v833_v19 = vsel %vm641_vm15, 1, %v2619_v4  ;;  %vm657_vm15 = vcmp.eq.s32.totalorder %v3166_v35, 39 }
 0x130   : > { %v3265_v43 = vpop.permute.xlu1 %1121 }
 0x131   : > { %5142 = vst [vmem:[#allocation29_spill] sm:$0xff] %v3265_v43  ;;  %v3268_v62 = vpop.permute.xlu0 %1118  ;;  %1307 = vperm.xlu1 %2605, %v832_v9   ;;  %v836_v43 = vsel %vm644_vm0, 1, %v2619_v4  ;;  %vm660_vm0 = vcmp.eq.s32.totalorder %v3174_v38, 40 }
 0x132   : > { %5143 = vst [vmem:[#allocation30_spill] sm:$0xff] %v3268_v62  ;;  %1304 = vperm.xlu0 %2604, %v831_v3   ;;  %v835_v62 = vsel %vm643_vm1, 1, %v2619_v4  ;;  %vm659_vm1 = vcmp.eq.s32.totalorder %v3152_v44, 40 }
 0x134   : > { %v3273_v57 = vpop.permute.xlu1 %1127 }
 0x135   : > { %5144 = vst [vmem:[#allocation31_spill] sm:$0xff] %v3273_v57  ;;  %v3276_v50 = vpop.permute.xlu0 %1124  ;;  %1313 = vperm.xlu1 %2605, %v834_v30   ;;  %v838_v57 = vsel %vm646_vm2, 1, %v2619_v4  ;;  %vm662_vm2 = vcmp.eq.s32.totalorder %v3160_v45, 40 }
 0x136   : > { %5145 = vst [vmem:[#allocation32_spill] sm:$0xff] %v3276_v50  ;;  %1310 = vperm.xlu0 %2604, %v833_v19   ;;  %v837_v50 = vsel %vm645_vm3, 1, %v2619_v4  ;;  %vm661_vm3 = vcmp.eq.s32.totalorder %v3166_v35, 40 }
 0x138   : > { %v3281_v9 = vpop.permute.xlu1 %1133 }
 0x139   : > { %5146 = vst [vmem:[#allocation33_spill] sm:$0xff] %v3281_v9  ;;  %v3284_v3 = vpop.permute.xlu0 %1130  ;;  %1319 = vperm.xlu1 %2605, %v836_v43   ;;  %v840_v9 = vsel %vm648_vm4, 1, %v2619_v4  ;;  %vm664_vm4 = vcmp.eq.s32.totalorder %v3174_v38, 41 }
 0x13a   : > { %5147 = vst [vmem:[#allocation34_spill] sm:$0xff] %v3284_v3  ;;  %1316 = vperm.xlu0 %2604, %v835_v62   ;;  %v839_v3 = vsel %vm647_vm5, 1, %v2619_v4  ;;  %vm663_vm5 = vcmp.eq.s32.totalorder %v3152_v44, 41 }
 0x13c   : > { %v3289_v30 = vpop.permute.xlu1 %1139 }
 0x13d   : > { %5148 = vst [vmem:[#allocation35_spill] sm:$0xff] %v3289_v30  ;;  %v3292_v19 = vpop.permute.xlu0 %1136  ;;  %1325 = vperm.xlu1 %2605, %v838_v57   ;;  %v842_v30 = vsel %vm650_vm6, 1, %v2619_v4  ;;  %vm666_vm6 = vcmp.eq.s32.totalorder %v3160_v45, 41 }
 0x13e   : > { %5149 = vst [vmem:[#allocation36_spill] sm:$0xff] %v3292_v19  ;;  %1322 = vperm.xlu0 %2604, %v837_v50   ;;  %v841_v19 = vsel %vm649_vm7, 1, %v2619_v4  ;;  %vm665_vm7 = vcmp.eq.s32.totalorder %v3166_v35, 41 }
 0x140   : > { %v3297_v43 = vpop.permute.xlu1 %1145 }
 0x141   : > { %5150 = vst [vmem:[#allocation37_spill] sm:$0xff] %v3297_v43  ;;  %v3300_v62 = vpop.permute.xlu0 %1142  ;;  %1331 = vperm.xlu1 %2605, %v840_v9   ;;  %v844_v43 = vsel %vm652_vm8, 1, %v2619_v4  ;;  %vm668_vm8 = vcmp.eq.s32.totalorder %v3174_v38, 42 }
 0x142   : > { %5151 = vst [vmem:[#allocation38_spill] sm:$0xff] %v3300_v62  ;;  %1328 = vperm.xlu0 %2604, %v839_v3   ;;  %v843_v62 = vsel %vm651_vm9, 1, %v2619_v4  ;;  %vm667_vm9 = vcmp.eq.s32.totalorder %v3152_v44, 42 }
 0x144   : > { %v3305_v57 = vpop.permute.xlu1 %1151 }
 0x145   : > { %5152 = vst [vmem:[#allocation39_spill] sm:$0xff] %v3305_v57  ;;  %v3308_v50 = vpop.permute.xlu0 %1148  ;;  %1337 = vperm.xlu1 %2605, %v842_v30   ;;  %v846_v57 = vsel %vm654_vm10, 1, %v2619_v4  ;;  %vm672_vm10 = vcmp.eq.s32.totalorder %v3174_v38, 43 }
 0x146   : > { %5153 = vst [vmem:[#allocation40_spill] sm:$0xff] %v3308_v50  ;;  %1334 = vperm.xlu0 %2604, %v841_v19   ;;  %v845_v50 = vsel %vm653_vm11, 1, %v2619_v4  ;;  %vm671_vm11 = vcmp.eq.s32.totalorder %v3152_v44, 43 }
 0x148   : > { %v3313_v9 = vpop.permute.xlu1 %1157 }
 0x149   : > { %5154 = vst [vmem:[#allocation41_spill] sm:$0xff] %v3313_v9  ;;  %v3316_v3 = vpop.permute.xlu0 %1154  ;;  %1343 = vperm.xlu1 %2605, %v844_v43   ;;  %v848_v9 = vsel %vm656_vm12, 1, %v2619_v4  ;;  %vm675_vm12 = vcmp.eq.s32.totalorder %v3152_v44, 44 }
 0x14a   : > { %5155 = vst [vmem:[#allocation42_spill] sm:$0xff] %v3316_v3  ;;  %1340 = vperm.xlu0 %2604, %v843_v62   ;;  %v847_v3 = vsel %vm655_vm13, 1, %v2619_v4  ;;  %vm669_vm13 = vcmp.eq.s32.totalorder %v3166_v35, 42 }
 0x14c   : > { %v3321_v30 = vpop.permute.xlu1 %1163 }
 0x14d   : > { %5156 = vst [vmem:[#allocation43_spill] sm:$0xff] %v3321_v30  ;;  %v3324_v19 = vpop.permute.xlu0 %1160  ;;  %1349 = vperm.xlu1 %2605, %v846_v57   ;;  %v850_v30 = vsel %vm658_vm14, 1, %v2619_v4  ;;  %vm673_vm14 = vcmp.eq.s32.totalorder %v3166_v35, 43 }
 0x14e   : > { %5157 = vst [vmem:[#allocation44_spill] sm:$0xff] %v3324_v19  ;;  %1346 = vperm.xlu0 %2604, %v845_v50   ;;  %v849_v19 = vsel %vm657_vm15, 1, %v2619_v4  ;;  %vm676_vm15 = vcmp.eq.s32.totalorder %v3174_v38, 44 }
 0x150   : > { %v3329_v43 = vpop.permute.xlu1 %1169 }
 0x151   : > { %5158 = vst [vmem:[#allocation45_spill] sm:$0xff] %v3329_v43  ;;  %v3332_v62 = vpop.permute.xlu0 %1166  ;;  %1355 = vperm.xlu1 %2605, %v848_v9   ;;  %v852_v43 = vsel %vm660_vm0, 1, %v2619_v4  ;;  %vm680_vm0 = vcmp.eq.s32.totalorder %v3174_v38, 45 }
 0x152   : > { %5159 = vst [vmem:[#allocation46_spill] sm:$0xff] %v3332_v62  ;;  %1352 = vperm.xlu0 %2604, %v847_v3   ;;  %v851_v62 = vsel %vm659_vm1, 1, %v2619_v4  ;;  %vm679_vm1 = vcmp.eq.s32.totalorder %v3152_v44, 45 }
 0x154   : > { %v3337_v57 = vpop.permute.xlu1 %1175 }
 0x155   : > { %5160 = vst [vmem:[#allocation47_spill] sm:$0xff] %v3337_v57  ;;  %v3340_v50 = vpop.permute.xlu0 %1172  ;;  %1361 = vperm.xlu1 %2605, %v850_v30   ;;  %v854_v57 = vsel %vm662_vm2, 1, %v2619_v4  ;;  %vm677_vm2 = vcmp.eq.s32.totalorder %v3166_v35, 44 }
 0x156   : > { %5161 = vst [vmem:[#allocation48_spill] sm:$0xff] %v3340_v50  ;;  %1358 = vperm.xlu0 %2604, %v849_v19   ;;  %v853_v50 = vsel %vm661_vm3, 1, %v2619_v4  ;;  %vm670_vm3 = vcmp.eq.s32.totalorder %v3160_v45, 42 }
 0x158   : > { %v3345_v9 = vpop.permute.xlu1 %1181 }
 0x159   : > { %5162 = vst [vmem:[#allocation49_spill] sm:$0xff] %v3345_v9  ;;  %v3348_v3 = vpop.permute.xlu0 %1178  ;;  %1367 = vperm.xlu1 %2605, %v852_v43   ;;  %v856_v9 = vsel %vm664_vm4, 1, %v2619_v4  ;;  %vm684_vm4 = vcmp.eq.s32.totalorder %v3174_v38, 46 }
 0x15a   : > { %5163 = vst [vmem:[#allocation50_spill] sm:$0xff] %v3348_v3  ;;  %1364 = vperm.xlu0 %2604, %v851_v62   ;;  %v855_v3 = vsel %vm663_vm5, 1, %v2619_v4  ;;  %vm683_vm5 = vcmp.eq.s32.totalorder %v3152_v44, 46 }
 0x15c   : > { %v3353_v30 = vpop.permute.xlu1 %1187 }
 0x15d   : > { %5164 = vst [vmem:[#allocation51_spill] sm:$0xff] %v3353_v30  ;;  %v3356_v19 = vpop.permute.xlu0 %1184  ;;  %1373 = vperm.xlu1 %2605, %v854_v57   ;;  %v858_v30 = vsel %vm666_vm6, 1, %v2619_v4  ;;  %vm681_vm6 = vcmp.eq.s32.totalorder %v3166_v35, 45 }
 0x15e   : > { %5165 = vst [vmem:[#allocation52_spill] sm:$0xff] %v3356_v19  ;;  %1370 = vperm.xlu0 %2604, %v853_v50   ;;  %v857_v19 = vsel %vm665_vm7, 1, %v2619_v4  ;;  %vm674_vm7 = vcmp.eq.s32.totalorder %v3160_v45, 43 }
 0x160   : > { %v3361_v43 = vpop.permute.xlu1 %1193 }
 0x161   : > { %5166 = vst [vmem:[#allocation53_spill] sm:$0xff] %v3361_v43  ;;  %v3364_v62 = vpop.permute.xlu0 %1190  ;;  %1379 = vperm.xlu1 %2605, %v856_v9   ;;  %v860_v43 = vsel %vm668_vm8, 1, %v2619_v4  ;;  %vm688_vm8 = vcmp.eq.s32.totalorder %v3174_v38, 47 }
 0x162   : > { %5167 = vst [vmem:[#allocation54_spill] sm:$0xff] %v3364_v62  ;;  %1376 = vperm.xlu0 %2604, %v855_v3   ;;  %v859_v62 = vsel %vm667_vm9, 1, %v2619_v4  ;;  %vm687_vm9 = vcmp.eq.s32.totalorder %v3152_v44, 47 }
 0x164   : > { %v3369_v57 = vpop.permute.xlu1 %1199 }
 0x165   : > { %5168 = vst [vmem:[#allocation55_spill] sm:$0xff] %v3369_v57  ;;  %v3372_v50 = vpop.permute.xlu0 %1196  ;;  %1385 = vperm.xlu1 %2605, %v858_v30   ;;  %v864_v57 = vsel %vm672_vm10, 1, %v2619_v4  ;;  %vm685_vm10 = vcmp.eq.s32.totalorder %v3166_v35, 46 }
 0x166   : > { %5169 = vst [vmem:[#allocation56_spill] sm:$0xff] %v3372_v50  ;;  %1382 = vperm.xlu0 %2604, %v857_v19   ;;  %v863_v50 = vsel %vm671_vm11, 1, %v2619_v4  ;;  %vm678_vm11 = vcmp.eq.s32.totalorder %v3160_v45, 44  ;;  %v877_v44 = vsel %vm685_vm10, 1, %v2619_v4 }
 0x167   : > { %v870_v38 = vsel %vm678_vm11, 1, %v2619_v4  ;;  %vm1472_vm11 = vcmp.eq.s32.totalorder %v2986_v12, 1 }
 0x168   : > { %v3377_v9 = vpop.permute.xlu1 %1205 }
 0x169   : > { %5170 = vst [vmem:[#allocation57_spill] sm:$0xff] %v3377_v9  ;;  %v3380_v3 = vpop.permute.xlu0 %1202  ;;  %1391 = vperm.xlu1 %2605, %v860_v43   ;;  %v867_v9 = vsel %vm675_vm12, 1, %v2619_v4  ;;  %vm689_vm12 = vcmp.eq.s32.totalorder %v3166_v35, 47 }
 0x16a   : > { %5171 = vst [vmem:[#allocation58_spill] sm:$0xff] %v3380_v3  ;;  %1388 = vperm.xlu0 %2604, %v859_v62   ;;  %v861_v3 = vsel %vm669_vm13, 1, %v2619_v4  ;;  %vm682_vm13 = vcmp.eq.s32.totalorder %v3160_v45, 45 }
 0x16c   : > { %v3385_v30 = vpop.permute.xlu1 %1211 }
 0x16d   : > { %5172 = vst [vmem:[#allocation59_spill] sm:$0xff] %v3385_v30  ;;  %v3388_v19 = vpop.permute.xlu0 %1208  ;;  %1403 = vperm.xlu1 %2605, %v864_v57   ;;  %v865_v30 = vsel %vm673_vm14, 1, %v2619_v4  ;;  %vm690_vm14 = vcmp.eq.s32.totalorder %v3160_v45, 47 }
 0x16e   : > { %5173 = vst [vmem:[#allocation60_spill] sm:$0xff] %v3388_v19  ;;  %1400 = vperm.xlu0 %2604, %v863_v50   ;;  %v868_v19 = vsel %vm676_vm15, 1, %v2619_v4  ;;  %vm686_vm15 = vcmp.eq.s32.totalorder %v3160_v45, 46  ;;  %v882_v35 = vsel %vm690_vm14, 1, %v2619_v4  ;;  %vm1483_vm14 = vcmp.eq.s32.totalorder %v3037_v37, 1  ;;  %v5241_v37 = vld [vmem:[#allocation16_spill] sm:$0xff] }
 0x170   : > { %v3393_v43 = vpop.permute.xlu1 %1217 }
 0x171   : > { %5174 = vst [vmem:[#allocation61_spill] sm:$0xff] %v3393_v43  ;;  %v3396_v62 = vpop.permute.xlu0 %1214  ;;  %1412 = vperm.xlu1 %2605, %v867_v9   ;;  %v872_v43 = vsel %vm680_vm0, 1, %v2619_v4  ;;  %vm1459_vm0 = vcmp.eq.s32.totalorder %v2940_v48, 1 }
 0x172   : > { %5175 = vst [vmem:[#allocation62_spill] sm:$0xff] %v3396_v62  ;;  %1394 = vperm.xlu0 %2604, %v861_v3   ;;  %v871_v62 = vsel %vm679_vm1, 1, %v2619_v4  ;;  %vm1480_vm1 = vcmp.eq.s32.totalorder %v3018_v28, 1 }
 0x174   : > { %v3401_v57 = vpop.permute.xlu1 %1223 }
 0x175   : > { %5176 = vst [vmem:[#allocation63_spill] sm:$0xff] %v3401_v57  ;;  %v3404_v50 = vpop.permute.xlu0 %1220  ;;  %1406 = vperm.xlu1 %2605, %v865_v30   ;;  %v869_v57 = vsel %vm677_vm2, 1, %v2619_v4  ;;  %vm1460_vm2 = vcmp.eq.s32.totalorder %v2949_v52, 1 }
 0x176   : > { %5177 = vst [vmem:[#allocation64_spill] sm:$0xff] %v3404_v50  ;;  %1415 = vperm.xlu0 %2604, %v868_v19   ;;  %v862_v50 = vsel %vm670_vm3, 1, %v2619_v4  ;;  %vm1475_vm3 = vcmp.eq.s32.totalorder %v3005_v21, 1 }
 0x178   : > { %v3409_v9 = vpop.permute.xlu1 %1229 }
 0x179   : > { %5178 = vst [vmem:[#allocation65_spill] sm:$0xff] %v3409_v9  ;;  %v3412_v3 = vpop.permute.xlu0 %1226  ;;  %1427 = vperm.xlu1 %2605, %v872_v43   ;;  %v876_v9 = vsel %vm684_vm4, 1, %v2619_v4  ;;  %vm1464_vm4 = vcmp.eq.s32.totalorder %v2954_v55, 1 }
 0x17a   : > { %5179 = vst [vmem:[#allocation66_spill] sm:$0xff] %v3412_v3  ;;  %1424 = vperm.xlu0 %2604, %v871_v62   ;;  %v875_v3 = vsel %vm683_vm5, 1, %v2619_v4  ;;  %vm1463_vm5 = vcmp.eq.s32.totalorder %v2957_v56, 1 }
 0x17c   : > { %v3417_v30 = vpop.permute.xlu1 %1235 }
 0x17d   : > { %5180 = vst [vmem:[#allocation67_spill] sm:$0xff] %v3417_v30  ;;  %v3420_v19 = vpop.permute.xlu0 %1232  ;;  %1418 = vperm.xlu1 %2605, %v869_v57   ;;  %v873_v30 = vsel %vm681_vm6, 1, %v2619_v4  ;;  %vm1477_vm6 = vcmp.eq.s32.totalorder %v3013_v25, 1 }
 0x17e   : > { %5181 = vst [vmem:[#allocation68_spill] sm:$0xff] %v3420_v19  ;;  %1397 = vperm.xlu0 %2604, %v862_v50   ;;  %v866_v19 = vsel %vm674_vm7, 1, %v2619_v4  ;;  %vm1468_vm7 = vcmp.eq.s32.totalorder %v2970_v63, 1 }
 0x180   : > { %v3425_v43 = vpop.permute.xlu1 %1241 }
 0x181   : > { %5182 = vst [vmem:[#allocation69_spill] sm:$0xff] %v3425_v43  ;;  %v3428_v62 = vpop.permute.xlu0 %1238  ;;  %1439 = vperm.xlu1 %2605, %v876_v9   ;;  %v880_v43 = vsel %vm688_vm8, 1, %v2619_v4  ;;  %vm1476_vm8 = vcmp.eq.s32.totalorder %v3002_v20, 1 }
 0x182   : > { %5183 = vst [vmem:[#allocation70_spill] sm:$0xff] %v3428_v62  ;;  %1436 = vperm.xlu0 %2604, %v875_v3   ;;  %v879_v62 = vsel %vm687_vm9, 1, %v2619_v4  ;;  %vm1467_vm9 = vcmp.eq.s32.totalorder %v2973_v0, 1 }
 0x184   : > { %v3433_v57 = vpop.permute.xlu1 %1247 }
 0x185   : > { %5184 = vst [vmem:[#allocation71_spill] sm:$0xff] %v3433_v57  ;;  %v3436_v50 = vpop.permute.xlu0 %1244  ;;  %1430 = vperm.xlu1 %2605, %v873_v30   ;;  %v5252_v57 = vld [vmem:[#allocation22_spill] sm:$0xff] }
 0x186   : > { %5185 = vst [vmem:[#allocation72_spill] sm:$0xff] %v3436_v50  ;;  %1409 = vperm.xlu0 %2604, %v866_v19  }
 0x188   : > { %v3441_v9 = vpop.permute.xlu1 %1253 }
 0x189   : > { %5186 = vst [vmem:[#allocation73_spill] sm:$0xff] %v3441_v9  ;;  %v3444_v3 = vpop.permute.xlu0 %1250  ;;  %1451 = vperm.xlu1 %2605, %v880_v43   ;;  %v881_v9 = vsel %vm689_vm12, 1, %v2619_v4 }
 0x18a   : > { %5187 = vst [vmem:[#allocation74_spill] sm:$0xff] %v3444_v3  ;;  %1448 = vperm.xlu0 %2604, %v879_v62   ;;  %v874_v3 = vsel %vm682_vm13, 1, %v2619_v4  ;;  %vm1484_vm13 = vcmp.eq.s32.totalorder %v3034_v36, 1 }
 0x18c   : > { %v3449_v30 = vpop.permute.xlu1 %1259 }
 0x18d   : > { %5188 = vst [vmem:[#allocation75_spill] sm:$0xff] %v3449_v30  ;;  %v3452_v19 = vpop.permute.xlu0 %1256  ;;  %1442 = vperm.xlu1 %2605, %v877_v44   ;;  %v878_v30 = vsel %vm686_vm15, 1, %v2619_v4  ;;  %vm1473_vm15 = vcmp.eq.s32.totalorder %v2997_v17, 1 }
 0x18e   : > { %5189 = vst [vmem:[#allocation76_spill] sm:$0xff] %v3452_v19  ;;  %1421 = vperm.xlu0 %2604, %v870_v38  }
 0x190   : > { %v3457_v43 = vpop.permute.xlu1 %1265 }
 0x191   : > { %5190 = vst [vmem:[#allocation77_spill] sm:$0xff] %v3457_v43  ;;  %v3460_v62 = vpop.permute.xlu0 %1262  ;;  %1454 = vperm.xlu1 %2605, %v881_v9  }
 0x192   : > { %5191 = vst [vmem:[#allocation78_spill] sm:$0xff] %v3460_v62  ;;  %1433 = vperm.xlu0 %2604, %v874_v3  }
 0x194   : > { %v3464_v44 = vpop.permute.xlu1 %1271 }
 0x195   : > { %5192 = vst [vmem:[#allocation79_spill] sm:$0xff] %v3464_v44  ;;  %v3466_v38 = vpop.permute.xlu0 %1268  ;;  %1457 = vperm.xlu1 %2605, %v882_v35  }
 0x196   : > { %5193 = vst [vmem:[#allocation80_spill] sm:$0xff] %v3466_v38  ;;  %1445 = vperm.xlu0 %2604, %v878_v30   ;;  %v5246_v38 = vld [vmem:[#allocation18_spill] sm:$0xff] }
 0x198   : > { %v3468_v19 = vpop.permute.xlu1 %1277 }
 0x199   : > { %5194 = vst [vmem:[#allocation81_spill] sm:$0xff] %v3468_v19  ;;  %v3470_v50 = vpop.permute.xlu0 %1274 }
 0x19a   : > { %5195 = vst [vmem:[#allocation82_spill] sm:$0xff] %v3470_v50 }
 0x19c   : > { %v3472_v43 = vpop.permute.xlu1 %1283 }
 0x19d   : > { %5196 = vst [vmem:[#allocation83_spill] sm:$0xff] %v3472_v43  ;;  %v3474_v45 = vpop.permute.xlu0 %1280 }
 0x19e   : > { %5197 = vst [vmem:[#allocation84_spill] sm:$0xff] %v3474_v45 }
 0x1a0   : > { %v3476_v9 = vpop.permute.xlu1 %1289 }
 0x1a1   : > { %5198 = vst [vmem:[#allocation85_spill] sm:$0xff] %v3476_v9  ;;  %v3478_v3 = vpop.permute.xlu0 %1286 }
 0x1a2   : > { %5199 = vst [vmem:[#allocation86_spill] sm:$0xff] %v3478_v3 }
 0x1a4   : > { %v3480_v62 = vpop.permute.xlu1 %1295 }
 0x1a5   : > { %5200 = vst [vmem:[#allocation87_spill] sm:$0xff] %v3480_v62  ;;  %v3482_v4 = vpop.permute.xlu0 %1292 }
 0x1a6   : > { %5201 = vst [vmem:[#allocation88_spill] sm:$0xff] %v3482_v4 }
 0x1a8   : > { %v3484_v44 = vpop.permute.xlu1 %1301 }
 0x1a9   : > { %5202 = vst [vmem:[#allocation89_spill] sm:$0xff] %v3484_v44  ;;  %v3486_v35 = vpop.permute.xlu0 %1298 }
 0x1aa   : > { %5203 = vst [vmem:[#allocation90_spill] sm:$0xff] %v3486_v35 }
 0x1ac   : > { %v3488_v30 = vpop.permute.xlu1 %1307 }
 0x1ad   : > { %5204 = vst [vmem:[#allocation91_spill] sm:$0xff] %v3488_v30  ;;  %v3490_v19 = vpop.permute.xlu0 %1304  ;;  %v2474_v30 = vld [vmem:[%s4992_s4] ss:$0 sm:$0xff] }
 0x1ae   : > { %5205 = vst [vmem:[#allocation92_spill] sm:$0xff] %v3490_v19 }
 0x1b0   : > { %v3492_v50 = vpop.permute.xlu1 %1313 }
 0x1b1   : > { %5206 = vst [vmem:[#allocation93_spill] sm:$0xff] %v3492_v50  ;;  %v3494_v43 = vpop.permute.xlu0 %1310 }
 0x1b2   : > { %5207 = vst [vmem:[#allocation94_spill] sm:$0xff] %v3494_v43 }
 0x1b4   : > { %v3496_v45 = vpop.permute.xlu1 %1319 }
 0x1b5   : > { %5208 = vst [vmem:[#allocation95_spill] sm:$0xff] %v3496_v45  ;;  %v3498_v9 = vpop.permute.xlu0 %1316 }
 0x1b6   : > { %5209 = vst [vmem:[#allocation96_spill] sm:$0xff] %v3498_v9 }
 0x1b8   : > { %v3500_v3 = vpop.permute.xlu1 %1325 }
 0x1b9   : > { %5210 = vst [vmem:[#allocation97_spill] sm:$0xff] %v3500_v3  ;;  %v3502_v62 = vpop.permute.xlu0 %1322 }
 0x1ba   : > { %5211 = vst [vmem:[#allocation98_spill] sm:$0xff] %v3502_v62 }
 0x1bc   : > { %v3504_v4 = vpop.permute.xlu1 %1331 }
 0x1bd   : > { %5212 = vst [vmem:[#allocation99_spill] sm:$0xff] %v3504_v4  ;;  %v3506_v44 = vpop.permute.xlu0 %1328 }
 0x1be   : > { %5213 = vst [vmem:[#allocation100_spill] sm:$0xff] %v3506_v44 }
 0x1c0   : > { %v2590_v44 = vpop.f32.mrf.mxu1  ;;  %v3519_v4 = vpop.permute.xlu1 %1337 }
 0x1c1   : > { %5214 = vst [vmem:[#allocation101_spill] sm:$0xff] %v3519_v4  ;;  %v3525_v3 = vadd.f32 %v2590_v44, %v2474_v30  ;;  %v3527_v62 = vpop.permute.xlu0 %1334 }
 0x1c2   : > { %5216 = vst [vmem:[#allocation103_spill] sm:$0xff] %v3527_v62  ;;  %v476_v4 = vpop.f32.mrf.mxu1 }
 0x1c3   : > { %5215 = vst [vmem:[#allocation102_spill] sm:$0xff] %v3525_v3  ;;  %v3538_v44 = vadd.f32 %v2474_v30, %v476_v4  ;;  %v1652_v45 = vsel %vm1460_vm2, %v3525_v3, -1e+30  ;;  %v3549_v43 = vsel %vm1464_vm4, %v3525_v3, -1e+30  ;;  %vm1492_vm4 = vcmp.eq.s32.totalorder %v3066_v58, 1 }
 0x1c4   : > { %v2593_v62 = vpop.f32.mrf.mxu1  ;;  %v1344_v9 = vpop.permute.xlu1 %1343  ;;  %v3554_v4 = vsel %vm1468_vm7, %v3525_v3, -1e+30  ;;  %v3564_v55 = vsel %vm1472_vm11, %v3525_v3, -1e+30  ;;  %v3569_v63 = vsel %vm1476_vm8, %v3525_v3, -1e+30 }
 0x1c5   : > { %5217 = vst [vmem:[#allocation104_spill] sm:$0xff] %v3538_v44  ;;  %v3559_v50 = vadd.f32 %v2593_v62, %v2474_v30  ;;  %vm1612_vm10 = vcmp.eq.s32.totalorder %v1344_v9, 1  ;;  %v1341_v52 = vpop.permute.xlu0 %1340  ;;  %vm1491_vm7 = vcmp.eq.s32.totalorder %v3069_v61, 1  ;;  %v1651_v9 = vsel %vm1459_vm0, %v3538_v44, -1e+30 }
 0x1c6   : > { %vm1611_vm12 = vcmp.eq.s32.totalorder %v1341_v52, 1  ;;  %v486_v62 = vpop.f32.mrf.mxu1  ;;  %v3580_v12 = vsel %vm1480_vm1, %v3525_v3, -1e+30  ;;  %vm1493_vm11 = vcmp.eq.s32.totalorder %v3077_v10, 1  ;;  %v3586_v20 = vsel %vm1612_vm10, %v3525_v3, -1e+30 }
 0x1c7   : > { %5218 = vst [vmem:[#allocation105_spill] sm:$0xff] %v3559_v50  ;;  %5219 = vst [vmem:[#allocation106_spill] sm:$0xff] %v3586_v20  ;;  %v3588_v52 = vadd.f32 %v2474_v30, %v486_v62  ;;  %v1655_v48 = vsel %vm1463_vm5, %v3538_v44, -1e+30  ;;  %v3596_v28 = vsel %vm1467_vm9, %v3538_v44, -1e+30  ;;  %v1849_v35 = vmax.f32 %v1651_v9, %v1652_v45 }
 0x1c8   : > { %v3602_v19 = vsel %vm1611_vm12, %v3538_v44, -1e+30  ;;  %v1350_v30 = vpop.permute.xlu1 %1349  ;;  %vm5222_vm10 = vcmp.eq.s32.totalorder %v2946_v51, 1  ;;  %vm5223_vm5 = vcmp.eq.s32.totalorder %v2962_v59, 1  ;;  %vm5224_vm12 = vcmp.eq.s32.totalorder %v2938_v47, 1  ;;  %v5244_v20 = vld [vmem:[#allocation15_spill] sm:$0xff] }
 0x1c9   : > { %5220 = vst [vmem:[#allocation107_spill] sm:$0xff] %v3588_v52  ;;  %5221 = vst [vmem:[#allocation108_spill] sm:$0xff] %v3602_v19  ;;  %v1654_v56 = vsel %vm5222_vm10, %v3559_v50, -1e+30  ;;  %v3610_v0 = vsel %vm5223_vm5, %v3559_v50, -1e+30  ;;  %v1858_v45 = vmax.f32 %v1655_v48, %v3549_v43 }
 0x1ca   : > { %vm1614_vm2 = vcmp.eq.s32.totalorder %v1350_v30, 1  ;;  %v1653_v62 = vsel %vm5224_vm12, %v3588_v52, -1e+30  ;;  %vm5225_vm8 = vcmp.eq.s32.totalorder %v2978_v7, 1  ;;  %vm1502_vm10 = vcmp.eq.s32.totalorder %v3106_v39, 1  ;;  %v5231_v43 = vld [vmem:[#allocation6_spill] sm:$0xff] }
 0x1cb   : > { %v3621_v51 = vsel %vm5225_vm8, %v3559_v50, -1e+30  ;;  %vm5226_vm1 = vcmp.eq.s32.totalorder %v2965_v60, 1  ;;  %vm5227_vm0 = vcmp.eq.s32.totalorder %v2989_v13, 1  ;;  %vm5228_vm8 = vcmp.eq.s32.totalorder %v2994_v16, 1  ;;  %v5245_v19 = vld [vmem:[#allocation17_spill] sm:$0xff] }
 0x1cc   : > { %v1657_v59 = vsel %vm5226_vm1, %v3588_v52, -1e+30  ;;  %v3632_v47 = vsel %vm5227_vm0, %v3538_v44, -1e+30  ;;  %v3637_v7 = vsel %vm5228_vm8, %v3559_v50, -1e+30  ;;  %v1850_v9 = vmax.f32 %v1849_v35, %v1653_v62 }
 0x1cd   : > { %vm1505_vm5 = vcmp.eq.s32.totalorder %v3125_v11, 1  ;;  %vm1507_vm9 = vcmp.eq.s32.totalorder %v3133_v27, 1  ;;  %v3644_v60 = vsel %vm1614_vm2, %v3559_v50, -1e+30  ;;  %vm5230_vm0 = vcmp.eq.s32.totalorder %v2981_v8, 1  ;;  %v5233_v35 = vld [vmem:[#allocation7_spill] sm:$0xff] }
 0x1ce   : > { %5229 = vst [vmem:[#allocation109_spill] sm:$0xff] %v3644_v60  ;;  %v1661_v13 = vsel %vm5230_vm0, %v3588_v52, -1e+30  ;;  %v1665_v16 = vsel %vm1473_vm15, %v3588_v52, -1e+30  ;;  %vm1508_vm1 = vcmp.eq.s32.totalorder %v3130_v22, 1  ;;  %v1859_v48 = vmax.f32 %v1858_v45, %v1657_v59 }
 0x1cf   : > { %vm1509_vm12 = vcmp.eq.s32.totalorder %v5231_v43, 1  ;;  %v3660_v30 = vsel %vm1475_vm3, %v3538_v44, -1e+30  ;;  %v3665_v8 = vsel %vm1477_vm6, %v3588_v52, -1e+30  ;;  %vm5232_vm15 = vcmp.eq.s32.totalorder %v3010_v24, 1 }
 0x1d0   : > { %v3670_v17 = vsel %vm5232_vm15, %v3559_v50, -1e+30  ;;  %v5234_v62 = vld [vmem:[#allocation8_spill] sm:$0xff]  ;;  %vm5235_vm3 = vcmp.eq.s32.totalorder %v3021_v29, 1  ;;  %vm5236_vm6 = vcmp.eq.s32.totalorder %v3029_v33, 1  ;;  %vm5237_vm15 = vcmp.eq.s32.totalorder %v3026_v32, 1 }
 0x1d1   : > { %v3678_v21 = vsel %vm5235_vm3, %v3538_v44, -1e+30  ;;  %v3683_v25 = vsel %vm5236_vm6, %v3588_v52, -1e+30  ;;  %v3688_v24 = vsel %vm5237_vm15, %v3559_v50, -1e+30  ;;  %v1867_v59 = vmax.f32 %v3596_v28, %v3554_v4 }
 0x1d2   : > { %vm1514_vm2 = vcmp.eq.s32.totalorder %v3163_v53, 1  ;;  %vm1515_vm0 = vcmp.eq.s32.totalorder %v3180_v2, 1  ;;  %v3696_v29 = vsel %vm1483_vm14, %v3538_v44, -1e+30  ;;  %v3701_v33 = vsel %vm1484_vm13, %v3525_v3, -1e+30 }
 0x1d3   : > { %vm5238_vm3 = vcmp.eq.s32.totalorder %v3045_v41, 1  ;;  %v5239_v45 = vld [vmem:[#allocation9_spill] sm:$0xff]  ;;  %v5240_v60 = vld [vmem:[#allocation10_spill] sm:$0xff]  ;;  %vm5242_vm8 = vcmp.eq.s32.totalorder %v3042_v40, 1  ;;  %v3721_v41 = vsel %vm1491_vm7, %v3538_v44, -1e+30  ;;  %v3728_v28 = vmax.f32 %v1850_v9, %v1654_v56 }
 0x1d4   : > { %v3706_v32 = vsel %vm5238_vm3, %v3588_v52, -1e+30  ;;  %vm1518_vm6 = vcmp.eq.s32.totalorder %v5239_v45, 1  ;;  %vm1517_vm15 = vcmp.eq.s32.totalorder %v5240_v60, 1  ;;  %v3716_v36 = vsel %vm5242_vm8, %v3559_v50, -1e+30 }
 0x1d5   : > { %v3726_v4 = vsel %vm1492_vm4, %v3525_v3, -1e+30  ;;  %5243 = vst [vmem:[#allocation6_spill] sm:$0xff] %v3728_v28  ;;  %vm1524_vm13 = vcmp.eq.s32.totalorder %v5244_v20, 1  ;;  %v3736_v40 = vsel %vm1493_vm11, %v3588_v52, -1e+30  ;;  %v1868_v56 = vmax.f32 %v1867_v59, %v1661_v13 }
 0x1d6   : > { %vm5247_vm7 = vcmp.eq.s32.totalorder %v3074_v5, 1  ;;  %vm5249_vm4 = vcmp.eq.s32.totalorder %v3085_v18, 1  ;;  %v5250_v9 = vld [vmem:[#allocation19_spill] sm:$0xff]  ;;  %v5251_v28 = vld [vmem:[#allocation20_spill] sm:$0xff]  ;;  %vm5253_vm11 = vcmp.eq.s32.totalorder %v3082_v15, 1  ;;  %v1876_v13 = vmax.f32 %v3632_v47, %v3564_v55  ;;  %v5258_v59 = vld [vmem:[#allocation21_spill] sm:$0xff] }
 0x1d7   : > { %v3741_v61 = vsel %vm5247_vm7, %v3559_v50, -1e+30  ;;  %v3746_v58 = vsel %vm5249_vm4, %v3538_v44, -1e+30  ;;  %v3754_v10 = vsel %vm5253_vm11, %v3525_v3, -1e+30  ;;  %v3787_v47 = vmax.f32 %v1859_v48, %v3610_v0 }
 0x1d8   : > { %5248 = vst [vmem:[#allocation7_spill] sm:$0xff] %v3741_v61  ;;  %vm5254_vm7 = vcmp.eq.s32.totalorder %v3093_v26, 1  ;;  %vm5256_vm4 = vcmp.eq.s32.totalorder %v3090_v23, 1  ;;  %vm1530_vm14 = vcmp.eq.s32.totalorder %v5258_v59, 1  ;;  %v5259_v61 = vld [vmem:[#allocation23_spill] sm:$0xff]  ;;  %v5260_v15 = vld [vmem:[#allocation24_spill] sm:$0xff]  ;;  %v1877_v48 = vmax.f32 %v1876_v13, %v1665_v16 }
 0x1d9   : > { %v3759_v5 = vsel %vm5254_vm7, %v3588_v52, -1e+30  ;;  %v3764_v18 = vsel %vm5256_vm4, %v3559_v50, -1e+30  ;;  %vm5261_vm3 = vcmp.eq.s32.totalorder %v3101_v34, 1  ;;  %vm5263_vm7 = vcmp.eq.s32.totalorder %v3098_v31, 1 }
 0x1da   : > { %5255 = vst [vmem:[#allocation8_spill] sm:$0xff] %v3759_v5  ;;  %5257 = vst [vmem:[#allocation9_spill] sm:$0xff] %v3764_v18  ;;  %v3774_v26 = vsel %vm5261_vm3, %v3538_v44, -1e+30  ;;  %v3779_v23 = vsel %vm5263_vm7, %v3525_v3, -1e+30  ;;  %v3826_v16 = vmax.f32 %v1868_v56, %v3621_v51  ;;  %v1885_v56 = vmax.f32 %v3660_v30, %v3569_v63 }
 0x1db   : > { %5262 = vst [vmem:[#allocation10_spill] sm:$0xff] %v3774_v26  ;;  %vm5264_vm4 = vcmp.eq.s32.totalorder %v3109_v42, 1  ;;  %5266 = vst [vmem:[#allocation15_spill] sm:$0xff] %v3787_v47  ;;  %v5267_v18 = vld [vmem:[#allocation25_spill] sm:$0xff]  ;;  %v5268_v5 = vld [vmem:[#allocation26_spill] sm:$0xff]  ;;  %vm5271_vm7 = vcmp.eq.s32.totalorder %v3117_v54, 1  ;;  %v1894_v30 = vmax.f32 %v3678_v21, %v3580_v12 }
 0x1dc   : > { %v3784_v55 = vsel %vm5264_vm4, %v3588_v52, -1e+30  ;;  %v5269_v34 = vld [vmem:[#allocation28_spill] sm:$0xff]  ;;  %v3795_v31 = vsel %vm1502_vm10, %v3559_v50, -1e+30  ;;  %vm5272_vm4 = vcmp.eq.s32.totalorder %v3114_v49, 1  ;;  %v1886_v21 = vmax.f32 %v1885_v56, %v3665_v8 }
 0x1dd   : > { %5265 = vst [vmem:[#allocation16_spill] sm:$0xff] %v3784_v55  ;;  %5270 = vst [vmem:[#allocation17_spill] sm:$0xff] %v3795_v31  ;;  %v3800_v42 = vsel %vm5271_vm7, %v3538_v44, -1e+30  ;;  %v3805_v0 = vsel %vm5272_vm4, %v3525_v3, -1e+30  ;;  %v3906_v8 = vmax.f32 %v1877_v48, %v3637_v7  ;;  %v1895_v48 = vmax.f32 %v1894_v30, %v3683_v25 }
 0x1de   : > { %v5273_v47 = vld [vmem:[#allocation27_spill] sm:$0xff]  ;;  %v5274_v55 = vld [vmem:[#allocation29_spill] sm:$0xff]  ;;  %v5275_v26 = vld [vmem:[#allocation30_spill] sm:$0xff]  ;;  %v3813_v39 = vsel %vm1505_vm5, %v3588_v52, -1e+30  ;;  %vm5276_vm10 = vcmp.eq.s32.totalorder %v3122_v1, 1  ;;  %v1903_v25 = vmax.f32 %v3696_v29, %v3701_v33  ;;  %v3966_v33 = vmax.f32 %v1886_v21, %v3670_v17 }
 0x1df   : > { %vm1536_vm8 = vcmp.eq.s32.totalorder %v5273_v47, 1  ;;  %vm1538_vm3 = vcmp.eq.s32.totalorder %v5274_v55, 1  ;;  %vm1537_vm11 = vcmp.eq.s32.totalorder %v5275_v26, 1  ;;  %v3818_v54 = vsel %vm5276_vm10, %v3559_v50, -1e+30  ;;  %5278 = vst [vmem:[#allocation19_spill] sm:$0xff] %v3826_v16 }
 0x1e0   : > { %5277 = vst [vmem:[#allocation18_spill] sm:$0xff] %v3818_v54  ;;  %v3823_v49 = vsel %vm1507_vm9, %v3538_v44, -1e+30  ;;  %v5279_v13 = vld [vmem:[#allocation31_spill] sm:$0xff]  ;;  %v5280_v31 = vld [vmem:[#allocation32_spill] sm:$0xff]  ;;  %v5281_v11 = vld [vmem:[#allocation34_spill] sm:$0xff]  ;;  %v1904_v21 = vmax.f32 %v1903_v25, %v3706_v32 }
 0x1e1   : > { %vm1539_vm4 = vcmp.eq.s32.totalorder %v5280_v31, 1  ;;  %v3834_v1 = vsel %vm1508_vm1, %v3525_v3, -1e+30  ;;  %v3839_v27 = vsel %vm1509_vm12, %v3588_v52, -1e+30  ;;  %vm5283_vm9 = vcmp.eq.s32.totalorder %v3141_v46, 1 }
 0x1e2   : > { %5282 = vst [vmem:[#allocation20_spill] sm:$0xff] %v3839_v27  ;;  %v3844_v51 = vsel %vm5283_vm9, %v3559_v50, -1e+30  ;;  %v5285_v16 = vld [vmem:[#allocation33_spill] sm:$0xff]  ;;  %v5286_v54 = vld [vmem:[#allocation35_spill] sm:$0xff]  ;;  %v5287_v22 = vld [vmem:[#allocation36_spill] sm:$0xff] }
 0x1e3   : > { %5284 = vst [vmem:[#allocation22_spill] sm:$0xff] %v3844_v51  ;;  %vm1542_vm10 = vcmp.eq.s32.totalorder %v5285_v16, 1  ;;  %vm5288_vm7 = vcmp.eq.s32.totalorder %v5234_v62, 1  ;;  %vm5290_vm12 = vcmp.eq.s32.totalorder %v5233_v35, 1  ;;  %vm5292_vm9 = vcmp.eq.s32.totalorder %v3169_v14, 1  ;;  %v5294_v51 = vld [vmem:[#allocation37_spill] sm:$0xff] }
 0x1e4   : > { %v3854_v43 = vsel %vm5288_vm7, %v3538_v44, -1e+30  ;;  %v3859_v46 = vsel %vm5290_vm12, %v3525_v3, -1e+30  ;;  %v3864_v63 = vsel %vm5292_vm9, %v3588_v52, -1e+30 }
 0x1e5   : > { %5289 = vst [vmem:[#allocation21_spill] sm:$0xff] %v3854_v43  ;;  %5291 = vst [vmem:[#allocation23_spill] sm:$0xff] %v3859_v46  ;;  %v5295_v27 = vld [vmem:[#allocation38_spill] sm:$0xff]  ;;  %v5296_v62 = vld [vmem:[#allocation40_spill] sm:$0xff]  ;;  %v3874_v35 = vsel %vm1514_vm2, %v3559_v50, -1e+30 }
 0x1e6   : > { %5293 = vst [vmem:[#allocation24_spill] sm:$0xff] %v3864_v63  ;;  %vm1545_vm1 = vcmp.eq.s32.totalorder %v5295_v27, 1  ;;  %5297 = vst [vmem:[#allocation25_spill] sm:$0xff] %v3874_v35  ;;  %v3879_v14 = vsel %vm1515_vm0, %v3538_v44, -1e+30  ;;  %vm5298_vm12 = vcmp.eq.s32.totalorder %v3177_v6, 1 }
 0x1e7   : > { %v3884_v12 = vsel %vm5298_vm12, %v3525_v3, -1e+30  ;;  %v5299_v63 = vld [vmem:[#allocation39_spill] sm:$0xff]  ;;  %v5300_v43 = vld [vmem:[#allocation41_spill] sm:$0xff]  ;;  %v5301_v46 = vld [vmem:[#allocation42_spill] sm:$0xff]  ;;  %vm5303_vm2 = vcmp.eq.s32.totalorder %v5241_v37, 1 }
 0x1e8   : > { %vm1548_vm9 = vcmp.eq.s32.totalorder %v5299_v63, 1  ;;  %vm1550_vm7 = vcmp.eq.s32.totalorder %v5300_v43, 1  ;;  %vm1549_vm5 = vcmp.eq.s32.totalorder %v5301_v46, 1  ;;  %v3893_v53 = vsel %vm1517_vm15, %v3588_v52, -1e+30  ;;  %5305 = vst [vmem:[#allocation27_spill] sm:$0xff] %v3906_v8 }
 0x1e9   : > { %v3898_v2 = vsel %vm1518_vm6, %v3559_v50, -1e+30  ;;  %v3903_v6 = vsel %vm5303_vm2, %v3538_v44, -1e+30  ;;  %v5306_v56 = vld [vmem:[#allocation47_spill] sm:$0xff]  ;;  %v5307_v35 = vld [vmem:[#allocation48_spill] sm:$0xff] }
 0x1ea   : > { %5302 = vst [vmem:[#allocation26_spill] sm:$0xff] %v3898_v2  ;;  %5304 = vst [vmem:[#allocation28_spill] sm:$0xff] %v3903_v6  ;;  %v5308_v60 = vld [vmem:[#allocation50_spill] sm:$0xff]  ;;  %v3914_v45 = vsel %vm1524_vm13, %v3525_v3, -1e+30  ;;  %vm5309_vm6 = vcmp.eq.s32.totalorder %v5246_v38, 1 }
 0x1eb   : > { %v3919_v37 = vsel %vm5309_vm6, %v3588_v52, -1e+30  ;;  %vm5310_vm2 = vcmp.eq.s32.totalorder %v5245_v19, 1  ;;  %v5312_v6 = vld [vmem:[#allocation49_spill] sm:$0xff]  ;;  %v5313_v8 = vld [vmem:[#allocation51_spill] sm:$0xff]  ;;  %v5314_v2 = vld [vmem:[#allocation52_spill] sm:$0xff] }
 0x1ec   : > { %v3924_v7 = vsel %vm5310_vm2, %v3559_v50, -1e+30  ;;  %vm1558_vm0 = vcmp.eq.s32.totalorder %v5312_v6, 1  ;;  %vm5315_vm13 = vcmp.eq.s32.totalorder %v5251_v28, 1  ;;  %vm5317_vm6 = vcmp.eq.s32.totalorder %v5250_v9, 1  ;;  %v5320_v30 = vld [vmem:[#allocation53_spill] sm:$0xff] }
 0x1ed   : > { %5311 = vst [vmem:[#allocation29_spill] sm:$0xff] %v3924_v7  ;;  %v3933_v20 = vsel %vm5315_vm13, %v3538_v44, -1e+30  ;;  %v3938_v38 = vsel %vm5317_vm6, %v3525_v3, -1e+30  ;;  %vm5318_vm2 = vcmp.eq.s32.totalorder %v5252_v57, 1 }
 0x1ee   : > { %5316 = vst [vmem:[#allocation30_spill] sm:$0xff] %v3933_v20  ;;  %v3943_v19 = vsel %vm5318_vm2, %v3588_v52, -1e+30  ;;  %v5321_v7 = vld [vmem:[#allocation54_spill] sm:$0xff]  ;;  %v5322_v28 = vld [vmem:[#allocation56_spill] sm:$0xff]  ;;  %vm5324_vm6 = vcmp.eq.s32.totalorder %v5260_v15, 1 }
 0x1ef   : > { %5319 = vst [vmem:[#allocation31_spill] sm:$0xff] %v3943_v19  ;;  %v3953_v9 = vsel %vm1530_vm14, %v3559_v50, -1e+30  ;;  %v3958_v57 = vsel %vm5324_vm6, %v3538_v44, -1e+30  ;;  %vm5326_vm2 = vcmp.eq.s32.totalorder %v5259_v61, 1 }
 0x1f0   : > { %5323 = vst [vmem:[#allocation32_spill] sm:$0xff] %v3953_v9  ;;  %5325 = vst [vmem:[#allocation34_spill] sm:$0xff] %v3958_v57  ;;  %v3963_v29 = vsel %vm5326_vm2, %v3525_v3, -1e+30  ;;  %v5328_v19 = vld [vmem:[#allocation55_spill] sm:$0xff]  ;;  %v5329_v20 = vld [vmem:[#allocation57_spill] sm:$0xff] }
 0x1f1   : > { %5327 = vst [vmem:[#allocation33_spill] sm:$0xff] %v3963_v29  ;;  %v5330_v59 = vld [vmem:[#allocation58_spill] sm:$0xff]  ;;  %vm5331_vm12 = vcmp.eq.s32.totalorder %v5268_v5, 1  ;;  %vm5333_vm6 = vcmp.eq.s32.totalorder %v5267_v18, 1  ;;  %vm5335_vm2 = vcmp.eq.s32.totalorder %v5269_v34, 1  ;;  %v5336_v57 = vld [vmem:[#allocation59_spill] sm:$0xff]  ;;  %v1921_v34 = vmax.f32 %v3721_v41, %v3726_v4 }
 0x1f2   : > { %v3974_v15 = vsel %vm5331_vm12, %v3588_v52, -1e+30  ;;  %v3979_v61 = vsel %vm5333_vm6, %v3559_v50, -1e+30  ;;  %v3984_v17 = vsel %vm5335_vm2, %v3538_v44, -1e+30  ;;  %v4026_v4 = vmax.f32 %v1895_v48, %v3688_v24 }
 0x1f3   : > { %5332 = vst [vmem:[#allocation35_spill] sm:$0xff] %v3974_v15  ;;  %5334 = vst [vmem:[#allocation36_spill] sm:$0xff] %v3979_v61  ;;  %vm1568_vm15 = vcmp.eq.s32.totalorder %v5336_v57, 1  ;;  %v5337_v29 = vld [vmem:[#allocation60_spill] sm:$0xff]  ;;  %v5338_v9 = vld [vmem:[#allocation62_spill] sm:$0xff]  ;;  %v1922_v24 = vmax.f32 %v1921_v34, %v3736_v40  ;;  %vm5369_vm6 = vcmp.eq.s32.totalorder %v5307_v35, 1 }
 0x1f4   : > { %vm1567_vm14 = vcmp.eq.s32.totalorder %v5337_v29, 1  ;;  %vm1569_vm13 = vcmp.eq.s32.totalorder %v5338_v9, 1  ;;  %v3993_v5 = vsel %vm1536_vm8, %v3525_v3, -1e+30  ;;  %v3998_v18 = vsel %vm1537_vm11, %v3588_v52, -1e+30 }
 0x1f5   : > { %5339 = vst [vmem:[#allocation37_spill] sm:$0xff] %v3998_v18  ;;  %v4003_v32 = vsel %vm1538_vm3, %v3559_v50, -1e+30  ;;  %v5341_v25 = vld [vmem:[#allocation61_spill] sm:$0xff]  ;;  %v5342_v61 = vld [vmem:[#allocation63_spill] sm:$0xff]  ;;  %v5343_v47 = vld [vmem:[#allocation64_spill] sm:$0xff] }
 0x1f6   : > { %5340 = vst [vmem:[#allocation38_spill] sm:$0xff] %v4003_v32  ;;  %vm1570_vm12 = vcmp.eq.s32.totalorder %v5341_v25, 1  ;;  %vm1571_vm8 = vcmp.eq.s32.totalorder %v5343_v47, 1  ;;  %v4013_v26 = vsel %vm1539_vm4, %v3538_v44, -1e+30  ;;  %vm5344_vm11 = vcmp.eq.s32.totalorder %v5279_v13, 1 }
 0x1f7   : > { %v4018_v55 = vsel %vm5344_vm11, %v3525_v3, -1e+30  ;;  %vm5345_vm3 = vcmp.eq.s32.totalorder %v5281_v11, 1  ;;  %v5347_v32 = vld [vmem:[#allocation65_spill] sm:$0xff]  ;;  %v5348_v18 = vld [vmem:[#allocation66_spill] sm:$0xff]  ;;  %vm5350_vm4 = vcmp.eq.s32.totalorder %v5287_v22, 1 }
 0x1f8   : > { %v4023_v41 = vsel %vm5345_vm3, %v3588_v52, -1e+30  ;;  %v4033_v31 = vsel %vm1542_vm10, %v3559_v50, -1e+30  ;;  %v4038_v13 = vsel %vm5350_vm4, %v3538_v44, -1e+30 }
 0x1f9   : > { %5346 = vst [vmem:[#allocation40_spill] sm:$0xff] %v4023_v41  ;;  %5349 = vst [vmem:[#allocation39_spill] sm:$0xff] %v4033_v31  ;;  %vm5351_vm11 = vcmp.eq.s32.totalorder %v5286_v54, 1  ;;  %v5352_v48 = vld [vmem:[#allocation67_spill] sm:$0xff]  ;;  %v5353_v41 = vld [vmem:[#allocation68_spill] sm:$0xff]  ;;  %vm5356_vm10 = vcmp.eq.s32.totalorder %v5294_v51, 1  ;;  %v4065_v54 = vmax.f32 %v1904_v21, %v3716_v36  ;;  %v1930_v21 = vmax.f32 %v3746_v58, %v3754_v10 }
 0x1fa   : > { %v4043_v11 = vsel %vm5351_vm11, %v3525_v3, -1e+30  ;;  %vm1576_vm3 = vcmp.eq.s32.totalorder %v5352_v48, 1  ;;  %vm1575_vm2 = vcmp.eq.s32.totalorder %v5353_v41, 1  ;;  %v5354_v15 = vld [vmem:[#allocation70_spill] sm:$0xff]  ;;  %vm5358_vm4 = vcmp.eq.s32.totalorder %v5296_v62, 1 }
 0x1fb   : > { %v4052_v16 = vsel %vm1545_vm1, %v3588_v52, -1e+30  ;;  %v4057_v22 = vsel %vm5356_vm10, %v3559_v50, -1e+30  ;;  %v4062_v40 = vsel %vm5358_vm4, %v3538_v44, -1e+30 }
 0x1fc   : > { %5355 = vst [vmem:[#allocation41_spill] sm:$0xff] %v4052_v16  ;;  %5357 = vst [vmem:[#allocation42_spill] sm:$0xff] %v4057_v22  ;;  %v5360_v34 = vld [vmem:[#allocation69_spill] sm:$0xff]  ;;  %v5361_v31 = vld [vmem:[#allocation71_spill] sm:$0xff]  ;;  %v4073_v51 = vsel %vm1548_vm9, %v3525_v3, -1e+30 }
 0x1fd   : > { %5359 = vst [vmem:[#allocation47_spill] sm:$0xff] %v4062_v40  ;;  %vm1578_vm11 = vcmp.eq.s32.totalorder %v5360_v34, 1  ;;  %v5362_v27 = vld [vmem:[#allocation72_spill] sm:$0xff]  ;;  %5363 = vst [vmem:[#allocation48_spill] sm:$0xff] %v4073_v51  ;;  %v4078_v62 = vsel %vm1549_vm5, %v3588_v52, -1e+30 }
 0x1fe   : > { %vm1579_vm1 = vcmp.eq.s32.totalorder %v5362_v27, 1  ;;  %5364 = vst [vmem:[#allocation50_spill] sm:$0xff] %v4078_v62  ;;  %v4083_v36 = vsel %vm1550_vm7, %v3559_v50, -1e+30  ;;  %v5366_v22 = vld [vmem:[#allocation73_spill] sm:$0xff]  ;;  %v5367_v16 = vld [vmem:[#allocation74_spill] sm:$0xff] }
 0x1ff   : > { %5365 = vst [vmem:[#allocation49_spill] sm:$0xff] %v4083_v36  ;;  %vm1581_vm4 = vcmp.eq.s32.totalorder %v5367_v16, 1  ;;  %v5368_v63 = vld [vmem:[#allocation80_spill] sm:$0xff]  ;;  %v4093_v46 = vsel %vm5369_vm6, %v3538_v44, -1e+30  ;;  %vm5371_vm5 = vcmp.eq.s32.totalorder %v5306_v56, 1 }
 0x200   : > { %5370 = vst [vmem:[#allocation51_spill] sm:$0xff] %v4093_v46  ;;  %v4098_v43 = vsel %vm5371_vm5, %v3525_v3, -1e+30  ;;  %vm5373_vm7 = vcmp.eq.s32.totalorder %v5308_v60, 1  ;;  %v5375_v10 = vld [vmem:[#allocation10_spill] sm:$0xff]  ;;  %v5376_v62 = vld [vmem:[#allocation79_spill] sm:$0xff] }
 0x201   : > { %5372 = vst [vmem:[#allocation52_spill] sm:$0xff] %v4098_v43  ;;  %v4103_v58 = vsel %vm5373_vm7, %v3588_v52, -1e+30  ;;  %v1939_v36 = vmax.f32 %v5375_v10, %v3779_v23  ;;  %v5377_v40 = vld [vmem:[#allocation81_spill] sm:$0xff]  ;;  %v5378_v35 = vld [vmem:[#allocation82_spill] sm:$0xff]  ;;  %vm5380_vm5 = vcmp.eq.s32.totalorder %v5314_v2, 1 }
 0x202   : > { %5374 = vst [vmem:[#allocation53_spill] sm:$0xff] %v4103_v58  ;;  %v4113_v56 = vsel %vm1558_vm0, %v3559_v50, -1e+30  ;;  %v4118_v60 = vsel %vm5380_vm5, %v3538_v44, -1e+30  ;;  %vm5382_vm7 = vcmp.eq.s32.totalorder %v5313_v8, 1 }
 0x203   : > { %5379 = vst [vmem:[#allocation54_spill] sm:$0xff] %v4113_v56  ;;  %5381 = vst [vmem:[#allocation56_spill] sm:$0xff] %v4118_v60  ;;  %v4123_v23 = vsel %vm5382_vm7, %v3525_v3, -1e+30  ;;  %v5384_v10 = vld [vmem:[#allocation8_spill] sm:$0xff]  ;;  %v5385_v46 = vld [vmem:[#allocation83_spill] sm:$0xff] }
 0x204   : > { %5383 = vst [vmem:[#allocation55_spill] sm:$0xff] %v4123_v23  ;;  %v1931_v58 = vmax.f32 %v1930_v21, %v5384_v10  ;;  %v5386_v43 = vld [vmem:[#allocation84_spill] sm:$0xff]  ;;  %v5387_v51 = vld [vmem:[#allocation86_spill] sm:$0xff]  ;;  %vm5388_vm0 = vcmp.eq.s32.totalorder %v5321_v7, 1  ;;  %vm5390_vm5 = vcmp.eq.s32.totalorder %v5320_v30, 1  ;;  %vm5392_vm7 = vcmp.eq.s32.totalorder %v5322_v28, 1 }
 0x205   : > { %v4132_v6 = vsel %vm5388_vm0, %v3588_v52, -1e+30  ;;  %v4137_v2 = vsel %vm5390_vm5, %v3559_v50, -1e+30  ;;  %v4142_v8 = vsel %vm5392_vm7, %v3538_v44, -1e+30 }
 0x206   : > { %5389 = vst [vmem:[#allocation57_spill] sm:$0xff] %v4132_v6  ;;  %5391 = vst [vmem:[#allocation58_spill] sm:$0xff] %v4137_v2  ;;  %v5394_v21 = vld [vmem:[#allocation7_spill] sm:$0xff]  ;;  %v5395_v60 = vld [vmem:[#allocation85_spill] sm:$0xff]  ;;  %vm5398_vm6 = vcmp.eq.s32.totalorder %v5328_v19, 1  ;;  %vm5399_vm5 = vcmp.eq.s32.totalorder %v5330_v59, 1 }
 0x207   : > { %5393 = vst [vmem:[#allocation59_spill] sm:$0xff] %v4142_v8  ;;  %v4145_v10 = vmax.f32 %v1922_v24, %v5394_v21  ;;  %v5396_v23 = vld [vmem:[#allocation87_spill] sm:$0xff]  ;;  %v5397_v7 = vld [vmem:[#allocation88_spill] sm:$0xff]  ;;  %v4153_v30 = vsel %vm5398_vm6, %v3525_v3, -1e+30  ;;  %vm5400_vm7 = vcmp.eq.s32.totalorder %v5329_v20, 1 }
 0x208   : > { %v4158_v28 = vsel %vm5399_vm5, %v3588_v52, -1e+30  ;;  %v4163_v24 = vsel %vm5400_vm7, %v3559_v50, -1e+30  ;;  %v5402_v21 = vld [vmem:[#allocation16_spill] sm:$0xff]  ;;  %v5403_v8 = vld [vmem:[#allocation89_spill] sm:$0xff] }
 0x209   : > { %5401 = vst [vmem:[#allocation60_spill] sm:$0xff] %v4163_v24  ;;  %v1940_v2 = vmax.f32 %v1939_v36, %v5402_v21  ;;  %vm1598_vm10 = vcmp.eq.s32.totalorder %v5403_v8, 1  ;;  %v5404_v6 = vld [vmem:[#allocation90_spill] sm:$0xff]  ;;  %v5405_v56 = vld [vmem:[#allocation92_spill] sm:$0xff]  ;;  %v4172_v19 = vsel %vm1567_vm14, %v3538_v44, -1e+30  ;;  %v1948_v36 = vmax.f32 %v3800_v42, %v3805_v0 }
 0x20a   : > { %vm1597_vm0 = vcmp.eq.s32.totalorder %v5404_v6, 1  ;;  %vm1599_vm9 = vcmp.eq.s32.totalorder %v5405_v56, 1  ;;  %5406 = vst [vmem:[#allocation62_spill] sm:$0xff] %v4172_v19  ;;  %v4177_v59 = vsel %vm1568_vm15, %v3525_v3, -1e+30  ;;  %v5409_v21 = vld [vmem:[#allocation91_spill] sm:$0xff] }
 0x20b   : > { %5407 = vst [vmem:[#allocation61_spill] sm:$0xff] %v4177_v59  ;;  %v4182_v20 = vsel %vm1569_vm13, %v3588_v52, -1e+30  ;;  %vm1600_vm6 = vcmp.eq.s32.totalorder %v5409_v21, 1  ;;  %v5410_v24 = vld [vmem:[#allocation93_spill] sm:$0xff]  ;;  %v5411_v29 = vld [vmem:[#allocation94_spill] sm:$0xff] }
 0x20c   : > { %5408 = vst [vmem:[#allocation63_spill] sm:$0xff] %v4182_v20  ;;  %vm1601_vm14 = vcmp.eq.s32.totalorder %v5411_v29, 1  ;;  %v4192_v57 = vsel %vm1570_vm12, %v3559_v50, -1e+30  ;;  %v4197_v9 = vsel %vm1571_vm8, %v3538_v44, -1e+30 }
 0x20d   : > { %5412 = vst [vmem:[#allocation64_spill] sm:$0xff] %v4192_v57  ;;  %5413 = vst [vmem:[#allocation65_spill] sm:$0xff] %v4197_v9  ;;  %vm5414_vm15 = vcmp.eq.s32.totalorder %v5342_v61, 1  ;;  %v5416_v0 = vld [vmem:[#allocation9_spill] sm:$0xff]  ;;  %v5417_v19 = vld [vmem:[#allocation95_spill] sm:$0xff]  ;;  %vm5420_vm5 = vcmp.eq.s32.totalorder %v5348_v18, 1  ;;  %v1949_v57 = vmax.f32 %v1948_v36, %v3813_v39 }
 0x20e   : > { %v4202_v42 = vsel %vm5414_vm15, %v3525_v3, -1e+30  ;;  %v4205_v20 = vmax.f32 %v1931_v58, %v5416_v0  ;;  %v5418_v59 = vld [vmem:[#allocation96_spill] sm:$0xff]  ;;  %v5419_v25 = vld [vmem:[#allocation98_spill] sm:$0xff]  ;;  %v4213_v47 = vsel %vm5420_vm5, %v3588_v52, -1e+30  ;;  %v1957_v58 = vmax.f32 %v3823_v49, %v3834_v1 }
 0x20f   : > { %5415 = vst [vmem:[#allocation66_spill] sm:$0xff] %v4202_v42  ;;  %vm1603_vm7 = vcmp.eq.s32.totalorder %v5418_v59, 1  ;;  %vm5421_vm8 = vcmp.eq.s32.totalorder %v5347_v32, 1  ;;  %v5423_v0 = vld [vmem:[#allocation97_spill] sm:$0xff]  ;;  %v5424_v9 = vld [vmem:[#allocation99_spill] sm:$0xff]  ;;  %v5425_v42 = vld [vmem:[#allocation100_spill] sm:$0xff] }
 0x210   : > { %v4218_v61 = vsel %vm5421_vm8, %v3559_v50, -1e+30  ;;  %vm1606_vm15 = vcmp.eq.s32.totalorder %v5423_v0, 1  ;;  %vm1608_vm13 = vcmp.eq.s32.totalorder %v5424_v9, 1  ;;  %vm1607_vm12 = vcmp.eq.s32.totalorder %v5425_v42, 1  ;;  %v5427_v49 = vld [vmem:[#allocation17_spill] sm:$0xff] }
 0x211   : > { %5422 = vst [vmem:[#allocation67_spill] sm:$0xff] %v4218_v61  ;;  %v4229_v18 = vsel %vm1575_vm2, %v3538_v44, -1e+30  ;;  %v4234_v32 = vsel %vm1576_vm3, %v3525_v3, -1e+30  ;;  %vm5426_vm5 = vcmp.eq.s32.totalorder %v5354_v15, 1  ;;  %v4242_v1 = vmax.f32 %v1940_v2, %v5427_v49 }
 0x212   : > { %v4239_v39 = vsel %vm5426_vm5, %v3588_v52, -1e+30  ;;  %v4247_v36 = vsel %vm1578_vm11, %v3559_v50, -1e+30  ;;  %v4252_v41 = vsel %vm1579_vm1, %v3538_v44, -1e+30 }
 0x213   : > { %5428 = vst [vmem:[#allocation68_spill] sm:$0xff] %v4247_v36  ;;  %vm5429_vm2 = vcmp.eq.s32.totalorder %v5361_v31, 1  ;;  %v5430_v15 = vld [vmem:[#allocation20_spill] sm:$0xff]  ;;  %v4263_v2 = vsel %vm1581_vm4, %v3588_v52, -1e+30  ;;  %vm5431_vm3 = vcmp.eq.s32.totalorder %v5366_v22, 1 }
 0x214   : > { %v4257_v48 = vsel %vm5429_vm2, %v3525_v3, -1e+30  ;;  %v1958_v61 = vmax.f32 %v1957_v58, %v5430_v15  ;;  %v4268_v34 = vsel %vm5431_vm3, %v3559_v50, -1e+30  ;;  %vm5433_vm11 = vcmp.eq.s32.totalorder %v5368_v63, 1  ;;  %v5434_v31 = vld [vmem:[#allocation18_spill] sm:$0xff] }
 0x215   : > { %5432 = vst [vmem:[#allocation70_spill] sm:$0xff] %v4268_v34  ;;  %v4273_v27 = vsel %vm5433_vm11, %v3538_v44, -1e+30  ;;  %v4276_v49 = vmax.f32 %v1949_v57, %v5434_v31  ;;  %vm5435_vm1 = vcmp.eq.s32.totalorder %v5376_v62, 1  ;;  %vm5436_vm4 = vcmp.eq.s32.totalorder %v5378_v35, 1  ;;  %v5439_v63 = vld [vmem:[#allocation23_spill] sm:$0xff]  ;;  %v4312_v31 = vpop.permute.xlu0 %1346 }
 0x216   : > { %v4281_v58 = vsel %vm5435_vm1, %v3525_v3, -1e+30  ;;  %v4286_v16 = vsel %vm5436_vm4, %v3588_v52, -1e+30  ;;  %vm5437_vm8 = vcmp.eq.s32.totalorder %v5377_v40, 1  ;;  %v5440_v15 = vld [vmem:[#allocation21_spill] sm:$0xff]  ;;  %v1975_v40 = vmax.f32 %v3879_v14, %v3884_v12 }
 0x217   : > { %v4291_v22 = vsel %vm5437_vm8, %v3559_v50, -1e+30  ;;  %v1966_v34 = vmax.f32 %v5440_v15, %v5439_v63  ;;  %vm5441_vm5 = vcmp.eq.s32.totalorder %v5386_v43, 1  ;;  %vm5442_vm2 = vcmp.eq.s32.totalorder %v5385_v46, 1  ;;  %v5450_v63 = vld [vmem:[#allocation24_spill] sm:$0xff]  ;;  %v5458_v56 = vld [vmem:[#allocation22_spill] sm:$0xff] }
 0x218   : > { %5438 = vst [vmem:[#allocation69_spill] sm:$0xff] %v4291_v22  ;;  %v4298_v57 = vsel %vm5441_vm5, %v3538_v44, -1e+30  ;;  %v4303_v62 = vsel %vm5442_vm2, %v3525_v3, -1e+30  ;;  %vm5443_vm3 = vcmp.eq.s32.totalorder %v5387_v51, 1 }
 0x219   : > { %v4308_v35 = vsel %vm5443_vm3, %v3588_v52, -1e+30  ;;  %vm5444_vm11 = vcmp.eq.s32.totalorder %v5395_v60, 1  ;;  %vm5446_vm1 = vcmp.eq.s32.totalorder %v5397_v7, 1  ;;  %vm5448_vm4 = vcmp.eq.s32.totalorder %v5396_v23, 1  ;;  %v5464_v29 = vld [vmem:[#allocation25_spill] sm:$0xff] }
 0x21a   : > { %v4317_v43 = vsel %vm5444_vm11, %v3559_v50, -1e+30  ;;  %v4322_v46 = vsel %vm5446_vm1, %v3538_v44, -1e+30  ;;  %v4327_v51 = vsel %vm5448_vm4, %v3525_v3, -1e+30  ;;  %v1967_v15 = vmax.f32 %v1966_v34, %v5450_v63 }
 0x21b   : > { %5445 = vst [vmem:[#allocation71_spill] sm:$0xff] %v4317_v43  ;;  %5447 = vst [vmem:[#allocation72_spill] sm:$0xff] %v4322_v46  ;;  %v4333_v14 = vsel %vm1597_vm0, %v3588_v52, -1e+30  ;;  %v4338_v12 = vsel %vm1598_vm10, %v3559_v50, -1e+30  ;;  %v1976_v23 = vmax.f32 %v1975_v40, %v3893_v53  ;;  %v4362_v34 = vmax.f32 %v1958_v61, %v5458_v56 }
 0x21c   : > { %5449 = vst [vmem:[#allocation73_spill] sm:$0xff] %v4327_v51  ;;  %5451 = vst [vmem:[#allocation74_spill] sm:$0xff] %v4333_v14  ;;  %v4343_v60 = vsel %vm1599_vm9, %v3538_v44, -1e+30  ;;  %v4349_v7 = vsel %vm1600_vm6, %v3525_v3, -1e+30  ;;  %v4381_v61 = vmax.f32 %v1967_v15, %v5464_v29 }
 0x21d   : > { %5452 = vst [vmem:[#allocation80_spill] sm:$0xff] %v4338_v12  ;;  %5453 = vst [vmem:[#allocation10_spill] sm:$0xff] %v4343_v60  ;;  %v4354_v6 = vsel %vm1601_vm14, %v3588_v52, -1e+30  ;;  %vm5456_vm10 = vcmp.eq.s32.totalorder %v5410_v24, 1  ;;  %vm1613_vm9 = vcmp.eq.s32.totalorder %v4312_v31, 1 }
 0x21e   : > { %5454 = vst [vmem:[#allocation79_spill] sm:$0xff] %v4349_v7  ;;  %5455 = vst [vmem:[#allocation81_spill] sm:$0xff] %v4354_v6  ;;  %v4359_v8 = vsel %vm5456_vm10, %v3559_v50, -1e+30  ;;  %v4368_v53 = vsel %vm1603_vm7, %v3538_v44, -1e+30 }
 0x21f   : > { %5457 = vst [vmem:[#allocation82_spill] sm:$0xff] %v4359_v8  ;;  %5459 = vst [vmem:[#allocation8_spill] sm:$0xff] %v4368_v53  ;;  %vm5460_vm0 = vcmp.eq.s32.totalorder %v5417_v19, 1  ;;  %vm5462_vm6 = vcmp.eq.s32.totalorder %v5419_v25, 1  ;;  %v4386_v40 = vsel %vm1606_vm15, %v3559_v50, -1e+30 }
 0x220   : > { %v4373_v21 = vsel %vm5460_vm0, %v3525_v3, -1e+30  ;;  %v4378_v24 = vsel %vm5462_vm6, %v3588_v52, -1e+30  ;;  %5465 = vst [vmem:[#allocation86_spill] sm:$0xff] %v4386_v40  ;;  %v5468_v25 = vld [vmem:[#allocation26_spill] sm:$0xff] }
 0x221   : > { %5461 = vst [vmem:[#allocation83_spill] sm:$0xff] %v4373_v21  ;;  %5463 = vst [vmem:[#allocation84_spill] sm:$0xff] %v4378_v24  ;;  %v4391_v59 = vsel %vm1607_vm12, %v3538_v44, -1e+30  ;;  %v4396_v19 = vsel %vm1608_vm13, %v3525_v3, -1e+30  ;;  %v4399_v63 = vmax.f32 %v1976_v23, %v5468_v25 }
 0x222   : > { %5466 = vst [vmem:[#allocation7_spill] sm:$0xff] %v4391_v59  ;;  %5467 = vst [vmem:[#allocation85_spill] sm:$0xff] %v4396_v19  ;;  %v5469_v15 = vld [vmem:[#allocation101_spill] sm:$0xff]  ;;  %v5470_v56 = vld [vmem:[#allocation103_spill] sm:$0xff]  ;;  %v1888_v21 = vrot.slane %v3966_v33, 4  ;;  %v1897_v9 = vrot.slane %v4026_v4, 4 }
 0x223   : > { %vm1610_vm14 = vcmp.eq.s32.totalorder %v5469_v15, 1  ;;  %vm1609_vm7 = vcmp.eq.s32.totalorder %v5470_v56, 1  ;;  %v5471_v0 = vld [vmem:[#allocation6_spill] sm:$0xff]  ;;  %v5472_v40 = vld [vmem:[#allocation15_spill] sm:$0xff]  ;;  %v1906_v3 = vrot.slane %v4065_v54, 4  ;;  %v1924_v23 = vrot.slane %v4145_v10, 4 }
 0x224   : > { %v1852_v29 = vrot.slane %v5471_v0, 4  ;;  %v1861_v24 = vrot.slane %v5472_v40, 4  ;;  %v5473_v53 = vld [vmem:[#allocation19_spill] sm:$0xff]  ;;  %v1889_v12 = vmax.f32 %v3966_v33, %v1888_v21  ;;  %v1898_v60 = vmax.f32 %v4026_v4, %v1897_v9 }
 0x225   : > { %v1870_v42 = vrot.slane %v5473_v53, 4  ;;  %v5474_v44 = vld [vmem:[#allocation27_spill] sm:$0xff]  ;;  %v1907_v7 = vmax.f32 %v4065_v54, %v1906_v3  ;;  %v1925_v14 = vmax.f32 %v4145_v10, %v1924_v23  ;;  %v4422_v23 = vsel %vm1609_vm7, %v3588_v52, -1e+30 }
 0x226   : > { %v1879_v59 = vrot.slane %v5474_v44, 4  ;;  %v1853_v25 = vmax.f32 %v5471_v0, %v1852_v29  ;;  %v1862_v19 = vmax.f32 %v5472_v40, %v1861_v24  ;;  %v1890_v36 = vrot.slane %v1889_v12, 2  ;;  %5475 = vst [vmem:[#allocation87_spill] sm:$0xff] %v4422_v23 }
 0x227   : > { %v1871_v8 = vmax.f32 %v5473_v53, %v1870_v42  ;;  %v1899_v0 = vrot.slane %v1898_v60, 2  ;;  %v1908_v29 = vrot.slane %v1907_v7, 2  ;;  %v1926_v24 = vrot.slane %v1925_v14, 2 }
 0x228   : > { %v1880_v6 = vmax.f32 %v5474_v44, %v1879_v59  ;;  %v1854_v46 = vrot.slane %v1853_v25, 2  ;;  %v1863_v51 = vrot.slane %v1862_v19, 2  ;;  %v1891_v59 = vmax.f32 %v1889_v12, %v1890_v36 }
 0x229   : > { %v1872_v43 = vrot.slane %v1871_v8, 2  ;;  %v1900_v33 = vmax.f32 %v1898_v60, %v1899_v0  ;;  %v1909_v21 = vmax.f32 %v1907_v7, %v1908_v29  ;;  %v1927_v4 = vmax.f32 %v1925_v14, %v1926_v24  ;;  %v5479_v24 = vld [vmem:[#allocation30_spill] sm:$0xff] }
 0x22a   : > { %v1881_v22 = vrot.slane %v1880_v6, 2  ;;  %v1855_v40 = vmax.f32 %v1853_v25, %v1854_v46  ;;  %v1864_v53 = vmax.f32 %v1862_v19, %v1863_v51  ;;  %v4427_v46 = vsel %vm1610_vm14, %v3559_v50, -1e+30 }
 0x22b   : > { %v1873_v42 = vmax.f32 %v1871_v8, %v1872_v43  ;;  %5476 = vst [vmem:[#allocation88_spill] sm:$0xff] %v4427_v46  ;;  %v4432_v36 = vsel %vm1613_vm9, %v3588_v52, -1e+30  ;;  %v1892_v51 = vrot.slane %v1891_v59, 1  ;;  %v1901_v14 = vrot.slane %v1900_v33, 1  ;;  %v5481_v52 = vld [vmem:[#allocation31_spill] sm:$0xff] }
 0x22c   : > { %v1882_v44 = vmax.f32 %v1880_v6, %v1881_v22  ;;  %v1856_v9 = vrot.slane %v1855_v40, 1  ;;  %v1865_v3 = vrot.slane %v1864_v53, 1  ;;  %v5477_v22 = vld [vmem:[#allocation28_spill] sm:$0xff]  ;;  %v1910_v12 = vrot.slane %v1909_v21, 1 }
 0x22d   : > { %v1874_v54 = vrot.slane %v1873_v42, 1  ;;  %v1993_v43 = vmax.f32 %v5477_v22, %v3914_v45  ;;  %v1928_v60 = vrot.slane %v1927_v4, 1  ;;  %v1933_v15 = vrot.slane %v4205_v20, 4 }
 0x22e   : > { %v1883_v10 = vrot.slane %v1882_v44, 1  ;;  %v4436_v7 = vmax.f32 %v1855_v40, %v1856_v9  ;;  %v4438_v6 = vmax.f32 %v1864_v53, %v1865_v3  ;;  %v1942_v31 = vrot.slane %v4242_v1, 4 }
 0x22f   : > { %v4440_v8 = vmax.f32 %v1873_v42, %v1874_v54  ;;  %v1951_v56 = vrot.slane %v4276_v49, 4  ;;  %v1960_v45 = vrot.slane %v4362_v34, 4  ;;  %v1969_v25 = vrot.slane %v4381_v61, 4 }
 0x230   : > { %v4442_v19 = vmax.f32 %v1882_v44, %v1883_v10  ;;  %v1978_v0 = vrot.slane %v4399_v63, 4  ;;  %v1994_v29 = vmax.f32 %v1993_v43, %v3919_v37  ;;  %v2002_v40 = vmax.f32 %v5479_v24, %v3938_v38  ;;  %v5480_v10 = vld [vmem:[#allocation29_spill] sm:$0xff]  ;;  %v4461_v37 = vpop.permute.xlu1 %1355  ;;  %v4463_v43 = vpop.permute.xlu0 %1352 }
 0x231   : > { %v1934_v53 = vmax.f32 %v4205_v20, %v1933_v15  ;;  %v1943_v42 = vmax.f32 %v4242_v1, %v1942_v31  ;;  %v1952_v44 = vmax.f32 %v4276_v49, %v1951_v56  ;;  %v1961_v9 = vmax.f32 %v4362_v34, %v1960_v45  ;;  %5482 = vst [vmem:[#allocation89_spill] sm:$0xff] %v4461_v37  ;;  %v5484_v34 = vld [vmem:[#allocation32_spill] sm:$0xff] }
 0x232   : > { %5478 = vst [vmem:[#allocation16_spill] sm:$0xff] %v4442_v19  ;;  %v1970_v3 = vmax.f32 %v4381_v61, %v1969_v25  ;;  %v1979_v54 = vmax.f32 %v4399_v63, %v1978_v0  ;;  %v1995_v22 = vmax.f32 %v1994_v29, %v5480_v10  ;;  %v2003_v50 = vmax.f32 %v2002_v40, %v5481_v52 }
 0x233   : > { %5483 = vst [vmem:[#allocation90_spill] sm:$0xff] %v4463_v43  ;;  %v1935_v38 = vrot.slane %v1934_v53, 2  ;;  %v1944_v20 = vrot.slane %v1943_v42, 2  ;;  %v1953_v15 = vrot.slane %v1952_v44, 2  ;;  %v1962_v1 = vrot.slane %v1961_v9, 2 }
 0x234   : > { %v1971_v31 = vrot.slane %v1970_v3, 2  ;;  %v1980_v49 = vrot.slane %v1979_v54, 2  ;;  %v1996_v56 = vrot.slane %v1995_v22, 4  ;;  %v2004_v45 = vmax.f32 %v2003_v50, %v5484_v34 }
 0x235   : > { %v1936_v61 = vmax.f32 %v1934_v53, %v1935_v38  ;;  %v1945_v25 = vmax.f32 %v1943_v42, %v1944_v20  ;;  %v1954_v63 = vmax.f32 %v1952_v44, %v1953_v15  ;;  %v1963_v0 = vmax.f32 %v1961_v9, %v1962_v1  ;;  %v4476_v42 = vpop.permute.xlu1 %1361  ;;  %v4478_v44 = vpop.permute.xlu0 %1358  ;;  %v5490_v1 = vld [vmem:[#allocation47_spill] sm:$0xff] }
 0x236   : > { %v4466_v29 = vmax.f32 %v1970_v3, %v1971_v31  ;;  %v4468_v52 = vmax.f32 %v1979_v54, %v1980_v49  ;;  %v1997_v24 = vmax.f32 %v1995_v22, %v1996_v56  ;;  %v2005_v40 = vrot.slane %v2004_v45, 4  ;;  %5485 = vst [vmem:[#allocation92_spill] sm:$0xff] %v4476_v42  ;;  %5486 = vst [vmem:[#allocation91_spill] sm:$0xff] %v4478_v44  ;;  %v5488_v22 = vld [vmem:[#allocation34_spill] sm:$0xff]  ;;  %v5491_v49 = vld [vmem:[#allocation52_spill] sm:$0xff] }
 0x237   : > { %v4470_v10 = vmax.f32 %v1891_v59, %v1892_v51  ;;  %v4472_v43 = vmax.f32 %v1900_v33, %v1901_v14  ;;  %v1937_v37 = vrot.slane %v1936_v61, 1  ;;  %v1946_v46 = vrot.slane %v1945_v25, 1  ;;  %v5492_v56 = vld [vmem:[#allocation51_spill] sm:$0xff] }
 0x238   : > { %v4474_v19 = vmax.f32 %v1909_v21, %v1910_v12  ;;  %v1955_v23 = vrot.slane %v1954_v63, 1  ;;  %v1998_v50 = vrot.slane %v1997_v24, 2  ;;  %v2006_v53 = vmax.f32 %v2004_v45, %v2005_v40  ;;  %v5487_v12 = vld [vmem:[#allocation33_spill] sm:$0xff]  ;;  %v5493_v45 = vld [vmem:[#allocation35_spill] sm:$0xff] }
 0x239   : > { %v4480_v9 = vmax.f32 %v1927_v4, %v1928_v60  ;;  %v1964_v3 = vrot.slane %v1963_v0, 1  ;;  %v4484_v33 = vmax.f32 %v1936_v61, %v1937_v37  ;;  %v4486_v51 = vmax.f32 %v1945_v25, %v1946_v46  ;;  %v5489_v46 = vld [vmem:[#allocation48_spill] sm:$0xff]  ;;  %v5494_v25 = vld [vmem:[#allocation37_spill] sm:$0xff] }
 0x23a   : > { %v4488_v21 = vmax.f32 %v1997_v24, %v1998_v50  ;;  %v2007_v14 = vrot.slane %v2006_v53, 2  ;;  %v2011_v38 = vmax.f32 %v5488_v22, %v5487_v12  ;;  %v2020_v20 = vmax.f32 %v3984_v17, %v3993_v5  ;;  %v5495_v5 = vld [vmem:[#allocation40_spill] sm:$0xff] }
 0x23b   : > { %v2029_v4 = vmax.f32 %v4013_v26, %v4018_v55  ;;  %v2038_v60 = vmax.f32 %v4038_v13, %v4043_v11  ;;  %v4498_v15 = vmax.f32 %v1954_v63, %v1955_v23  ;;  %v2047_v31 = vmax.f32 %v5490_v1, %v5489_v46  ;;  %v5496_v26 = vld [vmem:[#allocation41_spill] sm:$0xff]  ;;  %v5497_v11 = vld [vmem:[#allocation50_spill] sm:$0xff]  ;;  %v5501_v12 = vld [vmem:[#allocation36_spill] sm:$0xff] }
 0x23c   : > { %v4500_v37 = vmax.f32 %v2006_v53, %v2007_v14  ;;  %v2065_v34 = vmax.f32 %v5492_v56, %v5491_v49  ;;  %v2012_v61 = vmax.f32 %v2011_v38, %v5493_v45  ;;  %v2021_v17 = vmax.f32 %v2020_v20, %v5494_v25  ;;  %v5498_v63 = vld [vmem:[#allocation53_spill] sm:$0xff]  ;;  %v4515_v53 = vpop.permute.xlu1 %1367  ;;  %v4517_v14 = vpop.permute.xlu0 %1364  ;;  %v5502_v38 = vld [vmem:[#allocation38_spill] sm:$0xff]  ;;  %v5503_v46 = vld [vmem:[#allocation39_spill] sm:$0xff] }
 0x23d   : > { %v2030_v24 = vmax.f32 %v2029_v4, %v5495_v5  ;;  %v2039_v55 = vmax.f32 %v2038_v60, %v5496_v26  ;;  %v4510_v40 = vmax.f32 %v1963_v0, %v1964_v3  ;;  %v2000_v13 = vrot.slane %v4488_v21, 1  ;;  %5499 = vst [vmem:[#allocation93_spill] sm:$0xff] %v4515_v53  ;;  %5500 = vst [vmem:[#allocation94_spill] sm:$0xff] %v4517_v14  ;;  %v5504_v1 = vld [vmem:[#allocation42_spill] sm:$0xff]  ;;  %v5505_v3 = vld [vmem:[#allocation49_spill] sm:$0xff] }
 0x23e   : > { %v2048_v23 = vmax.f32 %v2047_v31, %v5497_v11  ;;  %v2066_v50 = vmax.f32 %v2065_v34, %v5498_v63  ;;  %v2013_v22 = vmax.f32 %v2012_v61, %v5501_v12  ;;  %v2022_v20 = vmax.f32 %v2021_v17, %v5502_v38  ;;  %v5506_v56 = vld [vmem:[#allocation54_spill] sm:$0xff]  ;;  %v5507_v45 = vld [vmem:[#allocation55_spill] sm:$0xff]  ;;  %v5508_v34 = vld [vmem:[#allocation56_spill] sm:$0xff] }
 0x23f   : > { %v2031_v4 = vmax.f32 %v2030_v24, %v5503_v46  ;;  %v2040_v60 = vmax.f32 %v2039_v55, %v5504_v1  ;;  %v2009_v0 = vrot.slane %v4500_v37, 1  ;;  %v2074_v25 = vmax.f32 %v5508_v34, %v5507_v45  ;;  %v5509_v17 = vld [vmem:[#allocation57_spill] sm:$0xff]  ;;  %v5510_v24 = vld [vmem:[#allocation59_spill] sm:$0xff] }
 0x240   : > { %v2049_v49 = vmax.f32 %v2048_v23, %v5505_v3  ;;  %v2067_v31 = vmax.f32 %v2066_v50, %v5506_v56  ;;  %v2014_v5 = vrot.slane %v2013_v22, 4  ;;  %v2023_v26 = vrot.slane %v2022_v20, 4  ;;  %v5511_v56 = vld [vmem:[#allocation58_spill] sm:$0xff]  ;;  %v4533_v34 = vpop.permute.xlu1 %1373  ;;  %v4535_v14 = vpop.permute.xlu0 %1370 }
 0x241   : > { %v2032_v11 = vrot.slane %v2031_v4, 4  ;;  %v2041_v63 = vrot.slane %v2040_v60, 4  ;;  %v2075_v38 = vmax.f32 %v2074_v25, %v5509_v17  ;;  %v2083_v55 = vmax.f32 %v5510_v24, %v4153_v30 }
 0x242   : > { %v2050_v61 = vrot.slane %v2049_v49, 4  ;;  %v2068_v12 = vrot.slane %v2067_v31, 4  ;;  %v2015_v46 = vmax.f32 %v2013_v22, %v2014_v5  ;;  %v2024_v1 = vmax.f32 %v2022_v20, %v2023_v26  ;;  %v5512_v20 = vld [vmem:[#allocation60_spill] sm:$0xff] }
 0x243   : > { %v2033_v59 = vmax.f32 %v2031_v4, %v2032_v11  ;;  %v2042_v23 = vmax.f32 %v2040_v60, %v2041_v63  ;;  %v2076_v54 = vmax.f32 %v2075_v38, %v5511_v56  ;;  %v2084_v45 = vmax.f32 %v2083_v55, %v4158_v28 }
 0x244   : > { %v2051_v3 = vmax.f32 %v2049_v49, %v2050_v61  ;;  %v2069_v50 = vmax.f32 %v2067_v31, %v2068_v12  ;;  %v2016_v53 = vrot.slane %v2015_v46, 2  ;;  %v2025_v44 = vrot.slane %v2024_v1, 2 }
 0x245   : > { %v2034_v25 = vrot.slane %v2033_v59, 2  ;;  %v2043_v17 = vrot.slane %v2042_v23, 2  ;;  %v2077_v22 = vrot.slane %v2076_v54, 4  ;;  %v2085_v4 = vmax.f32 %v2084_v45, %v5512_v20  ;;  %v5515_v45 = vld [vmem:[#allocation61_spill] sm:$0xff] }
 0x246   : > { %v2052_v42 = vrot.slane %v2051_v3, 2  ;;  %v2070_v30 = vrot.slane %v2069_v50, 2  ;;  %v2017_v60 = vmax.f32 %v2015_v46, %v2016_v53  ;;  %v2026_v49 = vmax.f32 %v2024_v1, %v2025_v44  ;;  %v4557_v1 = vpop.permute.xlu0 %1376 }
 0x247   : > { %v2035_v31 = vmax.f32 %v2033_v59, %v2034_v25  ;;  %v2044_v5 = vmax.f32 %v2042_v23, %v2043_v17  ;;  %v2078_v11 = vmax.f32 %v2076_v54, %v2077_v22  ;;  %v2086_v63 = vrot.slane %v2085_v4, 4  ;;  %v4555_v54 = vpop.permute.xlu1 %1379  ;;  %v5516_v25 = vld [vmem:[#allocation62_spill] sm:$0xff]  ;;  %v5518_v22 = vld [vmem:[#allocation65_spill] sm:$0xff] }
 0x248   : > { %v4538_v26 = vmax.f32 %v2051_v3, %v2052_v42  ;;  %v4540_v28 = vmax.f32 %v2069_v50, %v2070_v30  ;;  %v5513_v61 = vrot.slane %v4466_v29, 1  ;;  %v5514_v38 = vrot.slane %v4468_v52, 1  ;;  %v5517_v30 = vld [vmem:[#allocation66_spill] sm:$0xff] }
 0x249   : > { %v2018_v53 = vrot.slane %v2017_v60, 1  ;;  %v2027_v44 = vrot.slane %v2026_v49, 1  ;;  %v4553_v59 = vmax.f32 %v4488_v21, %v2000_v13  ;;  %v2036_v42 = vrot.slane %v2035_v31, 1 }
 0x24a   : > { %v4545_v12 = vmax.f32 %v4466_v29, %v5513_v61  ;;  %v4550_v24 = vmax.f32 %v4468_v52, %v5514_v38  ;;  %v2079_v55 = vrot.slane %v2078_v11, 2  ;;  %v2087_v46 = vmax.f32 %v2085_v4, %v2086_v63  ;;  %v5519_v63 = vld [vmem:[#allocation63_spill] sm:$0xff] }
 0x24b   : > { %v4560_v29 = vmax.f32 %v4500_v37, %v2009_v0  ;;  %v2045_v23 = vrot.slane %v2044_v5, 1  ;;  %v2054_v3 = vrot.slane %v4538_v26, 1  ;;  %v4564_v50 = vmax.f32 %v2017_v60, %v2018_v53 }
 0x24c   : > { %v4566_v56 = vmax.f32 %v2026_v49, %v2027_v44  ;;  %v4568_v21 = vmax.f32 %v2078_v11, %v2079_v55  ;;  %v2088_v13 = vrot.slane %v2087_v46, 2  ;;  %v2092_v17 = vmax.f32 %v5516_v25, %v5515_v45  ;;  %v5521_v44 = vld [vmem:[#allocation67_spill] sm:$0xff]  ;;  %v5523_v55 = vld [vmem:[#allocation70_spill] sm:$0xff]  ;;  %v5526_v45 = vld [vmem:[#allocation73_spill] sm:$0xff] }
 0x24d   : > { %v2101_v20 = vmax.f32 %v5518_v22, %v5517_v30  ;;  %v2110_v37 = vmax.f32 %v4229_v18, %v4234_v32  ;;  %v2119_v0 = vmax.f32 %v4252_v41, %v4257_v48  ;;  %v4578_v4 = vmax.f32 %v2035_v31, %v2036_v42  ;;  %v5522_v42 = vld [vmem:[#allocation68_spill] sm:$0xff] }
 0x24e   : > { %v4580_v60 = vmax.f32 %v2087_v46, %v2088_v13  ;;  %v2137_v49 = vmax.f32 %v4273_v27, %v4281_v58  ;;  %v2146_v11 = vmax.f32 %v4298_v57, %v4303_v62  ;;  %v2093_v61 = vmax.f32 %v2092_v17, %v5519_v63  ;;  %v4595_v27 = vpop.permute.xlu1 %1385  ;;  %v4597_v58 = vpop.permute.xlu0 %1382  ;;  %v5520_v57 = vld [vmem:[#allocation64_spill] sm:$0xff]  ;;  %v5524_v46 = vld [vmem:[#allocation69_spill] sm:$0xff]  ;;  %v5525_v13 = vld [vmem:[#allocation71_spill] sm:$0xff] }
 0x24f   : > { %v2102_v38 = vmax.f32 %v2101_v20, %v4213_v47  ;;  %v2111_v53 = vmax.f32 %v2110_v37, %v4239_v39  ;;  %v2120_v18 = vmax.f32 %v2119_v0, %v4263_v2  ;;  %v4590_v32 = vmax.f32 %v2044_v5, %v2045_v23  ;;  %v5529_v63 = vld [vmem:[#allocation79_spill] sm:$0xff] }
 0x250   : > { %v2081_v41 = vrot.slane %v4568_v21, 1  ;;  %v2138_v48 = vmax.f32 %v2137_v49, %v4286_v16  ;;  %v2147_v31 = vmax.f32 %v2146_v11, %v4308_v35  ;;  %v2094_v62 = vmax.f32 %v2093_v61, %v5520_v57  ;;  %v5527_v35 = vld [vmem:[#allocation72_spill] sm:$0xff]  ;;  %v5528_v49 = vld [vmem:[#allocation74_spill] sm:$0xff] }
 0x251   : > { %v2103_v47 = vmax.f32 %v2102_v38, %v5521_v44  ;;  %v2112_v39 = vmax.f32 %v2111_v53, %v5522_v42  ;;  %v2121_v2 = vmax.f32 %v2120_v18, %v5523_v55  ;;  %v2090_v5 = vrot.slane %v4580_v60, 1  ;;  %v5530_v61 = vld [vmem:[#allocation10_spill] sm:$0xff]  ;;  %v5531_v42 = vld [vmem:[#allocation80_spill] sm:$0xff] }
 0x252   : > { %v2139_v23 = vmax.f32 %v2138_v48, %v5524_v46  ;;  %v2148_v16 = vmax.f32 %v2147_v31, %v5525_v13  ;;  %v2155_v25 = vmax.f32 %v5527_v35, %v5526_v45  ;;  %v2095_v17 = vrot.slane %v2094_v62, 4  ;;  %v5532_v46 = vld [vmem:[#allocation81_spill] sm:$0xff]  ;;  %v4613_v45 = vpop.permute.xlu1 %1391  ;;  %v4615_v35 = vpop.permute.xlu0 %1388 }
 0x253   : > { %v2104_v30 = vrot.slane %v2103_v47, 4  ;;  %v2113_v22 = vrot.slane %v2112_v39, 4  ;;  %v2122_v20 = vrot.slane %v2121_v2, 4  ;;  %vm5112_vm13 = vcmask 1041409  }
 0x254   : > { %v2140_v37 = vrot.slane %v2139_v23, 4  ;;  %v2149_v0 = vrot.slane %v2148_v16, 4  ;;  %v2156_v11 = vmax.f32 %v2155_v25, %v5528_v49  ;;  %v2164_v38 = vmax.f32 %v5530_v61, %v5529_v63 }
 0x255   : > { %vm5113_vm12 = vcmask 1042434   ;;  %v2096_v53 = vmax.f32 %v2094_v62, %v2095_v17  ;;  %v2105_v18 = vmax.f32 %v2103_v47, %v2104_v30  ;;  %v2114_v48 = vmax.f32 %v2112_v39, %v2113_v22  ;;  %v5533_v39 = vld [vmem:[#allocation82_spill] sm:$0xff] }
 0x256   : > { %v2123_v31 = vmax.f32 %v2121_v2, %v2122_v20  ;;  %vm5114_vm15 = vcmask 1043459   ;;  %v2141_v57 = vmax.f32 %v2139_v23, %v2140_v37  ;;  %v2150_v44 = vmax.f32 %v2148_v16, %v2149_v0 }
 0x257   : > { %v2157_v55 = vmax.f32 %v2156_v11, %v5531_v42  ;;  %v2165_v13 = vmax.f32 %v2164_v38, %v5532_v46  ;;  %v2097_v25 = vrot.slane %v2096_v53, 2  ;;  %v2106_v49 = vrot.slane %v2105_v18, 2 }
 0x258   : > { %v2115_v52 = vrot.slane %v2114_v48, 2  ;;  %v2124_v63 = vrot.slane %v2123_v31, 2  ;;  %v2142_v61 = vrot.slane %v2141_v57, 2  ;;  %v2151_v62 = vrot.slane %v2150_v44, 2 }
 0x259   : > { %v2158_v47 = vrot.slane %v2157_v55, 4  ;;  %v2166_v2 = vmax.f32 %v2165_v13, %v5533_v39  ;;  %vm2335_vm8 = vcmask 1044484   ;;  %v2098_v23 = vmax.f32 %v2096_v53, %v2097_v25 }
 0x25a   : > { %v2107_v16 = vmax.f32 %v2105_v18, %v2106_v49  ;;  %v2116_v17 = vmax.f32 %v2114_v48, %v2115_v52  ;;  %v2125_v30 = vmax.f32 %v2123_v31, %v2124_v63  ;;  %v2143_v22 = vmax.f32 %v2141_v57, %v2142_v61  ;;  %v4627_v31 = vpop.permute.xlu1 %1403  ;;  %v4629_v57 = vpop.permute.xlu0 %1400 }
 0x25b   : > { %v2152_v20 = vmax.f32 %v2150_v44, %v2151_v62  ;;  %v2159_v37 = vmax.f32 %v2157_v55, %v2158_v47  ;;  %v2167_v0 = vrot.slane %v2166_v2, 4  ;;  %v4621_v11 = vmax.f32 %v4538_v26, %v2054_v3  ;;  %v5537_v62 = vld [vmem:[#allocation85_spill] sm:$0xff]  ;;  %v5538_v47 = vld [vmem:[#allocation7_spill] sm:$0xff] }
 0x25c   : > { %v5534_v38 = vrot.slane %v4540_v28, 1  ;;  %v2099_v46 = vrot.slane %v2098_v23, 1  ;;  %v2108_v13 = vrot.slane %v2107_v16, 1  ;;  %vm2337_vm5 = vcmask 1045509  }
 0x25d   : > { %v2082_v53 = vmax.f32 %v4568_v21, %v2081_v41  ;;  %v2117_v52 = vrot.slane %v2116_v17, 1  ;;  %v2160_v18 = vrot.slane %v2159_v37, 2  ;;  %v2168_v48 = vmax.f32 %v2166_v2, %v2167_v0  ;;  %v5535_v21 = vld [vmem:[#allocation83_spill] sm:$0xff]  ;;  %v5536_v41 = vld [vmem:[#allocation8_spill] sm:$0xff]  ;;  %v5540_v0 = vld [vmem:[#allocation106_spill] sm:$0xff] }
 0x25e   : > { %v2073_v42 = vmax.f32 %v4540_v28, %v5534_v38  ;;  %v2091_v44 = vmax.f32 %v4580_v60, %v2090_v5  ;;  %v2126_v26 = vrot.slane %v2125_v30, 1  ;;  %v2144_v3 = vrot.slane %v2143_v22, 1  ;;  %v5539_v2 = vld [vmem:[#allocation108_spill] sm:$0xff] }
 0x25f   : > { %v2153_v55 = vrot.slane %v2152_v20, 1  ;;  %v4632_v25 = vmax.f32 %v2098_v23, %v2099_v46  ;;  %v4634_v28 = vmax.f32 %v2107_v16, %v2108_v13  ;;  %v2161_v49 = vmax.f32 %v2159_v37, %v2160_v18  ;;  %v5542_v13 = vld [vmem:[#allocation84_spill] sm:$0xff] }
 0x260   : > { %v2169_v63 = vrot.slane %v2168_v48, 2  ;;  %vm2339_vm2 = vcmask 1046534   ;;  %v2173_v61 = vmax.f32 %v5536_v41, %v5535_v21  ;;  %v2182_v39 = vmax.f32 %v5538_v47, %v5537_v62  ;;  %v5543_v21 = vld [vmem:[#allocation87_spill] sm:$0xff]  ;;  %v5544_v62 = vld [vmem:[#allocation109_spill] sm:$0xff]  ;;  %v5545_v47 = vld [vmem:[#allocation16_spill] sm:$0xff] }
 0x261   : > { %v5541_v60 = vmax.f32 %v5539_v2, %v5540_v0  ;;  %v2330_v23 = vsel %vm5112_vm13, %v4438_v6, %v4436_v7  ;;  %v4647_v16 = vmax.f32 %v2116_v17, %v2117_v52  ;;  %v2343_v46 = vsel %vm5112_vm13, %v4484_v33, %v4480_v9  ;;  %v5546_v33 = vld [vmem:[#allocation86_spill] sm:$0xff] }
 0x262   : > { %v2170_v37 = vmax.f32 %v2168_v48, %v2169_v63  ;;  %v2332_v38 = vsel %vm5113_vm12, %v4440_v8, %v2330_v23  ;;  %v2174_v18 = vmax.f32 %v2173_v61, %v5542_v13  ;;  %v2183_v41 = vmax.f32 %v2182_v39, %v5543_v21  ;;  %v4661_v8 = vpop.permute.xlu1 %1412  ;;  %v4663_v48 = vpop.permute.xlu0 %1394  ;;  %v5547_v61 = vld [vmem:[#allocation88_spill] sm:$0xff]  ;;  %v5550_v13 = vld [vmem:[#allocation5_spill] sm:$0xff]  ;;  %v5552_v21 = vld [vmem:[#allocation11_spill] sm:$0xff] }
 0x263   : > { %v2192_v5 = vmax.f32 %v5541_v60, %v4432_v36  ;;  %v2334_v2 = vsel %vm5114_vm15, %v5545_v47, %v2332_v38  ;;  %v2145_v7 = vmax.f32 %v2143_v22, %v2144_v3  ;;  %v2154_v6 = vmax.f32 %v2152_v20, %v2153_v55 }
 0x264   : > { %v2162_v17 = vrot.slane %v2161_v49, 1  ;;  %v2344_v52 = vsel %vm5113_vm12, %v4486_v51, %v2343_v46  ;;  %v4665_v9 = vmax.f32 %v2125_v30, %v2126_v26  ;;  %v2175_v63 = vmax.f32 %v2174_v18, %v5546_v33  ;;  %v5548_v46 = vld [vmem:[#allocation2_spill] sm:$0xff] }
 0x265   : > { %v2193_v36 = vmax.f32 %v2192_v5, %v5544_v62  ;;  %v2184_v39 = vmax.f32 %v2183_v41, %v5547_v61  ;;  %v2171_v60 = vrot.slane %v2170_v37, 1  ;;  %v2336_v22 = vsel %vm2335_vm8, %v4470_v10, %v2334_v2  ;;  %v5555_v2 = vld [vmem:[#allocation14_spill] sm:$0xff] }
 0x266   : > { %v2345_v20 = vsel %vm5114_vm15, %v4498_v15, %v2344_v52  ;;  %v2350_v51 = vsel %vm5112_vm13, %v4560_v29, %v4553_v59  ;;  %v2176_v3 = vrot.slane %v2175_v63, 4  ;;  %v2163_v5 = vmax.f32 %v2161_v49, %v2162_v17  ;;  %v5549_v15 = vld [vmem:[#allocation3_spill] sm:$0xff]  ;;  %v5551_v49 = vld [vmem:[#allocation4_spill] sm:$0xff]  ;;  %v4697_v47 = vpop.permute.xlu0 %1415 }
 0x267   : > { %v2194_v0 = vrot.slane %v2193_v36, 4  ;;  %v2185_v55 = vrot.slane %v2184_v39, 4  ;;  %v2346_v26 = vsel %vm2335_vm8, %v4510_v40, %v2345_v20  ;;  %v2351_v23 = vsel %vm5113_vm12, %v4564_v50, %v2350_v51  ;;  %v5553_v50 = vld [vmem:[#allocation12_spill] sm:$0xff]  ;;  %v5557_v52 = vld [vmem:[#allocation43_spill] sm:$0xff] }
 0x268   : > { %v2357_v38 = vsel %vm5112_vm13, %v2082_v53, %v2073_v42  ;;  %v2364_v10 = vsel %vm5112_vm13, %v2154_v6, %v2145_v7  ;;  %vm1488_vm3 = vcmp.eq.s32.totalorder %v5548_v46, 1  ;;  %vm1487_vm11 = vcmp.eq.s32.totalorder %v5549_v15, 1  ;;  %v5556_v7 = vld [vmem:[#allocation44_spill] sm:$0xff] }
 0x269   : > { %v2195_v30 = vmax.f32 %v2193_v36, %v2194_v0  ;;  %vm1489_vm1 = vcmp.eq.s32.totalorder %v5550_v13, 1  ;;  %v2177_v59 = vmax.f32 %v2175_v63, %v2176_v3  ;;  %v2186_v29 = vmax.f32 %v2184_v39, %v2185_v55  ;;  %v4695_v36 = vpop.permute.xlu1 %1406  ;;  %v5560_v39 = vld [vmem:[#allocation89_spill] sm:$0xff]  ;;  %v5564_v55 = vld [vmem:[#allocation90_spill] sm:$0xff] }
 0x26a   : > { %v2338_v40 = vsel %vm2337_vm5, %v4472_v43, %v2336_v22  ;;  %vm1490_vm4 = vcmp.eq.s32.totalorder %v5551_v49, 1  ;;  %vm1519_vm9 = vcmp.eq.s32.totalorder %v5553_v50, 1  ;;  %v2172_v42 = vmax.f32 %v2170_v37, %v2171_v60  ;;  %v5554_v43 = vld [vmem:[#allocation13_spill] sm:$0xff]  ;;  %v5563_v60 = vld [vmem:[#allocation78_spill] sm:$0xff] }
 0x26b   : > { %v2196_v18 = vrot.slane %v2195_v30, 2  ;;  %v2347_v53 = vsel %vm2337_vm5, %v4545_v12, %v2346_v26  ;;  %v2352_v41 = vsel %vm5114_vm15, %v4566_v56, %v2351_v23  ;;  %v2358_v62 = vsel %vm5113_vm12, %v2091_v44, %v2357_v38  ;;  %v5558_v56 = vld [vmem:[#allocation46_spill] sm:$0xff]  ;;  %v5559_v44 = vld [vmem:[#allocation76_spill] sm:$0xff]  ;;  %v5561_v0 = vld [vmem:[#allocation45_spill] sm:$0xff] }
 0x26c   : > { %v2178_v6 = vrot.slane %v2177_v59, 2  ;;  %v2187_v37 = vrot.slane %v2186_v29, 2  ;;  %v2353_v12 = vsel %vm2335_vm8, %v4578_v4, %v2352_v41  ;;  %vm1553_vm13 = vcmp.eq.s32.totalorder %v5558_v56, 1  ;;  %v5562_v4 = vld [vmem:[#allocation75_spill] sm:$0xff]  ;;  %v5569_v41 = vld [vmem:[#allocation105_spill] sm:$0xff] }
 0x26d   : > { %v2197_v17 = vmax.f32 %v2195_v30, %v2196_v18  ;;  %vm1583_vm10 = vcmp.eq.s32.totalorder %v5559_v44, 1  ;;  %v4709_v33 = vsel %vm2339_vm2, %v4474_v19, %v2338_v40  ;;  %v2359_v63 = vsel %vm5114_vm15, %v4632_v25, %v2358_v62  ;;  %v5565_v30 = vld [vmem:[#allocation92_spill] sm:$0xff]  ;;  %v4746_v18 = vpop.permute.xlu0 %1424  ;;  %v5570_v62 = vld [vmem:[#allocation91_spill] sm:$0xff] }
 0x26e   : > { %v2365_v61 = vsel %vm5113_vm12, %v2163_v5, %v2364_v10  ;;  %vm1616_vm14 = vcmp.eq.s32.totalorder %v5560_v39, 1  ;;  %vm1584_vm6 = vcmp.eq.s32.totalorder %v5562_v4, 1  ;;  %v2179_v22 = vmax.f32 %v2177_v59, %v2178_v6  ;;  %v5579_v4 = vld [vmem:[#allocation93_spill] sm:$0xff] }
 0x26f   : > { %v2188_v20 = vmax.f32 %v2186_v29, %v2187_v37  ;;  %v2198_v51 = vrot.slane %v2197_v17, 1  ;;  %v2354_v19 = vsel %vm2337_vm5, %v4590_v32, %v2353_v12  ;;  %v4722_v3 = vsel %vm2339_vm2, %v4550_v24, %v2347_v53  ;;  %v4744_v29 = vpop.permute.xlu1 %1427 }
 0x270   : > { %v2360_v25 = vsel %vm2335_vm8, %v4634_v28, %v2359_v63  ;;  %vm1615_vm12 = vcmp.eq.s32.totalorder %v5564_v55, 1  ;;  %vm1618_vm0 = vcmp.eq.s32.totalorder %v5565_v30, 1  ;;  %v2180_v26 = vrot.slane %v2179_v22, 1  ;;  %v5566_v28 = vld [vmem:[#allocation102_spill] sm:$0xff] }
 0x271   : > { %v2189_v5 = vrot.slane %v2188_v20, 1  ;;  %v2361_v23 = vsel %vm2337_vm5, %v4647_v16, %v2360_v25  ;;  %v2366_v38 = vsel %vm5114_vm15, %v2172_v42, %v2365_v61  ;;  %v4731_v10 = vmax.f32 %v2197_v17, %v2198_v51  ;;  %v5567_v16 = vld [vmem:[#allocation77_spill] sm:$0xff]  ;;  %v5568_v42 = vld [vmem:[#allocation104_spill] sm:$0xff]  ;;  %v5571_v17 = vld [vmem:[#allocation107_spill] sm:$0xff]  ;;  %v4803_v56 = vpop.permute.xlu0 %1397 }
 0x272   : > { %v4735_v24 = vsel %vm2339_vm2, %v4621_v11, %v2354_v19  ;;  %v4739_v32 = vsel %vm2339_vm2, %v4665_v9, %v2361_v23  ;;  %v1808_v59 = vsel %vm1616_vm14, %v5566_v28, -1e+30  ;;  %vm1586_vm15 = vcmp.eq.s32.totalorder %v5567_v16, 1 }
 0x273   : > { %v2181_v40 = vmax.f32 %v2179_v22, %v2180_v26  ;;  %v1807_v53 = vsel %vm1615_vm12, %v5568_v42, -1e+30  ;;  %v1810_v11 = vsel %vm1618_vm0, %v5569_v41, -1e+30  ;;  %vm1617_vm7 = vcmp.eq.s32.totalorder %v5570_v62, 1  ;;  %v4801_v19 = vpop.permute.xlu1 %1418 }
 0x274   : > { %v2190_v6 = vmax.f32 %v2188_v20, %v2189_v5  ;;  %v1679_v9 = vsel %vm1487_vm11, %v5568_v42, -1e+30  ;;  %v1680_v37 = vsel %vm1488_vm3, %v5566_v28, -1e+30  ;;  %v1681_v12 = vsel %vm1489_vm1, %v5571_v17, -1e+30 }
 0x275   : > { %v2367_v63 = vsel %vm2335_vm8, %v2181_v40, %v2366_v38  ;;  %v1682_v61 = vsel %vm1490_vm4, %v5569_v41, -1e+30  ;;  %v1711_v39 = vsel %vm1519_vm9, %v5568_v42, -1e+30  ;;  %vm5572_vm12 = vcmp.eq.s32.totalorder %v5552_v21, 1  ;;  %v5580_v5 = vld [vmem:[#allocation94_spill] sm:$0xff] }
 0x276   : > { %v1712_v15 = vsel %vm5572_vm12, %v5566_v28, -1e+30  ;;  %v2200_v46 = vmax.f32 %v1807_v53, %v1808_v59  ;;  %vm5573_vm3 = vcmp.eq.s32.totalorder %v5555_v2, 1  ;;  %vm5574_vm11 = vcmp.eq.s32.totalorder %v5554_v43, 1 }
 0x277   : > { %v1713_v13 = vsel %vm5573_vm3, %v5571_v17, -1e+30  ;;  %v1714_v22 = vsel %vm5574_vm11, %v5569_v41, -1e+30  ;;  %vm5575_vm1 = vcmp.eq.s32.totalorder %v5556_v7, 1  ;;  %v4781_v50 = vsel %vm2337_vm5, %v2190_v6, %v2367_v63 }
 0x278   : > { %v1743_v49 = vsel %vm5575_vm1, %v5568_v42, -1e+30  ;;  %vm5576_vm4 = vcmp.eq.s32.totalorder %v5557_v52, 1  ;;  %v1745_v2 = vsel %vm1553_vm13, %v5571_v17, -1e+30  ;;  %vm5577_vm9 = vcmp.eq.s32.totalorder %v5561_v0, 1 }
 0x279   : > { %v1744_v21 = vsel %vm5576_vm4, %v5566_v28, -1e+30  ;;  %v1775_v43 = vsel %vm1583_vm10, %v5568_v42, -1e+30  ;;  %v1746_v7 = vsel %vm5577_vm9, %v5569_v41, -1e+30  ;;  %v1912_v51 = vmax.f32 %v1679_v9, %v1680_v37 }
 0x27a   : > { %v1776_v20 = vsel %vm1584_vm6, %v5566_v28, -1e+30  ;;  %vm5578_vm0 = vcmp.eq.s32.totalorder %v5563_v60, 1  ;;  %v1809_v44 = vsel %vm1617_vm7, %v5571_v17, -1e+30  ;;  %v1984_v25 = vmax.f32 %v1711_v39, %v1712_v15 }
 0x27b   : > { %v1777_v52 = vsel %vm5578_vm0, %v5571_v17, -1e+30  ;;  %v2056_v0 = vmax.f32 %v1743_v49, %v1744_v21  ;;  %v2128_v55 = vmax.f32 %v1775_v43, %v1776_v20  ;;  %v1913_v30 = vmax.f32 %v1912_v51, %v1681_v12 }
 0x27c   : > { %v2201_v26 = vmax.f32 %v2200_v46, %v1809_v44  ;;  %vm1620_vm13 = vcmp.eq.s32.totalorder %v5579_v4, 1  ;;  %vm1619_vm10 = vcmp.eq.s32.totalorder %v5580_v5, 1  ;;  %v1985_v60 = vmax.f32 %v1984_v25, %v1713_v13  ;;  %v4817_v46 = vpop.permute.xlu1 %1439  ;;  %v4819_v13 = vpop.permute.xlu0 %1436 }
 0x27d   : > { %v2057_v23 = vmax.f32 %v2056_v0, %v1745_v2  ;;  %v2129_v38 = vmax.f32 %v2128_v55, %v1777_v52  ;;  %v1812_v59 = vsel %vm1620_vm13, %v5566_v28, -1e+30  ;;  %v1778_v40 = vsel %vm1586_vm15, %v5569_v41, -1e+30 }
 0x27e   : > { %v1914_v53 = vmax.f32 %v1913_v30, %v1682_v61  ;;  %v2202_v62 = vmax.f32 %v2201_v26, %v1810_v11  ;;  %v1811_v6 = vsel %vm1619_vm10, %v5568_v42, -1e+30  ;;  %v1986_v9 = vmax.f32 %v1985_v60, %v1714_v22 }
 0x27f   : > { %v2058_v37 = vmax.f32 %v2057_v23, %v1746_v7  ;;  %v2130_v12 = vmax.f32 %v2129_v38, %v1778_v40  ;;  %vm1622_vm6 = vcmp.eq.s32.totalorder %v4533_v34, 1  ;;  %v2209_v15 = vmax.f32 %v1811_v6, %v1812_v59 }
 0x280   : > { %v1915_v63 = vrot.slane %v1914_v53, 4  ;;  %v2203_v39 = vrot.slane %v2202_v62, 4  ;;  %vm1621_vm14 = vcmp.eq.s32.totalorder %v4535_v14, 1  ;;  %v1987_v16 = vrot.slane %v1986_v9, 4  ;;  %v4829_v5 = vpop.permute.xlu1 %1430  ;;  %v4831_v60 = vpop.permute.xlu0 %1409 }
 0x281   : > { %v2059_v49 = vrot.slane %v2058_v37, 4  ;;  %v2131_v61 = vrot.slane %v2130_v12, 4  ;;  %v1813_v11 = vsel %vm1621_vm14, %v5571_v17, -1e+30  ;;  %vm1624_vm15 = vcmp.eq.s32.totalorder %v4555_v54, 1 }
 0x282   : > { %v1916_v21 = vmax.f32 %v1914_v53, %v1915_v63  ;;  %v2204_v22 = vmax.f32 %v2202_v62, %v2203_v39  ;;  %v2210_v2 = vmax.f32 %v2209_v15, %v1813_v11  ;;  %v1988_v43 = vmax.f32 %v1986_v9, %v1987_v16  ;;  %v1845_v15 = vld [vmem:[%s4994_s6 + $0x10] sm:$0xff]  ;;  %v1847_v16 = vld [vmem:[%s4994_s6 + $0x20] sm:$0xff] }
 0x283   : > { %v2060_v7 = vmax.f32 %v2058_v37, %v2059_v49  ;;  %v2132_v20 = vmax.f32 %v2130_v12, %v2131_v61  ;;  %v1814_v14 = vsel %vm1622_vm6, %v5569_v41, -1e+30  ;;  %v1816_v44 = vsel %vm1624_vm15, %v5566_v28, -1e+30  ;;  %v1843_v37 = vld [vmem:[%s4994_s6] sm:$0xff] }
 0x284   : > { %v1917_v52 = vrot.slane %v1916_v21, 2  ;;  %v2205_v51 = vrot.slane %v2204_v22, 2  ;;  %vm1623_vm7 = vcmp.eq.s32.totalorder %v4557_v1, 1  ;;  %v1989_v25 = vrot.slane %v1988_v43, 2 }
 0x285   : > { %v2061_v0 = vrot.slane %v2060_v7, 2  ;;  %v2133_v55 = vrot.slane %v2132_v20, 2  ;;  %v1815_v30 = vsel %vm1623_vm7, %v5568_v42, -1e+30  ;;  %vm2341_vm12 = vcmask 1047559  }
 0x286   : > { %v1918_v54 = vmax.f32 %v1916_v21, %v1917_v52  ;;  %v2206_v26 = vmax.f32 %v2204_v22, %v2205_v51  ;;  %v2211_v4 = vmax.f32 %v2210_v2, %v1814_v14  ;;  %v2369_v34 = vsel %vm2339_vm2, %v4731_v10, %v4781_v50  ;;  %v1844_v10 = vld [vmem:[%s4994_s6 + $0x8] sm:$0xff] }
 0x287   : > { %v1990_v23 = vmax.f32 %v1988_v43, %v1989_v25  ;;  %v2062_v38 = vmax.f32 %v2060_v7, %v2061_v0  ;;  %v2134_v1 = vmax.f32 %v2132_v20, %v2133_v55  ;;  %v2218_v53 = vmax.f32 %v1815_v30, %v1816_v44  ;;  %v4861_v7 = vpop.permute.xlu1 %1451  ;;  %v4863_v20 = vpop.permute.xlu0 %1448 }
 0x288   : > { %v1919_v59 = vrot.slane %v1918_v54, 1  ;;  %v2207_v40 = vrot.slane %v2206_v26, 1  ;;  %vm1626_vm3 = vcmp.eq.s32.totalorder %v4595_v27, 1  ;;  %vm1625_vm11 = vcmp.eq.s32.totalorder %v4597_v58, 1  ;;  %v1846_v58 = vld [vmem:[%s4994_s6 + $0x18] sm:$0xff] }
 0x289   : > { %v1991_v62 = vrot.slane %v1990_v23, 1  ;;  %v2063_v6 = vrot.slane %v2062_v38, 1  ;;  %v2135_v9 = vrot.slane %v2134_v1, 1  ;;  %v2212_v63 = vrot.slane %v2211_v4, 4 }
 0x28a   : > { %v1920_v50 = vmax.f32 %v1918_v54, %v1919_v59  ;;  %v2208_v12 = vmax.f32 %v2206_v26, %v2207_v40  ;;  %v1817_v39 = vsel %vm1625_vm11, %v5571_v17, -1e+30  ;;  %v1818_v43 = vsel %vm1626_vm3, %v5569_v41, -1e+30 }
 0x28b   : > { %v1992_v49 = vmax.f32 %v1990_v23, %v1991_v62  ;;  %v2064_v61 = vmax.f32 %v2062_v38, %v2063_v6  ;;  %v2136_v11 = vmax.f32 %v2134_v1, %v2135_v9  ;;  %v2219_v21 = vmax.f32 %v2218_v53, %v1817_v39  ;;  %v1443_v30 = vpop.permute.xlu1 %1442  ;;  %v1422_v54 = vpop.permute.xlu0 %1421 }
 0x28c   : > { %v2342_v22 = vsel %vm2341_vm12, %v1920_v50, %v4709_v33  ;;  %v2370_v2 = vsel %vm2341_vm12, %v2208_v12, %v2369_v34  ;;  %vm1628_vm1 = vcmp.eq.s32.totalorder %v4613_v45, 1  ;;  %vm1627_vm4 = vcmp.eq.s32.totalorder %v4615_v35, 1 }
 0x28d   : > { %v2349_v14 = vsel %vm2341_vm12, %v1992_v49, %v4722_v3  ;;  %v2356_v52 = vsel %vm2341_vm12, %v2064_v61, %v4735_v24  ;;  %v2363_v33 = vsel %vm2341_vm12, %v2136_v11, %v4739_v32  ;;  %v2384_v51 = vmax.f32 %v1843_v37, %v2342_v22 }
 0x28e   : > { %v2385_v44 = vmax.f32 %v1844_v10, %v2349_v14  ;;  %v2386_v25 = vmax.f32 %v1845_v15, %v2356_v52  ;;  %v2387_v27 = vmax.f32 %v1846_v58, %v2363_v33  ;;  %v2388_v0 = vmax.f32 %v1847_v16, %v2370_v2 }
 0x28f   : > { %2390 = vst [vmem:[%s4994_s6] sm:$0xff] %v2384_v51  ;;  %v2220_v55 = vmax.f32 %v2219_v21, %v1818_v43  ;;  %v1820_v35 = vsel %vm1628_vm1, %v5566_v28, -1e+30  ;;  %v1819_v3 = vsel %vm1627_vm4, %v5568_v42, -1e+30  ;;  %v4891_v24 = vmax.f32 %v2211_v4, %v2212_v63  ;;  %v1434_v53 = vpop.permute.xlu0 %1433 }
 0x290   : > { %2391 = vst [vmem:[%s4994_s6 + $0x8] sm:$0xff] %v2385_v44  ;;  %2392 = vst [vmem:[%s4994_s6 + $0x10] sm:$0xff] %v2386_v25  ;;  %vm1632_vm9 = vcmp.eq.s32.totalorder %v4627_v31, 1  ;;  %vm1631_vm0 = vcmp.eq.s32.totalorder %v4629_v57, 1  ;;  %vm1635_vm13 = vcmp.eq.s32.totalorder %v4661_v8, 1  ;;  %vm1629_vm10 = vcmp.eq.s32.totalorder %v4663_v48, 1 }
 0x291   : > { %2393 = vst [vmem:[%s4994_s6 + $0x18] sm:$0xff] %v2387_v27  ;;  %2394 = vst [vmem:[%s4994_s6 + $0x20] sm:$0xff] %v2388_v0  ;;  %v2221_v32 = vrot.slane %v2220_v55, 4  ;;  %vm1633_vm6 = vcmp.eq.s32.totalorder %v4695_v36, 1  ;;  %v2227_v45 = vmax.f32 %v1819_v3, %v1820_v35  ;;  %v1821_v34 = vsel %vm1629_vm10, %v5571_v17, -1e+30 }
 0x292   : > { %v1824_v4 = vsel %vm1632_vm9, %v5566_v28, -1e+30  ;;  %v1823_v23 = vsel %vm1631_vm0, %v5568_v42, -1e+30  ;;  %vm1636_vm14 = vcmp.eq.s32.totalorder %v4697_v47, 1  ;;  %vm1640_vm15 = vcmp.eq.s32.totalorder %v4744_v29, 1 }
 0x293   : > { %v2222_v26 = vmax.f32 %v2220_v55, %v2221_v32  ;;  %v2214_v31 = vrot.slane %v4891_v24, 2  ;;  %v1827_v57 = vsel %vm1635_vm13, %v5568_v42, -1e+30  ;;  %v1825_v8 = vsel %vm1633_vm6, %v5571_v17, -1e+30  ;;  %v1446_v61 = vpop.permute.xlu0 %1445 }
 0x294   : > { %vm1639_vm7 = vcmp.eq.s32.totalorder %v4746_v18, 1  ;;  %v2228_v48 = vmax.f32 %v2227_v45, %v1821_v34  ;;  %v1828_v36 = vsel %vm1636_vm14, %v5566_v28, -1e+30  ;;  %vm1637_vm3 = vcmp.eq.s32.totalorder %v4801_v19, 1  ;;  %v1455_v18 = vpop.permute.xlu1 %1454 }
 0x295   : > { %vm1630_vm11 = vcmp.eq.s32.totalorder %v4803_v56, 1  ;;  %v2223_v38 = vrot.slane %v2222_v26, 2  ;;  %v2236_v1 = vmax.f32 %v1823_v23, %v1824_v4  ;;  %v1832_v47 = vsel %vm1640_vm15, %v5566_v28, -1e+30 }
 0x296   : > { %v1822_v29 = vsel %vm1630_vm11, %v5569_v41, -1e+30  ;;  %v1831_v59 = vsel %vm1639_vm7, %v5568_v42, -1e+30  ;;  %vm1644_vm1 = vcmp.eq.s32.totalorder %v4817_v46, 1  ;;  %vm1643_vm4 = vcmp.eq.s32.totalorder %v4819_v13, 1 }
 0x297   : > { %v2229_v40 = vmax.f32 %v2228_v48, %v1822_v29  ;;  %v2237_v62 = vmax.f32 %v2236_v1, %v1825_v8  ;;  %v2245_v6 = vmax.f32 %v1827_v57, %v1828_v36  ;;  %v1829_v19 = vsel %vm1637_vm3, %v5571_v17, -1e+30 }
 0x298   : > { %v1836_v56 = vsel %vm1644_vm1, %v5566_v28, -1e+30  ;;  %v1835_v37 = vsel %vm1643_vm4, %v5568_v42, -1e+30  ;;  %vm1641_vm9 = vcmp.eq.s32.totalorder %v4829_v5, 1  ;;  %vm1634_vm0 = vcmp.eq.s32.totalorder %v4831_v60, 1  ;;  %v1458_v49 = vpop.permute.xlu1 %1457 }
 0x299   : > { %v2230_v9 = vrot.slane %v2229_v40, 4  ;;  %v2224_v10 = vmax.f32 %v2222_v26, %v2223_v38  ;;  %v2254_v50 = vmax.f32 %v1831_v59, %v1832_v47  ;;  %v1826_v46 = vsel %vm1634_vm0, %v5569_v41, -1e+30 }
 0x29a   : > { %vm1648_vm13 = vcmp.eq.s32.totalorder %v4861_v7, 1  ;;  %v2246_v13 = vmax.f32 %v2245_v6, %v1829_v19  ;;  %v2238_v63 = vmax.f32 %v2237_v62, %v1826_v46  ;;  %vm1647_vm10 = vcmp.eq.s32.totalorder %v4863_v20, 1 }
 0x29b   : > { %v2231_v12 = vmax.f32 %v2229_v40, %v2230_v9  ;;  %v2263_v39 = vmax.f32 %v1835_v37, %v1836_v56  ;;  %v1833_v15 = vsel %vm1641_vm9, %v5571_v17, -1e+30  ;;  %vm1645_vm6 = vcmp.eq.s32.totalorder %v1443_v30, 1 }
 0x29c   : > { %vm1638_vm14 = vcmp.eq.s32.totalorder %v1422_v54, 1  ;;  %v2239_v5 = vrot.slane %v2238_v63, 4  ;;  %v1840_v60 = vsel %vm1648_vm13, %v5566_v28, -1e+30  ;;  %v1839_v16 = vsel %vm1647_vm10, %v5568_v42, -1e+30 }
 0x29d   : > { %v2232_v58 = vrot.slane %v2231_v12, 2  ;;  %v1837_v11 = vsel %vm1645_vm6, %v5571_v17, -1e+30  ;;  %v1830_v21 = vsel %vm1638_vm14, %v5569_v41, -1e+30  ;;  %vm1649_vm15 = vcmp.eq.s32.totalorder %v1455_v18, 1 }
 0x29e   : > { %vm1642_vm7 = vcmp.eq.s32.totalorder %v1434_v53, 1  ;;  %v2255_v22 = vmax.f32 %v2254_v50, %v1833_v15  ;;  %v2240_v2 = vmax.f32 %v2238_v63, %v2239_v5  ;;  %v2247_v43 = vmax.f32 %v2246_v13, %v1830_v21 }
 0x29f   : > { %v1841_v7 = vsel %vm1649_vm15, %v5571_v17, -1e+30  ;;  %v2272_v20 = vmax.f32 %v1839_v16, %v1840_v60  ;;  %v1834_v14 = vsel %vm1642_vm7, %v5569_v41, -1e+30  ;;  %vm1650_vm3 = vcmp.eq.s32.totalorder %v1458_v49, 1 }
 0x2a0   : > { %vm1646_vm11 = vcmp.eq.s32.totalorder %v1446_v61, 1  ;;  %v2241_v28 = vrot.slane %v2240_v2, 2  ;;  %v2264_v42 = vmax.f32 %v2263_v39, %v1837_v11  ;;  %v2248_v52 = vrot.slane %v2247_v43, 4  ;;  %v1848_v39 = vld [vmem:[%s4994_s6 + $0x28] sm:$0xff] }
 0x2a1   : > { %v2256_v33 = vmax.f32 %v2255_v22, %v1834_v14  ;;  %v2233_v51 = vmax.f32 %v2231_v12, %v2232_v58  ;;  %v2273_v44 = vmax.f32 %v2272_v20, %v1841_v7  ;;  %v1842_v25 = vsel %vm1650_vm3, %v5569_v41, -1e+30 }
 0x2a2   : > { %v1838_v27 = vsel %vm1646_vm11, %v5569_v41, -1e+30  ;;  %v2215_v0 = vmax.f32 %v4891_v24, %v2214_v31  ;;  %v2242_v17 = vmax.f32 %v2240_v2, %v2241_v28  ;;  %v2249_v55 = vmax.f32 %v2247_v43, %v2248_v52 }
 0x2a3   : > { %v2257_v35 = vrot.slane %v2256_v33, 4  ;;  %v2274_v3 = vmax.f32 %v2273_v44, %v1842_v25  ;;  %v2265_v32 = vmax.f32 %v2264_v42, %v1838_v27  ;;  %v2225_v30 = vrot.slane %v2224_v10, 1 }
 0x2a4   : > { %v2250_v54 = vrot.slane %v2249_v55, 2  ;;  %v2234_v45 = vrot.slane %v2233_v51, 1  ;;  %v2216_v23 = vrot.slane %v2215_v0, 1  ;;  %v2243_v57 = vrot.slane %v2242_v17, 1 }
 0x2a5   : > { %v2258_v26 = vmax.f32 %v2256_v33, %v2257_v35  ;;  %v2275_v34 = vrot.slane %v2274_v3, 4  ;;  %v2266_v4 = vrot.slane %v2265_v32, 4  ;;  %v2226_v38 = vmax.f32 %v2224_v10, %v2225_v30 }
 0x2a6   : > { %v2251_v8 = vmax.f32 %v2249_v55, %v2250_v54  ;;  %v2235_v31 = vmax.f32 %v2233_v51, %v2234_v45  ;;  %v2217_v59 = vmax.f32 %v2215_v0, %v2216_v23  ;;  %v2244_v40 = vmax.f32 %v2242_v17, %v2243_v57 }
 0x2a7   : > { %v2259_v48 = vrot.slane %v2258_v26, 2  ;;  %v2276_v41 = vmax.f32 %v2274_v3, %v2275_v34  ;;  %v2267_v36 = vmax.f32 %v2265_v32, %v2266_v4  ;;  %vm5581_vm1 = vcmask 1041409  }
 0x2a8   : > { %v2252_v1 = vrot.slane %v2251_v8, 1  ;;  %v2371_v19 = vsel %vm5581_vm1, %v2226_v38, %v2217_v59  ;;  %vm5582_vm4 = vcmask 1042434   ;;  %vm5583_vm9 = vcmask 1043459  }
 0x2a9   : > { %v2260_v24 = vmax.f32 %v2258_v26, %v2259_v48  ;;  %v2277_v47 = vrot.slane %v2276_v41, 2  ;;  %v2268_v29 = vrot.slane %v2267_v36, 2  ;;  %v2372_v9 = vsel %vm5582_vm4, %v2235_v31, %v2371_v19 }
 0x2aa   : > { %v2253_v53 = vmax.f32 %v2251_v8, %v2252_v1  ;;  %v2373_v10 = vsel %vm5583_vm9, %v2244_v40, %v2372_v9 }
 0x2ab   : > { %v2261_v18 = vrot.slane %v2260_v24, 1  ;;  %v2278_v62 = vmax.f32 %v2276_v41, %v2277_v47  ;;  %v2269_v6 = vmax.f32 %v2267_v36, %v2268_v29 }
 0x2ac   : > { %v2374_v46 = vsel %vm2335_vm8, %v2253_v53, %v2373_v10 }
 0x2ad   : > { %v2262_v56 = vmax.f32 %v2260_v24, %v2261_v18  ;;  %v2279_v37 = vrot.slane %v2278_v62, 1  ;;  %v2270_v50 = vrot.slane %v2269_v6, 1 }
 0x2af   : > { %v2280_v13 = vmax.f32 %v2278_v62, %v2279_v37  ;;  %v2271_v12 = vmax.f32 %v2269_v6, %v2270_v50  ;;  %v2375_v63 = vsel %vm2337_vm5, %v2262_v56, %v2374_v46 }
 0x2b1   : > { %v2376_v15 = vsel %vm2339_vm2, %v2271_v12, %v2375_v63  ;;  %2399 = sbr.rel (%p2475_p5) target bundleno = 704 (0x2c0), region = 52 }
 0x2b2   : > { %v2377_v58 = vsel %vm2341_vm12, %v2280_v13, %v2376_v15 }
 0x2b3   : > { %v2389_v5 = vmax.f32 %v1848_v39, %v2377_v58 }
 0x2b5   : > { %2395 = vst [vmem:[%s4994_s6 + $0x28] sm:$0xff] %v2389_v5 }
 0x2b6   : > { %v2400_v60 = vld [vmem:[%s4994_s6] sm:$0xff]  ;;  %v2401_v16 = vld [vmem:[%s4994_s6 + $0x8] sm:$0xff]  ;;  %v2402_v49 = vld [vmem:[%s4994_s6 + $0x10] sm:$0xff] }
 0x2b7   : > { %vm2406_vm8 = vcmp.gt.f32.partialorder %v2400_v60, -1e+29  ;;  %vm2407_vm5 = vcmp.gt.f32.partialorder %v2401_v16, -1e+29  ;;  %vm2408_vm2 = vcmp.gt.f32.partialorder %v2402_v49, -1e+29 }
 0x2b8   : > { %v2412_v61 = vsel %vm2406_vm8, %v2400_v60, 0.0  ;;  %v2413_v11 = vsel %vm2407_vm5, %v2401_v16, 0.0  ;;  %v2414_v21 = vsel %vm2408_vm2, %v2402_v49, 0.0  ;;  %v2403_v22 = vld [vmem:[%s4994_s6 + $0x18] sm:$0xff]  ;;  %v2404_v2 = vld [vmem:[%s4994_s6 + $0x20] sm:$0xff] }
 0x2b9   : > { %2418 = vst [vmem:[%s4994_s6] sm:$0xff] %v2412_v61  ;;  %2419 = vst [vmem:[%s4994_s6 + $0x8] sm:$0xff] %v2413_v11  ;;  %vm2409_vm12 = vcmp.gt.f32.partialorder %v2403_v22, -1e+29  ;;  %vm2410_vm0 = vcmp.gt.f32.partialorder %v2404_v2, -1e+29 }
 0x2ba   : > { %2420 = vst [vmem:[%s4994_s6 + $0x10] sm:$0xff] %v2414_v21  ;;  %v2415_v7 = vsel %vm2409_vm12, %v2403_v22, 0.0  ;;  %v2416_v20 = vsel %vm2410_vm0, %v2404_v2, 0.0 }
 0x2bb   : > { %2421 = vst [vmem:[%s4994_s6 + $0x18] sm:$0xff] %v2415_v7  ;;  %2422 = vst [vmem:[%s4994_s6 + $0x20] sm:$0xff] %v2416_v20 }
 0x2bc   : > { %v2405_v43 = vld [vmem:[%s4994_s6 + $0x28] sm:$0xff] }
 0x2bd   : > { %vm2411_vm13 = vcmp.gt.f32.partialorder %v2405_v43, -1e+29 }
 0x2be   : > { %v2417_v14 = vsel %vm2411_vm13, %v2405_v43, 0.0 }
 0x2bf   : > { %2423 = vst [vmem:[%s4994_s6 + $0x28] sm:$0xff] %v2417_v14 }
 0x2c0 PF: > { %s16_s21 = sadd.s32 1, %s2616_s21  }
 0x2c1   : > { %p13_p6 = scmp.ge.s32.totalorder %s16_s21, 10  }
 0x2c3   :  { %15 = sbr.rel (!%p13_p6) target bundleno = 1 (0x1), region = 81 }

// kernel: heat_transfer_forward.7
= control target key start
LH: loop header
LB: loop body
LE: loop exit
PB: predicated region body
PF: predicated region fallthrough
CT: control target
= control target key end

     0   :  { %s656_s1 = inlined_call_operand.vmem [shape: f32[128,128], index: 1, kind: input, shape index: {}]   ;;  %s657_s0 = inlined_call_operand.vmem [shape: f32[192,128], index: 0, kind: input, shape index: {}]   ;;  %s658_s2 = inlined_call_operand.vmem [shape: f32[1,128], index: 2, kind: input, shape index: {}]   ;;  %s659_s3 = inlined_call_operand.vmem [shape: f32[192,128], index: 3, kind: output, shape index: {}]  }
   0x1   :  { %v53_v0 = vld [vmem:[%s656_s1 + $0x78] sm:$0xff]  ;;  %v52_v1 = vld [vmem:[%s656_s1 + $0x70] sm:$0xff]  ;;  %v51_v2 = vld [vmem:[%s656_s1 + $0x68] sm:$0xff] }
   0x2   :  { %315 = vmatprep.subr.mxu0 %v53_v0  ;;  %383 = vmatprep.subr.mxu1 %v53_v0  ;;  %v50_v3 = vld [vmem:[%s656_s1 + $0x60] sm:$0xff]  ;;  %v49_v4 = vld [vmem:[%s656_s1 + $0x58] sm:$0xff]  ;;  %v48_v5 = vld [vmem:[%s656_s1 + $0x50] sm:$0xff] }
   0x3   :  { %316 = vmatpush3.msra.mxu0 %v53_v0  ;;  %399 = vmatpush3.msra.mxu1 %v53_v0  ;;  %v47_v6 = vld [vmem:[%s656_s1 + $0x48] sm:$0xff]  ;;  %v46_v7 = vld [vmem:[%s656_s1 + $0x40] sm:$0xff]  ;;  %v45_v8 = vld [vmem:[%s656_s1 + $0x38] sm:$0xff] }
   0x4   :  { %317 = vmatprep.subr.mxu0 %v52_v1  ;;  %384 = vmatprep.subr.mxu1 %v52_v1  ;;  %v44_v9 = vld [vmem:[%s656_s1 + $0x30] sm:$0xff]  ;;  %v43_v10 = vld [vmem:[%s656_s1 + $0x28] sm:$0xff]  ;;  %v42_v11 = vld [vmem:[%s656_s1 + $0x20] sm:$0xff] }
   0x5   :  { %318 = vmatpush3.msra.mxu0 %v52_v1  ;;  %400 = vmatpush3.msra.mxu1 %v52_v1  ;;  %v41_v12 = vld [vmem:[%s656_s1 + $0x18] sm:$0xff]  ;;  %v40_v13 = vld [vmem:[%s656_s1 + $0x10] sm:$0xff]  ;;  %v39_v14 = vld [vmem:[%s656_s1 + $0x8] sm:$0xff] }
   0x6   :  { %319 = vmatprep.subr.mxu0 %v51_v2  ;;  %385 = vmatprep.subr.mxu1 %v51_v2  ;;  %v38_v15 = vld [vmem:[%s656_s1] sm:$0xff]  ;;  %v15_v18 = vld [vmem:[%s657_s0 + $0x8] sm:$0xff]  ;;  %v16_v20 = vld [vmem:[%s657_s0 + $0x10] sm:$0xff] }
   0x7   :  { %320 = vmatpush3.msra.mxu0 %v51_v2  ;;  %401 = vmatpush3.msra.mxu1 %v51_v2  ;;  %v14_v16 = vld [vmem:[%s657_s0] sm:$0xff]  ;;  %v27_v19 = vld [vmem:[%s657_s0 + $0x68] sm:$0xff]  ;;  %v28_v21 = vld [vmem:[%s657_s0 + $0x70] sm:$0xff] }
   0x8   :  { %321 = vmatprep.subr.mxu0 %v50_v3  ;;  %386 = vmatprep.subr.mxu1 %v50_v3  ;;  %v26_v17 = vld [vmem:[%s657_s0 + $0x60] sm:$0xff]  ;;  %v17_v22 = vld [vmem:[%s657_s0 + $0x18] sm:$0xff]  ;;  %v19_v26 = vld [vmem:[%s657_s0 + $0x28] sm:$0xff] }
   0x9   :  { %322 = vmatpush3.msra.mxu0 %v50_v3  ;;  %402 = vmatpush3.msra.mxu1 %v50_v3  ;;  %v29_v23 = vld [vmem:[%s657_s0 + $0x78] sm:$0xff]  ;;  %v18_v24 = vld [vmem:[%s657_s0 + $0x20] sm:$0xff]  ;;  %v31_v27 = vld [vmem:[%s657_s0 + $0x88] sm:$0xff] }
   0xa   :  { %323 = vmatprep.subr.mxu0 %v49_v4  ;;  %387 = vmatprep.subr.mxu1 %v49_v4  ;;  %v30_v25 = vld [vmem:[%s657_s0 + $0x80] sm:$0xff]  ;;  %v20_v28 = vld [vmem:[%s657_s0 + $0x30] sm:$0xff]  ;;  %v21_v30 = vld [vmem:[%s657_s0 + $0x38] sm:$0xff] }
   0xb   :  { %324 = vmatpush3.msra.mxu0 %v49_v4  ;;  %403 = vmatpush3.msra.mxu1 %v49_v4  ;;  %v32_v29 = vld [vmem:[%s657_s0 + $0x90] sm:$0xff]  ;;  %v33_v31 = vld [vmem:[%s657_s0 + $0x98] sm:$0xff]  ;;  %v22_v32 = vld [vmem:[%s657_s0 + $0x40] sm:$0xff] }
   0xc   :  { %325 = vmatprep.subr.mxu0 %v48_v5  ;;  %388 = vmatprep.subr.mxu1 %v48_v5  ;;  %v34_v33 = vld [vmem:[%s657_s0 + $0xa0] sm:$0xff]  ;;  %v23_v34 = vld [vmem:[%s657_s0 + $0x48] sm:$0xff]  ;;  %v24_v36 = vld [vmem:[%s657_s0 + $0x50] sm:$0xff] }
   0xd   :  { %326 = vmatpush3.msra.mxu0 %v48_v5  ;;  %404 = vmatpush3.msra.mxu1 %v48_v5  ;;  %v35_v35 = vld [vmem:[%s657_s0 + $0xa8] sm:$0xff]  ;;  %v36_v37 = vld [vmem:[%s657_s0 + $0xb0] sm:$0xff]  ;;  %v25_v38 = vld [vmem:[%s657_s0 + $0x58] sm:$0xff] }
   0xe   :  { %327 = vmatprep.subr.mxu0 %v47_v6  ;;  %389 = vmatprep.subr.mxu1 %v47_v6  ;;  %v37_v39 = vld [vmem:[%s657_s0 + $0xb8] sm:$0xff]  ;;  %v558_v40 = vld [vmem:[%s658_s2] ss:$0 sm:$0xff] }
   0xf   :  { %328 = vmatpush3.msra.mxu0 %v47_v6  ;;  %405 = vmatpush3.msra.mxu1 %v47_v6 }
  0x10   :  { %329 = vmatprep.subr.mxu0 %v46_v7  ;;  %390 = vmatprep.subr.mxu1 %v46_v7 }
  0x11   :  { %330 = vmatpush3.msra.mxu0 %v46_v7  ;;  %406 = vmatpush3.msra.mxu1 %v46_v7 }
  0x12   :  { %331 = vmatprep.subr.mxu0 %v45_v8  ;;  %391 = vmatprep.subr.mxu1 %v45_v8 }
  0x13   :  { %332 = vmatpush3.msra.mxu0 %v45_v8  ;;  %407 = vmatpush3.msra.mxu1 %v45_v8 }
  0x14   :  { %333 = vmatprep.subr.mxu0 %v44_v9  ;;  %392 = vmatprep.subr.mxu1 %v44_v9 }
  0x15   :  { %334 = vmatpush3.msra.mxu0 %v44_v9  ;;  %408 = vmatpush3.msra.mxu1 %v44_v9 }
  0x16   :  { %335 = vmatprep.subr.mxu0 %v43_v10  ;;  %393 = vmatprep.subr.mxu1 %v43_v10 }
  0x17   :  { %336 = vmatpush3.msra.mxu0 %v43_v10  ;;  %409 = vmatpush3.msra.mxu1 %v43_v10 }
  0x18   :  { %337 = vmatprep.subr.mxu0 %v42_v11  ;;  %394 = vmatprep.subr.mxu1 %v42_v11 }
  0x19   :  { %338 = vmatpush3.msra.mxu0 %v42_v11  ;;  %410 = vmatpush3.msra.mxu1 %v42_v11 }
  0x1a   :  { %339 = vmatprep.subr.mxu0 %v41_v12  ;;  %395 = vmatprep.subr.mxu1 %v41_v12 }
  0x1b   :  { %340 = vmatpush3.msra.mxu0 %v41_v12  ;;  %411 = vmatpush3.msra.mxu1 %v41_v12 }
  0x1c   :  { %341 = vmatprep.subr.mxu0 %v40_v13  ;;  %396 = vmatprep.subr.mxu1 %v40_v13 }
  0x1d   :  { %342 = vmatpush3.msra.mxu0 %v40_v13  ;;  %412 = vmatpush3.msra.mxu1 %v40_v13 }
  0x1e   :  { %343 = vmatprep.subr.mxu0 %v39_v14  ;;  %397 = vmatprep.subr.mxu1 %v39_v14 }
  0x1f   :  { %344 = vmatpush3.msra.mxu0 %v39_v14  ;;  %413 = vmatpush3.msra.mxu1 %v39_v14 }
  0x20   :  { %345 = vmatprep.subr.mxu0 %v38_v15  ;;  %398 = vmatprep.subr.mxu1 %v38_v15 }
  0x21   :  { %346 = vmatpush3.msra.mxu0 %v38_v15  ;;  %414 = vmatpush3.msra.mxu1 %v38_v15 }
  0x22   :  { %347 = vmatprep.mubr.f32.mxu0 %v14_v16  ;;  %365 = vmatprep.mubr.f32.mxu1 %v26_v17 }
  0x23   :  { %348 = vmatmul.mubr.f32.vlgmr.msra.gmra.mxu0 %v15_v18  ;;  %366 = vmatmul.mubr.f32.vlgmr.msra.gmra.mxu1 %v27_v19 }
  0x24   :  { %350 = vmatprep.mubr.f32.mxu0 %v16_v20  ;;  %368 = vmatprep.mubr.f32.mxu1 %v28_v21 }
  0x27   :  { %351 = vmatmul.mubr.f32.gmra.mxu0 %v17_v22  ;;  %369 = vmatmul.mubr.f32.gmra.mxu1 %v29_v23 }
  0x28   :  { %353 = vmatprep.mubr.f32.mxu0 %v18_v24  ;;  %371 = vmatprep.mubr.f32.mxu1 %v30_v25 }
  0x2b   :  { %354 = vmatmul.mubr.f32.gmra.mxu0 %v19_v26  ;;  %372 = vmatmul.mubr.f32.gmra.mxu1 %v31_v27 }
  0x2c   :  { %356 = vmatprep.mubr.f32.mxu0 %v20_v28  ;;  %374 = vmatprep.mubr.f32.mxu1 %v32_v29 }
  0x2f   :  { %357 = vmatmul.mubr.f32.gmra.mxu0 %v21_v30  ;;  %375 = vmatmul.mubr.f32.gmra.mxu1 %v33_v31 }
  0x30   :  { %359 = vmatprep.mubr.f32.mxu0 %v22_v32  ;;  %377 = vmatprep.mubr.f32.mxu1 %v34_v33 }
  0x33   :  { %360 = vmatmul.mubr.f32.gmra.mxu0 %v23_v34  ;;  %378 = vmatmul.mubr.f32.gmra.mxu1 %v35_v35 }
  0x34   :  { %362 = vmatprep.mubr.f32.mxu0 %v24_v36  ;;  %380 = vmatprep.mubr.f32.mxu1 %v36_v37 }
  0x37   :  { %363 = vmatmul.mubr.f32.gmra.mxu0 %v25_v38  ;;  %381 = vmatmul.mubr.f32.gmra.mxu1 %v37_v39 }
  0xe3   :  { %v349_v41 = vpop.f32.mrf.mxu0  ;;  %v367_v42 = vpop.f32.mrf.mxu1 }
  0xe4   :  { %v133_v43 = vadd.f32 %v349_v41, %v558_v40  ;;  %v193_v44 = vadd.f32 %v367_v42, %v558_v40 }
  0xe5   :  { %v127_v45 = vpop.f32.mrf.mxu0  ;;  %v187_v46 = vpop.f32.mrf.mxu1 }
  0xe6   :  { %247 = vst [vmem:[%s659_s3 + $0x8] sm:$0xff] %v133_v43  ;;  %259 = vst [vmem:[%s659_s3 + $0x68] sm:$0xff] %v193_v44  ;;  %v128_v47 = vadd.f32 %v558_v40, %v127_v45  ;;  %v188_v48 = vadd.f32 %v558_v40, %v187_v46 }
  0xe7   :  { %v352_v49 = vpop.f32.mrf.mxu0  ;;  %v370_v50 = vpop.f32.mrf.mxu1 }
  0xe8   :  { %246 = vst [vmem:[%s659_s3] sm:$0xff] %v128_v47  ;;  %258 = vst [vmem:[%s659_s3 + $0x60] sm:$0xff] %v188_v48  ;;  %v143_v51 = vadd.f32 %v352_v49, %v558_v40  ;;  %v203_v52 = vadd.f32 %v370_v50, %v558_v40 }
  0xe9   :  { %v137_v53 = vpop.f32.mrf.mxu0  ;;  %v197_v54 = vpop.f32.mrf.mxu1 }
  0xea   :  { %249 = vst [vmem:[%s659_s3 + $0x18] sm:$0xff] %v143_v51  ;;  %261 = vst [vmem:[%s659_s3 + $0x78] sm:$0xff] %v203_v52  ;;  %v138_v55 = vadd.f32 %v558_v40, %v137_v53  ;;  %v198_v56 = vadd.f32 %v558_v40, %v197_v54 }
  0xeb   :  { %v355_v57 = vpop.f32.mrf.mxu0  ;;  %v373_v58 = vpop.f32.mrf.mxu1 }
  0xec   :  { %248 = vst [vmem:[%s659_s3 + $0x10] sm:$0xff] %v138_v55  ;;  %260 = vst [vmem:[%s659_s3 + $0x70] sm:$0xff] %v198_v56  ;;  %v153_v59 = vadd.f32 %v355_v57, %v558_v40  ;;  %v213_v60 = vadd.f32 %v373_v58, %v558_v40 }
  0xed   :  { %v147_v61 = vpop.f32.mrf.mxu0  ;;  %v207_v62 = vpop.f32.mrf.mxu1 }
  0xee   :  { %251 = vst [vmem:[%s659_s3 + $0x28] sm:$0xff] %v153_v59  ;;  %263 = vst [vmem:[%s659_s3 + $0x88] sm:$0xff] %v213_v60  ;;  %v148_v63 = vadd.f32 %v558_v40, %v147_v61  ;;  %v208_v0 = vadd.f32 %v558_v40, %v207_v62 }
  0xef   :  { %v358_v1 = vpop.f32.mrf.mxu0  ;;  %v376_v2 = vpop.f32.mrf.mxu1 }
  0xf0   :  { %250 = vst [vmem:[%s659_s3 + $0x20] sm:$0xff] %v148_v63  ;;  %262 = vst [vmem:[%s659_s3 + $0x80] sm:$0xff] %v208_v0  ;;  %v163_v3 = vadd.f32 %v358_v1, %v558_v40  ;;  %v223_v4 = vadd.f32 %v376_v2, %v558_v40 }
  0xf1   :  { %v157_v5 = vpop.f32.mrf.mxu0  ;;  %v217_v6 = vpop.f32.mrf.mxu1 }
  0xf2   :  { %253 = vst [vmem:[%s659_s3 + $0x38] sm:$0xff] %v163_v3  ;;  %265 = vst [vmem:[%s659_s3 + $0x98] sm:$0xff] %v223_v4  ;;  %v158_v7 = vadd.f32 %v558_v40, %v157_v5  ;;  %v218_v8 = vadd.f32 %v558_v40, %v217_v6 }
  0xf3   :  { %v361_v9 = vpop.f32.mrf.mxu0  ;;  %v379_v10 = vpop.f32.mrf.mxu1 }
  0xf4   :  { %252 = vst [vmem:[%s659_s3 + $0x30] sm:$0xff] %v158_v7  ;;  %264 = vst [vmem:[%s659_s3 + $0x90] sm:$0xff] %v218_v8  ;;  %v173_v11 = vadd.f32 %v361_v9, %v558_v40  ;;  %v233_v12 = vadd.f32 %v379_v10, %v558_v40 }
  0xf5   :  { %v167_v13 = vpop.f32.mrf.mxu0  ;;  %v227_v14 = vpop.f32.mrf.mxu1 }
  0xf6   :  { %255 = vst [vmem:[%s659_s3 + $0x48] sm:$0xff] %v173_v11  ;;  %267 = vst [vmem:[%s659_s3 + $0xa8] sm:$0xff] %v233_v12  ;;  %v168_v15 = vadd.f32 %v558_v40, %v167_v13  ;;  %v228_v16 = vadd.f32 %v558_v40, %v227_v14 }
  0xf7   :  { %v364_v17 = vpop.f32.mrf.mxu0  ;;  %v382_v18 = vpop.f32.mrf.mxu1 }
  0xf8   :  { %254 = vst [vmem:[%s659_s3 + $0x40] sm:$0xff] %v168_v15  ;;  %266 = vst [vmem:[%s659_s3 + $0xa0] sm:$0xff] %v228_v16  ;;  %v183_v19 = vadd.f32 %v364_v17, %v558_v40  ;;  %v243_v20 = vadd.f32 %v382_v18, %v558_v40 }
  0xf9   :  { %v177_v21 = vpop.f32.mrf.mxu0  ;;  %v237_v22 = vpop.f32.mrf.mxu1 }
  0xfa   :  { %257 = vst [vmem:[%s659_s3 + $0x58] sm:$0xff] %v183_v19  ;;  %269 = vst [vmem:[%s659_s3 + $0xb8] sm:$0xff] %v243_v20  ;;  %v178_v23 = vadd.f32 %v558_v40, %v177_v21  ;;  %v238_v24 = vadd.f32 %v558_v40, %v237_v22 }
  0xfc   :  { %256 = vst [vmem:[%s659_s3 + $0x50] sm:$0xff] %v178_v23  ;;  %268 = vst [vmem:[%s659_s3 + $0xb0] sm:$0xff] %v238_v24 }

// kernel: heat_transfer_forward.10
= control target key start
LH: loop header
LB: loop body
LE: loop exit
PB: predicated region body
PF: predicated region fallthrough
CT: control target
= control target key end

     0   :  { %12 = vsyncpa [#allocation5], 0  ;;  %s2667_s21 = smov 0   ;;  %s2669_s22 = smov 0   ;;  %s4055_s0 = inlined_call_operand.vmem [shape: f32[256,128], index: 0, kind: input, shape index: {}]   ;;  %s4056_s1 = inlined_call_operand.vmem [shape: f32[128,512], index: 1, kind: input, shape index: {}]   ;;  %s4057_s2 = inlined_call_operand.vmem [shape: f32[512,384], index: 2, kind: input, shape index: {}]   ;;  %s4058_s3 = inlined_call_operand.vmem [shape: f32[256,384], index: 3, kind: input, shape index: {}]   ;;  %s4059_s4 = inlined_call_operand.vmem [shape: f32[48,256], index: 4, kind: input, shape index: {}]   ;;  %s4060_s5 = inlined_call_operand.hbm [shape: f32[48,128], index: 5, kind: output, shape index: {0}]   ;;  %s4061_s6 = inlined_call_operand.vmem [shape: f32[256,128], index: 6, kind: output, shape index: {1}]  }
   0x1   :  { %s2671_s23 = smov 0  }
   0x2 LB: > { %s2683_s24 = sadd.s32 4294967295, %s2625_s23   ;;  %s2686_s25 = sadd.s32 1, %s2625_s23   ;;  %s2625_s23 = sphi %s2671_s23, %s4110_s23   ;;  %s2621_s22 = sphi %s2669_s22, %s4109_s22   ;;  %s2617_s21 = sphi %s2667_s21, %s4108_s21  }
   0x3   : > { %s116_s26 = ssub.s32 %s2625_s23, %s2686_s25  ;;  %s119_s27 = sadd.s32 1, %s2621_s22 }
   0x4   : > { %p117_p0 = scmp.eq.s32.totalorder %s116_s26, 0  ;;  %p126_p1 = scmp.ne.s32.totalorder %s2621_s22, %s2617_s21 }
   0x5   : > { %p127_p2 = scmp.eq.s32.totalorder %s2625_s23, 0  ;;  %p2268_p4 = scmp.ge.s32.totalorder %s2625_s23, 2 }
   0x6   : > { %s2695_s28 = scalar_select %p117_p0, %s2621_s22, %s119_s27  }
   0x7   : > { %p128_p3 = por %p127_p2, %p126_p1  ;;  %205 = sbr.rel (%p2268_p4) target bundleno = 19 (0x13), region = 24 }
   0xc   : > { %227 = sbr.rel (!%p128_p3) target bundleno = 19 (0x13), region = 36  ;;  %s229_s29 = sand.u32 (%p128_p3), 1, %s2621_s22  }
   0xd   : > { %s2269_s30 = sshll.u32 (%p128_p3), %s2625_s23, 3  ;;  %s2537_s7 = smul.u32 (%p128_p3), 48, %s229_s29 }
   0xe   : > { %s233_s10 = scalar_lea.vmem (%p128_p3), %s4059_s4, %s2269_s30 }
   0xf   : > { %v272_v0 = vld [vmem:[%s233_s10] sm:$0xff] (%p128_p3)  ;;  %v274_v1 = vld [vmem:[%s233_s10 + $0x10] sm:$0xff] (%p128_p3)  ;;  %s231_s11 = scalar_lea.vmem (%p128_p3), [#allocation3], %s2537_s7 }
  0x10   : > { %v276_v2 = vld [vmem:[%s233_s10 + $0x20] sm:$0xff] (%p128_p3)  ;;  %v278_v3 = vld [vmem:[%s233_s10 + $0x30] sm:$0xff] (%p128_p3)  ;;  %273 = vst [vmem:[%s231_s11] sm:$0xff] (%p128_p3), %v272_v0  ;;  %275 = vst [vmem:[%s231_s11 + $0x8] sm:$0xff] (%p128_p3), %v274_v1 }
  0x11   : > { %v280_v4 = vld [vmem:[%s233_s10 + $0x40] sm:$0xff]  ;;  %v282_v5 = vld [vmem:[%s233_s10 + $0x50] sm:$0xff]  ;;  %277 = vst [vmem:[%s231_s11 + $0x10] sm:$0xff] %v276_v2  ;;  %279 = vst [vmem:[%s231_s11 + $0x18] sm:$0xff] %v278_v3 }
  0x12   : > { %281 = vst [vmem:[%s231_s11 + $0x20] sm:$0xff] %v280_v4  ;;  %283 = vst [vmem:[%s231_s11 + $0x28] sm:$0xff] %v282_v5 }
  0x13 PF: > { %p2270_p5 = scmp.ge.s32.totalorder %s2625_s23, 1  ;;  %p288_p6 = scmp.lt.s32.totalorder %s2625_s23, 3 }
  0x15   : > { %p289_p7 = pnand %p2270_p5, %p288_p6 }
  0x17   : > { %292 = sbr.rel (%p289_p7) target bundleno = 837 (0x345), region = 74 }
  0x1c   : > { %s295_s12 = sand.u32 1, %s2617_s21   ;;  %v431_v6 = vld [vmem:[%s4056_s1 + $0x1e8] sm:$0xff]  ;;  %v433_v7 = vld [vmem:[%s4056_s1 + $0x1f8] sm:$0xff]  ;;  %v430_v8 = vld [vmem:[%s4056_s1 + $0x1e0] sm:$0xff]  ;;  %s2271_s29 = sshll.u32 %s2683_s24, 4 }
  0x1d   : > { %s2715_s19 = smul.u32 48, %s295_s12  ;;  %434 = vmatprep.subr.mxu0 %v431_v6  ;;  %595 = vmatprep.subr.mxu1 %v433_v7  ;;  %v432_v9 = vld [vmem:[%s4056_s1 + $0x1f0] sm:$0xff]  ;;  %v427_v10 = vld [vmem:[%s4056_s1 + $0x1c8] sm:$0xff]  ;;  %v429_v11 = vld [vmem:[%s4056_s1 + $0x1d8] sm:$0xff]  ;;  %p2831_p8 = scmp.lt.s32.totalorder %s2271_s29, 31  ;;  %v2627_v7 = vmov 0.0  }
  0x1e   : > { %435 = vmatpush1.msra.mxu0 %v430_v8  ;;  %596 = vmatpush1.msra.mxu1 %v432_v9  ;;  %v426_v12 = vld [vmem:[%s4056_s1 + $0x1c0] sm:$0xff]  ;;  %v428_v13 = vld [vmem:[%s4056_s1 + $0x1d0] sm:$0xff]  ;;  %v423_v14 = vld [vmem:[%s4056_s1 + $0x1a8] sm:$0xff]  ;;  %p2277_p9 = scmp.ne.s32.totalorder %s2683_s24, 0 }
  0x1f   : > { %436 = vmatprep.subr.mxu0 %v427_v10  ;;  %597 = vmatprep.subr.mxu1 %v429_v11  ;;  %v425_v15 = vld [vmem:[%s4056_s1 + $0x1b8] sm:$0xff]  ;;  %v422_v16 = vld [vmem:[%s4056_s1 + $0x1a0] sm:$0xff]  ;;  %v424_v17 = vld [vmem:[%s4056_s1 + $0x1b0] sm:$0xff]  ;;  %s4112_s29 = smov (!%p2831_p8, %s2271_s29), 31 }
  0x20   : > { %437 = vmatpush1.msra.mxu0 %v426_v12  ;;  %598 = vmatpush1.msra.mxu1 %v428_v13  ;;  %v419_v18 = vld [vmem:[%s4056_s1 + $0x188] sm:$0xff]  ;;  %v421_v19 = vld [vmem:[%s4056_s1 + $0x198] sm:$0xff]  ;;  %v418_v20 = vld [vmem:[%s4056_s1 + $0x180] sm:$0xff]  ;;  %s2272_s15 = sshll.u32 %s4112_s29, 3  ;;  %s2539_s20 = smul.u32 24, %s4112_s29 }
  0x21   : > { %438 = vmatprep.subr.mxu0 %v423_v14  ;;  %599 = vmatprep.subr.mxu1 %v425_v15  ;;  %v420_v21 = vld [vmem:[%s4056_s1 + $0x190] sm:$0xff]  ;;  %v415_v22 = vld [vmem:[%s4056_s1 + $0x168] sm:$0xff]  ;;  %v417_v23 = vld [vmem:[%s4056_s1 + $0x178] sm:$0xff]  ;;  %s2913_s12 = scalar_lea.vmem %s4055_s0, %s2272_s15  ;;  %s3890_s30 = scalar_lea.vmem %s4061_s6, %s2272_s15 }
  0x22   : > { %439 = vmatpush1.msra.mxu0 %v422_v16  ;;  %600 = vmatpush1.msra.mxu1 %v424_v17  ;;  %v414_v24 = vld [vmem:[%s4056_s1 + $0x160] sm:$0xff]  ;;  %v416_v25 = vld [vmem:[%s4056_s1 + $0x170] sm:$0xff]  ;;  %v411_v26 = vld [vmem:[%s4056_s1 + $0x148] sm:$0xff]  ;;  %s3818_s26 = scalar_lea.vmem %s4058_s3, %s2539_s20  ;;  %s3976_s29 = scalar_lea.vmem [#allocation3], %s2715_s19 }
  0x23   : > { %440 = vmatprep.subr.mxu0 %v419_v18  ;;  %601 = vmatprep.subr.mxu1 %v421_v19  ;;  %v413_v27 = vld [vmem:[%s4056_s1 + $0x158] sm:$0xff]  ;;  %v410_v28 = vld [vmem:[%s4056_s1 + $0x140] sm:$0xff]  ;;  %v412_v29 = vld [vmem:[%s4056_s1 + $0x150] sm:$0xff] }
  0x24   : > { %441 = vmatpush1.msra.mxu0 %v418_v20  ;;  %602 = vmatpush1.msra.mxu1 %v420_v21  ;;  %v407_v30 = vld [vmem:[%s4056_s1 + $0x128] sm:$0xff]  ;;  %v409_v31 = vld [vmem:[%s4056_s1 + $0x138] sm:$0xff]  ;;  %v406_v32 = vld [vmem:[%s4056_s1 + $0x120] sm:$0xff] }
  0x25   : > { %442 = vmatprep.subr.mxu0 %v415_v22  ;;  %603 = vmatprep.subr.mxu1 %v417_v23  ;;  %v408_v33 = vld [vmem:[%s4056_s1 + $0x130] sm:$0xff]  ;;  %v403_v34 = vld [vmem:[%s4056_s1 + $0x108] sm:$0xff]  ;;  %v405_v35 = vld [vmem:[%s4056_s1 + $0x118] sm:$0xff] }
  0x26   : > { %443 = vmatpush1.msra.mxu0 %v414_v24  ;;  %604 = vmatpush1.msra.mxu1 %v416_v25  ;;  %v402_v36 = vld [vmem:[%s4056_s1 + $0x100] sm:$0xff]  ;;  %v404_v37 = vld [vmem:[%s4056_s1 + $0x110] sm:$0xff]  ;;  %v399_v38 = vld [vmem:[%s4056_s1 + $0xe8] sm:$0xff] }
  0x27   : > { %444 = vmatprep.subr.mxu0 %v411_v26  ;;  %605 = vmatprep.subr.mxu1 %v413_v27  ;;  %v401_v39 = vld [vmem:[%s4056_s1 + $0xf8] sm:$0xff]  ;;  %v398_v40 = vld [vmem:[%s4056_s1 + $0xe0] sm:$0xff]  ;;  %v400_v41 = vld [vmem:[%s4056_s1 + $0xf0] sm:$0xff] }
  0x28   : > { %445 = vmatpush1.msra.mxu0 %v410_v28  ;;  %606 = vmatpush1.msra.mxu1 %v412_v29  ;;  %v395_v42 = vld [vmem:[%s4056_s1 + $0xc8] sm:$0xff]  ;;  %v397_v43 = vld [vmem:[%s4056_s1 + $0xd8] sm:$0xff]  ;;  %v394_v44 = vld [vmem:[%s4056_s1 + $0xc0] sm:$0xff] }
  0x29   : > { %446 = vmatprep.subr.mxu0 %v407_v30  ;;  %607 = vmatprep.subr.mxu1 %v409_v31  ;;  %v396_v45 = vld [vmem:[%s4056_s1 + $0xd0] sm:$0xff]  ;;  %v391_v46 = vld [vmem:[%s4056_s1 + $0xa8] sm:$0xff]  ;;  %v393_v47 = vld [vmem:[%s4056_s1 + $0xb8] sm:$0xff] }
  0x2a   : > { %447 = vmatpush1.msra.mxu0 %v406_v32  ;;  %608 = vmatpush1.msra.mxu1 %v408_v33  ;;  %v390_v48 = vld [vmem:[%s4056_s1 + $0xa0] sm:$0xff]  ;;  %v392_v49 = vld [vmem:[%s4056_s1 + $0xb0] sm:$0xff]  ;;  %v387_v50 = vld [vmem:[%s4056_s1 + $0x88] sm:$0xff] }
  0x2b   : > { %448 = vmatprep.subr.mxu0 %v403_v34  ;;  %609 = vmatprep.subr.mxu1 %v405_v35  ;;  %v389_v51 = vld [vmem:[%s4056_s1 + $0x98] sm:$0xff]  ;;  %v386_v52 = vld [vmem:[%s4056_s1 + $0x80] sm:$0xff]  ;;  %v388_v53 = vld [vmem:[%s4056_s1 + $0x90] sm:$0xff] }
  0x2c   : > { %449 = vmatpush1.msra.mxu0 %v402_v36  ;;  %610 = vmatpush1.msra.mxu1 %v404_v37  ;;  %v383_v54 = vld [vmem:[%s4056_s1 + $0x68] sm:$0xff]  ;;  %v385_v55 = vld [vmem:[%s4056_s1 + $0x78] sm:$0xff]  ;;  %v382_v56 = vld [vmem:[%s4056_s1 + $0x60] sm:$0xff] }
  0x2d   : > { %450 = vmatprep.subr.mxu0 %v399_v38  ;;  %611 = vmatprep.subr.mxu1 %v401_v39  ;;  %v384_v57 = vld [vmem:[%s4056_s1 + $0x70] sm:$0xff]  ;;  %v379_v58 = vld [vmem:[%s4056_s1 + $0x48] sm:$0xff]  ;;  %v381_v59 = vld [vmem:[%s4056_s1 + $0x58] sm:$0xff] }
  0x2e   : > { %451 = vmatpush1.msra.mxu0 %v398_v40  ;;  %612 = vmatpush1.msra.mxu1 %v400_v41  ;;  %v378_v60 = vld [vmem:[%s4056_s1 + $0x40] sm:$0xff]  ;;  %v380_v61 = vld [vmem:[%s4056_s1 + $0x50] sm:$0xff]  ;;  %v375_v62 = vld [vmem:[%s4056_s1 + $0x28] sm:$0xff] }
  0x2f   : > { %452 = vmatprep.subr.mxu0 %v395_v42  ;;  %613 = vmatprep.subr.mxu1 %v397_v43  ;;  %v377_v63 = vld [vmem:[%s4056_s1 + $0x38] sm:$0xff]  ;;  %v374_v0 = vld [vmem:[%s4056_s1 + $0x20] sm:$0xff]  ;;  %v376_v1 = vld [vmem:[%s4056_s1 + $0x30] sm:$0xff] }
  0x30   : > { %453 = vmatpush1.msra.mxu0 %v394_v44  ;;  %614 = vmatpush1.msra.mxu1 %v396_v45  ;;  %v371_v2 = vld [vmem:[%s4056_s1 + $0x8] sm:$0xff]  ;;  %v373_v3 = vld [vmem:[%s4056_s1 + $0x18] sm:$0xff]  ;;  %v370_v4 = vld [vmem:[%s4056_s1] sm:$0xff] }
  0x31   : > { %454 = vmatprep.subr.mxu0 %v391_v46  ;;  %615 = vmatprep.subr.mxu1 %v393_v47  ;;  %v372_v5 = vld [vmem:[%s4056_s1 + $0x10] sm:$0xff]  ;;  %v354_v6 = vld [vmem:[%s2913_s12] sm:$0xff]  ;;  %v1121_v10 = vld [vmem:[%s4057_s2 + $0x168] sm:$0xff] }
  0x32   : > { %455 = vmatpush1.msra.mxu0 %v390_v48  ;;  %616 = vmatpush1.msra.mxu1 %v392_v49  ;;  %v1122_v8 = vld [vmem:[%s4057_s2 + $0x170] sm:$0xff]  ;;  %v1217_v11 = vld [vmem:[%s4057_s2 + $0x468] sm:$0xff]  ;;  %v1119_v13 = vld [vmem:[%s4057_s2 + $0x158] sm:$0xff] }
  0x33   : > { %456 = vmatprep.subr.mxu0 %v387_v50  ;;  %617 = vmatprep.subr.mxu1 %v389_v51  ;;  %v1218_v9 = vld [vmem:[%s4057_s2 + $0x470] sm:$0xff]  ;;  %v355_v12 = vld [vmem:[%s2913_s12 + $0x8] sm:$0xff]  ;;  %v1215_v14 = vld [vmem:[%s4057_s2 + $0x458] sm:$0xff] }
  0x34   : > { %457 = vmatpush1.msra.mxu0 %v386_v52  ;;  %618 = vmatpush1.msra.mxu1 %v388_v53  ;;  %v1118_v15 = vld [vmem:[%s4057_s2 + $0x150] sm:$0xff]  ;;  %v1116_v18 = vld [vmem:[%s4057_s2 + $0x140] sm:$0xff]  ;;  %v1115_v20 = vld [vmem:[%s4057_s2 + $0x138] sm:$0xff] }
  0x35   : > { %458 = vmatprep.subr.mxu0 %v383_v54  ;;  %619 = vmatprep.subr.mxu1 %v385_v55  ;;  %v1214_v16 = vld [vmem:[%s4057_s2 + $0x450] sm:$0xff]  ;;  %v1212_v19 = vld [vmem:[%s4057_s2 + $0x440] sm:$0xff]  ;;  %v1211_v21 = vld [vmem:[%s4057_s2 + $0x438] sm:$0xff] }
  0x36   : > { %459 = vmatpush1.msra.mxu0 %v382_v56  ;;  %620 = vmatpush1.msra.mxu1 %v384_v57  ;;  %v356_v17 = vld [vmem:[%s2913_s12 + $0x10] sm:$0xff]  ;;  %v357_v22 = vld [vmem:[%s2913_s12 + $0x18] sm:$0xff]  ;;  %v1113_v23 = vld [vmem:[%s4057_s2 + $0x128] sm:$0xff] }
  0x37   : > { %460 = vmatprep.subr.mxu0 %v379_v58  ;;  %621 = vmatprep.subr.mxu1 %v381_v59  ;;  %v1209_v24 = vld [vmem:[%s4057_s2 + $0x428] sm:$0xff]  ;;  %v1112_v25 = vld [vmem:[%s4057_s2 + $0x120] sm:$0xff]  ;;  %v1110_v28 = vld [vmem:[%s4057_s2 + $0x110] sm:$0xff] }
  0x38   : > { %461 = vmatpush1.msra.mxu0 %v378_v60  ;;  %622 = vmatpush1.msra.mxu1 %v380_v61  ;;  %v1208_v26 = vld [vmem:[%s4057_s2 + $0x420] sm:$0xff]  ;;  %v1206_v29 = vld [vmem:[%s4057_s2 + $0x410] sm:$0xff]  ;;  %v1109_v30 = vld [vmem:[%s4057_s2 + $0x108] sm:$0xff] }
  0x39   : > { %462 = vmatprep.subr.mxu0 %v375_v62  ;;  %623 = vmatprep.subr.mxu1 %v377_v63  ;;  %v358_v27 = vld [vmem:[%s2913_s12 + $0x20] sm:$0xff]  ;;  %v1205_v31 = vld [vmem:[%s4057_s2 + $0x408] sm:$0xff]  ;;  %v1107_v33 = vld [vmem:[%s4057_s2 + $0xf8] sm:$0xff] }
  0x3a   : > { %463 = vmatpush1.msra.mxu0 %v374_v0  ;;  %624 = vmatpush1.msra.mxu1 %v376_v1  ;;  %v359_v32 = vld [vmem:[%s2913_s12 + $0x28] sm:$0xff]  ;;  %v1203_v34 = vld [vmem:[%s4057_s2 + $0x3f8] sm:$0xff]  ;;  %v1106_v35 = vld [vmem:[%s4057_s2 + $0xf0] sm:$0xff] }
  0x3b   : > { %464 = vmatprep.subr.mxu0 %v371_v2  ;;  %625 = vmatprep.subr.mxu1 %v373_v3  ;;  %v1202_v36 = vld [vmem:[%s4057_s2 + $0x3f0] sm:$0xff]  ;;  %v1104_v38 = vld [vmem:[%s4057_s2 + $0xe0] sm:$0xff]  ;;  %v1103_v40 = vld [vmem:[%s4057_s2 + $0xd8] sm:$0xff] }
  0x3c   : > { %465 = vmatpush1.msra.mxu0 %v370_v4  ;;  %498 = vmatprep.mubr.f32.mxu0 %v2627_v7  ;;  %v360_v37 = vld [vmem:[%s2913_s12 + $0x30] sm:$0xff]  ;;  %v1200_v39 = vld [vmem:[%s4057_s2 + $0x3e0] sm:$0xff]  ;;  %v1199_v41 = vld [vmem:[%s4057_s2 + $0x3d8] sm:$0xff] }
  0x3d   : > { %626 = vmatpush1.msra.mxu1 %v372_v5  ;;  %659 = vmatprep.mubr.f32.mxu1 %v2627_v7  ;;  %v361_v42 = vld [vmem:[%s2913_s12 + $0x38] sm:$0xff]  ;;  %v1101_v43 = vld [vmem:[%s4057_s2 + $0xc8] sm:$0xff]  ;;  %v1100_v45 = vld [vmem:[%s4057_s2 + $0xc0] sm:$0xff] }
  0x3e   : > { %499 = vmatmul.mubr.f32.vlgmr.msra.gmra.mxu0 %v354_v6  ;;  %660 = vmatmul.mubr.f32.vlgmr.msra.gmra.mxu1 %v354_v6  ;;  %v1197_v44 = vld [vmem:[%s4057_s2 + $0x3c8] sm:$0xff]  ;;  %v1196_v46 = vld [vmem:[%s4057_s2 + $0x3c0] sm:$0xff]  ;;  %v1098_v48 = vld [vmem:[%s4057_s2 + $0xb0] sm:$0xff] }
  0x3f   : > { %504 = vmatprep.mubr.f32.mxu0 %v2627_v7  ;;  %665 = vmatprep.mubr.f32.mxu1 %v2627_v7  ;;  %v362_v47 = vld [vmem:[%s2913_s12 + $0x40] sm:$0xff]  ;;  %v1194_v49 = vld [vmem:[%s4057_s2 + $0x3b0] sm:$0xff]  ;;  %v1097_v50 = vld [vmem:[%s4057_s2 + $0xa8] sm:$0xff] }
  0x40   : > { %1268 = vmatprep.subr.mxu0 %v1122_v8  ;;  %1429 = vmatprep.subr.mxu1 %v1218_v9  ;;  %v1193_v51 = vld [vmem:[%s4057_s2 + $0x3a8] sm:$0xff]  ;;  %v1095_v53 = vld [vmem:[%s4057_s2 + $0x98] sm:$0xff]  ;;  %v1094_v55 = vld [vmem:[%s4057_s2 + $0x90] sm:$0xff] }
  0x41   : > { %1269 = vmatpush1.msra.mxu0 %v1121_v10  ;;  %1430 = vmatpush1.msra.mxu1 %v1217_v11  ;;  %v363_v52 = vld [vmem:[%s2913_s12 + $0x48] sm:$0xff]  ;;  %v1191_v54 = vld [vmem:[%s4057_s2 + $0x398] sm:$0xff]  ;;  %v1190_v56 = vld [vmem:[%s4057_s2 + $0x390] sm:$0xff] }
  0x42   : > { %505 = vmatmul.mubr.f32.gmra.mxu0 %v355_v12  ;;  %666 = vmatmul.mubr.f32.gmra.mxu1 %v355_v12  ;;  %v364_v57 = vld [vmem:[%s2913_s12 + $0x50] sm:$0xff]  ;;  %v1092_v58 = vld [vmem:[%s4057_s2 + $0x80] sm:$0xff]  ;;  %v1091_v60 = vld [vmem:[%s4057_s2 + $0x78] sm:$0xff] }
  0x43   : > { %510 = vmatprep.mubr.f32.mxu0 %v2627_v7  ;;  %671 = vmatprep.mubr.f32.mxu1 %v2627_v7  ;;  %v1188_v59 = vld [vmem:[%s4057_s2 + $0x380] sm:$0xff]  ;;  %v1187_v61 = vld [vmem:[%s4057_s2 + $0x378] sm:$0xff]  ;;  %v1089_v63 = vld [vmem:[%s4057_s2 + $0x68] sm:$0xff] }
  0x44   : > { %1270 = vmatprep.subr.mxu0 %v1119_v13  ;;  %1431 = vmatprep.subr.mxu1 %v1215_v14  ;;  %v365_v62 = vld [vmem:[%s2913_s12 + $0x58] sm:$0xff]  ;;  %v1185_v0 = vld [vmem:[%s4057_s2 + $0x368] sm:$0xff]  ;;  %v1088_v1 = vld [vmem:[%s4057_s2 + $0x60] sm:$0xff] }
  0x45   : > { %1271 = vmatpush1.msra.mxu0 %v1118_v15  ;;  %1432 = vmatpush1.msra.mxu1 %v1214_v16  ;;  %v1184_v2 = vld [vmem:[%s4057_s2 + $0x360] sm:$0xff]  ;;  %v1086_v4 = vld [vmem:[%s4057_s2 + $0x50] sm:$0xff]  ;;  %v1085_v6 = vld [vmem:[%s4057_s2 + $0x48] sm:$0xff] }
  0x46   : > { %511 = vmatmul.mubr.f32.gmra.mxu0 %v356_v17  ;;  %672 = vmatmul.mubr.f32.gmra.mxu1 %v356_v17  ;;  %v366_v3 = vld [vmem:[%s2913_s12 + $0x60] sm:$0xff]  ;;  %v1182_v5 = vld [vmem:[%s4057_s2 + $0x350] sm:$0xff]  ;;  %v1181_v8 = vld [vmem:[%s4057_s2 + $0x348] sm:$0xff] }
  0x47   : > { %516 = vmatprep.mubr.f32.mxu0 %v2627_v7  ;;  %677 = vmatprep.mubr.f32.mxu1 %v2627_v7  ;;  %v367_v9 = vld [vmem:[%s2913_s12 + $0x68] sm:$0xff]  ;;  %v1083_v10 = vld [vmem:[%s4057_s2 + $0x38] sm:$0xff]  ;;  %v1082_v12 = vld [vmem:[%s4057_s2 + $0x30] sm:$0xff] }
  0x48   : > { %1272 = vmatprep.subr.mxu0 %v1116_v18  ;;  %1433 = vmatprep.subr.mxu1 %v1212_v19  ;;  %v1179_v11 = vld [vmem:[%s4057_s2 + $0x338] sm:$0xff]  ;;  %v1178_v13 = vld [vmem:[%s4057_s2 + $0x330] sm:$0xff]  ;;  %v1080_v15 = vld [vmem:[%s4057_s2 + $0x20] sm:$0xff] }
  0x49   : > { %1273 = vmatpush1.msra.mxu0 %v1115_v20  ;;  %1434 = vmatpush1.msra.mxu1 %v1211_v21  ;;  %v368_v14 = vld [vmem:[%s2913_s12 + $0x70] sm:$0xff]  ;;  %v1176_v16 = vld [vmem:[%s4057_s2 + $0x320] sm:$0xff]  ;;  %v1079_v17 = vld [vmem:[%s4057_s2 + $0x18] sm:$0xff] }
  0x4a   : > { %517 = vmatmul.mubr.f32.gmra.mxu0 %v357_v22  ;;  %678 = vmatmul.mubr.f32.gmra.mxu1 %v357_v22  ;;  %v1175_v18 = vld [vmem:[%s4057_s2 + $0x318] sm:$0xff]  ;;  %v1077_v20 = vld [vmem:[%s4057_s2 + $0x8] sm:$0xff]  ;;  %v1076_v22 = vld [vmem:[%s4057_s2] sm:$0xff] }
  0x4b   : > { %522 = vmatprep.mubr.f32.mxu0 %v2627_v7  ;;  %683 = vmatprep.mubr.f32.mxu1 %v2627_v7  ;;  %v369_v19 = vld [vmem:[%s2913_s12 + $0x78] sm:$0xff]  ;;  %v1173_v21 = vld [vmem:[%s4057_s2 + $0x308] sm:$0xff] }
  0x4c   : > { %1274 = vmatprep.subr.mxu0 %v1113_v23  ;;  %1435 = vmatprep.subr.mxu1 %v1209_v24  ;;  %v1170_v23 = vld [vmem:[%s4057_s2 + $0x2f0] sm:$0xff] }
  0x4d   : > { %1275 = vmatpush1.msra.mxu0 %v1112_v25  ;;  %1436 = vmatpush1.msra.mxu1 %v1208_v26  ;;  %v1266_v24 = vld [vmem:[%s4057_s2 + $0x5f0] sm:$0xff]  ;;  %v1169_v25 = vld [vmem:[%s4057_s2 + $0x2e8] sm:$0xff] }
  0x4e   : > { %523 = vmatmul.mubr.f32.gmra.mxu0 %v358_v27  ;;  %684 = vmatmul.mubr.f32.gmra.mxu1 %v358_v27  ;;  %v1265_v26 = vld [vmem:[%s4057_s2 + $0x5e8] sm:$0xff]  ;;  %v1167_v27 = vld [vmem:[%s4057_s2 + $0x2d8] sm:$0xff] }
  0x4f   : > { %528 = vmatprep.mubr.f32.mxu0 %v2627_v7  ;;  %689 = vmatprep.mubr.f32.mxu1 %v2627_v7 }
  0x50   : > { %1276 = vmatprep.subr.mxu0 %v1110_v28  ;;  %1437 = vmatprep.subr.mxu1 %v1206_v29  ;;  %v1263_v28 = vld [vmem:[%s4057_s2 + $0x5d8] sm:$0xff]  ;;  %v1166_v29 = vld [vmem:[%s4057_s2 + $0x2d0] sm:$0xff] }
  0x51   : > { %1277 = vmatpush1.msra.mxu0 %v1109_v30  ;;  %1438 = vmatpush1.msra.mxu1 %v1205_v31  ;;  %v1262_v30 = vld [vmem:[%s4057_s2 + $0x5d0] sm:$0xff]  ;;  %v1164_v31 = vld [vmem:[%s4057_s2 + $0x2c0] sm:$0xff] }
  0x52   : > { %529 = vmatmul.mubr.f32.gmra.mxu0 %v359_v32  ;;  %690 = vmatmul.mubr.f32.gmra.mxu1 %v359_v32  ;;  %v1260_v32 = vld [vmem:[%s4057_s2 + $0x5c0] sm:$0xff] }
  0x53   : > { %534 = vmatprep.mubr.f32.mxu0 %v2627_v7  ;;  %695 = vmatprep.mubr.f32.mxu1 %v2627_v7 }
  0x54   : > { %1278 = vmatprep.subr.mxu0 %v1107_v33  ;;  %1439 = vmatprep.subr.mxu1 %v1203_v34  ;;  %v1163_v33 = vld [vmem:[%s4057_s2 + $0x2b8] sm:$0xff] }
  0x55   : > { %1279 = vmatpush1.msra.mxu0 %v1106_v35  ;;  %1440 = vmatpush1.msra.mxu1 %v1202_v36  ;;  %v1259_v34 = vld [vmem:[%s4057_s2 + $0x5b8] sm:$0xff]  ;;  %v1161_v35 = vld [vmem:[%s4057_s2 + $0x2a8] sm:$0xff] }
  0x56   : > { %535 = vmatmul.mubr.f32.gmra.mxu0 %v360_v37  ;;  %696 = vmatmul.mubr.f32.gmra.mxu1 %v360_v37  ;;  %v1257_v36 = vld [vmem:[%s4057_s2 + $0x5a8] sm:$0xff]  ;;  %v1160_v37 = vld [vmem:[%s4057_s2 + $0x2a0] sm:$0xff] }
  0x57   : > { %540 = vmatprep.mubr.f32.mxu0 %v2627_v7  ;;  %701 = vmatprep.mubr.f32.mxu1 %v2627_v7 }
  0x58   : > { %1280 = vmatprep.subr.mxu0 %v1104_v38  ;;  %1441 = vmatprep.subr.mxu1 %v1200_v39  ;;  %v1256_v38 = vld [vmem:[%s4057_s2 + $0x5a0] sm:$0xff]  ;;  %v1158_v39 = vld [vmem:[%s4057_s2 + $0x290] sm:$0xff] }
  0x59   : > { %1281 = vmatpush1.msra.mxu0 %v1103_v40  ;;  %1442 = vmatpush1.msra.mxu1 %v1199_v41  ;;  %v1254_v40 = vld [vmem:[%s4057_s2 + $0x590] sm:$0xff]  ;;  %v1157_v41 = vld [vmem:[%s4057_s2 + $0x288] sm:$0xff] }
  0x5a   : > { %541 = vmatmul.mubr.f32.gmra.mxu0 %v361_v42  ;;  %702 = vmatmul.mubr.f32.gmra.mxu1 %v361_v42  ;;  %v1253_v42 = vld [vmem:[%s4057_s2 + $0x588] sm:$0xff] }
  0x5b   : > { %546 = vmatprep.mubr.f32.mxu0 %v2627_v7  ;;  %707 = vmatprep.mubr.f32.mxu1 %v2627_v7 }
  0x5c   : > { %1282 = vmatprep.subr.mxu0 %v1101_v43  ;;  %1443 = vmatprep.subr.mxu1 %v1197_v44  ;;  %v1155_v43 = vld [vmem:[%s4057_s2 + $0x278] sm:$0xff] }
  0x5d   : > { %1283 = vmatpush1.msra.mxu0 %v1100_v45  ;;  %1444 = vmatpush1.msra.mxu1 %v1196_v46  ;;  %v1251_v44 = vld [vmem:[%s4057_s2 + $0x578] sm:$0xff]  ;;  %v1154_v45 = vld [vmem:[%s4057_s2 + $0x270] sm:$0xff] }
  0x5e   : > { %547 = vmatmul.mubr.f32.gmra.mxu0 %v362_v47  ;;  %708 = vmatmul.mubr.f32.gmra.mxu1 %v362_v47  ;;  %v1250_v46 = vld [vmem:[%s4057_s2 + $0x570] sm:$0xff]  ;;  %v1152_v47 = vld [vmem:[%s4057_s2 + $0x260] sm:$0xff] }
  0x5f   : > { %552 = vmatprep.mubr.f32.mxu0 %v2627_v7  ;;  %713 = vmatprep.mubr.f32.mxu1 %v2627_v7 }
  0x60   : > { %1284 = vmatprep.subr.mxu0 %v1098_v48  ;;  %1445 = vmatprep.subr.mxu1 %v1194_v49  ;;  %v1248_v48 = vld [vmem:[%s4057_s2 + $0x560] sm:$0xff]  ;;  %v1151_v49 = vld [vmem:[%s4057_s2 + $0x258] sm:$0xff] }
  0x61   : > { %1285 = vmatpush1.msra.mxu0 %v1097_v50  ;;  %1446 = vmatpush1.msra.mxu1 %v1193_v51  ;;  %v1247_v50 = vld [vmem:[%s4057_s2 + $0x558] sm:$0xff]  ;;  %v1149_v51 = vld [vmem:[%s4057_s2 + $0x248] sm:$0xff] }
  0x62   : > { %553 = vmatmul.mubr.f32.gmra.mxu0 %v363_v52  ;;  %714 = vmatmul.mubr.f32.gmra.mxu1 %v363_v52  ;;  %v1245_v52 = vld [vmem:[%s4057_s2 + $0x548] sm:$0xff] }
  0x63   : > { %558 = vmatprep.mubr.f32.mxu0 %v2627_v7  ;;  %719 = vmatprep.mubr.f32.mxu1 %v2627_v7 }
  0x64   : > { %1286 = vmatprep.subr.mxu0 %v1095_v53  ;;  %1447 = vmatprep.subr.mxu1 %v1191_v54  ;;  %v1148_v53 = vld [vmem:[%s4057_s2 + $0x240] sm:$0xff] }
  0x65   : > { %1287 = vmatpush1.msra.mxu0 %v1094_v55  ;;  %1448 = vmatpush1.msra.mxu1 %v1190_v56  ;;  %v1244_v54 = vld [vmem:[%s4057_s2 + $0x540] sm:$0xff]  ;;  %v1146_v55 = vld [vmem:[%s4057_s2 + $0x230] sm:$0xff] }
  0x66   : > { %559 = vmatmul.mubr.f32.gmra.mxu0 %v364_v57  ;;  %720 = vmatmul.mubr.f32.gmra.mxu1 %v364_v57  ;;  %v1242_v56 = vld [vmem:[%s4057_s2 + $0x530] sm:$0xff]  ;;  %v1145_v57 = vld [vmem:[%s4057_s2 + $0x228] sm:$0xff] }
  0x67   : > { %564 = vmatprep.mubr.f32.mxu0 %v2627_v7  ;;  %725 = vmatprep.mubr.f32.mxu1 %v2627_v7 }
  0x68   : > { %1288 = vmatprep.subr.mxu0 %v1092_v58  ;;  %1449 = vmatprep.subr.mxu1 %v1188_v59  ;;  %v1241_v58 = vld [vmem:[%s4057_s2 + $0x528] sm:$0xff]  ;;  %v1143_v59 = vld [vmem:[%s4057_s2 + $0x218] sm:$0xff] }
  0x69   : > { %1289 = vmatpush1.msra.mxu0 %v1091_v60  ;;  %1450 = vmatpush1.msra.mxu1 %v1187_v61  ;;  %v1239_v60 = vld [vmem:[%s4057_s2 + $0x518] sm:$0xff]  ;;  %v1142_v61 = vld [vmem:[%s4057_s2 + $0x210] sm:$0xff] }
  0x6a   : > { %565 = vmatmul.mubr.f32.gmra.mxu0 %v365_v62  ;;  %726 = vmatmul.mubr.f32.gmra.mxu1 %v365_v62  ;;  %v1238_v62 = vld [vmem:[%s4057_s2 + $0x510] sm:$0xff] }
  0x6b   : > { %570 = vmatprep.mubr.f32.mxu0 %v2627_v7  ;;  %731 = vmatprep.mubr.f32.mxu1 %v2627_v7 }
  0x6c   : > { %1290 = vmatprep.subr.mxu0 %v1089_v63  ;;  %1451 = vmatprep.subr.mxu1 %v1185_v0  ;;  %v1140_v63 = vld [vmem:[%s4057_s2 + $0x200] sm:$0xff] }
  0x6d   : > { %1291 = vmatpush1.msra.mxu0 %v1088_v1  ;;  %1452 = vmatpush1.msra.mxu1 %v1184_v2  ;;  %v1236_v0 = vld [vmem:[%s4057_s2 + $0x500] sm:$0xff]  ;;  %v1139_v1 = vld [vmem:[%s4057_s2 + $0x1f8] sm:$0xff] }
  0x6e   : > { %571 = vmatmul.mubr.f32.gmra.mxu0 %v366_v3  ;;  %732 = vmatmul.mubr.f32.gmra.mxu1 %v366_v3  ;;  %v1235_v2 = vld [vmem:[%s4057_s2 + $0x4f8] sm:$0xff]  ;;  %v1137_v3 = vld [vmem:[%s4057_s2 + $0x1e8] sm:$0xff] }
  0x6f   : > { %576 = vmatprep.mubr.f32.mxu0 %v2627_v7  ;;  %737 = vmatprep.mubr.f32.mxu1 %v2627_v7 }
  0x70   : > { %1292 = vmatprep.subr.mxu0 %v1086_v4  ;;  %1453 = vmatprep.subr.mxu1 %v1182_v5  ;;  %v1233_v4 = vld [vmem:[%s4057_s2 + $0x4e8] sm:$0xff]  ;;  %v1136_v5 = vld [vmem:[%s4057_s2 + $0x1e0] sm:$0xff] }
  0x71   : > { %1293 = vmatpush1.msra.mxu0 %v1085_v6  ;;  %1454 = vmatpush1.msra.mxu1 %v1181_v8  ;;  %v1232_v6 = vld [vmem:[%s4057_s2 + $0x4e0] sm:$0xff]  ;;  %v1134_v8 = vld [vmem:[%s4057_s2 + $0x1d0] sm:$0xff] }
  0x72   : > { %577 = vmatmul.mubr.f32.gmra.mxu0 %v367_v9  ;;  %738 = vmatmul.mubr.f32.gmra.mxu1 %v367_v9  ;;  %v1230_v9 = vld [vmem:[%s4057_s2 + $0x4d0] sm:$0xff] }
  0x73   : > { %582 = vmatprep.mubr.f32.mxu0 %v2627_v7  ;;  %743 = vmatprep.mubr.f32.mxu1 %v2627_v7 }
  0x74   : > { %1294 = vmatprep.subr.mxu0 %v1083_v10  ;;  %1455 = vmatprep.subr.mxu1 %v1179_v11  ;;  %v1133_v10 = vld [vmem:[%s4057_s2 + $0x1c8] sm:$0xff] }
  0x75   : > { %1295 = vmatpush1.msra.mxu0 %v1082_v12  ;;  %1456 = vmatpush1.msra.mxu1 %v1178_v13  ;;  %v1229_v11 = vld [vmem:[%s4057_s2 + $0x4c8] sm:$0xff]  ;;  %v1131_v12 = vld [vmem:[%s4057_s2 + $0x1b8] sm:$0xff] }
  0x76   : > { %583 = vmatmul.mubr.f32.gmra.mxu0 %v368_v14  ;;  %744 = vmatmul.mubr.f32.gmra.mxu1 %v368_v14  ;;  %v1227_v13 = vld [vmem:[%s4057_s2 + $0x4b8] sm:$0xff]  ;;  %v1130_v14 = vld [vmem:[%s4057_s2 + $0x1b0] sm:$0xff] }
  0x77   : > { %588 = vmatprep.mubr.f32.mxu0 %v2627_v7  ;;  %749 = vmatprep.mubr.f32.mxu1 %v2627_v7  ;;  %v1172_v7 = vld [vmem:[%s4057_s2 + $0x300] sm:$0xff] }
  0x78   : > { %1296 = vmatprep.subr.mxu0 %v1080_v15  ;;  %1457 = vmatprep.subr.mxu1 %v1176_v16  ;;  %v1226_v15 = vld [vmem:[%s4057_s2 + $0x4b0] sm:$0xff]  ;;  %v1128_v16 = vld [vmem:[%s4057_s2 + $0x1a0] sm:$0xff] }
  0x79   : > { %1297 = vmatpush1.msra.mxu0 %v1079_v17  ;;  %1458 = vmatpush1.msra.mxu1 %v1175_v18  ;;  %v1224_v17 = vld [vmem:[%s4057_s2 + $0x4a0] sm:$0xff]  ;;  %v1127_v18 = vld [vmem:[%s4057_s2 + $0x198] sm:$0xff] }
  0x7a   : > { %589 = vmatmul.mubr.f32.gmra.mxu0 %v369_v19  ;;  %750 = vmatmul.mubr.f32.gmra.mxu1 %v369_v19  ;;  %v1223_v19 = vld [vmem:[%s4057_s2 + $0x498] sm:$0xff] }
  0x7b   : > { %1298 = vmatprep.subr.mxu0 %v1077_v20  ;;  %1459 = vmatprep.subr.mxu1 %v1173_v21  ;;  %v1125_v20 = vld [vmem:[%s4057_s2 + $0x188] sm:$0xff] }
  0x7c   : > { %1299 = vmatpush1.msra.mxu0 %v1076_v22  ;;  %1460 = vmatpush1.msra.mxu1 %v1172_v7  ;;  %v1221_v21 = vld [vmem:[%s4057_s2 + $0x488] sm:$0xff]  ;;  %v1124_v22 = vld [vmem:[%s4057_s2 + $0x180] sm:$0xff] }
  0x7d   : > { %1300 = vmatprep.subr.mxu0 %v1170_v23  ;;  %1461 = vmatprep.subr.mxu1 %v1266_v24  ;;  %v1220_v7 = vld [vmem:[%s4057_s2 + $0x480] sm:$0xff]  ;;  %v1171_v23 = vld [vmem:[%s4057_s2 + $0x2f8] sm:$0xff] }
  0x7e   : > { %1301 = vmatpush2.msra.mxu0 %v1169_v25  ;;  %1462 = vmatpush2.msra.mxu1 %v1265_v26  ;;  %v1267_v24 = vld [vmem:[%s4057_s2 + $0x5f8] sm:$0xff] }
  0x7f   : > { %1302 = vmatprep.subr.mxu0 %v1167_v27  ;;  %1463 = vmatprep.subr.mxu1 %v1263_v28 }
  0x80   : > { %1303 = vmatpush2.msra.mxu0 %v1166_v29  ;;  %1464 = vmatpush2.msra.mxu1 %v1262_v30 }
  0x81   : > { %1304 = vmatprep.subr.mxu0 %v1164_v31  ;;  %1465 = vmatprep.subr.mxu1 %v1260_v32 }
  0x82   : > { %1305 = vmatpush2.msra.mxu0 %v1163_v33  ;;  %1466 = vmatpush2.msra.mxu1 %v1259_v34 }
  0x83   : > { %1306 = vmatprep.subr.mxu0 %v1161_v35  ;;  %1467 = vmatprep.subr.mxu1 %v1257_v36  ;;  %v1123_v35 = vld [vmem:[%s4057_s2 + $0x178] sm:$0xff] }
  0x84   : > { %1307 = vmatpush2.msra.mxu0 %v1160_v37  ;;  %1468 = vmatpush2.msra.mxu1 %v1256_v38 }
  0x85   : > { %1308 = vmatprep.subr.mxu0 %v1158_v39  ;;  %1469 = vmatprep.subr.mxu1 %v1254_v40 }
  0x86   : > { %1309 = vmatpush2.msra.mxu0 %v1157_v41  ;;  %1470 = vmatpush2.msra.mxu1 %v1253_v42  ;;  %v1168_v41 = vld [vmem:[%s4057_s2 + $0x2e0] sm:$0xff] }
  0x87   : > { %1310 = vmatprep.subr.mxu0 %v1155_v43  ;;  %1471 = vmatprep.subr.mxu1 %v1251_v44  ;;  %v1120_v44 = vld [vmem:[%s4057_s2 + $0x160] sm:$0xff] }
  0x88   : > { %1311 = vmatpush2.msra.mxu0 %v1154_v45  ;;  %1472 = vmatpush2.msra.mxu1 %v1250_v46 }
  0x89   : > { %1312 = vmatprep.subr.mxu0 %v1152_v47  ;;  %1473 = vmatprep.subr.mxu1 %v1248_v48 }
  0x8a   : > { %1313 = vmatpush2.msra.mxu0 %v1151_v49  ;;  %1474 = vmatpush2.msra.mxu1 %v1247_v50  ;;  %v1165_v50 = vld [vmem:[%s4057_s2 + $0x2c8] sm:$0xff] }
  0x8b   : > { %1314 = vmatprep.subr.mxu0 %v1149_v51  ;;  %1475 = vmatprep.subr.mxu1 %v1245_v52 }
  0x8c   : > { %1315 = vmatpush2.msra.mxu0 %v1148_v53  ;;  %1476 = vmatpush2.msra.mxu1 %v1244_v54 }
  0x8d   : > { %1316 = vmatprep.subr.mxu0 %v1146_v55  ;;  %1477 = vmatprep.subr.mxu1 %v1242_v56 }
  0x8e   : > { %1317 = vmatpush2.msra.mxu0 %v1145_v57  ;;  %1478 = vmatpush2.msra.mxu1 %v1241_v58  ;;  %v1219_v57 = vld [vmem:[%s4057_s2 + $0x478] sm:$0xff]  ;;  %v1117_v58 = vld [vmem:[%s4057_s2 + $0x148] sm:$0xff] }
  0x8f   : > { %1318 = vmatprep.subr.mxu0 %v1143_v59  ;;  %1479 = vmatprep.subr.mxu1 %v1239_v60 }
  0x90   : > { %1319 = vmatpush2.msra.mxu0 %v1142_v61  ;;  %1480 = vmatpush2.msra.mxu1 %v1238_v62  ;;  %v1264_v61 = vld [vmem:[%s4057_s2 + $0x5e0] sm:$0xff] }
  0x91   : > { %1320 = vmatprep.subr.mxu0 %v1140_v63  ;;  %1481 = vmatprep.subr.mxu1 %v1236_v0 }
  0x92   : > { %1321 = vmatpush2.msra.mxu0 %v1139_v1  ;;  %1482 = vmatpush2.msra.mxu1 %v1235_v2 }
  0x93   : > { %1322 = vmatprep.subr.mxu0 %v1137_v3  ;;  %1483 = vmatprep.subr.mxu1 %v1233_v4  ;;  %v1162_v3 = vld [vmem:[%s4057_s2 + $0x2b0] sm:$0xff] }
  0x94   : > { %1323 = vmatpush2.msra.mxu0 %v1136_v5  ;;  %1484 = vmatpush2.msra.mxu1 %v1232_v6 }
  0x95   : > { %1324 = vmatprep.subr.mxu0 %v1134_v8  ;;  %1485 = vmatprep.subr.mxu1 %v1230_v9 }
  0x96   : > { %1325 = vmatpush2.msra.mxu0 %v1133_v10  ;;  %1486 = vmatpush2.msra.mxu1 %v1229_v11  ;;  %v1216_v11 = vld [vmem:[%s4057_s2 + $0x460] sm:$0xff] }
  0x97   : > { %1326 = vmatprep.subr.mxu0 %v1131_v12  ;;  %1487 = vmatprep.subr.mxu1 %v1227_v13  ;;  %v1114_v12 = vld [vmem:[%s4057_s2 + $0x130] sm:$0xff] }
  0x98   : > { %1327 = vmatpush2.msra.mxu0 %v1130_v14  ;;  %1488 = vmatpush2.msra.mxu1 %v1226_v15  ;;  %v1261_v15 = vld [vmem:[%s4057_s2 + $0x5c8] sm:$0xff] }
  0x99   : > { %1328 = vmatprep.subr.mxu0 %v1128_v16  ;;  %1489 = vmatprep.subr.mxu1 %v1224_v17 }
  0x9a   : > { %1329 = vmatpush2.msra.mxu0 %v1127_v18  ;;  %1490 = vmatpush2.msra.mxu1 %v1223_v19 }
  0x9b   : > { %1330 = vmatprep.subr.mxu0 %v1125_v20  ;;  %1491 = vmatprep.subr.mxu1 %v1221_v21  ;;  %v1159_v21 = vld [vmem:[%s4057_s2 + $0x298] sm:$0xff] }
  0x9c   : > { %1331 = vmatpush2.msra.mxu0 %v1124_v22  ;;  %1492 = vmatpush2.msra.mxu1 %v1220_v7 }
  0x9d   : > { %2282 = vmatprep.subr.mxu0 %v1171_v23  ;;  %2362 = vmatprep.subr.mxu1 %v1267_v24 }
  0xfe   : > { %v3359_v25 = vpop.f32.mrf.mxu0  ;;  %v661_v26 = vpop.f32.mrf.mxu1 }
  0xff   : > { %v852_v27 = vmul.f32 0.1, %v661_v26  ;;  %vm836_vm0 = vcmp.gt.f32.partialorder %v661_v26, 0.0 }
 0x100   : > { %v502_v28 = vpop.f32.mrf.mxu0  ;;  %v663_v29 = vpop.f32.mrf.mxu1 }
 0x101   : > { %vm772_vm1 = vcmp.gt.f32.partialorder %v502_v28, 0.0  ;;  %v788_v30 = vmul.f32 0.1, %v502_v28  ;;  %vm916_vm2 = vcmp.gt.f32.partialorder %v663_v29, 0.0  ;;  %v932_v31 = vmul.f32 0.1, %v663_v29 }
 0x102   : > { %v3361_v32 = vpop.f32.mrf.mxu0  ;;  %v667_v33 = vpop.f32.mrf.mxu1  ;;  %v868_v36 = vsel %vm836_vm0, %v661_v26, %v852_v27 }
 0x103   : > { %v3363_v34 = vsel %vm772_vm1, %v502_v28, %v788_v30  ;;  %v948_v37 = vsel %vm916_vm2, %v663_v29, %v932_v31  ;;  %v853_v38 = vmul.f32 0.1, %v667_v33  ;;  %vm837_vm3 = vcmp.gt.f32.partialorder %v667_v33, 0.0  ;;  %v1213_v28 = vld [vmem:[%s4057_s2 + $0x448] sm:$0xff]  ;;  %v1111_v29 = vld [vmem:[%s4057_s2 + $0x118] sm:$0xff] }
 0x104   : > { %v508_v39 = vpop.f32.mrf.mxu0  ;;  %v669_v40 = vpop.f32.mrf.mxu1  ;;  %1332 = vmatprep.mubr.f32.mxu0 %v3363_v34  ;;  %v964_v42 = vmul.f32 %v948_v37, %v948_v37  ;;  %v3385_v51 = vmul.f32 %v868_v36, %v868_v36 }
 0x105   : > { %vm773_vm4 = vcmp.gt.f32.partialorder %v508_v39, 0.0  ;;  %v789_v43 = vmul.f32 0.1, %v508_v39  ;;  %1333 = vmatmul.mubr.f32.vlgmr.msra.gmra.mxu0 %v3359_v25  ;;  %vm917_vm5 = vcmp.gt.f32.partialorder %v669_v40, 0.0  ;;  %v933_v45 = vmul.f32 0.1, %v669_v40 }
 0x106   : > { %v3376_v46 = vpop.f32.mrf.mxu0  ;;  %v673_v47 = vpop.f32.mrf.mxu1  ;;  %2283 = vmatpush3.msra.mxu0 %v1123_v35  ;;  %v3380_v49 = vmul.f32 %v964_v42, %v948_v37  ;;  %v869_v52 = vsel %vm837_vm3, %v667_v33, %v853_v38  ;;  %v1258_v33 = vld [vmem:[%s4057_s2 + $0x5b0] sm:$0xff] }
 0x107   : > { %v3378_v48 = vsel %vm773_vm4, %v508_v39, %v789_v43  ;;  %2284 = vmatprep.subr.mxu0 %v1168_v41  ;;  %v949_v53 = vsel %vm917_vm5, %v669_v40, %v933_v45  ;;  %v854_v54 = vmul.f32 0.1, %v673_v47  ;;  %vm838_vm6 = vcmp.gt.f32.partialorder %v673_v47, 0.0  ;;  %v1156_v40 = vld [vmem:[%s4057_s2 + $0x280] sm:$0xff] }
 0x108   : > { %v514_v55 = vpop.f32.mrf.mxu0  ;;  %v675_v56 = vpop.f32.mrf.mxu1  ;;  %1338 = vmatprep.mubr.f32.mxu0 %v3378_v48  ;;  %2285 = vmatpush3.msra.mxu0 %v1120_v44  ;;  %v965_v59 = vmul.f32 %v949_v53, %v949_v53  ;;  %v3409_v4 = vmul.f32 %v869_v52, %v869_v52  ;;  %v1108_v52 = vld [vmem:[%s4057_s2 + $0x100] sm:$0xff] }
 0x109   : > { %vm774_vm7 = vcmp.gt.f32.partialorder %v514_v55, 0.0  ;;  %v790_v60 = vmul.f32 0.1, %v514_v55  ;;  %1493 = vmatprep.mubr.f32.mxu1 %v3380_v49  ;;  %1339 = vmatmul.mubr.f32.gmra.mxu0 %v3361_v32  ;;  %vm918_vm8 = vcmp.gt.f32.partialorder %v675_v56, 0.0  ;;  %v934_v62 = vmul.f32 0.1, %v675_v56 }
 0x10a   : > { %1494 = vmatmul.mubr.f32.vlgmr.msra.gmra.mxu1 %v3385_v51  ;;  %v3400_v63 = vpop.f32.mrf.mxu0  ;;  %v679_v0 = vpop.f32.mrf.mxu1  ;;  %2286 = vmatprep.subr.mxu0 %v1165_v50  ;;  %v3404_v2 = vmul.f32 %v965_v59, %v949_v53  ;;  %v870_v5 = vsel %vm838_vm6, %v673_v47, %v854_v54  ;;  %v1210_v50 = vld [vmem:[%s4057_s2 + $0x430] sm:$0xff] }
 0x10b   : > { %2363 = vmatpush3.msra.mxu1 %v1219_v57  ;;  %v3402_v1 = vsel %vm774_vm7, %v514_v55, %v790_v60  ;;  %2287 = vmatpush3.msra.mxu0 %v1117_v58  ;;  %v950_v6 = vsel %vm918_vm8, %v675_v56, %v934_v62  ;;  %v855_v8 = vmul.f32 0.1, %v679_v0  ;;  %vm839_vm9 = vcmp.gt.f32.partialorder %v679_v0, 0.0  ;;  %v1255_v55 = vld [vmem:[%s4057_s2 + $0x598] sm:$0xff] }
 0x10c   : > { %v520_v9 = vpop.f32.mrf.mxu0  ;;  %v681_v10 = vpop.f32.mrf.mxu1  ;;  %1344 = vmatprep.mubr.f32.mxu0 %v3402_v1  ;;  %2364 = vmatprep.subr.mxu1 %v1264_v61  ;;  %v966_v13 = vmul.f32 %v950_v6, %v950_v6  ;;  %v3434_v22 = vmul.f32 %v870_v5, %v870_v5  ;;  %v1153_v61 = vld [vmem:[%s4057_s2 + $0x268] sm:$0xff] }
 0x10d   : > { %vm775_vm10 = vcmp.gt.f32.partialorder %v520_v9, 0.0  ;;  %v791_v14 = vmul.f32 0.1, %v520_v9  ;;  %1499 = vmatprep.mubr.f32.mxu1 %v3404_v2  ;;  %1345 = vmatmul.mubr.f32.gmra.mxu0 %v3376_v46  ;;  %vm919_vm11 = vcmp.gt.f32.partialorder %v681_v10, 0.0  ;;  %v935_v16 = vmul.f32 0.1, %v681_v10 }
 0x10e   : > { %1500 = vmatmul.mubr.f32.gmra.mxu1 %v3409_v4  ;;  %v3425_v17 = vpop.f32.mrf.mxu0  ;;  %v685_v18 = vpop.f32.mrf.mxu1  ;;  %2288 = vmatprep.subr.mxu0 %v1162_v3  ;;  %v3429_v20 = vmul.f32 %v966_v13, %v950_v6  ;;  %v871_v7 = vsel %vm839_vm9, %v679_v0, %v855_v8  ;;  %v1252_v13 = vld [vmem:[%s4057_s2 + $0x580] sm:$0xff] }
 0x10f   : > { %2365 = vmatpush3.msra.mxu1 %v1216_v11  ;;  %v3427_v19 = vsel %vm775_vm10, %v520_v9, %v791_v14  ;;  %2289 = vmatpush3.msra.mxu0 %v1114_v12  ;;  %v951_v23 = vsel %vm919_vm11, %v681_v10, %v935_v16  ;;  %v856_v24 = vmul.f32 0.1, %v685_v18  ;;  %vm840_vm12 = vcmp.gt.f32.partialorder %v685_v18, 0.0  ;;  %v1207_v9 = vld [vmem:[%s4057_s2 + $0x418] sm:$0xff]  ;;  %v1105_v10 = vld [vmem:[%s4057_s2 + $0xe8] sm:$0xff] }
 0x110   : > { %v526_v26 = vpop.f32.mrf.mxu0  ;;  %v687_v27 = vpop.f32.mrf.mxu1  ;;  %1350 = vmatprep.mubr.f32.mxu0 %v3427_v19  ;;  %2366 = vmatprep.subr.mxu1 %v1261_v15  ;;  %v967_v30 = vmul.f32 %v951_v23, %v951_v23  ;;  %v3459_v41 = vmul.f32 %v871_v7, %v871_v7  ;;  %v1150_v7 = vld [vmem:[%s4057_s2 + $0x250] sm:$0xff] }
 0x111   : > { %vm776_vm13 = vcmp.gt.f32.partialorder %v526_v26, 0.0  ;;  %v792_v31 = vmul.f32 0.1, %v526_v26  ;;  %1505 = vmatprep.mubr.f32.mxu1 %v3429_v20  ;;  %1351 = vmatmul.mubr.f32.gmra.mxu0 %v3400_v63  ;;  %vm920_vm14 = vcmp.gt.f32.partialorder %v687_v27, 0.0  ;;  %v936_v35 = vmul.f32 0.1, %v687_v27 }
 0x112   : > { %1506 = vmatmul.mubr.f32.gmra.mxu1 %v3434_v22  ;;  %v3450_v36 = vpop.f32.mrf.mxu0  ;;  %v691_v37 = vpop.f32.mrf.mxu1  ;;  %2290 = vmatprep.subr.mxu0 %v1159_v21  ;;  %v3454_v39 = vmul.f32 %v967_v30, %v951_v23  ;;  %v872_v42 = vsel %vm840_vm12, %v685_v18, %v856_v24  ;;  %v1204_v30 = vld [vmem:[%s4057_s2 + $0x400] sm:$0xff] }
 0x113   : > { %2367 = vmatpush3.msra.mxu1 %v1213_v28  ;;  %v3452_v38 = vsel %vm776_vm13, %v526_v26, %v792_v31  ;;  %2291 = vmatpush3.msra.mxu0 %v1111_v29  ;;  %v952_v43 = vsel %vm920_vm14, %v687_v27, %v936_v35  ;;  %v857_v44 = vmul.f32 0.1, %v691_v37  ;;  %vm841_vm15 = vcmp.gt.f32.partialorder %v691_v37, 0.0  ;;  %v1102_v31 = vld [vmem:[%s4057_s2 + $0xd0] sm:$0xff] }
 0x114   : > { %v532_v45 = vpop.f32.mrf.mxu0  ;;  %v693_v47 = vpop.f32.mrf.mxu1  ;;  %1356 = vmatprep.mubr.f32.mxu0 %v3452_v38  ;;  %2368 = vmatprep.subr.mxu1 %v1258_v33  ;;  %v968_v53 = vmul.f32 %v952_v43, %v952_v43  ;;  %v3484_v62 = vmul.f32 %v872_v42, %v872_v42 }
 0x115   : > { %vm777_vm0 = vcmp.gt.f32.partialorder %v532_v45, 0.0  ;;  %v793_v54 = vmul.f32 0.1, %v532_v45  ;;  %1511 = vmatprep.mubr.f32.mxu1 %v3454_v39  ;;  %1357 = vmatmul.mubr.f32.gmra.mxu0 %v3425_v17  ;;  %vm921_vm1 = vcmp.gt.f32.partialorder %v693_v47, 0.0  ;;  %v937_v56 = vmul.f32 0.1, %v693_v47 }
 0x116   : > { %1512 = vmatmul.mubr.f32.gmra.mxu1 %v3459_v41  ;;  %v3475_v57 = vpop.f32.mrf.mxu0  ;;  %v697_v58 = vpop.f32.mrf.mxu1  ;;  %2292 = vmatprep.subr.mxu0 %v1156_v40  ;;  %v3479_v60 = vmul.f32 %v968_v53, %v952_v43  ;;  %v873_v0 = vsel %vm841_vm15, %v691_v37, %v857_v44  ;;  %v1249_v37 = vld [vmem:[%s4057_s2 + $0x568] sm:$0xff] }
 0x117   : > { %2369 = vmatpush3.msra.mxu1 %v1210_v50  ;;  %v3477_v59 = vsel %vm777_vm0, %v532_v45, %v793_v54  ;;  %2293 = vmatpush3.msra.mxu0 %v1108_v52  ;;  %v953_v3 = vsel %vm921_vm1, %v693_v47, %v937_v56  ;;  %v858_v5 = vmul.f32 0.1, %v697_v58  ;;  %vm842_vm2 = vcmp.gt.f32.partialorder %v697_v58, 0.0  ;;  %v1147_v47 = vld [vmem:[%s4057_s2 + $0x238] sm:$0xff] }
 0x118   : > { %v538_v6 = vpop.f32.mrf.mxu0  ;;  %v699_v8 = vpop.f32.mrf.mxu1  ;;  %1362 = vmatprep.mubr.f32.mxu0 %v3477_v59  ;;  %2370 = vmatprep.subr.mxu1 %v1255_v55  ;;  %v969_v11 = vmul.f32 %v953_v3, %v953_v3  ;;  %v3509_v23 = vmul.f32 %v873_v0, %v873_v0 }
 0x119   : > { %vm778_vm3 = vcmp.gt.f32.partialorder %v538_v6, 0.0  ;;  %v794_v12 = vmul.f32 0.1, %v538_v6  ;;  %1517 = vmatprep.mubr.f32.mxu1 %v3479_v60  ;;  %1363 = vmatmul.mubr.f32.gmra.mxu0 %v3450_v36  ;;  %vm922_vm4 = vcmp.gt.f32.partialorder %v699_v8, 0.0  ;;  %v938_v14 = vmul.f32 0.1, %v699_v8 }
 0x11a   : > { %1518 = vmatmul.mubr.f32.gmra.mxu1 %v3484_v62  ;;  %v3500_v15 = vpop.f32.mrf.mxu0  ;;  %v703_v16 = vpop.f32.mrf.mxu1  ;;  %2294 = vmatprep.subr.mxu0 %v1153_v61  ;;  %v3504_v21 = vmul.f32 %v969_v11, %v953_v3  ;;  %v874_v24 = vsel %vm842_vm2, %v697_v58, %v858_v5  ;;  %v1201_v58 = vld [vmem:[%s4057_s2 + $0x3e8] sm:$0xff]  ;;  %v1099_v61 = vld [vmem:[%s4057_s2 + $0xb8] sm:$0xff]  ;;  %v1246_v5 = vld [vmem:[%s4057_s2 + $0x550] sm:$0xff] }
 0x11b   : > { %2371 = vmatpush3.msra.mxu1 %v1207_v9  ;;  %v3502_v18 = vsel %vm778_vm3, %v538_v6, %v794_v12  ;;  %2295 = vmatpush3.msra.mxu0 %v1105_v10  ;;  %v954_v26 = vsel %vm922_vm4, %v699_v8, %v938_v14  ;;  %v859_v27 = vmul.f32 0.1, %v703_v16  ;;  %vm843_vm5 = vcmp.gt.f32.partialorder %v703_v16, 0.0  ;;  %v1144_v12 = vld [vmem:[%s4057_s2 + $0x220] sm:$0xff] }
 0x11c   : > { %v544_v28 = vpop.f32.mrf.mxu0  ;;  %v705_v29 = vpop.f32.mrf.mxu1  ;;  %1368 = vmatprep.mubr.f32.mxu0 %v3502_v18  ;;  %2372 = vmatprep.subr.mxu1 %v1252_v13  ;;  %v970_v33 = vmul.f32 %v954_v26, %v954_v26  ;;  %v3534_v50 = vmul.f32 %v874_v24, %v874_v24 }
 0x11d   : > { %vm779_vm6 = vcmp.gt.f32.partialorder %v544_v28, 0.0  ;;  %v795_v35 = vmul.f32 0.1, %v544_v28  ;;  %1523 = vmatprep.mubr.f32.mxu1 %v3504_v21  ;;  %1369 = vmatmul.mubr.f32.gmra.mxu0 %v3475_v57  ;;  %vm923_vm7 = vcmp.gt.f32.partialorder %v705_v29, 0.0  ;;  %v939_v40 = vmul.f32 0.1, %v705_v29 }
 0x11e   : > { %1524 = vmatmul.mubr.f32.gmra.mxu1 %v3509_v23  ;;  %v3525_v42 = vpop.f32.mrf.mxu0  ;;  %v709_v43 = vpop.f32.mrf.mxu1  ;;  %2296 = vmatprep.subr.mxu0 %v1150_v7  ;;  %v3529_v45 = vmul.f32 %v970_v33, %v954_v26  ;;  %v875_v52 = vsel %vm843_vm5, %v703_v16, %v859_v27  ;;  %v1198_v27 = vld [vmem:[%s4057_s2 + $0x3d0] sm:$0xff] }
 0x11f   : > { %2373 = vmatpush3.msra.mxu1 %v1204_v30  ;;  %v3527_v44 = vsel %vm779_vm6, %v544_v28, %v795_v35  ;;  %2297 = vmatpush3.msra.mxu0 %v1102_v31  ;;  %v955_v53 = vsel %vm923_vm7, %v705_v29, %v939_v40  ;;  %v860_v54 = vmul.f32 0.1, %v709_v43  ;;  %vm844_vm8 = vcmp.gt.f32.partialorder %v709_v43, 0.0  ;;  %v1096_v28 = vld [vmem:[%s4057_s2 + $0xa0] sm:$0xff]  ;;  %v1243_v31 = vld [vmem:[%s4057_s2 + $0x538] sm:$0xff] }
 0x120   : > { %v550_v55 = vpop.f32.mrf.mxu0  ;;  %v711_v56 = vpop.f32.mrf.mxu1  ;;  %1374 = vmatprep.mubr.f32.mxu0 %v3527_v44  ;;  %2374 = vmatprep.subr.mxu1 %v1249_v37  ;;  %v971_v0 = vmul.f32 %v955_v53, %v955_v53  ;;  %v3559_v13 = vmul.f32 %v875_v52, %v875_v52 }
 0x121   : > { %vm780_vm9 = vcmp.gt.f32.partialorder %v550_v55, 0.0  ;;  %v796_v3 = vmul.f32 0.1, %v550_v55  ;;  %1529 = vmatprep.mubr.f32.mxu1 %v3529_v45  ;;  %1375 = vmatmul.mubr.f32.gmra.mxu0 %v3500_v15  ;;  %vm924_vm10 = vcmp.gt.f32.partialorder %v711_v56, 0.0  ;;  %v940_v6 = vmul.f32 0.1, %v711_v56 }
 0x122   : > { %1530 = vmatmul.mubr.f32.gmra.mxu1 %v3534_v50  ;;  %v3550_v8 = vpop.f32.mrf.mxu0  ;;  %v715_v9 = vpop.f32.mrf.mxu1  ;;  %2298 = vmatprep.subr.mxu0 %v1147_v47  ;;  %v3554_v11 = vmul.f32 %v971_v0, %v955_v53  ;;  %v876_v14 = vsel %vm844_vm8, %v709_v43, %v860_v54  ;;  %v1141_v47 = vld [vmem:[%s4057_s2 + $0x208] sm:$0xff] }
 0x123   : > { %2375 = vmatpush3.msra.mxu1 %v1201_v58  ;;  %v3552_v10 = vsel %vm780_vm9, %v550_v55, %v796_v3  ;;  %2299 = vmatpush3.msra.mxu0 %v1099_v61  ;;  %v956_v16 = vsel %vm924_vm10, %v711_v56, %v940_v6  ;;  %v861_v7 = vmul.f32 0.1, %v715_v9  ;;  %vm845_vm11 = vcmp.gt.f32.partialorder %v715_v9, 0.0  ;;  %v1195_v61 = vld [vmem:[%s4057_s2 + $0x3b8] sm:$0xff]  ;;  %v1093_v0 = vld [vmem:[%s4057_s2 + $0x88] sm:$0xff]  ;;  %v1240_v6 = vld [vmem:[%s4057_s2 + $0x520] sm:$0xff] }
 0x124   : > { %v556_v24 = vpop.f32.mrf.mxu0  ;;  %v717_v26 = vpop.f32.mrf.mxu1  ;;  %1380 = vmatprep.mubr.f32.mxu0 %v3552_v10  ;;  %2376 = vmatprep.subr.mxu1 %v1246_v5  ;;  %v972_v29 = vmul.f32 %v956_v16, %v956_v16  ;;  %v3584_v52 = vmul.f32 %v876_v14, %v876_v14 }
 0x125   : > { %vm781_vm12 = vcmp.gt.f32.partialorder %v556_v24, 0.0  ;;  %v797_v30 = vmul.f32 0.1, %v556_v24  ;;  %1535 = vmatprep.mubr.f32.mxu1 %v3554_v11  ;;  %1381 = vmatmul.mubr.f32.gmra.mxu0 %v3525_v42  ;;  %vm925_vm13 = vcmp.gt.f32.partialorder %v717_v26, 0.0  ;;  %v941_v33 = vmul.f32 0.1, %v717_v26 }
 0x126   : > { %1536 = vmatmul.mubr.f32.gmra.mxu1 %v3559_v13  ;;  %v3575_v35 = vpop.f32.mrf.mxu0  ;;  %v721_v37 = vpop.f32.mrf.mxu1  ;;  %2300 = vmatprep.subr.mxu0 %v1144_v12  ;;  %v3579_v43 = vmul.f32 %v972_v29, %v956_v16  ;;  %v877_v53 = vsel %vm845_vm11, %v715_v9, %v861_v7 }
 0x127   : > { %4078 = vst [vmem:[#allocation7_spill] sm:$0xff] %v3575_v35  ;;  %2377 = vmatpush3.msra.mxu1 %v1198_v27  ;;  %v3577_v40 = vsel %vm781_vm12, %v556_v24, %v797_v30  ;;  %2301 = vmatpush3.msra.mxu0 %v1096_v28  ;;  %v957_v54 = vsel %vm925_vm13, %v717_v26, %v941_v33  ;;  %v862_v55 = vmul.f32 0.1, %v721_v37  ;;  %vm846_vm14 = vcmp.gt.f32.partialorder %v721_v37, 0.0  ;;  %v1138_v24 = vld [vmem:[%s4057_s2 + $0x1f0] sm:$0xff]  ;;  %v1192_v33 = vld [vmem:[%s4057_s2 + $0x3a0] sm:$0xff] }
 0x128   : > { %v562_v56 = vpop.f32.mrf.mxu0  ;;  %v723_v58 = vpop.f32.mrf.mxu1  ;;  %1386 = vmatprep.mubr.f32.mxu0 %v3577_v40  ;;  %2378 = vmatprep.subr.mxu1 %v1243_v31  ;;  %v973_v3 = vmul.f32 %v957_v54, %v957_v54  ;;  %v3609_v26 = vmul.f32 %v877_v53, %v877_v53 }
 0x129   : > { %vm782_vm15 = vcmp.gt.f32.partialorder %v562_v56, 0.0  ;;  %v798_v5 = vmul.f32 0.1, %v562_v56  ;;  %1541 = vmatprep.mubr.f32.mxu1 %v3579_v43  ;;  %1387 = vmatmul.mubr.f32.gmra.mxu0 %v3550_v8  ;;  %vm926_vm0 = vcmp.gt.f32.partialorder %v723_v58, 0.0  ;;  %v942_v9 = vmul.f32 0.1, %v723_v58 }
 0x12a   : > { %1542 = vmatmul.mubr.f32.gmra.mxu1 %v3584_v52  ;;  %v3600_v12 = vpop.f32.mrf.mxu0  ;;  %v727_v14 = vpop.f32.mrf.mxu1  ;;  %2302 = vmatprep.subr.mxu0 %v1141_v47  ;;  %v3604_v7 = vmul.f32 %v973_v3, %v957_v54  ;;  %4081 = vst [vmem:[#allocation10_spill] sm:$0xff] %v3609_v26  ;;  %v878_v27 = vsel %vm846_vm14, %v721_v37, %v862_v55  ;;  %v1090_v47 = vld [vmem:[%s4057_s2 + $0x70] sm:$0xff]  ;;  %v1237_v37 = vld [vmem:[%s4057_s2 + $0x508] sm:$0xff]  ;;  %v1135_v3 = vld [vmem:[%s4057_s2 + $0x1d8] sm:$0xff] }
 0x12b   : > { %4079 = vst [vmem:[#allocation8_spill] sm:$0xff] %v3600_v12  ;;  %2379 = vmatpush3.msra.mxu1 %v1195_v61  ;;  %v3602_v16 = vsel %vm782_vm15, %v562_v56, %v798_v5  ;;  %2303 = vmatpush3.msra.mxu0 %v1093_v0  ;;  %v958_v28 = vsel %vm926_vm0, %v723_v58, %v942_v9  ;;  %v863_v29 = vmul.f32 0.1, %v727_v14  ;;  %vm847_vm1 = vcmp.gt.f32.partialorder %v727_v14, 0.0 }
 0x12c   : > { %4080 = vst [vmem:[#allocation9_spill] sm:$0xff] %v3604_v7  ;;  %v568_v30 = vpop.f32.mrf.mxu0  ;;  %v729_v31 = vpop.f32.mrf.mxu1  ;;  %1392 = vmatprep.mubr.f32.mxu0 %v3602_v16  ;;  %2380 = vmatprep.subr.mxu1 %v1240_v6  ;;  %v974_v54 = vmul.f32 %v958_v28, %v958_v28  ;;  %v3634_v5 = vmul.f32 %v878_v27, %v878_v27 }
 0x12d   : > { %vm783_vm2 = vcmp.gt.f32.partialorder %v568_v30, 0.0  ;;  %v799_v53 = vmul.f32 0.1, %v568_v30  ;;  %1547 = vmatprep.mubr.f32.mxu1 %v3604_v7  ;;  %1393 = vmatmul.mubr.f32.gmra.mxu0 %v3575_v35  ;;  %vm927_vm3 = vcmp.gt.f32.partialorder %v729_v31, 0.0  ;;  %v943_v55 = vmul.f32 0.1, %v729_v31 }
 0x12e   : > { %1548 = vmatmul.mubr.f32.gmra.mxu1 %v3609_v26  ;;  %v3625_v56 = vpop.f32.mrf.mxu0  ;;  %v733_v58 = vpop.f32.mrf.mxu1  ;;  %2304 = vmatprep.subr.mxu0 %v1138_v24  ;;  %v3629_v0 = vmul.f32 %v974_v54, %v958_v28  ;;  %4085 = vst [vmem:[#allocation14_spill] sm:$0xff] %v3634_v5  ;;  %v879_v6 = vsel %vm847_vm1, %v727_v14, %v863_v29  ;;  %v1189_v24 = vld [vmem:[%s4057_s2 + $0x388] sm:$0xff]  ;;  %v1087_v28 = vld [vmem:[%s4057_s2 + $0x58] sm:$0xff]  ;;  %v1234_v14 = vld [vmem:[%s4057_s2 + $0x4f0] sm:$0xff] }
 0x12f   : > { %4082 = vst [vmem:[#allocation11_spill] sm:$0xff] %v3625_v56  ;;  %2381 = vmatpush3.msra.mxu1 %v1192_v33  ;;  %v3627_v61 = vsel %vm783_vm2, %v568_v30, %v799_v53  ;;  %2305 = vmatpush3.msra.mxu0 %v1090_v47  ;;  %v959_v9 = vsel %vm927_vm3, %v729_v31, %v943_v55  ;;  %v864_v26 = vmul.f32 0.1, %v733_v58  ;;  %vm848_vm4 = vcmp.gt.f32.partialorder %v733_v58, 0.0  ;;  %v1132_v53 = vld [vmem:[%s4057_s2 + $0x1c0] sm:$0xff] }
 0x130   : > { %4083 = vst [vmem:[#allocation12_spill] sm:$0xff] %v3627_v61  ;;  %4084 = vst [vmem:[#allocation13_spill] sm:$0xff] %v3629_v0  ;;  %v574_v35 = vpop.f32.mrf.mxu0  ;;  %v735_v7 = vpop.f32.mrf.mxu1  ;;  %1398 = vmatprep.mubr.f32.mxu0 %v3627_v61  ;;  %2382 = vmatprep.subr.mxu1 %v1237_v37  ;;  %v975_v30 = vmul.f32 %v959_v9, %v959_v9  ;;  %v3659_v37 = vmul.f32 %v879_v6, %v879_v6 }
 0x131   : > { %vm784_vm5 = vcmp.gt.f32.partialorder %v574_v35, 0.0  ;;  %v800_v27 = vmul.f32 0.1, %v574_v35  ;;  %1553 = vmatprep.mubr.f32.mxu1 %v3629_v0  ;;  %1399 = vmatmul.mubr.f32.gmra.mxu0 %v3600_v12  ;;  %vm928_vm6 = vcmp.gt.f32.partialorder %v735_v7, 0.0  ;;  %v944_v29 = vmul.f32 0.1, %v735_v7 }
 0x132   : > { %1554 = vmatmul.mubr.f32.gmra.mxu1 %v3634_v5  ;;  %v3650_v31 = vpop.f32.mrf.mxu0  ;;  %v739_v33 = vpop.f32.mrf.mxu1  ;;  %2306 = vmatprep.subr.mxu0 %v1135_v3  ;;  %v3654_v54 = vmul.f32 %v975_v30, %v959_v9  ;;  %4089 = vst [vmem:[#allocation18_spill] sm:$0xff] %v3659_v37  ;;  %v880_v55 = vsel %vm848_vm4, %v733_v58, %v864_v26  ;;  %v1084_v3 = vld [vmem:[%s4057_s2 + $0x40] sm:$0xff] }
 0x133   : > { %4086 = vst [vmem:[#allocation15_spill] sm:$0xff] %v3650_v31  ;;  %2383 = vmatpush3.msra.mxu1 %v1189_v24  ;;  %v3652_v47 = vsel %vm784_vm5, %v574_v35, %v800_v27  ;;  %2307 = vmatpush3.msra.mxu0 %v1087_v28  ;;  %v960_v12 = vsel %vm928_vm6, %v735_v7, %v944_v29  ;;  %v865_v5 = vmul.f32 0.1, %v739_v33  ;;  %v1186_v35 = vld [vmem:[%s4057_s2 + $0x370] sm:$0xff]  ;;  %vm849_vm7 = vcmp.gt.f32.partialorder %v739_v33, 0.0  ;;  %v1231_v7 = vld [vmem:[%s4057_s2 + $0x4d8] sm:$0xff] }
 0x134   : > { %4087 = vst [vmem:[#allocation16_spill] sm:$0xff] %v3652_v47  ;;  %4088 = vst [vmem:[#allocation17_spill] sm:$0xff] %v3654_v54  ;;  %v580_v0 = vpop.f32.mrf.mxu0  ;;  %v741_v61 = vpop.f32.mrf.mxu1  ;;  %1404 = vmatprep.mubr.f32.mxu0 %v3652_v47  ;;  %2384 = vmatprep.subr.mxu1 %v1234_v14  ;;  %v976_v9 = vmul.f32 %v960_v12, %v960_v12  ;;  %v1129_v27 = vld [vmem:[%s4057_s2 + $0x1a8] sm:$0xff]  ;;  %v3684_v14 = vmul.f32 %v880_v55, %v880_v55 }
 0x135   : > { %vm785_vm8 = vcmp.gt.f32.partialorder %v580_v0, 0.0  ;;  %v801_v6 = vmul.f32 0.1, %v580_v0  ;;  %1559 = vmatprep.mubr.f32.mxu1 %v3654_v54  ;;  %1405 = vmatmul.mubr.f32.gmra.mxu0 %v3625_v56  ;;  %vm929_vm9 = vcmp.gt.f32.partialorder %v741_v61, 0.0  ;;  %v945_v26 = vmul.f32 0.1, %v741_v61 }
 0x136   : > { %1560 = vmatmul.mubr.f32.gmra.mxu1 %v3659_v37  ;;  %v3675_v58 = vpop.f32.mrf.mxu0  ;;  %v745_v24 = vpop.f32.mrf.mxu1  ;;  %2308 = vmatprep.subr.mxu0 %v1132_v53  ;;  %v3679_v30 = vmul.f32 %v976_v9, %v960_v12  ;;  %4092 = vst [vmem:[#allocation21_spill] sm:$0xff] %v3684_v14  ;;  %v881_v29 = vsel %vm849_vm7, %v739_v33, %v865_v5  ;;  %v1183_v12 = vld [vmem:[%s4057_s2 + $0x358] sm:$0xff] }
 0x137   : > { %4090 = vst [vmem:[#allocation19_spill] sm:$0xff] %v3675_v58  ;;  %2385 = vmatpush3.msra.mxu1 %v1186_v35  ;;  %v3677_v28 = vsel %vm785_vm8, %v580_v0, %v801_v6  ;;  %2309 = vmatpush3.msra.mxu0 %v1084_v3  ;;  %v961_v56 = vsel %vm929_vm9, %v741_v61, %v945_v26  ;;  %v866_v37 = vmul.f32 0.1, %v745_v24  ;;  %v1081_v0 = vld [vmem:[%s4057_s2 + $0x28] sm:$0xff]  ;;  %vm850_vm10 = vcmp.gt.f32.partialorder %v745_v24, 0.0  ;;  %v1228_v61 = vld [vmem:[%s4057_s2 + $0x4c0] sm:$0xff] }
 0x138   : > { %4091 = vst [vmem:[#allocation20_spill] sm:$0xff] %v3679_v30  ;;  %v586_v54 = vpop.f32.mrf.mxu0  ;;  %v747_v47 = vpop.f32.mrf.mxu1  ;;  %1410 = vmatprep.mubr.f32.mxu0 %v3677_v28  ;;  %2386 = vmatprep.subr.mxu1 %v1231_v7  ;;  %v977_v53 = vmul.f32 %v961_v56, %v961_v56  ;;  %v1126_v6 = vld [vmem:[%s4057_s2 + $0x190] sm:$0xff]  ;;  %v3709_v7 = vmul.f32 %v881_v29, %v881_v29 }
 0x139   : > { %vm786_vm11 = vcmp.gt.f32.partialorder %v586_v54, 0.0  ;;  %v802_v55 = vmul.f32 0.1, %v586_v54  ;;  %1565 = vmatprep.mubr.f32.mxu1 %v3679_v30  ;;  %1411 = vmatmul.mubr.f32.gmra.mxu0 %v3650_v31  ;;  %vm930_vm12 = vcmp.gt.f32.partialorder %v747_v47, 0.0  ;;  %v946_v5 = vmul.f32 0.1, %v747_v47 }
 0x13a   : > { %1566 = vmatmul.mubr.f32.gmra.mxu1 %v3684_v14  ;;  %v3700_v33 = vpop.f32.mrf.mxu0  ;;  %v751_v35 = vpop.f32.mrf.mxu1  ;;  %2310 = vmatprep.subr.mxu0 %v1129_v27  ;;  %v3704_v9 = vmul.f32 %v977_v53, %v961_v56  ;;  %v882_v26 = vsel %vm850_vm10, %v745_v24, %v866_v37  ;;  %v1180_v56 = vld [vmem:[%s4057_s2 + $0x340] sm:$0xff] }
 0x13b   : > { %2387 = vmatpush3.msra.mxu1 %v1183_v12  ;;  %v3702_v3 = vsel %vm786_vm11, %v586_v54, %v802_v55  ;;  %2311 = vmatpush3.msra.mxu0 %v1081_v0  ;;  %v962_v31 = vsel %vm930_vm12, %v747_v47, %v946_v5  ;;  %v1078_v54 = vld [vmem:[%s4057_s2 + $0x10] sm:$0xff]  ;;  %v867_v12 = vmul.f32 0.1, %v751_v35  ;;  %v1225_v47 = vld [vmem:[%s4057_s2 + $0x4a8] sm:$0xff]  ;;  %vm851_vm14 = vcmp.gt.f32.partialorder %v751_v35, 0.0 }
 0x13c   : > { %v592_v14 = vpop.f32.mrf.mxu0  ;;  %v753_v30 = vpop.f32.mrf.mxu1  ;;  %1416 = vmatprep.mubr.f32.mxu0 %v3702_v3  ;;  %2388 = vmatprep.subr.mxu1 %v1228_v61  ;;  %v978_v27 = vmul.f32 %v962_v31, %v962_v31  ;;  %v3729_v53 = vmul.f32 %v882_v26, %v882_v26  ;;  %v1177_v61 = vld [vmem:[%s4057_s2 + $0x328] sm:$0xff] }
 0x13d   : > { %vm787_vm13 = vcmp.gt.f32.partialorder %v592_v14, 0.0  ;;  %v803_v29 = vmul.f32 0.1, %v592_v14  ;;  %1571 = vmatprep.mubr.f32.mxu1 %v3704_v9  ;;  %1417 = vmatmul.mubr.f32.gmra.mxu0 %v3675_v58  ;;  %vm931_vm15 = vcmp.gt.f32.partialorder %v753_v30, 0.0  ;;  %v947_v37 = vmul.f32 0.1, %v753_v30 }
 0x13e   : > { %1572 = vmatmul.mubr.f32.gmra.mxu1 %v3709_v7  ;;  %2312 = vmatprep.subr.mxu0 %v1126_v6  ;;  %v3727_v0 = vmul.f32 %v978_v27, %v962_v31  ;;  %v883_v5 = vsel %vm851_vm14, %v751_v35, %v867_v12  ;;  %v1222_v31 = vld [vmem:[%s4057_s2 + $0x490] sm:$0xff]  ;;  %v1887_v6 = vld [vmem:[%s3818_s26 + $0x38] sm:$0xff]  ;;  %v1889_v12 = vld [vmem:[%s3818_s26 + $0x48] sm:$0xff] }
 0x13f   : > { %2389 = vmatpush3.msra.mxu1 %v1180_v56  ;;  %v3725_v24 = vsel %vm787_vm13, %v592_v14, %v803_v29  ;;  %2313 = vmatpush3.msra.mxu0 %v1078_v54  ;;  %v963_v55 = vsel %vm931_vm15, %v753_v30, %v947_v37  ;;  %v3744_v14 = vmul.f32 %v883_v5, %v883_v5  ;;  %v1174_v35 = vld [vmem:[%s4057_s2 + $0x310] sm:$0xff] }
 0x140   : > { %1422 = vmatprep.mubr.f32.mxu0 %v3725_v24  ;;  %2390 = vmatprep.subr.mxu1 %v1225_v47  ;;  %v979_v58 = vmul.f32 %v963_v55, %v963_v55 }
 0x141   : > { %1577 = vmatprep.mubr.f32.mxu1 %v3727_v0  ;;  %1423 = vmatmul.mubr.f32.gmra.mxu0 %v3700_v33 }
 0x142   : > { %1578 = vmatmul.mubr.f32.gmra.mxu1 %v3729_v53  ;;  %1654 = vmatprep.mubr.f32.mxu0 %v3363_v34  ;;  %v3742_v30 = vmul.f32 %v979_v58, %v963_v55  ;;  %v4095_v34 = vld [vmem:[#allocation10_spill] sm:$0xff]  ;;  %v1886_v58 = vld [vmem:[%s3818_s26 + $0x30] sm:$0xff] }
 0x143   : > { %2391 = vmatpush3.msra.mxu1 %v1177_v61 }
 0x144   : > { %2392 = vmatprep.subr.mxu1 %v1222_v31  ;;  %1583 = vmatprep.mubr.f32.mxu1 %v3742_v30 }
 0x145   : > { %1655 = vmatmul.mubr.f32.vlgmr.msra.gmra.mxu0 %v3359_v25  ;;  %2393 = vmatpush3.msra.mxu1 %v1174_v35  ;;  %v4093_v25 = vld [vmem:[#allocation9_spill] sm:$0xff] }
 0x146   : > { %1584 = vmatmul.mubr.f32.gmra.mxu1 %v3744_v14  ;;  %1659 = vmatprep.mubr.f32.mxu0 %v3378_v48  ;;  %v4097_v48 = vld [vmem:[#allocation13_spill] sm:$0xff] }
 0x147   : > { %1799 = vmatprep.mubr.f32.mxu1 %v3380_v49  ;;  %v4098_v49 = vld [vmem:[#allocation8_spill] sm:$0xff] }
 0x149   : > { %1660 = vmatmul.mubr.f32.gmra.mxu0 %v3361_v32  ;;  %v4094_v32 = vld [vmem:[#allocation7_spill] sm:$0xff] }
 0x14a   : > { %1800 = vmatmul.mubr.f32.vlgmr.msra.gmra.mxu1 %v3385_v51  ;;  %1664 = vmatprep.mubr.f32.mxu0 %v3402_v1  ;;  %v4099_v51 = vld [vmem:[#allocation14_spill] sm:$0xff]  ;;  %v4101_v1 = vld [vmem:[#allocation17_spill] sm:$0xff] }
 0x14b   : > { %1804 = vmatprep.mubr.f32.mxu1 %v3404_v2  ;;  %v4102_v2 = vld [vmem:[#allocation11_spill] sm:$0xff] }
 0x14d   : > { %1665 = vmatmul.mubr.f32.gmra.mxu0 %v3376_v46  ;;  %v4096_v46 = vld [vmem:[#allocation12_spill] sm:$0xff] }
 0x14e   : > { %1805 = vmatmul.mubr.f32.gmra.mxu1 %v3409_v4  ;;  %1669 = vmatprep.mubr.f32.mxu0 %v3427_v19  ;;  %v4103_v4 = vld [vmem:[#allocation18_spill] sm:$0xff]  ;;  %v4105_v19 = vld [vmem:[#allocation15_spill] sm:$0xff] }
 0x14f   : > { %1809 = vmatprep.mubr.f32.mxu1 %v3429_v20  ;;  %v4106_v20 = vld [vmem:[#allocation21_spill] sm:$0xff] }
 0x151   : > { %1670 = vmatmul.mubr.f32.gmra.mxu0 %v3400_v63  ;;  %v4100_v63 = vld [vmem:[#allocation16_spill] sm:$0xff] }
 0x152   : > { %1810 = vmatmul.mubr.f32.gmra.mxu1 %v3434_v22  ;;  %1674 = vmatprep.mubr.f32.mxu0 %v3452_v38  ;;  %v4107_v22 = vld [vmem:[#allocation19_spill] sm:$0xff] }
 0x153   : > { %1814 = vmatprep.mubr.f32.mxu1 %v3454_v39 }
 0x155   : > { %1675 = vmatmul.mubr.f32.gmra.mxu0 %v3425_v17  ;;  %v4104_v17 = vld [vmem:[#allocation20_spill] sm:$0xff] }
 0x156   : > { %1815 = vmatmul.mubr.f32.gmra.mxu1 %v3459_v41  ;;  %1679 = vmatprep.mubr.f32.mxu0 %v3477_v59 }
 0x157   : > { %1819 = vmatprep.mubr.f32.mxu1 %v3479_v60 }
 0x159   : > { %1680 = vmatmul.mubr.f32.gmra.mxu0 %v3450_v36 }
 0x15a   : > { %1820 = vmatmul.mubr.f32.gmra.mxu1 %v3484_v62  ;;  %1684 = vmatprep.mubr.f32.mxu0 %v3502_v18 }
 0x15b   : > { %1824 = vmatprep.mubr.f32.mxu1 %v3504_v21 }
 0x15d   : > { %1685 = vmatmul.mubr.f32.gmra.mxu0 %v3475_v57  ;;  %v1880_v57 = vld [vmem:[%s3818_s26] sm:$0xff] }
 0x15e   : > { %1825 = vmatmul.mubr.f32.gmra.mxu1 %v3509_v23  ;;  %1689 = vmatprep.mubr.f32.mxu0 %v3527_v44  ;;  %v1883_v44 = vld [vmem:[%s3818_s26 + $0x18] sm:$0xff] }
 0x15f   : > { %1829 = vmatprep.mubr.f32.mxu1 %v3529_v45 }
 0x161   : > { %1690 = vmatmul.mubr.f32.gmra.mxu0 %v3500_v15  ;;  %v1881_v15 = vld [vmem:[%s3818_s26 + $0x8] sm:$0xff] }
 0x162   : > { %1830 = vmatmul.mubr.f32.gmra.mxu1 %v3534_v50  ;;  %1694 = vmatprep.mubr.f32.mxu0 %v3552_v10 }
 0x163   : > { %1834 = vmatprep.mubr.f32.mxu1 %v3554_v11  ;;  %v1884_v11 = vld [vmem:[%s3818_s26 + $0x20] sm:$0xff] }
 0x165   : > { %1695 = vmatmul.mubr.f32.gmra.mxu0 %v3525_v42 }
 0x166   : > { %1835 = vmatmul.mubr.f32.gmra.mxu1 %v3559_v13  ;;  %1699 = vmatprep.mubr.f32.mxu0 %v3577_v40 }
 0x167   : > { %1839 = vmatprep.mubr.f32.mxu1 %v3579_v43 }
 0x169   : > { %1700 = vmatmul.mubr.f32.gmra.mxu0 %v3550_v8 }
 0x16a   : > { %1840 = vmatmul.mubr.f32.gmra.mxu1 %v3584_v52  ;;  %1704 = vmatprep.mubr.f32.mxu0 %v3602_v16 }
 0x16b   : > { %1844 = vmatprep.mubr.f32.mxu1 %v4093_v25 }
 0x16d   : > { %1705 = vmatmul.mubr.f32.gmra.mxu0 %v4094_v32 }
 0x16e   : > { %1845 = vmatmul.mubr.f32.gmra.mxu1 %v4095_v34  ;;  %1709 = vmatprep.mubr.f32.mxu0 %v4096_v46  ;;  %v1893_v34 = vld [vmem:[%s3818_s26 + $0x68] sm:$0xff] }
 0x16f   : > { %1849 = vmatprep.mubr.f32.mxu1 %v4097_v48 }
 0x171   : > { %1710 = vmatmul.mubr.f32.gmra.mxu0 %v4098_v49 }
 0x172   : > { %1850 = vmatmul.mubr.f32.gmra.mxu1 %v4099_v51  ;;  %1714 = vmatprep.mubr.f32.mxu0 %v4100_v63 }
 0x173   : > { %1854 = vmatprep.mubr.f32.mxu1 %v4101_v1  ;;  %v1895_v1 = vld [vmem:[%s3818_s26 + $0x78] sm:$0xff] }
 0x175   : > { %1715 = vmatmul.mubr.f32.gmra.mxu0 %v4102_v2 }
 0x176   : > { %1855 = vmatmul.mubr.f32.gmra.mxu1 %v4103_v4  ;;  %1719 = vmatprep.mubr.f32.mxu0 %v3677_v28 }
 0x177   : > { %1859 = vmatprep.mubr.f32.mxu1 %v4104_v17 }
 0x179   : > { %1720 = vmatmul.mubr.f32.gmra.mxu0 %v4105_v19 }
 0x17a   : > { %1860 = vmatmul.mubr.f32.gmra.mxu1 %v4106_v20  ;;  %1724 = vmatprep.mubr.f32.mxu0 %v3702_v3  ;;  %v1896_v20 = vld [vmem:[%s3818_s26 + $0x80] sm:$0xff] }
 0x17b   : > { %1864 = vmatprep.mubr.f32.mxu1 %v3704_v9 }
 0x17d   : > { %1725 = vmatmul.mubr.f32.gmra.mxu0 %v4107_v22 }
 0x17e   : > { %1865 = vmatmul.mubr.f32.gmra.mxu1 %v3709_v7  ;;  %1729 = vmatprep.mubr.f32.mxu0 %v3725_v24 }
 0x17f   : > { %1869 = vmatprep.mubr.f32.mxu1 %v3727_v0  ;;  %v1890_v0 = vld [vmem:[%s3818_s26 + $0x50] sm:$0xff] }
 0x181   : > { %1730 = vmatmul.mubr.f32.gmra.mxu0 %v3700_v33 }
 0x182   : > { %1870 = vmatmul.mubr.f32.gmra.mxu1 %v3729_v53 }
 0x183   : > { %1874 = vmatprep.mubr.f32.mxu1 %v3742_v30  ;;  %v1892_v30 = vld [vmem:[%s3818_s26 + $0x60] sm:$0xff] }
 0x186   : > { %1875 = vmatmul.mubr.f32.gmra.mxu1 %v3744_v14 }
 0x1c5   : > { %v1334_v36 = vpop.f32.mrf.mxu0 }
 0x1c7   : > { %v1336_v38 = vpop.f32.mrf.mxu0 }
 0x1c9   : > { %v1340_v39 = vpop.f32.mrf.mxu0 }
 0x1ca   : > { %v1495_v41 = vpop.f32.mrf.mxu1 }
 0x1cb   : > { %v1496_v59 = vadd.f32 %v1495_v41, %v1334_v36  ;;  %v1342_v60 = vpop.f32.mrf.mxu0 }
 0x1cc   : > { %v1497_v62 = vpop.f32.mrf.mxu1 }
 0x1cd   : > { %v1928_v18 = vmul.f32 %v1880_v57, %v1496_v59  ;;  %v1498_v21 = vadd.f32 %v1497_v62, %v1336_v38  ;;  %v1346_v23 = vpop.f32.mrf.mxu0  ;;  %v1898_v57 = vld [vmem:[%s3818_s26 + $0x90] sm:$0xff] }
 0x1ce   : > { %v1501_v42 = vpop.f32.mrf.mxu1 }
 0x1cf   : > { %v1944_v45 = vmul.f32 %v1881_v15, %v1498_v21  ;;  %v1502_v50 = vadd.f32 %v1501_v42, %v1340_v39  ;;  %v1348_v8 = vpop.f32.mrf.mxu0 }
 0x1d0   : > { %v1503_v10 = vpop.f32.mrf.mxu1 }
 0x1d1   : > { %v3824_v13 = vadd.f32 %v1944_v45, %v1928_v18  ;;  %v1929_v40 = vmul.f32 %v1883_v44, %v1502_v50  ;;  %v1504_v43 = vadd.f32 %v1503_v10, %v1342_v60  ;;  %v1352_v52 = vpop.f32.mrf.mxu0  ;;  %v1899_v18 = vld [vmem:[%s3818_s26 + $0x98] sm:$0xff]  ;;  %v1901_v50 = vld [vmem:[%s3818_s26 + $0xa8] sm:$0xff] }
 0x1d2   : > { %v1507_v16 = vpop.f32.mrf.mxu1 }
 0x1d3   : > { %v1945_v28 = vmul.f32 %v1884_v11, %v1504_v43  ;;  %v1508_v33 = vadd.f32 %v1507_v16, %v1346_v23  ;;  %v1354_v3 = vpop.f32.mrf.mxu0  ;;  %v1902_v43 = vld [vmem:[%s3818_s26 + $0xb0] sm:$0xff] }
 0x1d4   : > { %v1509_v9 = vpop.f32.mrf.mxu1 }
 0x1d5   : > { %v3828_v7 = vadd.f32 %v1945_v28, %v1929_v40  ;;  %v1930_v26 = vmul.f32 %v1886_v58, %v1508_v33  ;;  %v1510_v56 = vadd.f32 %v1509_v9, %v1348_v8  ;;  %v1358_v54 = vpop.f32.mrf.mxu0 }
 0x1d6   : > { %v1513_v27 = vpop.f32.mrf.mxu1 }
 0x1d7   : > { %v1946_v29 = vmul.f32 %v1887_v6, %v1510_v56  ;;  %v1514_v47 = vadd.f32 %v1513_v27, %v1352_v52  ;;  %v1360_v37 = vpop.f32.mrf.mxu0 }
 0x1d8   : > { %v1515_v24 = vpop.f32.mrf.mxu1 }
 0x1d9   : > { %v3832_v53 = vadd.f32 %v1946_v29, %v1930_v26  ;;  %v1931_v55 = vmul.f32 %v1889_v12, %v1514_v47  ;;  %v1516_v61 = vadd.f32 %v1515_v24, %v1354_v3  ;;  %v1364_v5 = vpop.f32.mrf.mxu0  ;;  %v1904_v3 = vld [vmem:[%s3818_s26 + $0xc0] sm:$0xff]  ;;  %v1907_v24 = vld [vmem:[%s3818_s26 + $0xd8] sm:$0xff] }
 0x1da   : > { %v1519_v31 = vpop.f32.mrf.mxu1 }
 0x1db   : > { %v1947_v14 = vmul.f32 %v1890_v0, %v1516_v61  ;;  %v1520_v35 = vadd.f32 %v1519_v31, %v1358_v54  ;;  %v1366_v25 = vpop.f32.mrf.mxu0  ;;  %v1905_v54 = vld [vmem:[%s3818_s26 + $0xc8] sm:$0xff]  ;;  %v1908_v31 = vld [vmem:[%s3818_s26 + $0xe0] sm:$0xff] }
 0x1dc   : > { %v1521_v32 = vpop.f32.mrf.mxu1 }
 0x1dd   : > { %v3836_v46 = vadd.f32 %v1947_v14, %v1931_v55  ;;  %v1932_v48 = vmul.f32 %v1892_v30, %v1520_v35  ;;  %v1522_v49 = vadd.f32 %v1521_v32, %v1360_v37  ;;  %v1370_v51 = vpop.f32.mrf.mxu0 }
 0x1de   : > { %v1525_v63 = vpop.f32.mrf.mxu1 }
 0x1df   : > { %v1948_v2 = vmul.f32 %v1893_v34, %v1522_v49  ;;  %v1526_v4 = vadd.f32 %v1525_v63, %v1364_v5  ;;  %v1372_v17 = vpop.f32.mrf.mxu0  ;;  %v1910_v34 = vld [vmem:[%s3818_s26 + $0xf0] sm:$0xff] }
 0x1e0   : > { %v1527_v19 = vpop.f32.mrf.mxu1 }
 0x1e1   : > { %v3840_v22 = vadd.f32 %v1948_v2, %v1932_v48  ;;  %v1933_v36 = vmul.f32 %v1895_v1, %v1526_v4  ;;  %v1528_v38 = vadd.f32 %v1527_v19, %v1366_v25  ;;  %v1376_v39 = vpop.f32.mrf.mxu0  ;;  %v1911_v1 = vld [vmem:[%s3818_s26 + $0xf8] sm:$0xff] }
 0x1e2   : > { %v1531_v41 = vpop.f32.mrf.mxu1 }
 0x1e3   : > { %v1949_v59 = vmul.f32 %v1896_v20, %v1528_v38  ;;  %v1532_v60 = vadd.f32 %v1531_v41, %v1370_v51  ;;  %v1378_v62 = vpop.f32.mrf.mxu0 }
 0x1e4   : > { %v1533_v15 = vpop.f32.mrf.mxu1 }
 0x1e5   : > { %v3844_v21 = vadd.f32 %v1949_v59, %v1933_v36  ;;  %v1934_v23 = vmul.f32 %v1898_v57, %v1532_v60  ;;  %v1534_v42 = vadd.f32 %v1533_v15, %v1372_v17  ;;  %v1382_v44 = vpop.f32.mrf.mxu0  ;;  %v1913_v36 = vld [vmem:[%s3818_s26 + $0x108] sm:$0xff]  ;;  %v1914_v59 = vld [vmem:[%s3818_s26 + $0x110] sm:$0xff] }
 0x1e6   : > { %v1537_v45 = vpop.f32.mrf.mxu1 }
 0x1e7   : > { %v1950_v8 = vmul.f32 %v1899_v18, %v1534_v42  ;;  %v1538_v10 = vadd.f32 %v1537_v45, %v1376_v39  ;;  %v1384_v11 = vpop.f32.mrf.mxu0  ;;  %v1916_v42 = vld [vmem:[%s3818_s26 + $0x120] sm:$0xff] }
 0x1e8   : > { %v1539_v40 = vpop.f32.mrf.mxu1 }
 0x1e9   : > { %v3848_v52 = vadd.f32 %v1950_v8, %v1934_v23  ;;  %v1935_v16 = vmul.f32 %v1901_v50, %v1538_v10  ;;  %v1540_v58 = vadd.f32 %v1539_v40, %v1378_v62  ;;  %v1388_v28 = vpop.f32.mrf.mxu0  ;;  %v1917_v10 = vld [vmem:[%s3818_s26 + $0x128] sm:$0xff] }
 0x1ea   : > { %v1543_v33 = vpop.f32.mrf.mxu1 }
 0x1eb   : > { %v1951_v9 = vmul.f32 %v1902_v43, %v1540_v58  ;;  %v1544_v6 = vadd.f32 %v1543_v33, %v1382_v44  ;;  %v1390_v26 = vpop.f32.mrf.mxu0 }
 0x1ec   : > { %v1545_v56 = vpop.f32.mrf.mxu1 }
 0x1ed   : > { %v3852_v27 = vadd.f32 %v1951_v9, %v1935_v16  ;;  %v1936_v12 = vmul.f32 %v1904_v3, %v1544_v6  ;;  %v1546_v29 = vadd.f32 %v1545_v56, %v1384_v11  ;;  %v1394_v47 = vpop.f32.mrf.mxu0 }
 0x1ee   : > { %v1549_v37 = vpop.f32.mrf.mxu1 }
 0x1ef   : > { %v1952_v0 = vmul.f32 %v1905_v54, %v1546_v29  ;;  %v1550_v55 = vadd.f32 %v1549_v37, %v1388_v28  ;;  %v1396_v61 = vpop.f32.mrf.mxu0  ;;  %v1919_v28 = vld [vmem:[%s3818_s26 + $0x138] sm:$0xff]  ;;  %v1922_v37 = vld [vmem:[%s3818_s26 + $0x150] sm:$0xff] }
 0x1f0   : > { %v1551_v5 = vpop.f32.mrf.mxu1 }
 0x1f1   : > { %v3856_v30 = vadd.f32 %v1952_v0, %v1936_v12  ;;  %v1937_v14 = vmul.f32 %v1907_v24, %v1550_v55  ;;  %v1552_v35 = vadd.f32 %v1551_v5, %v1390_v26  ;;  %v1400_v25 = vpop.f32.mrf.mxu0  ;;  %v1920_v26 = vld [vmem:[%s3818_s26 + $0x140] sm:$0xff]  ;;  %v1923_v5 = vld [vmem:[%s3818_s26 + $0x158] sm:$0xff] }
 0x1f2   : > { %v1555_v32 = vpop.f32.mrf.mxu1 }
 0x1f3   : > { %v1953_v48 = vmul.f32 %v1908_v31, %v1552_v35  ;;  %v1556_v49 = vadd.f32 %v1555_v32, %v1394_v47  ;;  %v1402_v51 = vpop.f32.mrf.mxu0 }
 0x1f4   : > { %v1557_v63 = vpop.f32.mrf.mxu1 }
 0x1f5   : > { %v3860_v2 = vadd.f32 %v1953_v48, %v1937_v14  ;;  %v1938_v4 = vmul.f32 %v1910_v34, %v1556_v49  ;;  %v1558_v17 = vadd.f32 %v1557_v63, %v1396_v61  ;;  %v1406_v19 = vpop.f32.mrf.mxu0  ;;  %v1925_v34 = vld [vmem:[%s3818_s26 + $0x168] sm:$0xff] }
 0x1f6   : > { %v1561_v20 = vpop.f32.mrf.mxu1 }
 0x1f7   : > { %v1954_v38 = vmul.f32 %v1911_v1, %v1558_v17  ;;  %v1562_v39 = vadd.f32 %v1561_v20, %v1400_v25  ;;  %v1408_v41 = vpop.f32.mrf.mxu0  ;;  %v1926_v1 = vld [vmem:[%s3818_s26 + $0x170] sm:$0xff] }
 0x1f8   : > { %v1563_v57 = vpop.f32.mrf.mxu1 }
 0x1f9   : > { %v3864_v60 = vadd.f32 %v1954_v38, %v1938_v4  ;;  %v1939_v62 = vmul.f32 %v1913_v36, %v1562_v39  ;;  %v1564_v15 = vadd.f32 %v1563_v57, %v1402_v51  ;;  %v1412_v18 = vpop.f32.mrf.mxu0 }
 0x1fa   : > { %v1567_v23 = vpop.f32.mrf.mxu1 }
 0x1fb   : > { %v1955_v44 = vmul.f32 %v1914_v59, %v1564_v15  ;;  %v1568_v45 = vadd.f32 %v1567_v23, %v1406_v19  ;;  %v1414_v50 = vpop.f32.mrf.mxu0 }
 0x1fc   : > { %v1569_v8 = vpop.f32.mrf.mxu1 }
 0x1fd   : > { %v3868_v11 = vadd.f32 %v1955_v44, %v1939_v62  ;;  %v1940_v40 = vmul.f32 %v1916_v42, %v1568_v45  ;;  %v1570_v43 = vadd.f32 %v1569_v8, %v1408_v41  ;;  %v1418_v16 = vpop.f32.mrf.mxu0 }
 0x1fe   : > { %v1573_v58 = vpop.f32.mrf.mxu1 }
 0x1ff   : > { %v1956_v33 = vmul.f32 %v1917_v10, %v1570_v43  ;;  %v1574_v3 = vadd.f32 %v1573_v58, %v1412_v18  ;;  %v1420_v9 = vpop.f32.mrf.mxu0  ;;  %v1882_v18 = vld [vmem:[%s3818_s26 + $0x10] sm:$0xff]  ;;  %v1885_v43 = vld [vmem:[%s3818_s26 + $0x28] sm:$0xff] }
 0x200   : > { %v1575_v6 = vpop.f32.mrf.mxu1 }
 0x201   : > { %v3872_v56 = vadd.f32 %v1956_v33, %v1940_v40  ;;  %v1941_v54 = vmul.f32 %v1919_v28, %v1574_v3  ;;  %v1576_v12 = vadd.f32 %v1575_v6, %v1414_v50  ;;  %v1424_v29 = vpop.f32.mrf.mxu0 }
 0x202   : > { %v1579_v47 = vpop.f32.mrf.mxu1 }
 0x203   : > { %v1957_v24 = vmul.f32 %v1920_v26, %v1576_v12  ;;  %v1580_v0 = vadd.f32 %v1579_v47, %v1418_v16  ;;  %v1426_v55 = vpop.f32.mrf.mxu0  ;;  %v1888_v12 = vld [vmem:[%s3818_s26 + $0x40] sm:$0xff] }
 0x204   : > { %v1581_v61 = vpop.f32.mrf.mxu1 }
 0x205   : > { %v3876_v31 = vadd.f32 %v1957_v24, %v1941_v54  ;;  %v1942_v14 = vmul.f32 %v1922_v37, %v1580_v0  ;;  %v1582_v35 = vadd.f32 %v1581_v61, %v1420_v9  ;;  %v2314_v25 = vpop.f32.mrf.mxu0 }
 0x206   : > { %v1585_v32 = vpop.f32.mrf.mxu1 }
 0x207   : > { %v1958_v48 = vmul.f32 %v1923_v5, %v1582_v35  ;;  %v1586_v49 = vadd.f32 %v1585_v32, %v1424_v29  ;;  %v2315_v51 = vpop.f32.mrf.mxu0 }
 0x208   : > { %v1587_v63 = vpop.f32.mrf.mxu1  ;;  %v2316_v59 = vadd.f32 %v2315_v51, %v2314_v25 }
 0x209   : > { %v3880_v4 = vadd.f32 %v1958_v48, %v1942_v14  ;;  %v1943_v17 = vmul.f32 %v1925_v34, %v1586_v49  ;;  %v1588_v19 = vadd.f32 %v1587_v63, %v1426_v55  ;;  %v2317_v20 = vpop.f32.mrf.mxu0  ;;  %v1891_v14 = vld [vmem:[%s3818_s26 + $0x58] sm:$0xff] }
 0x20a   : > { %v2394_v36 = vpop.f32.mrf.mxu1 }
 0x20b   : > { %v1959_v38 = vmul.f32 %v1926_v1, %v1588_v19  ;;  %v2318_v39 = vpop.f32.mrf.mxu0  ;;  %v1894_v1 = vld [vmem:[%s3818_s26 + $0x70] sm:$0xff] }
 0x20c   : > { %v2395_v41 = vpop.f32.mrf.mxu1  ;;  %v2319_v50 = vadd.f32 %v2318_v39, %v2317_v20 }
 0x20d   : > { %v3882_v57 = vadd.f32 %v1959_v38, %v1943_v17  ;;  %v2396_v62 = vadd.f32 %v2395_v41, %v2394_v36  ;;  %v2320_v15 = vpop.f32.mrf.mxu0 }
 0x20e   : > { %v2397_v23 = vpop.f32.mrf.mxu1 }
 0x20f   : > { %v1802_v42 = vadd.f32 %v2396_v62, %v2316_v59  ;;  %v2321_v44 = vpop.f32.mrf.mxu0  ;;  %v1897_v62 = vld [vmem:[%s3818_s26 + $0x88] sm:$0xff] }
 0x210   : > { %v2398_v45 = vpop.f32.mrf.mxu1  ;;  %v2322_v9 = vadd.f32 %v2321_v44, %v2320_v15 }
 0x211   : > { %v1976_v8 = vmul.f32 %v1882_v18, %v1802_v42  ;;  %v2399_v10 = vadd.f32 %v2398_v45, %v2397_v23  ;;  %v2323_v40 = vpop.f32.mrf.mxu0 }
 0x212   : > { %v2400_v16 = vpop.f32.mrf.mxu1 }
 0x213   : > { %v3894_v58 = vadd.f32 %v1976_v8, %v3824_v13  ;;  %v1807_v28 = vadd.f32 %v2399_v10, %v2319_v50  ;;  %v2324_v33 = vpop.f32.mrf.mxu0  ;;  %v1900_v10 = vld [vmem:[%s3818_s26 + $0xa0] sm:$0xff] }
 0x214   : > { %v2401_v3 = vpop.f32.mrf.mxu1  ;;  %v2325_v0 = vadd.f32 %v2324_v33, %v2323_v40 }
 0x215   : > { %2008 = vst [vmem:[%s3890_s30] sm:$0xff] %v3894_v58  ;;  %v1977_v6 = vmul.f32 %v1885_v43, %v1807_v28  ;;  %v2402_v26 = vadd.f32 %v2401_v3, %v2400_v16  ;;  %v2326_v54 = vpop.f32.mrf.mxu0 }
 0x216   : > { %v2403_v29 = vpop.f32.mrf.mxu1 }
 0x217   : > { %v3900_v47 = vadd.f32 %v1977_v6, %v3828_v7  ;;  %v1812_v37 = vadd.f32 %v2402_v26, %v2322_v9  ;;  %v2327_v24 = vpop.f32.mrf.mxu0  ;;  %v1903_v26 = vld [vmem:[%s3818_s26 + $0xb8] sm:$0xff] }
 0x218   : > { %v2404_v13 = vpop.f32.mrf.mxu1  ;;  %v2328_v48 = vadd.f32 %v2327_v24, %v2326_v54 }
 0x219   : > { %2009 = vst [vmem:[%s3890_s30 + $0x8] sm:$0xff] %v3900_v47  ;;  %v1978_v55 = vmul.f32 %v1888_v12, %v1812_v37  ;;  %v2405_v61 = vadd.f32 %v2404_v13, %v2403_v29  ;;  %v2329_v5 = vpop.f32.mrf.mxu0 }
 0x21a   : > { %v2406_v35 = vpop.f32.mrf.mxu1 }
 0x21b   : > { %v3906_v25 = vadd.f32 %v1978_v55, %v3832_v53  ;;  %v1817_v32 = vadd.f32 %v2405_v61, %v2325_v0  ;;  %v2330_v34 = vpop.f32.mrf.mxu0  ;;  %v1906_v61 = vld [vmem:[%s3818_s26 + $0xd0] sm:$0xff] }
 0x21c   : > { %v2407_v7 = vpop.f32.mrf.mxu1  ;;  %v2331_v38 = vadd.f32 %v2330_v34, %v2329_v5 }
 0x21d   : > { %2010 = vst [vmem:[%s3890_s30 + $0x10] sm:$0xff] %v3906_v25  ;;  %v1979_v49 = vmul.f32 %v1891_v14, %v1817_v32  ;;  %v2408_v51 = vadd.f32 %v2407_v7, %v2406_v35  ;;  %v2332_v63 = vpop.f32.mrf.mxu0 }
 0x21e   : > { %v2409_v17 = vpop.f32.mrf.mxu1 }
 0x21f   : > { %v3912_v19 = vadd.f32 %v1979_v49, %v3836_v46  ;;  %v1822_v20 = vadd.f32 %v2408_v51, %v2328_v48  ;;  %v2333_v36 = vpop.f32.mrf.mxu0  ;;  %v1909_v51 = vld [vmem:[%s3818_s26 + $0xe8] sm:$0xff] }
 0x220   : > { %v2410_v53 = vpop.f32.mrf.mxu1  ;;  %v2334_v44 = vadd.f32 %v2333_v36, %v2332_v63 }
 0x221   : > { %2011 = vst [vmem:[%s3890_s30 + $0x18] sm:$0xff] %v3912_v19  ;;  %v1980_v39 = vmul.f32 %v1894_v1, %v1822_v20  ;;  %v2411_v41 = vadd.f32 %v2410_v53, %v2409_v17  ;;  %v2335_v59 = vpop.f32.mrf.mxu0 }
 0x222   : > { %v2412_v15 = vpop.f32.mrf.mxu1 }
 0x223   : > { %v3918_v18 = vadd.f32 %v1980_v39, %v3840_v22  ;;  %v1827_v23 = vadd.f32 %v2411_v41, %v2331_v38  ;;  %v2336_v42 = vpop.f32.mrf.mxu0  ;;  %v1912_v41 = vld [vmem:[%s3818_s26 + $0x100] sm:$0xff] }
 0x224   : > { %v2413_v46 = vpop.f32.mrf.mxu1  ;;  %v2337_v33 = vadd.f32 %v2336_v42, %v2335_v59 }
 0x225   : > { %2012 = vst [vmem:[%s3890_s30 + $0x20] sm:$0xff] %v3918_v18  ;;  %v1981_v45 = vmul.f32 %v1897_v62, %v1827_v23  ;;  %v2414_v50 = vadd.f32 %v2413_v46, %v2412_v15  ;;  %v2338_v8 = vpop.f32.mrf.mxu0 }
 0x226   : > { %v2415_v40 = vpop.f32.mrf.mxu1 }
 0x227   : > { %v3924_v43 = vadd.f32 %v1981_v45, %v3844_v21  ;;  %v1832_v16 = vadd.f32 %v2414_v50, %v2334_v44  ;;  %v2339_v28 = vpop.f32.mrf.mxu0  ;;  %v1915_v50 = vld [vmem:[%s3818_s26 + $0x118] sm:$0xff] }
 0x228   : > { %v2416_v22 = vpop.f32.mrf.mxu1  ;;  %v2340_v24 = vadd.f32 %v2339_v28, %v2338_v8 }
 0x229   : > { %2013 = vst [vmem:[%s3890_s30 + $0x28] sm:$0xff] %v3924_v43  ;;  %v1982_v3 = vmul.f32 %v1900_v10, %v1832_v16  ;;  %v2417_v9 = vadd.f32 %v2416_v22, %v2415_v40  ;;  %v2341_v6 = vpop.f32.mrf.mxu0 }
 0x22a   : > { %v2418_v54 = vpop.f32.mrf.mxu1 }
 0x22b   : > { %v3930_v12 = vadd.f32 %v1982_v3, %v3848_v52  ;;  %v1837_v29 = vadd.f32 %v2417_v9, %v2337_v33  ;;  %v2342_v37 = vpop.f32.mrf.mxu0  ;;  %v1918_v9 = vld [vmem:[%s3818_s26 + $0x130] sm:$0xff] }
 0x22c   : > { %v2419_v21 = vpop.f32.mrf.mxu1  ;;  %v2343_v34 = vadd.f32 %v2342_v37, %v2341_v6 }
 0x22d   : > { %2014 = vst [vmem:[%s3890_s30 + $0x30] sm:$0xff] %v3930_v12  ;;  %v1983_v13 = vmul.f32 %v1903_v26, %v1837_v29  ;;  %v2420_v0 = vadd.f32 %v2419_v21, %v2418_v54  ;;  %v2344_v55 = vpop.f32.mrf.mxu0 }
 0x22e   : > { %v2421_v5 = vpop.f32.mrf.mxu1 }
 0x22f   : > { %v3936_v14 = vadd.f32 %v1983_v13, %v3852_v27  ;;  %v1842_v35 = vadd.f32 %v2420_v0, %v2340_v24  ;;  %v2345_v32 = vpop.f32.mrf.mxu0  ;;  %v1921_v13 = vld [vmem:[%s3818_s26 + $0x148] sm:$0xff] }
 0x230   : > { %v2422_v52 = vpop.f32.mrf.mxu1  ;;  %v2346_v36 = vadd.f32 %v2345_v32, %v2344_v55 }
 0x231   : > { %2015 = vst [vmem:[%s3890_s30 + $0x38] sm:$0xff] %v3936_v14  ;;  %v1984_v7 = vmul.f32 %v1906_v61, %v1842_v35  ;;  %v2423_v48 = vadd.f32 %v2422_v52, %v2421_v5  ;;  %v2347_v49 = vpop.f32.mrf.mxu0 }
 0x232   : > { %v2424_v63 = vpop.f32.mrf.mxu1 }
 0x233   : > { %v3942_v1 = vadd.f32 %v1984_v7, %v3856_v30  ;;  %v1847_v17 = vadd.f32 %v2423_v48, %v2343_v34  ;;  %v2348_v20 = vpop.f32.mrf.mxu0  ;;  %v1924_v7 = vld [vmem:[%s3818_s26 + $0x160] sm:$0xff] }
 0x234   : > { %v2425_v27 = vpop.f32.mrf.mxu1  ;;  %v2349_v42 = vadd.f32 %v2348_v20, %v2347_v49 }
 0x235   : > { %2016 = vst [vmem:[%s3890_s30 + $0x40] sm:$0xff] %v3942_v1  ;;  %v1985_v53 = vmul.f32 %v1909_v51, %v1847_v17  ;;  %v2426_v38 = vadd.f32 %v2425_v27, %v2424_v63  ;;  %v2350_v39 = vpop.f32.mrf.mxu0  ;;  %v1927_v27 = vld [vmem:[%s3818_s26 + $0x178] sm:$0xff] }
 0x236   : > { %v2427_v59 = vpop.f32.mrf.mxu1 }
 0x237   : > { %v3948_v62 = vadd.f32 %v1985_v53, %v3860_v2  ;;  %v1852_v15 = vadd.f32 %v2426_v38, %v2346_v36  ;;  %v2351_v23 = vpop.f32.mrf.mxu0 }
 0x238   : > { %v2428_v30 = vpop.f32.mrf.mxu1  ;;  %v2352_v28 = vadd.f32 %v2351_v23, %v2350_v39 }
 0x239   : > { %2017 = vst [vmem:[%s3890_s30 + $0x48] sm:$0xff] %v3948_v62  ;;  %v1986_v46 = vmul.f32 %v1912_v41, %v1852_v15  ;;  %v2429_v44 = vadd.f32 %v2428_v30, %v2427_v59  ;;  %v2353_v45 = vpop.f32.mrf.mxu0 }
 0x23a   : > { %v2430_v8 = vpop.f32.mrf.mxu1 }
 0x23b   : > { %v3954_v10 = vadd.f32 %v1986_v46, %v3864_v60  ;;  %v1857_v40 = vadd.f32 %v2429_v44, %v2349_v42  ;;  %v2354_v16 = vpop.f32.mrf.mxu0 }
 0x23c   : > { %v2431_v2 = vpop.f32.mrf.mxu1  ;;  %v2355_v37 = vadd.f32 %v2354_v16, %v2353_v45 }
 0x23d   : > { %2018 = vst [vmem:[%s3890_s30 + $0x50] sm:$0xff] %v3954_v10  ;;  %v1987_v22 = vmul.f32 %v1915_v50, %v1857_v40  ;;  %v2432_v33 = vadd.f32 %v2431_v2, %v2430_v8  ;;  %v2356_v3 = vpop.f32.mrf.mxu0 }
 0x23e   : > { %v2433_v6 = vpop.f32.mrf.mxu1 }
 0x23f   : > { %v3960_v26 = vadd.f32 %v1987_v22, %v3868_v11  ;;  %v1862_v54 = vadd.f32 %v2432_v33, %v2352_v28  ;;  %v2357_v29 = vpop.f32.mrf.mxu0 }
 0x240   : > { %v2434_v60 = vpop.f32.mrf.mxu1  ;;  %v2358_v11 = vadd.f32 %v2357_v29, %v2356_v3 }
 0x241   : > { %2019 = vst [vmem:[%s3890_s30 + $0x58] sm:$0xff] %v3960_v26  ;;  %v1988_v21 = vmul.f32 %v1918_v9, %v1862_v54  ;;  %v2435_v24 = vadd.f32 %v2434_v60, %v2433_v6  ;;  %v2359_v0 = vpop.f32.mrf.mxu0 }
 0x242   : > { %v2436_v55 = vpop.f32.mrf.mxu1 }
 0x243   : > { %v2004_v61 = vadd.f32 %v1988_v21, %v3872_v56  ;;  %v1867_v5 = vadd.f32 %v2435_v24, %v2355_v37  ;;  %v2360_v34 = vpop.f32.mrf.mxu0 }
 0x244   : > { %v2437_v35 = vpop.f32.mrf.mxu1  ;;  %v2361_v17 = vadd.f32 %v2360_v34, %v2359_v0 }
 0x245   : > { %2020 = vst [vmem:[%s3890_s30 + $0x60] sm:$0xff] %v2004_v61  ;;  %v1989_v32 = vmul.f32 %v1921_v13, %v1867_v5  ;;  %v2438_v52 = vadd.f32 %v2437_v35, %v2436_v55 }
 0x246   : > { %v2439_v48 = vpop.f32.mrf.mxu1 }
 0x247   : > { %v2005_v49 = vadd.f32 %v1989_v32, %v3876_v31  ;;  %v1872_v51 = vadd.f32 %v2438_v52, %v2358_v11 }
 0x248   : > { %v2440_v63 = vpop.f32.mrf.mxu1 }
 0x249   : > { %2021 = vst [vmem:[%s3890_s30 + $0x68] sm:$0xff] %v2005_v49  ;;  %v1990_v56 = vmul.f32 %v1924_v7, %v1872_v51  ;;  %v2441_v20 = vadd.f32 %v2440_v63, %v2439_v48 }
 0x24b   : > { %v2006_v36 = vadd.f32 %v1990_v56, %v3880_v4  ;;  %v1877_v53 = vadd.f32 %v2441_v20, %v2361_v17 }
 0x24d   : > { %2022 = vst [vmem:[%s3890_s30 + $0x70] sm:$0xff] %v2006_v36  ;;  %v1991_v38 = vmul.f32 %v1927_v27, %v1877_v53  ;;  %2027 = sbr.rel (%p2277_p9) target bundleno = 598 (0x256), region = 82 }
 0x24f   : > { %v2007_v39 = vadd.f32 %v1991_v38, %v3882_v57 }
 0x251   : > { %2023 = vst [vmem:[%s3890_s30 + $0x78] sm:$0xff] %v2007_v39 }
 0x252   : > { %v2628_v31 = vmov 0.0  }
 0x253   : > { %2028 = vst [vmem:[#allocation4] sm:$0xff] %v2628_v31  ;;  %2029 = vst [vmem:[#allocation4 + $0x8] sm:$0xff] %v2628_v31 }
 0x254   : > { %2030 = vst [vmem:[#allocation4 + $0x10] sm:$0xff] %v2628_v31  ;;  %2031 = vst [vmem:[#allocation4 + $0x18] sm:$0xff] %v2628_v31 }
 0x255   : > { %2032 = vst [vmem:[#allocation4 + $0x20] sm:$0xff] %v2628_v31  ;;  %2033 = vst [vmem:[#allocation4 + $0x28] sm:$0xff] %v2628_v31 }
 0x256 PF: > { %2505 = vmatprep.subr.mxu1 %v2007_v39  ;;  %2464 = vmatprep.subr.mxu0 %v2007_v39  ;;  %v2042_v4 = vld [vmem:[%s3976_s29 + $0x10] sm:$0xff]  ;;  %v2043_v57 = vld [vmem:[%s3976_s29 + $0x18] sm:$0xff]  ;;  %s2629_s19 = smov [#allocation4]   ;;  %p2544_p10 = scmp.eq.s32.totalorder %s2683_s24, 1 }
 0x257   : > { %2521 = vmatpush3.msra.mxu1 %v2007_v39  ;;  %2465 = vmatpush3.msra.mxu0 %v2007_v39  ;;  %s2164_s15 = sshll.u32 %s2629_s19, 4  ;;  %s2165_s15 = int_to_ptr.vmem [resolvable:$true] %s2164_s15 }
 0x258   : > { %2506 = vmatprep.subr.mxu1 %v2006_v36  ;;  %2466 = vmatprep.subr.mxu0 %v2006_v36  ;;  %s2575_s7 = scalar_lea.vmem %s2165_s15, 768  ;;  %p2582_p0 = scmp.lt.s32.totalorder %s2165_s15, %s2165_s15 }
 0x259   : > { %2522 = vmatpush3.msra.mxu1 %v2006_v36  ;;  %2467 = vmatpush3.msra.mxu0 %v2006_v36  ;;  %p2576_p11 = scmp.ne.s32.totalorder %s2165_s15, %s2575_s7  ;;  %p2583_p1 = scmp.lt.s32.totalorder %s2575_s7, %s2575_s7 }
 0x25a   : > { %2507 = vmatprep.subr.mxu1 %v2005_v49  ;;  %2468 = vmatprep.subr.mxu0 %v2005_v49  ;;  %v2034_v15 = vld [vmem:[#allocation4] sm:$0xff] }
 0x25b   : > { %2523 = vmatpush3.msra.mxu1 %v2005_v49  ;;  %2469 = vmatpush3.msra.mxu0 %v2005_v49  ;;  %p2577_p12 = pnand %p2576_p11, %p2544_p10  ;;  %p2584_p2 = por %p2583_p1, %p2582_p0 }
 0x25c   : > { %2508 = vmatprep.subr.mxu1 %v2004_v61  ;;  %2470 = vmatprep.subr.mxu0 %v2004_v61  ;;  %v2039_v23 = vld [vmem:[#allocation4 + $0x28] sm:$0xff]  ;;  %v2038_v44 = vld [vmem:[#allocation4 + $0x20] sm:$0xff] }
 0x25d   : > { %2524 = vmatpush3.msra.mxu1 %v2004_v61  ;;  %2471 = vmatpush3.msra.mxu0 %v2004_v61  ;;  %p2578_p13 = pneg %p2577_p12 }
 0x25e   : > { %2509 = vmatprep.subr.mxu1 %v3960_v26  ;;  %2472 = vmatprep.subr.mxu0 %v3960_v26 }
 0x25f   : > { %2525 = vmatpush3.msra.mxu1 %v3960_v26  ;;  %2473 = vmatpush3.msra.mxu0 %v3960_v26  ;;  %p2585_p3 = pnand %p2584_p2, %p2578_p13 }
 0x260   : > { %2510 = vmatprep.subr.mxu1 %v3954_v10  ;;  %2474 = vmatprep.subr.mxu0 %v3954_v10 }
 0x261   : > { %2526 = vmatpush3.msra.mxu1 %v3954_v10  ;;  %2475 = vmatpush3.msra.mxu0 %v3954_v10 }
 0x262   : > { %2511 = vmatprep.subr.mxu1 %v3948_v62  ;;  %2476 = vmatprep.subr.mxu0 %v3948_v62 }
 0x263   : > { %2527 = vmatpush3.msra.mxu1 %v3948_v62  ;;  %2477 = vmatpush3.msra.mxu0 %v3948_v62 }
 0x264   : > { %2512 = vmatprep.subr.mxu1 %v3942_v1  ;;  %2478 = vmatprep.subr.mxu0 %v3942_v1 }
 0x265   : > { %2528 = vmatpush3.msra.mxu1 %v3942_v1  ;;  %2479 = vmatpush3.msra.mxu0 %v3942_v1  ;;  %v2036_v1 = vld [vmem:[#allocation4 + $0x10] sm:$0xff] }
 0x266   : > { %2513 = vmatprep.subr.mxu1 %v3936_v14  ;;  %2480 = vmatprep.subr.mxu0 %v3936_v14 }
 0x267   : > { %2529 = vmatpush3.msra.mxu1 %v3936_v14  ;;  %2481 = vmatpush3.msra.mxu0 %v3936_v14  ;;  %v2035_v14 = vld [vmem:[#allocation4 + $0x8] sm:$0xff] }
 0x268   : > { %2514 = vmatprep.subr.mxu1 %v3930_v12  ;;  %2482 = vmatprep.subr.mxu0 %v3930_v12 }
 0x269   : > { %2530 = vmatpush3.msra.mxu1 %v3930_v12  ;;  %2483 = vmatpush3.msra.mxu0 %v3930_v12 }
 0x26a   : > { %2515 = vmatprep.subr.mxu1 %v3924_v43  ;;  %2484 = vmatprep.subr.mxu0 %v3924_v43 }
 0x26b   : > { %2531 = vmatpush3.msra.mxu1 %v3924_v43  ;;  %2485 = vmatpush3.msra.mxu0 %v3924_v43  ;;  %v2045_v43 = vld [vmem:[%s3976_s29 + $0x28] sm:$0xff] }
 0x26c   : > { %2516 = vmatprep.subr.mxu1 %v3918_v18  ;;  %2486 = vmatprep.subr.mxu0 %v3918_v18 }
 0x26d   : > { %2532 = vmatpush3.msra.mxu1 %v3918_v18  ;;  %2487 = vmatpush3.msra.mxu0 %v3918_v18  ;;  %v2044_v18 = vld [vmem:[%s3976_s29 + $0x20] sm:$0xff] }
 0x26e   : > { %2517 = vmatprep.subr.mxu1 %v3912_v19  ;;  %2488 = vmatprep.subr.mxu0 %v3912_v19 }
 0x26f   : > { %2533 = vmatpush3.msra.mxu1 %v3912_v19  ;;  %2489 = vmatpush3.msra.mxu0 %v3912_v19  ;;  %v2040_v19 = vld [vmem:[%s3976_s29] sm:$0xff] }
 0x270   : > { %2518 = vmatprep.subr.mxu1 %v3906_v25  ;;  %2490 = vmatprep.subr.mxu0 %v3906_v25 }
 0x271   : > { %2534 = vmatpush3.msra.mxu1 %v3906_v25  ;;  %2491 = vmatpush3.msra.mxu0 %v3906_v25  ;;  %v2041_v25 = vld [vmem:[%s3976_s29 + $0x8] sm:$0xff] }
 0x272   : > { %2519 = vmatprep.subr.mxu1 %v3900_v47  ;;  %2492 = vmatprep.subr.mxu0 %v3900_v47 }
 0x273   : > { %2535 = vmatpush3.msra.mxu1 %v3900_v47  ;;  %2493 = vmatpush3.msra.mxu0 %v3900_v47  ;;  %v2037_v47 = vld [vmem:[#allocation4 + $0x18] sm:$0xff] }
 0x274   : > { %2520 = vmatprep.subr.mxu1 %v3894_v58  ;;  %2499 = vmatprep.mubr.f32.mxu1 %v2042_v4 }
 0x275   : > { %2536 = vmatpush3.msra.mxu1 %v3894_v58  ;;  %2494 = vmatprep.subr.mxu0 %v3894_v58 }
 0x276   : > { %2500 = vmatmul.mubr.f32.vlgmr.msra.gmra.mxu1 %v2043_v57  ;;  %2495 = vmatpush3.msra.mxu0 %v3894_v58 }
 0x277   : > { %2496 = vmatprep.mubr.f32.mxu0 %v2040_v19  ;;  %2502 = vmatprep.mubr.f32.mxu1 %v2044_v18 }
 0x278   : > { %2497 = vmatmul.mubr.f32.vlgmr.msra.gmra.mxu0 %v2041_v25 }
 0x27a   : > { %2503 = vmatmul.mubr.f32.gmra.mxu1 %v2045_v43 }
 0x336   : > { %v2501_v12 = vpop.f32.mrf.mxu1 }
 0x337   : > { %v2144_v41 = vadd.f32 %v2501_v12, %v2037_v47 }
 0x338   : > { %v2498_v59 = vpop.f32.mrf.mxu0  ;;  %v2122_v62 = vpop.f32.mrf.mxu1 }
 0x339   : > { %2150 = vst [vmem:[#allocation4 + $0x18] sm:$0xff] %v2144_v41  ;;  %v2142_v30 = vadd.f32 %v2498_v59, %v2035_v14  ;;  %v2143_v42 = vadd.f32 %v2122_v62, %v2036_v1 }
 0x33a   : > { %v2112_v58 = vpop.f32.mrf.mxu0  ;;  %v2504_v46 = vpop.f32.mrf.mxu1 }
 0x33b   : > { %2148 = vst [vmem:[#allocation4 + $0x8] sm:$0xff] %v2142_v30  ;;  %2149 = vst [vmem:[#allocation4 + $0x10] sm:$0xff] %v2143_v42  ;;  %v2141_v45 = vadd.f32 %v2112_v58, %v2034_v15  ;;  %v2146_v50 = vadd.f32 %v2504_v46, %v2039_v23 }
 0x33c   : > { %v2132_v8 = vpop.f32.mrf.mxu1 }
 0x33d   : > { %2147 = vst [vmem:[#allocation4] sm:$0xff] %v2141_v45  ;;  %2152 = vst [vmem:[#allocation4 + $0x28] sm:$0xff] %v2146_v50  ;;  %v2145_v10 = vadd.f32 %v2132_v8, %v2038_v44 }
 0x33f   : > { %2151 = vst [vmem:[#allocation4 + $0x20] sm:$0xff] %v2145_v10 }
 0x340   : > { %2588 = shalt.err (!%p2585_p3)
}
 0x341   : > { %s2630_s8 = smov 128   ;;  %s2631_s9 = smov 8  }
 0x342   : > { %2541 = dma.vmem_to_hbm [thread:$0]  (%p2544_p10), %s2165_s15, 768, %s4060_s5, [#allocation5], %s2630_s8, %s2630_s8, %s2631_s9  }
 0x343   : > { %2612 = dma.done.wait (%p2544_p10), [#allocation5], 768  }
 0x344   : > { %2614 = vsyncadd (%p2544_p10), [#allocation5], 4294966528 }
 0x345 PF: > { %p15_p4 = scmp.ge.s32.totalorder %s2686_s25, 4   ;;  %s4108_s21 = smov %s2621_s22 }
 0x346   : > { %s4109_s22 = smov %s2695_s28  ;;  %s4110_s23 = smov %s2686_s25 }
 0x347   :  { %17 = sbr.rel (!%p15_p4) target bundleno = 2 (0x2), region = 132 }
 0x34c   :  { %2192 = vsyncpa [#allocation5], 1 }
 0x34d   :  { %2194 = vsyncpa [#allocation5 + $0x1], 1 }

// kernel: heat_transfer_forward.13
= control target key start
LH: loop header
LB: loop body
LE: loop exit
PB: predicated region body
PF: predicated region fallthrough
CT: control target
= control target key end

     0   :  { %12 = vsyncpa [#allocation5], 0  ;;  %s4167_s0 = inlined_call_operand.vmem [shape: f32[256,128], index: 0, kind: input, shape index: {}]   ;;  %s4168_s1 = inlined_call_operand.vmem [shape: f32[128,512], index: 1, kind: input, shape index: {}]   ;;  %s4169_s2 = inlined_call_operand.vmem [shape: f32[512,384], index: 2, kind: input, shape index: {}]   ;;  %s4170_s3 = inlined_call_operand.vmem [shape: f32[256,384], index: 3, kind: input, shape index: {}]   ;;  %s4171_s4 = inlined_call_operand.vmem [shape: f32[48,256], index: 4, kind: input, shape index: {}]   ;;  %s4172_s5 = inlined_call_operand.vmem [shape: f32[48,128], index: 5, kind: output, shape index: {0}]   ;;  %s4173_s6 = inlined_call_operand.hbm [shape: f32[256,128], index: 6, kind: output, shape index: {1}]  }
   0x1   :  { %14 = vsyncpa [#allocation5 + $0x1], 0  ;;  %s2682_s21 = smov 0   ;;  %s2684_s22 = smov 0  }
   0x2   :  { %s2686_s23 = smov 0   ;;  %s2688_s24 = smov 0  }
   0x3 LB: > { %s2703_s25 = sadd.s32 4294967295, %s2640_s24   ;;  %s2262_s26 = sadd.s32 4294967294, %s2640_s24   ;;  %s2640_s24 = sphi %s2688_s24, %s4225_s24   ;;  %s2636_s23 = sphi %s2686_s23, %s4224_s23   ;;  %s2632_s22 = sphi %s2684_s22, %s4223_s22   ;;  %s2628_s21 = sphi %s2682_s21, %s4222_s21  }
   0x4   : > { %s2707_s27 = sadd.s32 1, %s2640_s24   ;;  %s121_s28 = sadd.s32 1, %s2636_s23 }
   0x5   : > { %s118_s29 = ssub.s32 %s2640_s24, %s2707_s27  ;;  %p128_p0 = scmp.ne.s32.totalorder %s2636_s23, %s2632_s22 }
   0x6   : > { %p119_p1 = scmp.eq.s32.totalorder %s118_s29, 0  ;;  %p129_p2 = scmp.eq.s32.totalorder %s2640_s24, 0 }
   0x7   : > { %p179_p3 = scmp.eq.s32.totalorder %s2703_s25, 1  ;;  %p184_p4 = scmp.ne.s32.totalorder %s2632_s22, %s2628_s21 }
   0x8   : > { %s2719_s30 = scalar_select %p119_p1, %s2636_s23, %s121_s28  }
   0x9   : > { %p130_p5 = por %p129_p2, %p128_p0  ;;  %p2721_p6 = por %p179_p3, %p128_p0 }
   0xa   : > { %p185_p7 = scmp.eq.s32.totalorder %s2262_s26, 1  ;;  %p2264_p9 = scmp.ge.s32.totalorder %s2640_s24, 2 }
   0xc   : > { %p2725_p8 = por %p185_p7, %p184_p4  ;;  %207 = sbr.rel (%p2264_p9) target bundleno = 24 (0x18), region = 24 }
  0x11   : > { %229 = sbr.rel (!%p130_p5) target bundleno = 24 (0x18), region = 36  ;;  %s231_s9 = sand.u32 (%p130_p5), 1, %s2636_s23  }
  0x12   : > { %s2265_s10 = sshll.u32 (%p130_p5), %s2640_s24, 3  ;;  %s2534_s11 = smul.u32 (%p130_p5), 48, %s231_s9 }
  0x13   : > { %s235_s14 = scalar_lea.vmem (%p130_p5), %s4171_s4, %s2265_s10 }
  0x14   : > { %v274_v0 = vld [vmem:[%s235_s14] sm:$0xff] (%p130_p5)  ;;  %v276_v1 = vld [vmem:[%s235_s14 + $0x10] sm:$0xff] (%p130_p5)  ;;  %s233_s15 = scalar_lea.vmem (%p130_p5), [#allocation3], %s2534_s11 }
  0x15   : > { %v278_v2 = vld [vmem:[%s235_s14 + $0x20] sm:$0xff] (%p130_p5)  ;;  %v280_v3 = vld [vmem:[%s235_s14 + $0x30] sm:$0xff] (%p130_p5)  ;;  %275 = vst [vmem:[%s233_s15] sm:$0xff] (%p130_p5), %v274_v0  ;;  %277 = vst [vmem:[%s233_s15 + $0x8] sm:$0xff] (%p130_p5), %v276_v1 }
  0x16   : > { %v282_v4 = vld [vmem:[%s235_s14 + $0x40] sm:$0xff]  ;;  %v284_v5 = vld [vmem:[%s235_s14 + $0x50] sm:$0xff]  ;;  %279 = vst [vmem:[%s233_s15 + $0x10] sm:$0xff] %v278_v2  ;;  %281 = vst [vmem:[%s233_s15 + $0x18] sm:$0xff] %v280_v3 }
  0x17   : > { %283 = vst [vmem:[%s233_s15 + $0x20] sm:$0xff] %v282_v4  ;;  %285 = vst [vmem:[%s233_s15 + $0x28] sm:$0xff] %v284_v5 }
  0x18 PF: > { %p2266_p10 = scmp.ge.s32.totalorder %s2640_s24, 1  ;;  %p290_p11 = scmp.lt.s32.totalorder %s2640_s24, 3 }
  0x1a   : > { %p291_p12 = pnand %p2266_p10, %p290_p11 }
  0x1c   : > { %294 = sbr.rel (%p291_p12) target bundleno = 837 (0x345), region = 74 }
  0x21   : > { %v428_v6 = vld [vmem:[%s4168_s1 + $0x1e8] sm:$0xff]  ;;  %v430_v7 = vld [vmem:[%s4168_s1 + $0x1f8] sm:$0xff]  ;;  %v427_v8 = vld [vmem:[%s4168_s1 + $0x1e0] sm:$0xff]  ;;  %s2268_s9 = sshll.u32 %s2703_s25, 4  ;;  %s3844_s20 = sand.u32 1, %s2632_s22  }
  0x22   : > { %431 = vmatprep.subr.mxu0 %v428_v6  ;;  %592 = vmatprep.subr.mxu1 %v430_v7  ;;  %v429_v9 = vld [vmem:[%s4168_s1 + $0x1f0] sm:$0xff]  ;;  %v424_v10 = vld [vmem:[%s4168_s1 + $0x1c8] sm:$0xff]  ;;  %v426_v11 = vld [vmem:[%s4168_s1 + $0x1d8] sm:$0xff]  ;;  %p2862_p13 = scmp.lt.s32.totalorder %s2268_s9, 31  ;;  %v2642_v7 = vmov 0.0   ;;  %s2535_s26 = smul.u32 48, %s3844_s20 }
  0x23   : > { %432 = vmatpush1.msra.mxu0 %v427_v8  ;;  %593 = vmatpush1.msra.mxu1 %v429_v9  ;;  %v423_v12 = vld [vmem:[%s4168_s1 + $0x1c0] sm:$0xff]  ;;  %v425_v13 = vld [vmem:[%s4168_s1 + $0x1d0] sm:$0xff]  ;;  %v420_v14 = vld [vmem:[%s4168_s1 + $0x1a8] sm:$0xff]  ;;  %p2272_p0 = scmp.ne.s32.totalorder %s2703_s25, 0 }
  0x24   : > { %433 = vmatprep.subr.mxu0 %v424_v10  ;;  %594 = vmatprep.subr.mxu1 %v426_v11  ;;  %v422_v15 = vld [vmem:[%s4168_s1 + $0x1b8] sm:$0xff]  ;;  %v419_v16 = vld [vmem:[%s4168_s1 + $0x1a0] sm:$0xff]  ;;  %v421_v17 = vld [vmem:[%s4168_s1 + $0x1b0] sm:$0xff]  ;;  %s4227_s9 = smov (!%p2862_p13, %s2268_s9), 31  ;;  %s4006_s15 = scalar_lea.vmem [#allocation3], %s2535_s26 }
  0x25   : > { %434 = vmatpush1.msra.mxu0 %v423_v12  ;;  %595 = vmatpush1.msra.mxu1 %v425_v13  ;;  %v416_v18 = vld [vmem:[%s4168_s1 + $0x188] sm:$0xff]  ;;  %v418_v19 = vld [vmem:[%s4168_s1 + $0x198] sm:$0xff]  ;;  %v415_v20 = vld [vmem:[%s4168_s1 + $0x180] sm:$0xff]  ;;  %s2269_s14 = sshll.u32 %s4227_s9, 3  ;;  %s2536_s29 = smul.u32 24, %s4227_s9 }
  0x26   : > { %435 = vmatprep.subr.mxu0 %v420_v14  ;;  %596 = vmatprep.subr.mxu1 %v422_v15  ;;  %v417_v21 = vld [vmem:[%s4168_s1 + $0x190] sm:$0xff]  ;;  %v412_v22 = vld [vmem:[%s4168_s1 + $0x168] sm:$0xff]  ;;  %v414_v23 = vld [vmem:[%s4168_s1 + $0x178] sm:$0xff]  ;;  %s2942_s16 = scalar_lea.vmem %s4167_s0, %s2269_s14  ;;  %s2267_s9 = sshll.u32 %s3844_s20, 7 }
  0x27   : > { %436 = vmatpush1.msra.mxu0 %v419_v16  ;;  %597 = vmatpush1.msra.mxu1 %v421_v17  ;;  %v411_v24 = vld [vmem:[%s4168_s1 + $0x160] sm:$0xff]  ;;  %v413_v25 = vld [vmem:[%s4168_s1 + $0x170] sm:$0xff]  ;;  %v408_v26 = vld [vmem:[%s4168_s1 + $0x148] sm:$0xff]  ;;  %s3851_s12 = scalar_lea.vmem %s4170_s3, %s2536_s29  ;;  %s3923_s13 = scalar_lea.vmem [#allocation4], %s2267_s9 }
  0x28   : > { %437 = vmatprep.subr.mxu0 %v416_v18  ;;  %598 = vmatprep.subr.mxu1 %v418_v19  ;;  %v410_v27 = vld [vmem:[%s4168_s1 + $0x158] sm:$0xff]  ;;  %v407_v28 = vld [vmem:[%s4168_s1 + $0x140] sm:$0xff]  ;;  %v409_v29 = vld [vmem:[%s4168_s1 + $0x150] sm:$0xff] }
  0x29   : > { %438 = vmatpush1.msra.mxu0 %v415_v20  ;;  %599 = vmatpush1.msra.mxu1 %v417_v21  ;;  %v404_v30 = vld [vmem:[%s4168_s1 + $0x128] sm:$0xff]  ;;  %v406_v31 = vld [vmem:[%s4168_s1 + $0x138] sm:$0xff]  ;;  %v403_v32 = vld [vmem:[%s4168_s1 + $0x120] sm:$0xff] }
  0x2a   : > { %439 = vmatprep.subr.mxu0 %v412_v22  ;;  %600 = vmatprep.subr.mxu1 %v414_v23  ;;  %v405_v33 = vld [vmem:[%s4168_s1 + $0x130] sm:$0xff]  ;;  %v400_v34 = vld [vmem:[%s4168_s1 + $0x108] sm:$0xff]  ;;  %v402_v35 = vld [vmem:[%s4168_s1 + $0x118] sm:$0xff] }
  0x2b   : > { %440 = vmatpush1.msra.mxu0 %v411_v24  ;;  %601 = vmatpush1.msra.mxu1 %v413_v25  ;;  %v399_v36 = vld [vmem:[%s4168_s1 + $0x100] sm:$0xff]  ;;  %v401_v37 = vld [vmem:[%s4168_s1 + $0x110] sm:$0xff]  ;;  %v396_v38 = vld [vmem:[%s4168_s1 + $0xe8] sm:$0xff] }
  0x2c   : > { %441 = vmatprep.subr.mxu0 %v408_v26  ;;  %602 = vmatprep.subr.mxu1 %v410_v27  ;;  %v398_v39 = vld [vmem:[%s4168_s1 + $0xf8] sm:$0xff]  ;;  %v395_v40 = vld [vmem:[%s4168_s1 + $0xe0] sm:$0xff]  ;;  %v397_v41 = vld [vmem:[%s4168_s1 + $0xf0] sm:$0xff] }
  0x2d   : > { %442 = vmatpush1.msra.mxu0 %v407_v28  ;;  %603 = vmatpush1.msra.mxu1 %v409_v29  ;;  %v392_v42 = vld [vmem:[%s4168_s1 + $0xc8] sm:$0xff]  ;;  %v394_v43 = vld [vmem:[%s4168_s1 + $0xd8] sm:$0xff]  ;;  %v391_v44 = vld [vmem:[%s4168_s1 + $0xc0] sm:$0xff] }
  0x2e   : > { %443 = vmatprep.subr.mxu0 %v404_v30  ;;  %604 = vmatprep.subr.mxu1 %v406_v31  ;;  %v393_v45 = vld [vmem:[%s4168_s1 + $0xd0] sm:$0xff]  ;;  %v388_v46 = vld [vmem:[%s4168_s1 + $0xa8] sm:$0xff]  ;;  %v390_v47 = vld [vmem:[%s4168_s1 + $0xb8] sm:$0xff] }
  0x2f   : > { %444 = vmatpush1.msra.mxu0 %v403_v32  ;;  %605 = vmatpush1.msra.mxu1 %v405_v33  ;;  %v387_v48 = vld [vmem:[%s4168_s1 + $0xa0] sm:$0xff]  ;;  %v389_v49 = vld [vmem:[%s4168_s1 + $0xb0] sm:$0xff]  ;;  %v384_v50 = vld [vmem:[%s4168_s1 + $0x88] sm:$0xff] }
  0x30   : > { %445 = vmatprep.subr.mxu0 %v400_v34  ;;  %606 = vmatprep.subr.mxu1 %v402_v35  ;;  %v386_v51 = vld [vmem:[%s4168_s1 + $0x98] sm:$0xff]  ;;  %v383_v52 = vld [vmem:[%s4168_s1 + $0x80] sm:$0xff]  ;;  %v385_v53 = vld [vmem:[%s4168_s1 + $0x90] sm:$0xff] }
  0x31   : > { %446 = vmatpush1.msra.mxu0 %v399_v36  ;;  %607 = vmatpush1.msra.mxu1 %v401_v37  ;;  %v380_v54 = vld [vmem:[%s4168_s1 + $0x68] sm:$0xff]  ;;  %v382_v55 = vld [vmem:[%s4168_s1 + $0x78] sm:$0xff]  ;;  %v379_v56 = vld [vmem:[%s4168_s1 + $0x60] sm:$0xff] }
  0x32   : > { %447 = vmatprep.subr.mxu0 %v396_v38  ;;  %608 = vmatprep.subr.mxu1 %v398_v39  ;;  %v381_v57 = vld [vmem:[%s4168_s1 + $0x70] sm:$0xff]  ;;  %v376_v58 = vld [vmem:[%s4168_s1 + $0x48] sm:$0xff]  ;;  %v378_v59 = vld [vmem:[%s4168_s1 + $0x58] sm:$0xff] }
  0x33   : > { %448 = vmatpush1.msra.mxu0 %v395_v40  ;;  %609 = vmatpush1.msra.mxu1 %v397_v41  ;;  %v375_v60 = vld [vmem:[%s4168_s1 + $0x40] sm:$0xff]  ;;  %v377_v61 = vld [vmem:[%s4168_s1 + $0x50] sm:$0xff]  ;;  %v372_v62 = vld [vmem:[%s4168_s1 + $0x28] sm:$0xff] }
  0x34   : > { %449 = vmatprep.subr.mxu0 %v392_v42  ;;  %610 = vmatprep.subr.mxu1 %v394_v43  ;;  %v374_v63 = vld [vmem:[%s4168_s1 + $0x38] sm:$0xff]  ;;  %v371_v0 = vld [vmem:[%s4168_s1 + $0x20] sm:$0xff]  ;;  %v373_v1 = vld [vmem:[%s4168_s1 + $0x30] sm:$0xff] }
  0x35   : > { %450 = vmatpush1.msra.mxu0 %v391_v44  ;;  %611 = vmatpush1.msra.mxu1 %v393_v45  ;;  %v368_v2 = vld [vmem:[%s4168_s1 + $0x8] sm:$0xff]  ;;  %v370_v3 = vld [vmem:[%s4168_s1 + $0x18] sm:$0xff]  ;;  %v367_v4 = vld [vmem:[%s4168_s1] sm:$0xff] }
  0x36   : > { %451 = vmatprep.subr.mxu0 %v388_v46  ;;  %612 = vmatprep.subr.mxu1 %v390_v47  ;;  %v369_v5 = vld [vmem:[%s4168_s1 + $0x10] sm:$0xff]  ;;  %v351_v6 = vld [vmem:[%s2942_s16] sm:$0xff]  ;;  %v1118_v10 = vld [vmem:[%s4169_s2 + $0x168] sm:$0xff] }
  0x37   : > { %452 = vmatpush1.msra.mxu0 %v387_v48  ;;  %613 = vmatpush1.msra.mxu1 %v389_v49  ;;  %v1119_v8 = vld [vmem:[%s4169_s2 + $0x170] sm:$0xff]  ;;  %v1214_v11 = vld [vmem:[%s4169_s2 + $0x468] sm:$0xff]  ;;  %v1116_v13 = vld [vmem:[%s4169_s2 + $0x158] sm:$0xff] }
  0x38   : > { %453 = vmatprep.subr.mxu0 %v384_v50  ;;  %614 = vmatprep.subr.mxu1 %v386_v51  ;;  %v1215_v9 = vld [vmem:[%s4169_s2 + $0x470] sm:$0xff]  ;;  %v352_v12 = vld [vmem:[%s2942_s16 + $0x8] sm:$0xff]  ;;  %v1212_v14 = vld [vmem:[%s4169_s2 + $0x458] sm:$0xff] }
  0x39   : > { %454 = vmatpush1.msra.mxu0 %v383_v52  ;;  %615 = vmatpush1.msra.mxu1 %v385_v53  ;;  %v1115_v15 = vld [vmem:[%s4169_s2 + $0x150] sm:$0xff]  ;;  %v1113_v18 = vld [vmem:[%s4169_s2 + $0x140] sm:$0xff]  ;;  %v1112_v20 = vld [vmem:[%s4169_s2 + $0x138] sm:$0xff] }
  0x3a   : > { %455 = vmatprep.subr.mxu0 %v380_v54  ;;  %616 = vmatprep.subr.mxu1 %v382_v55  ;;  %v1211_v16 = vld [vmem:[%s4169_s2 + $0x450] sm:$0xff]  ;;  %v1209_v19 = vld [vmem:[%s4169_s2 + $0x440] sm:$0xff]  ;;  %v1208_v21 = vld [vmem:[%s4169_s2 + $0x438] sm:$0xff] }
  0x3b   : > { %456 = vmatpush1.msra.mxu0 %v379_v56  ;;  %617 = vmatpush1.msra.mxu1 %v381_v57  ;;  %v353_v17 = vld [vmem:[%s2942_s16 + $0x10] sm:$0xff]  ;;  %v354_v22 = vld [vmem:[%s2942_s16 + $0x18] sm:$0xff]  ;;  %v1110_v23 = vld [vmem:[%s4169_s2 + $0x128] sm:$0xff] }
  0x3c   : > { %457 = vmatprep.subr.mxu0 %v376_v58  ;;  %618 = vmatprep.subr.mxu1 %v378_v59  ;;  %v1206_v24 = vld [vmem:[%s4169_s2 + $0x428] sm:$0xff]  ;;  %v1109_v25 = vld [vmem:[%s4169_s2 + $0x120] sm:$0xff]  ;;  %v1107_v28 = vld [vmem:[%s4169_s2 + $0x110] sm:$0xff] }
  0x3d   : > { %458 = vmatpush1.msra.mxu0 %v375_v60  ;;  %619 = vmatpush1.msra.mxu1 %v377_v61  ;;  %v1205_v26 = vld [vmem:[%s4169_s2 + $0x420] sm:$0xff]  ;;  %v1203_v29 = vld [vmem:[%s4169_s2 + $0x410] sm:$0xff]  ;;  %v1106_v30 = vld [vmem:[%s4169_s2 + $0x108] sm:$0xff] }
  0x3e   : > { %459 = vmatprep.subr.mxu0 %v372_v62  ;;  %620 = vmatprep.subr.mxu1 %v374_v63  ;;  %v355_v27 = vld [vmem:[%s2942_s16 + $0x20] sm:$0xff]  ;;  %v1202_v31 = vld [vmem:[%s4169_s2 + $0x408] sm:$0xff]  ;;  %v1104_v33 = vld [vmem:[%s4169_s2 + $0xf8] sm:$0xff] }
  0x3f   : > { %460 = vmatpush1.msra.mxu0 %v371_v0  ;;  %621 = vmatpush1.msra.mxu1 %v373_v1  ;;  %v356_v32 = vld [vmem:[%s2942_s16 + $0x28] sm:$0xff]  ;;  %v1200_v34 = vld [vmem:[%s4169_s2 + $0x3f8] sm:$0xff]  ;;  %v1103_v35 = vld [vmem:[%s4169_s2 + $0xf0] sm:$0xff] }
  0x40   : > { %461 = vmatprep.subr.mxu0 %v368_v2  ;;  %622 = vmatprep.subr.mxu1 %v370_v3  ;;  %v1199_v36 = vld [vmem:[%s4169_s2 + $0x3f0] sm:$0xff]  ;;  %v1101_v38 = vld [vmem:[%s4169_s2 + $0xe0] sm:$0xff]  ;;  %v1100_v40 = vld [vmem:[%s4169_s2 + $0xd8] sm:$0xff] }
  0x41   : > { %462 = vmatpush1.msra.mxu0 %v367_v4  ;;  %495 = vmatprep.mubr.f32.mxu0 %v2642_v7  ;;  %v357_v37 = vld [vmem:[%s2942_s16 + $0x30] sm:$0xff]  ;;  %v1197_v39 = vld [vmem:[%s4169_s2 + $0x3e0] sm:$0xff]  ;;  %v1196_v41 = vld [vmem:[%s4169_s2 + $0x3d8] sm:$0xff] }
  0x42   : > { %623 = vmatpush1.msra.mxu1 %v369_v5  ;;  %656 = vmatprep.mubr.f32.mxu1 %v2642_v7  ;;  %v358_v42 = vld [vmem:[%s2942_s16 + $0x38] sm:$0xff]  ;;  %v1098_v43 = vld [vmem:[%s4169_s2 + $0xc8] sm:$0xff]  ;;  %v1097_v45 = vld [vmem:[%s4169_s2 + $0xc0] sm:$0xff] }
  0x43   : > { %496 = vmatmul.mubr.f32.vlgmr.msra.gmra.mxu0 %v351_v6  ;;  %657 = vmatmul.mubr.f32.vlgmr.msra.gmra.mxu1 %v351_v6  ;;  %v1194_v44 = vld [vmem:[%s4169_s2 + $0x3c8] sm:$0xff]  ;;  %v1193_v46 = vld [vmem:[%s4169_s2 + $0x3c0] sm:$0xff]  ;;  %v1095_v48 = vld [vmem:[%s4169_s2 + $0xb0] sm:$0xff] }
  0x44   : > { %501 = vmatprep.mubr.f32.mxu0 %v2642_v7  ;;  %662 = vmatprep.mubr.f32.mxu1 %v2642_v7  ;;  %v359_v47 = vld [vmem:[%s2942_s16 + $0x40] sm:$0xff]  ;;  %v1191_v49 = vld [vmem:[%s4169_s2 + $0x3b0] sm:$0xff]  ;;  %v1094_v50 = vld [vmem:[%s4169_s2 + $0xa8] sm:$0xff] }
  0x45   : > { %1265 = vmatprep.subr.mxu0 %v1119_v8  ;;  %1426 = vmatprep.subr.mxu1 %v1215_v9  ;;  %v1190_v51 = vld [vmem:[%s4169_s2 + $0x3a8] sm:$0xff]  ;;  %v1092_v53 = vld [vmem:[%s4169_s2 + $0x98] sm:$0xff]  ;;  %v1091_v55 = vld [vmem:[%s4169_s2 + $0x90] sm:$0xff] }
  0x46   : > { %1266 = vmatpush1.msra.mxu0 %v1118_v10  ;;  %1427 = vmatpush1.msra.mxu1 %v1214_v11  ;;  %v360_v52 = vld [vmem:[%s2942_s16 + $0x48] sm:$0xff]  ;;  %v1188_v54 = vld [vmem:[%s4169_s2 + $0x398] sm:$0xff]  ;;  %v1187_v56 = vld [vmem:[%s4169_s2 + $0x390] sm:$0xff] }
  0x47   : > { %502 = vmatmul.mubr.f32.gmra.mxu0 %v352_v12  ;;  %663 = vmatmul.mubr.f32.gmra.mxu1 %v352_v12  ;;  %v361_v57 = vld [vmem:[%s2942_s16 + $0x50] sm:$0xff]  ;;  %v1089_v58 = vld [vmem:[%s4169_s2 + $0x80] sm:$0xff]  ;;  %v1088_v60 = vld [vmem:[%s4169_s2 + $0x78] sm:$0xff] }
  0x48   : > { %507 = vmatprep.mubr.f32.mxu0 %v2642_v7  ;;  %668 = vmatprep.mubr.f32.mxu1 %v2642_v7  ;;  %v1185_v59 = vld [vmem:[%s4169_s2 + $0x380] sm:$0xff]  ;;  %v1184_v61 = vld [vmem:[%s4169_s2 + $0x378] sm:$0xff]  ;;  %v1086_v63 = vld [vmem:[%s4169_s2 + $0x68] sm:$0xff] }
  0x49   : > { %1267 = vmatprep.subr.mxu0 %v1116_v13  ;;  %1428 = vmatprep.subr.mxu1 %v1212_v14  ;;  %v362_v62 = vld [vmem:[%s2942_s16 + $0x58] sm:$0xff]  ;;  %v1182_v0 = vld [vmem:[%s4169_s2 + $0x368] sm:$0xff]  ;;  %v1085_v1 = vld [vmem:[%s4169_s2 + $0x60] sm:$0xff] }
  0x4a   : > { %1268 = vmatpush1.msra.mxu0 %v1115_v15  ;;  %1429 = vmatpush1.msra.mxu1 %v1211_v16  ;;  %v1181_v2 = vld [vmem:[%s4169_s2 + $0x360] sm:$0xff]  ;;  %v1083_v4 = vld [vmem:[%s4169_s2 + $0x50] sm:$0xff]  ;;  %v1082_v6 = vld [vmem:[%s4169_s2 + $0x48] sm:$0xff] }
  0x4b   : > { %508 = vmatmul.mubr.f32.gmra.mxu0 %v353_v17  ;;  %669 = vmatmul.mubr.f32.gmra.mxu1 %v353_v17  ;;  %v363_v3 = vld [vmem:[%s2942_s16 + $0x60] sm:$0xff]  ;;  %v1179_v5 = vld [vmem:[%s4169_s2 + $0x350] sm:$0xff]  ;;  %v1178_v8 = vld [vmem:[%s4169_s2 + $0x348] sm:$0xff] }
  0x4c   : > { %513 = vmatprep.mubr.f32.mxu0 %v2642_v7  ;;  %674 = vmatprep.mubr.f32.mxu1 %v2642_v7  ;;  %v364_v9 = vld [vmem:[%s2942_s16 + $0x68] sm:$0xff]  ;;  %v1080_v10 = vld [vmem:[%s4169_s2 + $0x38] sm:$0xff]  ;;  %v1079_v12 = vld [vmem:[%s4169_s2 + $0x30] sm:$0xff] }
  0x4d   : > { %1269 = vmatprep.subr.mxu0 %v1113_v18  ;;  %1430 = vmatprep.subr.mxu1 %v1209_v19  ;;  %v1176_v11 = vld [vmem:[%s4169_s2 + $0x338] sm:$0xff]  ;;  %v1175_v13 = vld [vmem:[%s4169_s2 + $0x330] sm:$0xff]  ;;  %v1077_v15 = vld [vmem:[%s4169_s2 + $0x20] sm:$0xff] }
  0x4e   : > { %1270 = vmatpush1.msra.mxu0 %v1112_v20  ;;  %1431 = vmatpush1.msra.mxu1 %v1208_v21  ;;  %v365_v14 = vld [vmem:[%s2942_s16 + $0x70] sm:$0xff]  ;;  %v1173_v16 = vld [vmem:[%s4169_s2 + $0x320] sm:$0xff]  ;;  %v1076_v17 = vld [vmem:[%s4169_s2 + $0x18] sm:$0xff] }
  0x4f   : > { %514 = vmatmul.mubr.f32.gmra.mxu0 %v354_v22  ;;  %675 = vmatmul.mubr.f32.gmra.mxu1 %v354_v22  ;;  %v1172_v18 = vld [vmem:[%s4169_s2 + $0x318] sm:$0xff]  ;;  %v1074_v20 = vld [vmem:[%s4169_s2 + $0x8] sm:$0xff]  ;;  %v1073_v22 = vld [vmem:[%s4169_s2] sm:$0xff] }
  0x50   : > { %519 = vmatprep.mubr.f32.mxu0 %v2642_v7  ;;  %680 = vmatprep.mubr.f32.mxu1 %v2642_v7  ;;  %v366_v19 = vld [vmem:[%s2942_s16 + $0x78] sm:$0xff]  ;;  %v1170_v21 = vld [vmem:[%s4169_s2 + $0x308] sm:$0xff] }
  0x51   : > { %1271 = vmatprep.subr.mxu0 %v1110_v23  ;;  %1432 = vmatprep.subr.mxu1 %v1206_v24  ;;  %v1167_v23 = vld [vmem:[%s4169_s2 + $0x2f0] sm:$0xff] }
  0x52   : > { %1272 = vmatpush1.msra.mxu0 %v1109_v25  ;;  %1433 = vmatpush1.msra.mxu1 %v1205_v26  ;;  %v1263_v24 = vld [vmem:[%s4169_s2 + $0x5f0] sm:$0xff]  ;;  %v1166_v25 = vld [vmem:[%s4169_s2 + $0x2e8] sm:$0xff] }
  0x53   : > { %520 = vmatmul.mubr.f32.gmra.mxu0 %v355_v27  ;;  %681 = vmatmul.mubr.f32.gmra.mxu1 %v355_v27  ;;  %v1262_v26 = vld [vmem:[%s4169_s2 + $0x5e8] sm:$0xff]  ;;  %v1164_v27 = vld [vmem:[%s4169_s2 + $0x2d8] sm:$0xff] }
  0x54   : > { %525 = vmatprep.mubr.f32.mxu0 %v2642_v7  ;;  %686 = vmatprep.mubr.f32.mxu1 %v2642_v7 }
  0x55   : > { %1273 = vmatprep.subr.mxu0 %v1107_v28  ;;  %1434 = vmatprep.subr.mxu1 %v1203_v29  ;;  %v1260_v28 = vld [vmem:[%s4169_s2 + $0x5d8] sm:$0xff]  ;;  %v1163_v29 = vld [vmem:[%s4169_s2 + $0x2d0] sm:$0xff] }
  0x56   : > { %1274 = vmatpush1.msra.mxu0 %v1106_v30  ;;  %1435 = vmatpush1.msra.mxu1 %v1202_v31  ;;  %v1259_v30 = vld [vmem:[%s4169_s2 + $0x5d0] sm:$0xff]  ;;  %v1161_v31 = vld [vmem:[%s4169_s2 + $0x2c0] sm:$0xff] }
  0x57   : > { %526 = vmatmul.mubr.f32.gmra.mxu0 %v356_v32  ;;  %687 = vmatmul.mubr.f32.gmra.mxu1 %v356_v32  ;;  %v1257_v32 = vld [vmem:[%s4169_s2 + $0x5c0] sm:$0xff] }
  0x58   : > { %531 = vmatprep.mubr.f32.mxu0 %v2642_v7  ;;  %692 = vmatprep.mubr.f32.mxu1 %v2642_v7 }
  0x59   : > { %1275 = vmatprep.subr.mxu0 %v1104_v33  ;;  %1436 = vmatprep.subr.mxu1 %v1200_v34  ;;  %v1160_v33 = vld [vmem:[%s4169_s2 + $0x2b8] sm:$0xff] }
  0x5a   : > { %1276 = vmatpush1.msra.mxu0 %v1103_v35  ;;  %1437 = vmatpush1.msra.mxu1 %v1199_v36  ;;  %v1256_v34 = vld [vmem:[%s4169_s2 + $0x5b8] sm:$0xff]  ;;  %v1158_v35 = vld [vmem:[%s4169_s2 + $0x2a8] sm:$0xff] }
  0x5b   : > { %532 = vmatmul.mubr.f32.gmra.mxu0 %v357_v37  ;;  %693 = vmatmul.mubr.f32.gmra.mxu1 %v357_v37  ;;  %v1254_v36 = vld [vmem:[%s4169_s2 + $0x5a8] sm:$0xff]  ;;  %v1157_v37 = vld [vmem:[%s4169_s2 + $0x2a0] sm:$0xff] }
  0x5c   : > { %537 = vmatprep.mubr.f32.mxu0 %v2642_v7  ;;  %698 = vmatprep.mubr.f32.mxu1 %v2642_v7 }
  0x5d   : > { %1277 = vmatprep.subr.mxu0 %v1101_v38  ;;  %1438 = vmatprep.subr.mxu1 %v1197_v39  ;;  %v1253_v38 = vld [vmem:[%s4169_s2 + $0x5a0] sm:$0xff]  ;;  %v1155_v39 = vld [vmem:[%s4169_s2 + $0x290] sm:$0xff] }
  0x5e   : > { %1278 = vmatpush1.msra.mxu0 %v1100_v40  ;;  %1439 = vmatpush1.msra.mxu1 %v1196_v41  ;;  %v1251_v40 = vld [vmem:[%s4169_s2 + $0x590] sm:$0xff]  ;;  %v1154_v41 = vld [vmem:[%s4169_s2 + $0x288] sm:$0xff] }
  0x5f   : > { %538 = vmatmul.mubr.f32.gmra.mxu0 %v358_v42  ;;  %699 = vmatmul.mubr.f32.gmra.mxu1 %v358_v42  ;;  %v1250_v42 = vld [vmem:[%s4169_s2 + $0x588] sm:$0xff] }
  0x60   : > { %543 = vmatprep.mubr.f32.mxu0 %v2642_v7  ;;  %704 = vmatprep.mubr.f32.mxu1 %v2642_v7 }
  0x61   : > { %1279 = vmatprep.subr.mxu0 %v1098_v43  ;;  %1440 = vmatprep.subr.mxu1 %v1194_v44  ;;  %v1152_v43 = vld [vmem:[%s4169_s2 + $0x278] sm:$0xff] }
  0x62   : > { %1280 = vmatpush1.msra.mxu0 %v1097_v45  ;;  %1441 = vmatpush1.msra.mxu1 %v1193_v46  ;;  %v1248_v44 = vld [vmem:[%s4169_s2 + $0x578] sm:$0xff]  ;;  %v1151_v45 = vld [vmem:[%s4169_s2 + $0x270] sm:$0xff] }
  0x63   : > { %544 = vmatmul.mubr.f32.gmra.mxu0 %v359_v47  ;;  %705 = vmatmul.mubr.f32.gmra.mxu1 %v359_v47  ;;  %v1247_v46 = vld [vmem:[%s4169_s2 + $0x570] sm:$0xff]  ;;  %v1149_v47 = vld [vmem:[%s4169_s2 + $0x260] sm:$0xff] }
  0x64   : > { %549 = vmatprep.mubr.f32.mxu0 %v2642_v7  ;;  %710 = vmatprep.mubr.f32.mxu1 %v2642_v7 }
  0x65   : > { %1281 = vmatprep.subr.mxu0 %v1095_v48  ;;  %1442 = vmatprep.subr.mxu1 %v1191_v49  ;;  %v1245_v48 = vld [vmem:[%s4169_s2 + $0x560] sm:$0xff]  ;;  %v1148_v49 = vld [vmem:[%s4169_s2 + $0x258] sm:$0xff] }
  0x66   : > { %1282 = vmatpush1.msra.mxu0 %v1094_v50  ;;  %1443 = vmatpush1.msra.mxu1 %v1190_v51  ;;  %v1244_v50 = vld [vmem:[%s4169_s2 + $0x558] sm:$0xff]  ;;  %v1146_v51 = vld [vmem:[%s4169_s2 + $0x248] sm:$0xff] }
  0x67   : > { %550 = vmatmul.mubr.f32.gmra.mxu0 %v360_v52  ;;  %711 = vmatmul.mubr.f32.gmra.mxu1 %v360_v52  ;;  %v1242_v52 = vld [vmem:[%s4169_s2 + $0x548] sm:$0xff] }
  0x68   : > { %555 = vmatprep.mubr.f32.mxu0 %v2642_v7  ;;  %716 = vmatprep.mubr.f32.mxu1 %v2642_v7 }
  0x69   : > { %1283 = vmatprep.subr.mxu0 %v1092_v53  ;;  %1444 = vmatprep.subr.mxu1 %v1188_v54  ;;  %v1145_v53 = vld [vmem:[%s4169_s2 + $0x240] sm:$0xff] }
  0x6a   : > { %1284 = vmatpush1.msra.mxu0 %v1091_v55  ;;  %1445 = vmatpush1.msra.mxu1 %v1187_v56  ;;  %v1241_v54 = vld [vmem:[%s4169_s2 + $0x540] sm:$0xff]  ;;  %v1143_v55 = vld [vmem:[%s4169_s2 + $0x230] sm:$0xff] }
  0x6b   : > { %556 = vmatmul.mubr.f32.gmra.mxu0 %v361_v57  ;;  %717 = vmatmul.mubr.f32.gmra.mxu1 %v361_v57  ;;  %v1239_v56 = vld [vmem:[%s4169_s2 + $0x530] sm:$0xff]  ;;  %v1142_v57 = vld [vmem:[%s4169_s2 + $0x228] sm:$0xff] }
  0x6c   : > { %561 = vmatprep.mubr.f32.mxu0 %v2642_v7  ;;  %722 = vmatprep.mubr.f32.mxu1 %v2642_v7 }
  0x6d   : > { %1285 = vmatprep.subr.mxu0 %v1089_v58  ;;  %1446 = vmatprep.subr.mxu1 %v1185_v59  ;;  %v1238_v58 = vld [vmem:[%s4169_s2 + $0x528] sm:$0xff]  ;;  %v1140_v59 = vld [vmem:[%s4169_s2 + $0x218] sm:$0xff] }
  0x6e   : > { %1286 = vmatpush1.msra.mxu0 %v1088_v60  ;;  %1447 = vmatpush1.msra.mxu1 %v1184_v61  ;;  %v1236_v60 = vld [vmem:[%s4169_s2 + $0x518] sm:$0xff]  ;;  %v1139_v61 = vld [vmem:[%s4169_s2 + $0x210] sm:$0xff] }
  0x6f   : > { %562 = vmatmul.mubr.f32.gmra.mxu0 %v362_v62  ;;  %723 = vmatmul.mubr.f32.gmra.mxu1 %v362_v62  ;;  %v1235_v62 = vld [vmem:[%s4169_s2 + $0x510] sm:$0xff] }
  0x70   : > { %567 = vmatprep.mubr.f32.mxu0 %v2642_v7  ;;  %728 = vmatprep.mubr.f32.mxu1 %v2642_v7 }
  0x71   : > { %1287 = vmatprep.subr.mxu0 %v1086_v63  ;;  %1448 = vmatprep.subr.mxu1 %v1182_v0  ;;  %v1137_v63 = vld [vmem:[%s4169_s2 + $0x200] sm:$0xff] }
  0x72   : > { %1288 = vmatpush1.msra.mxu0 %v1085_v1  ;;  %1449 = vmatpush1.msra.mxu1 %v1181_v2  ;;  %v1233_v0 = vld [vmem:[%s4169_s2 + $0x500] sm:$0xff]  ;;  %v1136_v1 = vld [vmem:[%s4169_s2 + $0x1f8] sm:$0xff] }
  0x73   : > { %568 = vmatmul.mubr.f32.gmra.mxu0 %v363_v3  ;;  %729 = vmatmul.mubr.f32.gmra.mxu1 %v363_v3  ;;  %v1232_v2 = vld [vmem:[%s4169_s2 + $0x4f8] sm:$0xff]  ;;  %v1134_v3 = vld [vmem:[%s4169_s2 + $0x1e8] sm:$0xff] }
  0x74   : > { %573 = vmatprep.mubr.f32.mxu0 %v2642_v7  ;;  %734 = vmatprep.mubr.f32.mxu1 %v2642_v7 }
  0x75   : > { %1289 = vmatprep.subr.mxu0 %v1083_v4  ;;  %1450 = vmatprep.subr.mxu1 %v1179_v5  ;;  %v1230_v4 = vld [vmem:[%s4169_s2 + $0x4e8] sm:$0xff]  ;;  %v1133_v5 = vld [vmem:[%s4169_s2 + $0x1e0] sm:$0xff] }
  0x76   : > { %1290 = vmatpush1.msra.mxu0 %v1082_v6  ;;  %1451 = vmatpush1.msra.mxu1 %v1178_v8  ;;  %v1229_v6 = vld [vmem:[%s4169_s2 + $0x4e0] sm:$0xff]  ;;  %v1131_v8 = vld [vmem:[%s4169_s2 + $0x1d0] sm:$0xff] }
  0x77   : > { %574 = vmatmul.mubr.f32.gmra.mxu0 %v364_v9  ;;  %735 = vmatmul.mubr.f32.gmra.mxu1 %v364_v9  ;;  %v1227_v9 = vld [vmem:[%s4169_s2 + $0x4d0] sm:$0xff] }
  0x78   : > { %579 = vmatprep.mubr.f32.mxu0 %v2642_v7  ;;  %740 = vmatprep.mubr.f32.mxu1 %v2642_v7 }
  0x79   : > { %1291 = vmatprep.subr.mxu0 %v1080_v10  ;;  %1452 = vmatprep.subr.mxu1 %v1176_v11  ;;  %v1130_v10 = vld [vmem:[%s4169_s2 + $0x1c8] sm:$0xff] }
  0x7a   : > { %1292 = vmatpush1.msra.mxu0 %v1079_v12  ;;  %1453 = vmatpush1.msra.mxu1 %v1175_v13  ;;  %v1226_v11 = vld [vmem:[%s4169_s2 + $0x4c8] sm:$0xff]  ;;  %v1128_v12 = vld [vmem:[%s4169_s2 + $0x1b8] sm:$0xff] }
  0x7b   : > { %580 = vmatmul.mubr.f32.gmra.mxu0 %v365_v14  ;;  %741 = vmatmul.mubr.f32.gmra.mxu1 %v365_v14  ;;  %v1224_v13 = vld [vmem:[%s4169_s2 + $0x4b8] sm:$0xff]  ;;  %v1127_v14 = vld [vmem:[%s4169_s2 + $0x1b0] sm:$0xff] }
  0x7c   : > { %585 = vmatprep.mubr.f32.mxu0 %v2642_v7  ;;  %746 = vmatprep.mubr.f32.mxu1 %v2642_v7  ;;  %v1169_v7 = vld [vmem:[%s4169_s2 + $0x300] sm:$0xff] }
  0x7d   : > { %1293 = vmatprep.subr.mxu0 %v1077_v15  ;;  %1454 = vmatprep.subr.mxu1 %v1173_v16  ;;  %v1223_v15 = vld [vmem:[%s4169_s2 + $0x4b0] sm:$0xff]  ;;  %v1125_v16 = vld [vmem:[%s4169_s2 + $0x1a0] sm:$0xff] }
  0x7e   : > { %1294 = vmatpush1.msra.mxu0 %v1076_v17  ;;  %1455 = vmatpush1.msra.mxu1 %v1172_v18  ;;  %v1221_v17 = vld [vmem:[%s4169_s2 + $0x4a0] sm:$0xff]  ;;  %v1124_v18 = vld [vmem:[%s4169_s2 + $0x198] sm:$0xff] }
  0x7f   : > { %586 = vmatmul.mubr.f32.gmra.mxu0 %v366_v19  ;;  %747 = vmatmul.mubr.f32.gmra.mxu1 %v366_v19  ;;  %v1220_v19 = vld [vmem:[%s4169_s2 + $0x498] sm:$0xff] }
  0x80   : > { %1295 = vmatprep.subr.mxu0 %v1074_v20  ;;  %1456 = vmatprep.subr.mxu1 %v1170_v21  ;;  %v1122_v20 = vld [vmem:[%s4169_s2 + $0x188] sm:$0xff] }
  0x81   : > { %1296 = vmatpush1.msra.mxu0 %v1073_v22  ;;  %1457 = vmatpush1.msra.mxu1 %v1169_v7  ;;  %v1218_v21 = vld [vmem:[%s4169_s2 + $0x488] sm:$0xff]  ;;  %v1121_v22 = vld [vmem:[%s4169_s2 + $0x180] sm:$0xff] }
  0x82   : > { %1297 = vmatprep.subr.mxu0 %v1167_v23  ;;  %1458 = vmatprep.subr.mxu1 %v1263_v24  ;;  %v1217_v7 = vld [vmem:[%s4169_s2 + $0x480] sm:$0xff]  ;;  %v1168_v23 = vld [vmem:[%s4169_s2 + $0x2f8] sm:$0xff] }
  0x83   : > { %1298 = vmatpush2.msra.mxu0 %v1166_v25  ;;  %1459 = vmatpush2.msra.mxu1 %v1262_v26  ;;  %v1264_v24 = vld [vmem:[%s4169_s2 + $0x5f8] sm:$0xff] }
  0x84   : > { %1299 = vmatprep.subr.mxu0 %v1164_v27  ;;  %1460 = vmatprep.subr.mxu1 %v1260_v28 }
  0x85   : > { %1300 = vmatpush2.msra.mxu0 %v1163_v29  ;;  %1461 = vmatpush2.msra.mxu1 %v1259_v30 }
  0x86   : > { %1301 = vmatprep.subr.mxu0 %v1161_v31  ;;  %1462 = vmatprep.subr.mxu1 %v1257_v32 }
  0x87   : > { %1302 = vmatpush2.msra.mxu0 %v1160_v33  ;;  %1463 = vmatpush2.msra.mxu1 %v1256_v34 }
  0x88   : > { %1303 = vmatprep.subr.mxu0 %v1158_v35  ;;  %1464 = vmatprep.subr.mxu1 %v1254_v36  ;;  %v1120_v35 = vld [vmem:[%s4169_s2 + $0x178] sm:$0xff] }
  0x89   : > { %1304 = vmatpush2.msra.mxu0 %v1157_v37  ;;  %1465 = vmatpush2.msra.mxu1 %v1253_v38 }
  0x8a   : > { %1305 = vmatprep.subr.mxu0 %v1155_v39  ;;  %1466 = vmatprep.subr.mxu1 %v1251_v40 }
  0x8b   : > { %1306 = vmatpush2.msra.mxu0 %v1154_v41  ;;  %1467 = vmatpush2.msra.mxu1 %v1250_v42  ;;  %v1165_v41 = vld [vmem:[%s4169_s2 + $0x2e0] sm:$0xff] }
  0x8c   : > { %1307 = vmatprep.subr.mxu0 %v1152_v43  ;;  %1468 = vmatprep.subr.mxu1 %v1248_v44  ;;  %v1117_v44 = vld [vmem:[%s4169_s2 + $0x160] sm:$0xff] }
  0x8d   : > { %1308 = vmatpush2.msra.mxu0 %v1151_v45  ;;  %1469 = vmatpush2.msra.mxu1 %v1247_v46 }
  0x8e   : > { %1309 = vmatprep.subr.mxu0 %v1149_v47  ;;  %1470 = vmatprep.subr.mxu1 %v1245_v48 }
  0x8f   : > { %1310 = vmatpush2.msra.mxu0 %v1148_v49  ;;  %1471 = vmatpush2.msra.mxu1 %v1244_v50  ;;  %v1162_v50 = vld [vmem:[%s4169_s2 + $0x2c8] sm:$0xff] }
  0x90   : > { %1311 = vmatprep.subr.mxu0 %v1146_v51  ;;  %1472 = vmatprep.subr.mxu1 %v1242_v52 }
  0x91   : > { %1312 = vmatpush2.msra.mxu0 %v1145_v53  ;;  %1473 = vmatpush2.msra.mxu1 %v1241_v54 }
  0x92   : > { %1313 = vmatprep.subr.mxu0 %v1143_v55  ;;  %1474 = vmatprep.subr.mxu1 %v1239_v56 }
  0x93   : > { %1314 = vmatpush2.msra.mxu0 %v1142_v57  ;;  %1475 = vmatpush2.msra.mxu1 %v1238_v58  ;;  %v1216_v57 = vld [vmem:[%s4169_s2 + $0x478] sm:$0xff]  ;;  %v1114_v58 = vld [vmem:[%s4169_s2 + $0x148] sm:$0xff] }
  0x94   : > { %1315 = vmatprep.subr.mxu0 %v1140_v59  ;;  %1476 = vmatprep.subr.mxu1 %v1236_v60 }
  0x95   : > { %1316 = vmatpush2.msra.mxu0 %v1139_v61  ;;  %1477 = vmatpush2.msra.mxu1 %v1235_v62  ;;  %v1261_v61 = vld [vmem:[%s4169_s2 + $0x5e0] sm:$0xff] }
  0x96   : > { %1317 = vmatprep.subr.mxu0 %v1137_v63  ;;  %1478 = vmatprep.subr.mxu1 %v1233_v0 }
  0x97   : > { %1318 = vmatpush2.msra.mxu0 %v1136_v1  ;;  %1479 = vmatpush2.msra.mxu1 %v1232_v2 }
  0x98   : > { %1319 = vmatprep.subr.mxu0 %v1134_v3  ;;  %1480 = vmatprep.subr.mxu1 %v1230_v4  ;;  %v1159_v3 = vld [vmem:[%s4169_s2 + $0x2b0] sm:$0xff] }
  0x99   : > { %1320 = vmatpush2.msra.mxu0 %v1133_v5  ;;  %1481 = vmatpush2.msra.mxu1 %v1229_v6 }
  0x9a   : > { %1321 = vmatprep.subr.mxu0 %v1131_v8  ;;  %1482 = vmatprep.subr.mxu1 %v1227_v9 }
  0x9b   : > { %1322 = vmatpush2.msra.mxu0 %v1130_v10  ;;  %1483 = vmatpush2.msra.mxu1 %v1226_v11  ;;  %v1213_v11 = vld [vmem:[%s4169_s2 + $0x460] sm:$0xff] }
  0x9c   : > { %1323 = vmatprep.subr.mxu0 %v1128_v12  ;;  %1484 = vmatprep.subr.mxu1 %v1224_v13  ;;  %v1111_v12 = vld [vmem:[%s4169_s2 + $0x130] sm:$0xff] }
  0x9d   : > { %1324 = vmatpush2.msra.mxu0 %v1127_v14  ;;  %1485 = vmatpush2.msra.mxu1 %v1223_v15  ;;  %v1258_v15 = vld [vmem:[%s4169_s2 + $0x5c8] sm:$0xff] }
  0x9e   : > { %1325 = vmatprep.subr.mxu0 %v1125_v16  ;;  %1486 = vmatprep.subr.mxu1 %v1221_v17 }
  0x9f   : > { %1326 = vmatpush2.msra.mxu0 %v1124_v18  ;;  %1487 = vmatpush2.msra.mxu1 %v1220_v19 }
  0xa0   : > { %1327 = vmatprep.subr.mxu0 %v1122_v20  ;;  %1488 = vmatprep.subr.mxu1 %v1218_v21  ;;  %v1156_v21 = vld [vmem:[%s4169_s2 + $0x298] sm:$0xff] }
  0xa1   : > { %1328 = vmatpush2.msra.mxu0 %v1121_v22  ;;  %1489 = vmatpush2.msra.mxu1 %v1217_v7 }
  0xa2   : > { %2279 = vmatprep.subr.mxu0 %v1168_v23  ;;  %2359 = vmatprep.subr.mxu1 %v1264_v24 }
 0x103   : > { %v3388_v25 = vpop.f32.mrf.mxu0  ;;  %v658_v26 = vpop.f32.mrf.mxu1 }
 0x104   : > { %v849_v27 = vmul.f32 0.1, %v658_v26  ;;  %vm833_vm0 = vcmp.gt.f32.partialorder %v658_v26, 0.0 }
 0x105   : > { %v499_v28 = vpop.f32.mrf.mxu0  ;;  %v660_v29 = vpop.f32.mrf.mxu1 }
 0x106   : > { %vm769_vm1 = vcmp.gt.f32.partialorder %v499_v28, 0.0  ;;  %v785_v30 = vmul.f32 0.1, %v499_v28  ;;  %vm913_vm2 = vcmp.gt.f32.partialorder %v660_v29, 0.0  ;;  %v929_v31 = vmul.f32 0.1, %v660_v29 }
 0x107   : > { %v3390_v32 = vpop.f32.mrf.mxu0  ;;  %v664_v33 = vpop.f32.mrf.mxu1  ;;  %v865_v36 = vsel %vm833_vm0, %v658_v26, %v849_v27 }
 0x108   : > { %v3392_v34 = vsel %vm769_vm1, %v499_v28, %v785_v30  ;;  %v945_v37 = vsel %vm913_vm2, %v660_v29, %v929_v31  ;;  %v850_v38 = vmul.f32 0.1, %v664_v33  ;;  %vm834_vm3 = vcmp.gt.f32.partialorder %v664_v33, 0.0  ;;  %v1210_v28 = vld [vmem:[%s4169_s2 + $0x448] sm:$0xff]  ;;  %v1108_v29 = vld [vmem:[%s4169_s2 + $0x118] sm:$0xff] }
 0x109   : > { %v505_v39 = vpop.f32.mrf.mxu0  ;;  %v666_v40 = vpop.f32.mrf.mxu1  ;;  %1329 = vmatprep.mubr.f32.mxu0 %v3392_v34  ;;  %v961_v42 = vmul.f32 %v945_v37, %v945_v37  ;;  %v3414_v51 = vmul.f32 %v865_v36, %v865_v36 }
 0x10a   : > { %vm770_vm4 = vcmp.gt.f32.partialorder %v505_v39, 0.0  ;;  %v786_v43 = vmul.f32 0.1, %v505_v39  ;;  %1330 = vmatmul.mubr.f32.vlgmr.msra.gmra.mxu0 %v3388_v25  ;;  %vm914_vm5 = vcmp.gt.f32.partialorder %v666_v40, 0.0  ;;  %v930_v45 = vmul.f32 0.1, %v666_v40 }
 0x10b   : > { %v3405_v46 = vpop.f32.mrf.mxu0  ;;  %v670_v47 = vpop.f32.mrf.mxu1  ;;  %2280 = vmatpush3.msra.mxu0 %v1120_v35  ;;  %v3409_v49 = vmul.f32 %v961_v42, %v945_v37  ;;  %v866_v52 = vsel %vm834_vm3, %v664_v33, %v850_v38  ;;  %v1255_v33 = vld [vmem:[%s4169_s2 + $0x5b0] sm:$0xff] }
 0x10c   : > { %v3407_v48 = vsel %vm770_vm4, %v505_v39, %v786_v43  ;;  %2281 = vmatprep.subr.mxu0 %v1165_v41  ;;  %v946_v53 = vsel %vm914_vm5, %v666_v40, %v930_v45  ;;  %v851_v54 = vmul.f32 0.1, %v670_v47  ;;  %vm835_vm6 = vcmp.gt.f32.partialorder %v670_v47, 0.0  ;;  %v1153_v40 = vld [vmem:[%s4169_s2 + $0x280] sm:$0xff] }
 0x10d   : > { %v511_v55 = vpop.f32.mrf.mxu0  ;;  %v672_v56 = vpop.f32.mrf.mxu1  ;;  %1335 = vmatprep.mubr.f32.mxu0 %v3407_v48  ;;  %2282 = vmatpush3.msra.mxu0 %v1117_v44  ;;  %v962_v59 = vmul.f32 %v946_v53, %v946_v53  ;;  %v3438_v4 = vmul.f32 %v866_v52, %v866_v52  ;;  %v1105_v52 = vld [vmem:[%s4169_s2 + $0x100] sm:$0xff] }
 0x10e   : > { %vm771_vm7 = vcmp.gt.f32.partialorder %v511_v55, 0.0  ;;  %v787_v60 = vmul.f32 0.1, %v511_v55  ;;  %1490 = vmatprep.mubr.f32.mxu1 %v3409_v49  ;;  %1336 = vmatmul.mubr.f32.gmra.mxu0 %v3390_v32  ;;  %vm915_vm8 = vcmp.gt.f32.partialorder %v672_v56, 0.0  ;;  %v931_v62 = vmul.f32 0.1, %v672_v56 }
 0x10f   : > { %1491 = vmatmul.mubr.f32.vlgmr.msra.gmra.mxu1 %v3414_v51  ;;  %v3429_v63 = vpop.f32.mrf.mxu0  ;;  %v676_v0 = vpop.f32.mrf.mxu1  ;;  %2283 = vmatprep.subr.mxu0 %v1162_v50  ;;  %v3433_v2 = vmul.f32 %v962_v59, %v946_v53  ;;  %v867_v5 = vsel %vm835_vm6, %v670_v47, %v851_v54  ;;  %v1207_v50 = vld [vmem:[%s4169_s2 + $0x430] sm:$0xff] }
 0x110   : > { %2360 = vmatpush3.msra.mxu1 %v1216_v57  ;;  %v3431_v1 = vsel %vm771_vm7, %v511_v55, %v787_v60  ;;  %2284 = vmatpush3.msra.mxu0 %v1114_v58  ;;  %v947_v6 = vsel %vm915_vm8, %v672_v56, %v931_v62  ;;  %v852_v8 = vmul.f32 0.1, %v676_v0  ;;  %vm836_vm9 = vcmp.gt.f32.partialorder %v676_v0, 0.0  ;;  %v1252_v55 = vld [vmem:[%s4169_s2 + $0x598] sm:$0xff] }
 0x111   : > { %v517_v9 = vpop.f32.mrf.mxu0  ;;  %v678_v10 = vpop.f32.mrf.mxu1  ;;  %1341 = vmatprep.mubr.f32.mxu0 %v3431_v1  ;;  %2361 = vmatprep.subr.mxu1 %v1261_v61  ;;  %v963_v13 = vmul.f32 %v947_v6, %v947_v6  ;;  %v3463_v22 = vmul.f32 %v867_v5, %v867_v5  ;;  %v1150_v61 = vld [vmem:[%s4169_s2 + $0x268] sm:$0xff] }
 0x112   : > { %vm772_vm10 = vcmp.gt.f32.partialorder %v517_v9, 0.0  ;;  %v788_v14 = vmul.f32 0.1, %v517_v9  ;;  %1496 = vmatprep.mubr.f32.mxu1 %v3433_v2  ;;  %1342 = vmatmul.mubr.f32.gmra.mxu0 %v3405_v46  ;;  %vm916_vm11 = vcmp.gt.f32.partialorder %v678_v10, 0.0  ;;  %v932_v16 = vmul.f32 0.1, %v678_v10 }
 0x113   : > { %1497 = vmatmul.mubr.f32.gmra.mxu1 %v3438_v4  ;;  %v3454_v17 = vpop.f32.mrf.mxu0  ;;  %v682_v18 = vpop.f32.mrf.mxu1  ;;  %2285 = vmatprep.subr.mxu0 %v1159_v3  ;;  %v3458_v20 = vmul.f32 %v963_v13, %v947_v6  ;;  %v868_v7 = vsel %vm836_vm9, %v676_v0, %v852_v8  ;;  %v1249_v13 = vld [vmem:[%s4169_s2 + $0x580] sm:$0xff] }
 0x114   : > { %2362 = vmatpush3.msra.mxu1 %v1213_v11  ;;  %v3456_v19 = vsel %vm772_vm10, %v517_v9, %v788_v14  ;;  %2286 = vmatpush3.msra.mxu0 %v1111_v12  ;;  %v948_v23 = vsel %vm916_vm11, %v678_v10, %v932_v16  ;;  %v853_v24 = vmul.f32 0.1, %v682_v18  ;;  %vm837_vm12 = vcmp.gt.f32.partialorder %v682_v18, 0.0  ;;  %v1204_v9 = vld [vmem:[%s4169_s2 + $0x418] sm:$0xff]  ;;  %v1102_v10 = vld [vmem:[%s4169_s2 + $0xe8] sm:$0xff] }
 0x115   : > { %v523_v26 = vpop.f32.mrf.mxu0  ;;  %v684_v27 = vpop.f32.mrf.mxu1  ;;  %1347 = vmatprep.mubr.f32.mxu0 %v3456_v19  ;;  %2363 = vmatprep.subr.mxu1 %v1258_v15  ;;  %v964_v30 = vmul.f32 %v948_v23, %v948_v23  ;;  %v3488_v41 = vmul.f32 %v868_v7, %v868_v7  ;;  %v1147_v7 = vld [vmem:[%s4169_s2 + $0x250] sm:$0xff] }
 0x116   : > { %vm773_vm13 = vcmp.gt.f32.partialorder %v523_v26, 0.0  ;;  %v789_v31 = vmul.f32 0.1, %v523_v26  ;;  %1502 = vmatprep.mubr.f32.mxu1 %v3458_v20  ;;  %1348 = vmatmul.mubr.f32.gmra.mxu0 %v3429_v63  ;;  %vm917_vm14 = vcmp.gt.f32.partialorder %v684_v27, 0.0  ;;  %v933_v35 = vmul.f32 0.1, %v684_v27 }
 0x117   : > { %1503 = vmatmul.mubr.f32.gmra.mxu1 %v3463_v22  ;;  %v3479_v36 = vpop.f32.mrf.mxu0  ;;  %v688_v37 = vpop.f32.mrf.mxu1  ;;  %2287 = vmatprep.subr.mxu0 %v1156_v21  ;;  %v3483_v39 = vmul.f32 %v964_v30, %v948_v23  ;;  %v869_v42 = vsel %vm837_vm12, %v682_v18, %v853_v24  ;;  %v1201_v30 = vld [vmem:[%s4169_s2 + $0x400] sm:$0xff] }
 0x118   : > { %2364 = vmatpush3.msra.mxu1 %v1210_v28  ;;  %v3481_v38 = vsel %vm773_vm13, %v523_v26, %v789_v31  ;;  %2288 = vmatpush3.msra.mxu0 %v1108_v29  ;;  %v949_v43 = vsel %vm917_vm14, %v684_v27, %v933_v35  ;;  %v854_v44 = vmul.f32 0.1, %v688_v37  ;;  %vm838_vm15 = vcmp.gt.f32.partialorder %v688_v37, 0.0  ;;  %v1099_v31 = vld [vmem:[%s4169_s2 + $0xd0] sm:$0xff] }
 0x119   : > { %v529_v45 = vpop.f32.mrf.mxu0  ;;  %v690_v47 = vpop.f32.mrf.mxu1  ;;  %1353 = vmatprep.mubr.f32.mxu0 %v3481_v38  ;;  %2365 = vmatprep.subr.mxu1 %v1255_v33  ;;  %v965_v53 = vmul.f32 %v949_v43, %v949_v43  ;;  %v3513_v62 = vmul.f32 %v869_v42, %v869_v42 }
 0x11a   : > { %vm774_vm0 = vcmp.gt.f32.partialorder %v529_v45, 0.0  ;;  %v790_v54 = vmul.f32 0.1, %v529_v45  ;;  %1508 = vmatprep.mubr.f32.mxu1 %v3483_v39  ;;  %1354 = vmatmul.mubr.f32.gmra.mxu0 %v3454_v17  ;;  %vm918_vm1 = vcmp.gt.f32.partialorder %v690_v47, 0.0  ;;  %v934_v56 = vmul.f32 0.1, %v690_v47 }
 0x11b   : > { %1509 = vmatmul.mubr.f32.gmra.mxu1 %v3488_v41  ;;  %v3504_v57 = vpop.f32.mrf.mxu0  ;;  %v694_v58 = vpop.f32.mrf.mxu1  ;;  %2289 = vmatprep.subr.mxu0 %v1153_v40  ;;  %v3508_v60 = vmul.f32 %v965_v53, %v949_v43  ;;  %v870_v0 = vsel %vm838_vm15, %v688_v37, %v854_v44  ;;  %v1246_v37 = vld [vmem:[%s4169_s2 + $0x568] sm:$0xff] }
 0x11c   : > { %2366 = vmatpush3.msra.mxu1 %v1207_v50  ;;  %v3506_v59 = vsel %vm774_vm0, %v529_v45, %v790_v54  ;;  %2290 = vmatpush3.msra.mxu0 %v1105_v52  ;;  %v950_v3 = vsel %vm918_vm1, %v690_v47, %v934_v56  ;;  %v855_v5 = vmul.f32 0.1, %v694_v58  ;;  %vm839_vm2 = vcmp.gt.f32.partialorder %v694_v58, 0.0  ;;  %v1144_v47 = vld [vmem:[%s4169_s2 + $0x238] sm:$0xff] }
 0x11d   : > { %v535_v6 = vpop.f32.mrf.mxu0  ;;  %v696_v8 = vpop.f32.mrf.mxu1  ;;  %1359 = vmatprep.mubr.f32.mxu0 %v3506_v59  ;;  %2367 = vmatprep.subr.mxu1 %v1252_v55  ;;  %v966_v11 = vmul.f32 %v950_v3, %v950_v3  ;;  %v3538_v23 = vmul.f32 %v870_v0, %v870_v0 }
 0x11e   : > { %vm775_vm3 = vcmp.gt.f32.partialorder %v535_v6, 0.0  ;;  %v791_v12 = vmul.f32 0.1, %v535_v6  ;;  %1514 = vmatprep.mubr.f32.mxu1 %v3508_v60  ;;  %1360 = vmatmul.mubr.f32.gmra.mxu0 %v3479_v36  ;;  %vm919_vm4 = vcmp.gt.f32.partialorder %v696_v8, 0.0  ;;  %v935_v14 = vmul.f32 0.1, %v696_v8 }
 0x11f   : > { %1515 = vmatmul.mubr.f32.gmra.mxu1 %v3513_v62  ;;  %v3529_v15 = vpop.f32.mrf.mxu0  ;;  %v700_v16 = vpop.f32.mrf.mxu1  ;;  %2291 = vmatprep.subr.mxu0 %v1150_v61  ;;  %v3533_v21 = vmul.f32 %v966_v11, %v950_v3  ;;  %v871_v24 = vsel %vm839_vm2, %v694_v58, %v855_v5  ;;  %v1198_v58 = vld [vmem:[%s4169_s2 + $0x3e8] sm:$0xff]  ;;  %v1096_v61 = vld [vmem:[%s4169_s2 + $0xb8] sm:$0xff]  ;;  %v1243_v5 = vld [vmem:[%s4169_s2 + $0x550] sm:$0xff] }
 0x120   : > { %2368 = vmatpush3.msra.mxu1 %v1204_v9  ;;  %v3531_v18 = vsel %vm775_vm3, %v535_v6, %v791_v12  ;;  %2292 = vmatpush3.msra.mxu0 %v1102_v10  ;;  %v951_v26 = vsel %vm919_vm4, %v696_v8, %v935_v14  ;;  %v856_v27 = vmul.f32 0.1, %v700_v16  ;;  %vm840_vm5 = vcmp.gt.f32.partialorder %v700_v16, 0.0  ;;  %v1141_v12 = vld [vmem:[%s4169_s2 + $0x220] sm:$0xff] }
 0x121   : > { %v541_v28 = vpop.f32.mrf.mxu0  ;;  %v702_v29 = vpop.f32.mrf.mxu1  ;;  %1365 = vmatprep.mubr.f32.mxu0 %v3531_v18  ;;  %2369 = vmatprep.subr.mxu1 %v1249_v13  ;;  %v967_v33 = vmul.f32 %v951_v26, %v951_v26  ;;  %v3563_v50 = vmul.f32 %v871_v24, %v871_v24 }
 0x122   : > { %vm776_vm6 = vcmp.gt.f32.partialorder %v541_v28, 0.0  ;;  %v792_v35 = vmul.f32 0.1, %v541_v28  ;;  %1520 = vmatprep.mubr.f32.mxu1 %v3533_v21  ;;  %1366 = vmatmul.mubr.f32.gmra.mxu0 %v3504_v57  ;;  %vm920_vm7 = vcmp.gt.f32.partialorder %v702_v29, 0.0  ;;  %v936_v40 = vmul.f32 0.1, %v702_v29 }
 0x123   : > { %1521 = vmatmul.mubr.f32.gmra.mxu1 %v3538_v23  ;;  %v3554_v42 = vpop.f32.mrf.mxu0  ;;  %v706_v43 = vpop.f32.mrf.mxu1  ;;  %2293 = vmatprep.subr.mxu0 %v1147_v7  ;;  %v3558_v45 = vmul.f32 %v967_v33, %v951_v26  ;;  %v872_v52 = vsel %vm840_vm5, %v700_v16, %v856_v27  ;;  %v1195_v27 = vld [vmem:[%s4169_s2 + $0x3d0] sm:$0xff] }
 0x124   : > { %2370 = vmatpush3.msra.mxu1 %v1201_v30  ;;  %v3556_v44 = vsel %vm776_vm6, %v541_v28, %v792_v35  ;;  %2294 = vmatpush3.msra.mxu0 %v1099_v31  ;;  %v952_v53 = vsel %vm920_vm7, %v702_v29, %v936_v40  ;;  %v857_v54 = vmul.f32 0.1, %v706_v43  ;;  %vm841_vm8 = vcmp.gt.f32.partialorder %v706_v43, 0.0  ;;  %v1093_v28 = vld [vmem:[%s4169_s2 + $0xa0] sm:$0xff]  ;;  %v1240_v31 = vld [vmem:[%s4169_s2 + $0x538] sm:$0xff] }
 0x125   : > { %v547_v55 = vpop.f32.mrf.mxu0  ;;  %v708_v56 = vpop.f32.mrf.mxu1  ;;  %1371 = vmatprep.mubr.f32.mxu0 %v3556_v44  ;;  %2371 = vmatprep.subr.mxu1 %v1246_v37  ;;  %v968_v0 = vmul.f32 %v952_v53, %v952_v53  ;;  %v3588_v13 = vmul.f32 %v872_v52, %v872_v52 }
 0x126   : > { %vm777_vm9 = vcmp.gt.f32.partialorder %v547_v55, 0.0  ;;  %v793_v3 = vmul.f32 0.1, %v547_v55  ;;  %1526 = vmatprep.mubr.f32.mxu1 %v3558_v45  ;;  %1372 = vmatmul.mubr.f32.gmra.mxu0 %v3529_v15  ;;  %vm921_vm10 = vcmp.gt.f32.partialorder %v708_v56, 0.0  ;;  %v937_v6 = vmul.f32 0.1, %v708_v56 }
 0x127   : > { %1527 = vmatmul.mubr.f32.gmra.mxu1 %v3563_v50  ;;  %v3579_v8 = vpop.f32.mrf.mxu0  ;;  %v712_v9 = vpop.f32.mrf.mxu1  ;;  %2295 = vmatprep.subr.mxu0 %v1144_v47  ;;  %v3583_v11 = vmul.f32 %v968_v0, %v952_v53  ;;  %v873_v14 = vsel %vm841_vm8, %v706_v43, %v857_v54  ;;  %v1138_v47 = vld [vmem:[%s4169_s2 + $0x208] sm:$0xff] }
 0x128   : > { %2372 = vmatpush3.msra.mxu1 %v1198_v58  ;;  %v3581_v10 = vsel %vm777_vm9, %v547_v55, %v793_v3  ;;  %2296 = vmatpush3.msra.mxu0 %v1096_v61  ;;  %v953_v16 = vsel %vm921_vm10, %v708_v56, %v937_v6  ;;  %v858_v7 = vmul.f32 0.1, %v712_v9  ;;  %vm842_vm11 = vcmp.gt.f32.partialorder %v712_v9, 0.0  ;;  %v1192_v61 = vld [vmem:[%s4169_s2 + $0x3b8] sm:$0xff]  ;;  %v1090_v0 = vld [vmem:[%s4169_s2 + $0x88] sm:$0xff]  ;;  %v1237_v6 = vld [vmem:[%s4169_s2 + $0x520] sm:$0xff] }
 0x129   : > { %v553_v24 = vpop.f32.mrf.mxu0  ;;  %v714_v26 = vpop.f32.mrf.mxu1  ;;  %1377 = vmatprep.mubr.f32.mxu0 %v3581_v10  ;;  %2373 = vmatprep.subr.mxu1 %v1243_v5  ;;  %v969_v29 = vmul.f32 %v953_v16, %v953_v16  ;;  %v3613_v52 = vmul.f32 %v873_v14, %v873_v14 }
 0x12a   : > { %vm778_vm12 = vcmp.gt.f32.partialorder %v553_v24, 0.0  ;;  %v794_v30 = vmul.f32 0.1, %v553_v24  ;;  %1532 = vmatprep.mubr.f32.mxu1 %v3583_v11  ;;  %1378 = vmatmul.mubr.f32.gmra.mxu0 %v3554_v42  ;;  %vm922_vm13 = vcmp.gt.f32.partialorder %v714_v26, 0.0  ;;  %v938_v33 = vmul.f32 0.1, %v714_v26 }
 0x12b   : > { %1533 = vmatmul.mubr.f32.gmra.mxu1 %v3588_v13  ;;  %v3604_v35 = vpop.f32.mrf.mxu0  ;;  %v718_v37 = vpop.f32.mrf.mxu1  ;;  %2297 = vmatprep.subr.mxu0 %v1141_v12  ;;  %v3608_v43 = vmul.f32 %v969_v29, %v953_v16  ;;  %v874_v53 = vsel %vm842_vm11, %v712_v9, %v858_v7 }
 0x12c   : > { %4192 = vst [vmem:[#allocation7_spill] sm:$0xff] %v3604_v35  ;;  %2374 = vmatpush3.msra.mxu1 %v1195_v27  ;;  %v3606_v40 = vsel %vm778_vm12, %v553_v24, %v794_v30  ;;  %2298 = vmatpush3.msra.mxu0 %v1093_v28  ;;  %v954_v54 = vsel %vm922_vm13, %v714_v26, %v938_v33  ;;  %v859_v55 = vmul.f32 0.1, %v718_v37  ;;  %vm843_vm14 = vcmp.gt.f32.partialorder %v718_v37, 0.0  ;;  %v1135_v24 = vld [vmem:[%s4169_s2 + $0x1f0] sm:$0xff]  ;;  %v1189_v33 = vld [vmem:[%s4169_s2 + $0x3a0] sm:$0xff] }
 0x12d   : > { %v559_v56 = vpop.f32.mrf.mxu0  ;;  %v720_v58 = vpop.f32.mrf.mxu1  ;;  %1383 = vmatprep.mubr.f32.mxu0 %v3606_v40  ;;  %2375 = vmatprep.subr.mxu1 %v1240_v31  ;;  %v970_v3 = vmul.f32 %v954_v54, %v954_v54  ;;  %v3638_v26 = vmul.f32 %v874_v53, %v874_v53 }
 0x12e   : > { %vm779_vm15 = vcmp.gt.f32.partialorder %v559_v56, 0.0  ;;  %v795_v5 = vmul.f32 0.1, %v559_v56  ;;  %1538 = vmatprep.mubr.f32.mxu1 %v3608_v43  ;;  %1384 = vmatmul.mubr.f32.gmra.mxu0 %v3579_v8  ;;  %vm923_vm0 = vcmp.gt.f32.partialorder %v720_v58, 0.0  ;;  %v939_v9 = vmul.f32 0.1, %v720_v58 }
 0x12f   : > { %1539 = vmatmul.mubr.f32.gmra.mxu1 %v3613_v52  ;;  %v3629_v12 = vpop.f32.mrf.mxu0  ;;  %v724_v14 = vpop.f32.mrf.mxu1  ;;  %2299 = vmatprep.subr.mxu0 %v1138_v47  ;;  %v3633_v7 = vmul.f32 %v970_v3, %v954_v54  ;;  %4195 = vst [vmem:[#allocation10_spill] sm:$0xff] %v3638_v26  ;;  %v875_v27 = vsel %vm843_vm14, %v718_v37, %v859_v55  ;;  %v1087_v47 = vld [vmem:[%s4169_s2 + $0x70] sm:$0xff]  ;;  %v1234_v37 = vld [vmem:[%s4169_s2 + $0x508] sm:$0xff]  ;;  %v1132_v3 = vld [vmem:[%s4169_s2 + $0x1d8] sm:$0xff] }
 0x130   : > { %4193 = vst [vmem:[#allocation8_spill] sm:$0xff] %v3629_v12  ;;  %2376 = vmatpush3.msra.mxu1 %v1192_v61  ;;  %v3631_v16 = vsel %vm779_vm15, %v559_v56, %v795_v5  ;;  %2300 = vmatpush3.msra.mxu0 %v1090_v0  ;;  %v955_v28 = vsel %vm923_vm0, %v720_v58, %v939_v9  ;;  %v860_v29 = vmul.f32 0.1, %v724_v14  ;;  %vm844_vm1 = vcmp.gt.f32.partialorder %v724_v14, 0.0 }
 0x131   : > { %4194 = vst [vmem:[#allocation9_spill] sm:$0xff] %v3633_v7  ;;  %v565_v30 = vpop.f32.mrf.mxu0  ;;  %v726_v31 = vpop.f32.mrf.mxu1  ;;  %1389 = vmatprep.mubr.f32.mxu0 %v3631_v16  ;;  %2377 = vmatprep.subr.mxu1 %v1237_v6  ;;  %v971_v54 = vmul.f32 %v955_v28, %v955_v28  ;;  %v3663_v5 = vmul.f32 %v875_v27, %v875_v27 }
 0x132   : > { %vm780_vm2 = vcmp.gt.f32.partialorder %v565_v30, 0.0  ;;  %v796_v53 = vmul.f32 0.1, %v565_v30  ;;  %1544 = vmatprep.mubr.f32.mxu1 %v3633_v7  ;;  %1390 = vmatmul.mubr.f32.gmra.mxu0 %v3604_v35  ;;  %vm924_vm3 = vcmp.gt.f32.partialorder %v726_v31, 0.0  ;;  %v940_v55 = vmul.f32 0.1, %v726_v31 }
 0x133   : > { %1545 = vmatmul.mubr.f32.gmra.mxu1 %v3638_v26  ;;  %v3654_v56 = vpop.f32.mrf.mxu0  ;;  %v730_v58 = vpop.f32.mrf.mxu1  ;;  %2301 = vmatprep.subr.mxu0 %v1135_v24  ;;  %v3658_v0 = vmul.f32 %v971_v54, %v955_v28  ;;  %4199 = vst [vmem:[#allocation14_spill] sm:$0xff] %v3663_v5  ;;  %v876_v6 = vsel %vm844_vm1, %v724_v14, %v860_v29  ;;  %v1186_v24 = vld [vmem:[%s4169_s2 + $0x388] sm:$0xff]  ;;  %v1084_v28 = vld [vmem:[%s4169_s2 + $0x58] sm:$0xff]  ;;  %v1231_v14 = vld [vmem:[%s4169_s2 + $0x4f0] sm:$0xff] }
 0x134   : > { %4196 = vst [vmem:[#allocation11_spill] sm:$0xff] %v3654_v56  ;;  %2378 = vmatpush3.msra.mxu1 %v1189_v33  ;;  %v3656_v61 = vsel %vm780_vm2, %v565_v30, %v796_v53  ;;  %2302 = vmatpush3.msra.mxu0 %v1087_v47  ;;  %v956_v9 = vsel %vm924_vm3, %v726_v31, %v940_v55  ;;  %v861_v26 = vmul.f32 0.1, %v730_v58  ;;  %vm845_vm4 = vcmp.gt.f32.partialorder %v730_v58, 0.0  ;;  %v1129_v53 = vld [vmem:[%s4169_s2 + $0x1c0] sm:$0xff] }
 0x135   : > { %4197 = vst [vmem:[#allocation12_spill] sm:$0xff] %v3656_v61  ;;  %4198 = vst [vmem:[#allocation13_spill] sm:$0xff] %v3658_v0  ;;  %v571_v35 = vpop.f32.mrf.mxu0  ;;  %v732_v7 = vpop.f32.mrf.mxu1  ;;  %1395 = vmatprep.mubr.f32.mxu0 %v3656_v61  ;;  %2379 = vmatprep.subr.mxu1 %v1234_v37  ;;  %v972_v30 = vmul.f32 %v956_v9, %v956_v9  ;;  %v3688_v37 = vmul.f32 %v876_v6, %v876_v6 }
 0x136   : > { %vm781_vm5 = vcmp.gt.f32.partialorder %v571_v35, 0.0  ;;  %v797_v27 = vmul.f32 0.1, %v571_v35  ;;  %1550 = vmatprep.mubr.f32.mxu1 %v3658_v0  ;;  %1396 = vmatmul.mubr.f32.gmra.mxu0 %v3629_v12  ;;  %vm925_vm6 = vcmp.gt.f32.partialorder %v732_v7, 0.0  ;;  %v941_v29 = vmul.f32 0.1, %v732_v7 }
 0x137   : > { %1551 = vmatmul.mubr.f32.gmra.mxu1 %v3663_v5  ;;  %v3679_v31 = vpop.f32.mrf.mxu0  ;;  %v736_v33 = vpop.f32.mrf.mxu1  ;;  %2303 = vmatprep.subr.mxu0 %v1132_v3  ;;  %v3683_v54 = vmul.f32 %v972_v30, %v956_v9  ;;  %4203 = vst [vmem:[#allocation18_spill] sm:$0xff] %v3688_v37  ;;  %v877_v55 = vsel %vm845_vm4, %v730_v58, %v861_v26  ;;  %v1081_v3 = vld [vmem:[%s4169_s2 + $0x40] sm:$0xff] }
 0x138   : > { %4200 = vst [vmem:[#allocation15_spill] sm:$0xff] %v3679_v31  ;;  %2380 = vmatpush3.msra.mxu1 %v1186_v24  ;;  %v3681_v47 = vsel %vm781_vm5, %v571_v35, %v797_v27  ;;  %2304 = vmatpush3.msra.mxu0 %v1084_v28  ;;  %v957_v12 = vsel %vm925_vm6, %v732_v7, %v941_v29  ;;  %v862_v5 = vmul.f32 0.1, %v736_v33  ;;  %v1183_v35 = vld [vmem:[%s4169_s2 + $0x370] sm:$0xff]  ;;  %vm846_vm7 = vcmp.gt.f32.partialorder %v736_v33, 0.0  ;;  %v1228_v7 = vld [vmem:[%s4169_s2 + $0x4d8] sm:$0xff] }
 0x139   : > { %4201 = vst [vmem:[#allocation16_spill] sm:$0xff] %v3681_v47  ;;  %4202 = vst [vmem:[#allocation17_spill] sm:$0xff] %v3683_v54  ;;  %v577_v0 = vpop.f32.mrf.mxu0  ;;  %v738_v61 = vpop.f32.mrf.mxu1  ;;  %1401 = vmatprep.mubr.f32.mxu0 %v3681_v47  ;;  %2381 = vmatprep.subr.mxu1 %v1231_v14  ;;  %v973_v9 = vmul.f32 %v957_v12, %v957_v12  ;;  %v1126_v27 = vld [vmem:[%s4169_s2 + $0x1a8] sm:$0xff]  ;;  %v3713_v14 = vmul.f32 %v877_v55, %v877_v55 }
 0x13a   : > { %vm782_vm8 = vcmp.gt.f32.partialorder %v577_v0, 0.0  ;;  %v798_v6 = vmul.f32 0.1, %v577_v0  ;;  %1556 = vmatprep.mubr.f32.mxu1 %v3683_v54  ;;  %1402 = vmatmul.mubr.f32.gmra.mxu0 %v3654_v56  ;;  %vm926_vm9 = vcmp.gt.f32.partialorder %v738_v61, 0.0  ;;  %v942_v26 = vmul.f32 0.1, %v738_v61 }
 0x13b   : > { %1557 = vmatmul.mubr.f32.gmra.mxu1 %v3688_v37  ;;  %v3704_v58 = vpop.f32.mrf.mxu0  ;;  %v742_v24 = vpop.f32.mrf.mxu1  ;;  %2305 = vmatprep.subr.mxu0 %v1129_v53  ;;  %v3708_v30 = vmul.f32 %v973_v9, %v957_v12  ;;  %4206 = vst [vmem:[#allocation21_spill] sm:$0xff] %v3713_v14  ;;  %v878_v29 = vsel %vm846_vm7, %v736_v33, %v862_v5  ;;  %v1180_v12 = vld [vmem:[%s4169_s2 + $0x358] sm:$0xff] }
 0x13c   : > { %4204 = vst [vmem:[#allocation19_spill] sm:$0xff] %v3704_v58  ;;  %2382 = vmatpush3.msra.mxu1 %v1183_v35  ;;  %v3706_v28 = vsel %vm782_vm8, %v577_v0, %v798_v6  ;;  %2306 = vmatpush3.msra.mxu0 %v1081_v3  ;;  %v958_v56 = vsel %vm926_vm9, %v738_v61, %v942_v26  ;;  %v863_v37 = vmul.f32 0.1, %v742_v24  ;;  %v1078_v0 = vld [vmem:[%s4169_s2 + $0x28] sm:$0xff]  ;;  %vm847_vm10 = vcmp.gt.f32.partialorder %v742_v24, 0.0  ;;  %v1225_v61 = vld [vmem:[%s4169_s2 + $0x4c0] sm:$0xff] }
 0x13d   : > { %4205 = vst [vmem:[#allocation20_spill] sm:$0xff] %v3708_v30  ;;  %v583_v54 = vpop.f32.mrf.mxu0  ;;  %v744_v47 = vpop.f32.mrf.mxu1  ;;  %1407 = vmatprep.mubr.f32.mxu0 %v3706_v28  ;;  %2383 = vmatprep.subr.mxu1 %v1228_v7  ;;  %v974_v53 = vmul.f32 %v958_v56, %v958_v56  ;;  %v1123_v6 = vld [vmem:[%s4169_s2 + $0x190] sm:$0xff]  ;;  %v3738_v7 = vmul.f32 %v878_v29, %v878_v29 }
 0x13e   : > { %vm783_vm11 = vcmp.gt.f32.partialorder %v583_v54, 0.0  ;;  %v799_v55 = vmul.f32 0.1, %v583_v54  ;;  %1562 = vmatprep.mubr.f32.mxu1 %v3708_v30  ;;  %1408 = vmatmul.mubr.f32.gmra.mxu0 %v3679_v31  ;;  %vm927_vm12 = vcmp.gt.f32.partialorder %v744_v47, 0.0  ;;  %v943_v5 = vmul.f32 0.1, %v744_v47 }
 0x13f   : > { %1563 = vmatmul.mubr.f32.gmra.mxu1 %v3713_v14  ;;  %v3729_v33 = vpop.f32.mrf.mxu0  ;;  %v748_v35 = vpop.f32.mrf.mxu1  ;;  %2307 = vmatprep.subr.mxu0 %v1126_v27  ;;  %v3733_v9 = vmul.f32 %v974_v53, %v958_v56  ;;  %v879_v26 = vsel %vm847_vm10, %v742_v24, %v863_v37  ;;  %v1177_v56 = vld [vmem:[%s4169_s2 + $0x340] sm:$0xff] }
 0x140   : > { %2384 = vmatpush3.msra.mxu1 %v1180_v12  ;;  %v3731_v3 = vsel %vm783_vm11, %v583_v54, %v799_v55  ;;  %2308 = vmatpush3.msra.mxu0 %v1078_v0  ;;  %v959_v31 = vsel %vm927_vm12, %v744_v47, %v943_v5  ;;  %v1075_v54 = vld [vmem:[%s4169_s2 + $0x10] sm:$0xff]  ;;  %v864_v12 = vmul.f32 0.1, %v748_v35  ;;  %v1222_v47 = vld [vmem:[%s4169_s2 + $0x4a8] sm:$0xff]  ;;  %vm848_vm14 = vcmp.gt.f32.partialorder %v748_v35, 0.0 }
 0x141   : > { %v589_v14 = vpop.f32.mrf.mxu0  ;;  %v750_v30 = vpop.f32.mrf.mxu1  ;;  %1413 = vmatprep.mubr.f32.mxu0 %v3731_v3  ;;  %2385 = vmatprep.subr.mxu1 %v1225_v61  ;;  %v975_v27 = vmul.f32 %v959_v31, %v959_v31  ;;  %v3758_v53 = vmul.f32 %v879_v26, %v879_v26  ;;  %v1174_v61 = vld [vmem:[%s4169_s2 + $0x328] sm:$0xff] }
 0x142   : > { %vm784_vm13 = vcmp.gt.f32.partialorder %v589_v14, 0.0  ;;  %v800_v29 = vmul.f32 0.1, %v589_v14  ;;  %1568 = vmatprep.mubr.f32.mxu1 %v3733_v9  ;;  %1414 = vmatmul.mubr.f32.gmra.mxu0 %v3704_v58  ;;  %vm928_vm15 = vcmp.gt.f32.partialorder %v750_v30, 0.0  ;;  %v944_v37 = vmul.f32 0.1, %v750_v30 }
 0x143   : > { %1569 = vmatmul.mubr.f32.gmra.mxu1 %v3738_v7  ;;  %2309 = vmatprep.subr.mxu0 %v1123_v6  ;;  %v3756_v0 = vmul.f32 %v975_v27, %v959_v31  ;;  %v880_v5 = vsel %vm848_vm14, %v748_v35, %v864_v12  ;;  %v1219_v31 = vld [vmem:[%s4169_s2 + $0x490] sm:$0xff]  ;;  %v1884_v6 = vld [vmem:[%s3851_s12 + $0x38] sm:$0xff]  ;;  %v1886_v12 = vld [vmem:[%s3851_s12 + $0x48] sm:$0xff] }
 0x144   : > { %2386 = vmatpush3.msra.mxu1 %v1177_v56  ;;  %v3754_v24 = vsel %vm784_vm13, %v589_v14, %v800_v29  ;;  %2310 = vmatpush3.msra.mxu0 %v1075_v54  ;;  %v960_v55 = vsel %vm928_vm15, %v750_v30, %v944_v37  ;;  %v3773_v14 = vmul.f32 %v880_v5, %v880_v5  ;;  %v1171_v35 = vld [vmem:[%s4169_s2 + $0x310] sm:$0xff] }
 0x145   : > { %1419 = vmatprep.mubr.f32.mxu0 %v3754_v24  ;;  %2387 = vmatprep.subr.mxu1 %v1222_v47  ;;  %v976_v58 = vmul.f32 %v960_v55, %v960_v55 }
 0x146   : > { %1574 = vmatprep.mubr.f32.mxu1 %v3756_v0  ;;  %1420 = vmatmul.mubr.f32.gmra.mxu0 %v3729_v33 }
 0x147   : > { %1575 = vmatmul.mubr.f32.gmra.mxu1 %v3758_v53  ;;  %1651 = vmatprep.mubr.f32.mxu0 %v3392_v34  ;;  %v3771_v30 = vmul.f32 %v976_v58, %v960_v55  ;;  %v4209_v34 = vld [vmem:[#allocation10_spill] sm:$0xff]  ;;  %v1883_v58 = vld [vmem:[%s3851_s12 + $0x30] sm:$0xff] }
 0x148   : > { %2388 = vmatpush3.msra.mxu1 %v1174_v61 }
 0x149   : > { %2389 = vmatprep.subr.mxu1 %v1219_v31  ;;  %1580 = vmatprep.mubr.f32.mxu1 %v3771_v30 }
 0x14a   : > { %1652 = vmatmul.mubr.f32.vlgmr.msra.gmra.mxu0 %v3388_v25  ;;  %2390 = vmatpush3.msra.mxu1 %v1171_v35  ;;  %v4207_v25 = vld [vmem:[#allocation9_spill] sm:$0xff] }
 0x14b   : > { %1581 = vmatmul.mubr.f32.gmra.mxu1 %v3773_v14  ;;  %1656 = vmatprep.mubr.f32.mxu0 %v3407_v48  ;;  %v4211_v48 = vld [vmem:[#allocation13_spill] sm:$0xff] }
 0x14c   : > { %1796 = vmatprep.mubr.f32.mxu1 %v3409_v49  ;;  %v4212_v49 = vld [vmem:[#allocation8_spill] sm:$0xff] }
 0x14e   : > { %1657 = vmatmul.mubr.f32.gmra.mxu0 %v3390_v32  ;;  %v4208_v32 = vld [vmem:[#allocation7_spill] sm:$0xff] }
 0x14f   : > { %1797 = vmatmul.mubr.f32.vlgmr.msra.gmra.mxu1 %v3414_v51  ;;  %1661 = vmatprep.mubr.f32.mxu0 %v3431_v1  ;;  %v4213_v51 = vld [vmem:[#allocation14_spill] sm:$0xff]  ;;  %v4215_v1 = vld [vmem:[#allocation17_spill] sm:$0xff] }
 0x150   : > { %1801 = vmatprep.mubr.f32.mxu1 %v3433_v2  ;;  %v4216_v2 = vld [vmem:[#allocation11_spill] sm:$0xff] }
 0x152   : > { %1662 = vmatmul.mubr.f32.gmra.mxu0 %v3405_v46  ;;  %v4210_v46 = vld [vmem:[#allocation12_spill] sm:$0xff] }
 0x153   : > { %1802 = vmatmul.mubr.f32.gmra.mxu1 %v3438_v4  ;;  %1666 = vmatprep.mubr.f32.mxu0 %v3456_v19  ;;  %v4217_v4 = vld [vmem:[#allocation18_spill] sm:$0xff]  ;;  %v4219_v19 = vld [vmem:[#allocation15_spill] sm:$0xff] }
 0x154   : > { %1806 = vmatprep.mubr.f32.mxu1 %v3458_v20  ;;  %v4220_v20 = vld [vmem:[#allocation21_spill] sm:$0xff] }
 0x156   : > { %1667 = vmatmul.mubr.f32.gmra.mxu0 %v3429_v63  ;;  %v4214_v63 = vld [vmem:[#allocation16_spill] sm:$0xff] }
 0x157   : > { %1807 = vmatmul.mubr.f32.gmra.mxu1 %v3463_v22  ;;  %1671 = vmatprep.mubr.f32.mxu0 %v3481_v38  ;;  %v4221_v22 = vld [vmem:[#allocation19_spill] sm:$0xff] }
 0x158   : > { %1811 = vmatprep.mubr.f32.mxu1 %v3483_v39 }
 0x15a   : > { %1672 = vmatmul.mubr.f32.gmra.mxu0 %v3454_v17  ;;  %v4218_v17 = vld [vmem:[#allocation20_spill] sm:$0xff] }
 0x15b   : > { %1812 = vmatmul.mubr.f32.gmra.mxu1 %v3488_v41  ;;  %1676 = vmatprep.mubr.f32.mxu0 %v3506_v59 }
 0x15c   : > { %1816 = vmatprep.mubr.f32.mxu1 %v3508_v60 }
 0x15e   : > { %1677 = vmatmul.mubr.f32.gmra.mxu0 %v3479_v36 }
 0x15f   : > { %1817 = vmatmul.mubr.f32.gmra.mxu1 %v3513_v62  ;;  %1681 = vmatprep.mubr.f32.mxu0 %v3531_v18 }
 0x160   : > { %1821 = vmatprep.mubr.f32.mxu1 %v3533_v21 }
 0x162   : > { %1682 = vmatmul.mubr.f32.gmra.mxu0 %v3504_v57  ;;  %v1877_v57 = vld [vmem:[%s3851_s12] sm:$0xff] }
 0x163   : > { %1822 = vmatmul.mubr.f32.gmra.mxu1 %v3538_v23  ;;  %1686 = vmatprep.mubr.f32.mxu0 %v3556_v44  ;;  %v1880_v44 = vld [vmem:[%s3851_s12 + $0x18] sm:$0xff] }
 0x164   : > { %1826 = vmatprep.mubr.f32.mxu1 %v3558_v45 }
 0x166   : > { %1687 = vmatmul.mubr.f32.gmra.mxu0 %v3529_v15  ;;  %v1878_v15 = vld [vmem:[%s3851_s12 + $0x8] sm:$0xff] }
 0x167   : > { %1827 = vmatmul.mubr.f32.gmra.mxu1 %v3563_v50  ;;  %1691 = vmatprep.mubr.f32.mxu0 %v3581_v10 }
 0x168   : > { %1831 = vmatprep.mubr.f32.mxu1 %v3583_v11  ;;  %v1881_v11 = vld [vmem:[%s3851_s12 + $0x20] sm:$0xff] }
 0x16a   : > { %1692 = vmatmul.mubr.f32.gmra.mxu0 %v3554_v42 }
 0x16b   : > { %1832 = vmatmul.mubr.f32.gmra.mxu1 %v3588_v13  ;;  %1696 = vmatprep.mubr.f32.mxu0 %v3606_v40 }
 0x16c   : > { %1836 = vmatprep.mubr.f32.mxu1 %v3608_v43 }
 0x16e   : > { %1697 = vmatmul.mubr.f32.gmra.mxu0 %v3579_v8 }
 0x16f   : > { %1837 = vmatmul.mubr.f32.gmra.mxu1 %v3613_v52  ;;  %1701 = vmatprep.mubr.f32.mxu0 %v3631_v16 }
 0x170   : > { %1841 = vmatprep.mubr.f32.mxu1 %v4207_v25 }
 0x172   : > { %1702 = vmatmul.mubr.f32.gmra.mxu0 %v4208_v32 }
 0x173   : > { %1842 = vmatmul.mubr.f32.gmra.mxu1 %v4209_v34  ;;  %1706 = vmatprep.mubr.f32.mxu0 %v4210_v46  ;;  %v1890_v34 = vld [vmem:[%s3851_s12 + $0x68] sm:$0xff] }
 0x174   : > { %1846 = vmatprep.mubr.f32.mxu1 %v4211_v48 }
 0x176   : > { %1707 = vmatmul.mubr.f32.gmra.mxu0 %v4212_v49 }
 0x177   : > { %1847 = vmatmul.mubr.f32.gmra.mxu1 %v4213_v51  ;;  %1711 = vmatprep.mubr.f32.mxu0 %v4214_v63 }
 0x178   : > { %1851 = vmatprep.mubr.f32.mxu1 %v4215_v1  ;;  %v1892_v1 = vld [vmem:[%s3851_s12 + $0x78] sm:$0xff] }
 0x17a   : > { %1712 = vmatmul.mubr.f32.gmra.mxu0 %v4216_v2 }
 0x17b   : > { %1852 = vmatmul.mubr.f32.gmra.mxu1 %v4217_v4  ;;  %1716 = vmatprep.mubr.f32.mxu0 %v3706_v28 }
 0x17c   : > { %1856 = vmatprep.mubr.f32.mxu1 %v4218_v17 }
 0x17e   : > { %1717 = vmatmul.mubr.f32.gmra.mxu0 %v4219_v19 }
 0x17f   : > { %1857 = vmatmul.mubr.f32.gmra.mxu1 %v4220_v20  ;;  %1721 = vmatprep.mubr.f32.mxu0 %v3731_v3  ;;  %v1893_v20 = vld [vmem:[%s3851_s12 + $0x80] sm:$0xff] }
 0x180   : > { %1861 = vmatprep.mubr.f32.mxu1 %v3733_v9 }
 0x182   : > { %1722 = vmatmul.mubr.f32.gmra.mxu0 %v4221_v22 }
 0x183   : > { %1862 = vmatmul.mubr.f32.gmra.mxu1 %v3738_v7  ;;  %1726 = vmatprep.mubr.f32.mxu0 %v3754_v24 }
 0x184   : > { %1866 = vmatprep.mubr.f32.mxu1 %v3756_v0  ;;  %v1887_v0 = vld [vmem:[%s3851_s12 + $0x50] sm:$0xff] }
 0x186   : > { %1727 = vmatmul.mubr.f32.gmra.mxu0 %v3729_v33 }
 0x187   : > { %1867 = vmatmul.mubr.f32.gmra.mxu1 %v3758_v53 }
 0x188   : > { %1871 = vmatprep.mubr.f32.mxu1 %v3771_v30  ;;  %v1889_v30 = vld [vmem:[%s3851_s12 + $0x60] sm:$0xff] }
 0x18b   : > { %1872 = vmatmul.mubr.f32.gmra.mxu1 %v3773_v14 }
 0x1ca   : > { %v1331_v36 = vpop.f32.mrf.mxu0 }
 0x1cc   : > { %v1333_v38 = vpop.f32.mrf.mxu0 }
 0x1ce   : > { %v1337_v39 = vpop.f32.mrf.mxu0 }
 0x1cf   : > { %v1492_v41 = vpop.f32.mrf.mxu1 }
 0x1d0   : > { %v1493_v59 = vadd.f32 %v1492_v41, %v1331_v36  ;;  %v1339_v60 = vpop.f32.mrf.mxu0 }
 0x1d1   : > { %v1494_v62 = vpop.f32.mrf.mxu1 }
 0x1d2   : > { %v1925_v18 = vmul.f32 %v1877_v57, %v1493_v59  ;;  %v1495_v21 = vadd.f32 %v1494_v62, %v1333_v38  ;;  %v1343_v23 = vpop.f32.mrf.mxu0  ;;  %v1895_v57 = vld [vmem:[%s3851_s12 + $0x90] sm:$0xff] }
 0x1d3   : > { %v1498_v42 = vpop.f32.mrf.mxu1 }
 0x1d4   : > { %v1941_v45 = vmul.f32 %v1878_v15, %v1495_v21  ;;  %v1499_v50 = vadd.f32 %v1498_v42, %v1337_v39  ;;  %v1345_v8 = vpop.f32.mrf.mxu0 }
 0x1d5   : > { %v1500_v10 = vpop.f32.mrf.mxu1 }
 0x1d6   : > { %v3857_v13 = vadd.f32 %v1941_v45, %v1925_v18  ;;  %v1926_v40 = vmul.f32 %v1880_v44, %v1499_v50  ;;  %v1501_v43 = vadd.f32 %v1500_v10, %v1339_v60  ;;  %v1349_v52 = vpop.f32.mrf.mxu0  ;;  %v1896_v18 = vld [vmem:[%s3851_s12 + $0x98] sm:$0xff]  ;;  %v1898_v50 = vld [vmem:[%s3851_s12 + $0xa8] sm:$0xff] }
 0x1d7   : > { %v1504_v16 = vpop.f32.mrf.mxu1 }
 0x1d8   : > { %v1942_v28 = vmul.f32 %v1881_v11, %v1501_v43  ;;  %v1505_v33 = vadd.f32 %v1504_v16, %v1343_v23  ;;  %v1351_v3 = vpop.f32.mrf.mxu0  ;;  %v1899_v43 = vld [vmem:[%s3851_s12 + $0xb0] sm:$0xff] }
 0x1d9   : > { %v1506_v9 = vpop.f32.mrf.mxu1 }
 0x1da   : > { %v3861_v7 = vadd.f32 %v1942_v28, %v1926_v40  ;;  %v1927_v26 = vmul.f32 %v1883_v58, %v1505_v33  ;;  %v1507_v56 = vadd.f32 %v1506_v9, %v1345_v8  ;;  %v1355_v54 = vpop.f32.mrf.mxu0 }
 0x1db   : > { %v1510_v27 = vpop.f32.mrf.mxu1 }
 0x1dc   : > { %v1943_v29 = vmul.f32 %v1884_v6, %v1507_v56  ;;  %v1511_v47 = vadd.f32 %v1510_v27, %v1349_v52  ;;  %v1357_v37 = vpop.f32.mrf.mxu0 }
 0x1dd   : > { %v1512_v24 = vpop.f32.mrf.mxu1 }
 0x1de   : > { %v3865_v53 = vadd.f32 %v1943_v29, %v1927_v26  ;;  %v1928_v55 = vmul.f32 %v1886_v12, %v1511_v47  ;;  %v1513_v61 = vadd.f32 %v1512_v24, %v1351_v3  ;;  %v1361_v5 = vpop.f32.mrf.mxu0  ;;  %v1901_v3 = vld [vmem:[%s3851_s12 + $0xc0] sm:$0xff]  ;;  %v1904_v24 = vld [vmem:[%s3851_s12 + $0xd8] sm:$0xff] }
 0x1df   : > { %v1516_v31 = vpop.f32.mrf.mxu1 }
 0x1e0   : > { %v1944_v14 = vmul.f32 %v1887_v0, %v1513_v61  ;;  %v1517_v35 = vadd.f32 %v1516_v31, %v1355_v54  ;;  %v1363_v25 = vpop.f32.mrf.mxu0  ;;  %v1902_v54 = vld [vmem:[%s3851_s12 + $0xc8] sm:$0xff]  ;;  %v1905_v31 = vld [vmem:[%s3851_s12 + $0xe0] sm:$0xff] }
 0x1e1   : > { %v1518_v32 = vpop.f32.mrf.mxu1 }
 0x1e2   : > { %v3869_v46 = vadd.f32 %v1944_v14, %v1928_v55  ;;  %v1929_v48 = vmul.f32 %v1889_v30, %v1517_v35  ;;  %v1519_v49 = vadd.f32 %v1518_v32, %v1357_v37  ;;  %v1367_v51 = vpop.f32.mrf.mxu0 }
 0x1e3   : > { %v1522_v63 = vpop.f32.mrf.mxu1 }
 0x1e4   : > { %v1945_v2 = vmul.f32 %v1890_v34, %v1519_v49  ;;  %v1523_v4 = vadd.f32 %v1522_v63, %v1361_v5  ;;  %v1369_v17 = vpop.f32.mrf.mxu0  ;;  %v1907_v34 = vld [vmem:[%s3851_s12 + $0xf0] sm:$0xff] }
 0x1e5   : > { %v1524_v19 = vpop.f32.mrf.mxu1 }
 0x1e6   : > { %v3873_v22 = vadd.f32 %v1945_v2, %v1929_v48  ;;  %v1930_v36 = vmul.f32 %v1892_v1, %v1523_v4  ;;  %v1525_v38 = vadd.f32 %v1524_v19, %v1363_v25  ;;  %v1373_v39 = vpop.f32.mrf.mxu0  ;;  %v1908_v1 = vld [vmem:[%s3851_s12 + $0xf8] sm:$0xff] }
 0x1e7   : > { %v1528_v41 = vpop.f32.mrf.mxu1 }
 0x1e8   : > { %v1946_v59 = vmul.f32 %v1893_v20, %v1525_v38  ;;  %v1529_v60 = vadd.f32 %v1528_v41, %v1367_v51  ;;  %v1375_v62 = vpop.f32.mrf.mxu0 }
 0x1e9   : > { %v1530_v15 = vpop.f32.mrf.mxu1 }
 0x1ea   : > { %v3877_v21 = vadd.f32 %v1946_v59, %v1930_v36  ;;  %v1931_v23 = vmul.f32 %v1895_v57, %v1529_v60  ;;  %v1531_v42 = vadd.f32 %v1530_v15, %v1369_v17  ;;  %v1379_v44 = vpop.f32.mrf.mxu0  ;;  %v1910_v36 = vld [vmem:[%s3851_s12 + $0x108] sm:$0xff]  ;;  %v1911_v59 = vld [vmem:[%s3851_s12 + $0x110] sm:$0xff] }
 0x1eb   : > { %v1534_v45 = vpop.f32.mrf.mxu1 }
 0x1ec   : > { %v1947_v8 = vmul.f32 %v1896_v18, %v1531_v42  ;;  %v1535_v10 = vadd.f32 %v1534_v45, %v1373_v39  ;;  %v1381_v11 = vpop.f32.mrf.mxu0  ;;  %v1913_v42 = vld [vmem:[%s3851_s12 + $0x120] sm:$0xff] }
 0x1ed   : > { %v1536_v40 = vpop.f32.mrf.mxu1 }
 0x1ee   : > { %v3881_v52 = vadd.f32 %v1947_v8, %v1931_v23  ;;  %v1932_v16 = vmul.f32 %v1898_v50, %v1535_v10  ;;  %v1537_v58 = vadd.f32 %v1536_v40, %v1375_v62  ;;  %v1385_v28 = vpop.f32.mrf.mxu0  ;;  %v1914_v10 = vld [vmem:[%s3851_s12 + $0x128] sm:$0xff] }
 0x1ef   : > { %v1540_v33 = vpop.f32.mrf.mxu1 }
 0x1f0   : > { %v1948_v9 = vmul.f32 %v1899_v43, %v1537_v58  ;;  %v1541_v6 = vadd.f32 %v1540_v33, %v1379_v44  ;;  %v1387_v26 = vpop.f32.mrf.mxu0 }
 0x1f1   : > { %v1542_v56 = vpop.f32.mrf.mxu1 }
 0x1f2   : > { %v3885_v27 = vadd.f32 %v1948_v9, %v1932_v16  ;;  %v1933_v12 = vmul.f32 %v1901_v3, %v1541_v6  ;;  %v1543_v29 = vadd.f32 %v1542_v56, %v1381_v11  ;;  %v1391_v47 = vpop.f32.mrf.mxu0 }
 0x1f3   : > { %v1546_v37 = vpop.f32.mrf.mxu1 }
 0x1f4   : > { %v1949_v0 = vmul.f32 %v1902_v54, %v1543_v29  ;;  %v1547_v55 = vadd.f32 %v1546_v37, %v1385_v28  ;;  %v1393_v61 = vpop.f32.mrf.mxu0  ;;  %v1916_v28 = vld [vmem:[%s3851_s12 + $0x138] sm:$0xff]  ;;  %v1919_v37 = vld [vmem:[%s3851_s12 + $0x150] sm:$0xff] }
 0x1f5   : > { %v1548_v5 = vpop.f32.mrf.mxu1 }
 0x1f6   : > { %v3889_v30 = vadd.f32 %v1949_v0, %v1933_v12  ;;  %v1934_v14 = vmul.f32 %v1904_v24, %v1547_v55  ;;  %v1549_v35 = vadd.f32 %v1548_v5, %v1387_v26  ;;  %v1397_v25 = vpop.f32.mrf.mxu0  ;;  %v1917_v26 = vld [vmem:[%s3851_s12 + $0x140] sm:$0xff]  ;;  %v1920_v5 = vld [vmem:[%s3851_s12 + $0x158] sm:$0xff] }
 0x1f7   : > { %v1552_v32 = vpop.f32.mrf.mxu1 }
 0x1f8   : > { %v1950_v48 = vmul.f32 %v1905_v31, %v1549_v35  ;;  %v1553_v49 = vadd.f32 %v1552_v32, %v1391_v47  ;;  %v1399_v51 = vpop.f32.mrf.mxu0 }
 0x1f9   : > { %v1554_v63 = vpop.f32.mrf.mxu1 }
 0x1fa   : > { %v3893_v2 = vadd.f32 %v1950_v48, %v1934_v14  ;;  %v1935_v4 = vmul.f32 %v1907_v34, %v1553_v49  ;;  %v1555_v17 = vadd.f32 %v1554_v63, %v1393_v61  ;;  %v1403_v19 = vpop.f32.mrf.mxu0  ;;  %v1922_v34 = vld [vmem:[%s3851_s12 + $0x168] sm:$0xff] }
 0x1fb   : > { %v1558_v20 = vpop.f32.mrf.mxu1 }
 0x1fc   : > { %v1951_v38 = vmul.f32 %v1908_v1, %v1555_v17  ;;  %v1559_v39 = vadd.f32 %v1558_v20, %v1397_v25  ;;  %v1405_v41 = vpop.f32.mrf.mxu0  ;;  %v1923_v1 = vld [vmem:[%s3851_s12 + $0x170] sm:$0xff] }
 0x1fd   : > { %v1560_v57 = vpop.f32.mrf.mxu1 }
 0x1fe   : > { %v3897_v60 = vadd.f32 %v1951_v38, %v1935_v4  ;;  %v1936_v62 = vmul.f32 %v1910_v36, %v1559_v39  ;;  %v1561_v15 = vadd.f32 %v1560_v57, %v1399_v51  ;;  %v1409_v18 = vpop.f32.mrf.mxu0 }
 0x1ff   : > { %v1564_v23 = vpop.f32.mrf.mxu1 }
 0x200   : > { %v1952_v44 = vmul.f32 %v1911_v59, %v1561_v15  ;;  %v1565_v45 = vadd.f32 %v1564_v23, %v1403_v19  ;;  %v1411_v50 = vpop.f32.mrf.mxu0 }
 0x201   : > { %v1566_v8 = vpop.f32.mrf.mxu1 }
 0x202   : > { %v3901_v11 = vadd.f32 %v1952_v44, %v1936_v62  ;;  %v1937_v40 = vmul.f32 %v1913_v42, %v1565_v45  ;;  %v1567_v43 = vadd.f32 %v1566_v8, %v1405_v41  ;;  %v1415_v16 = vpop.f32.mrf.mxu0 }
 0x203   : > { %v1570_v58 = vpop.f32.mrf.mxu1 }
 0x204   : > { %v1953_v33 = vmul.f32 %v1914_v10, %v1567_v43  ;;  %v1571_v3 = vadd.f32 %v1570_v58, %v1409_v18  ;;  %v1417_v9 = vpop.f32.mrf.mxu0  ;;  %v1879_v18 = vld [vmem:[%s3851_s12 + $0x10] sm:$0xff]  ;;  %v1882_v43 = vld [vmem:[%s3851_s12 + $0x28] sm:$0xff] }
 0x205   : > { %v1572_v6 = vpop.f32.mrf.mxu1 }
 0x206   : > { %v3905_v56 = vadd.f32 %v1953_v33, %v1937_v40  ;;  %v1938_v54 = vmul.f32 %v1916_v28, %v1571_v3  ;;  %v1573_v12 = vadd.f32 %v1572_v6, %v1411_v50  ;;  %v1421_v29 = vpop.f32.mrf.mxu0 }
 0x207   : > { %v1576_v47 = vpop.f32.mrf.mxu1 }
 0x208   : > { %v1954_v24 = vmul.f32 %v1917_v26, %v1573_v12  ;;  %v1577_v0 = vadd.f32 %v1576_v47, %v1415_v16  ;;  %v1423_v55 = vpop.f32.mrf.mxu0  ;;  %v1885_v12 = vld [vmem:[%s3851_s12 + $0x40] sm:$0xff] }
 0x209   : > { %v1578_v61 = vpop.f32.mrf.mxu1 }
 0x20a   : > { %v3909_v31 = vadd.f32 %v1954_v24, %v1938_v54  ;;  %v1939_v14 = vmul.f32 %v1919_v37, %v1577_v0  ;;  %v1579_v35 = vadd.f32 %v1578_v61, %v1417_v9  ;;  %v2311_v25 = vpop.f32.mrf.mxu0 }
 0x20b   : > { %v1582_v32 = vpop.f32.mrf.mxu1 }
 0x20c   : > { %v1955_v48 = vmul.f32 %v1920_v5, %v1579_v35  ;;  %v1583_v49 = vadd.f32 %v1582_v32, %v1421_v29  ;;  %v2312_v51 = vpop.f32.mrf.mxu0 }
 0x20d   : > { %v1584_v63 = vpop.f32.mrf.mxu1  ;;  %v2313_v59 = vadd.f32 %v2312_v51, %v2311_v25 }
 0x20e   : > { %v3913_v4 = vadd.f32 %v1955_v48, %v1939_v14  ;;  %v1940_v17 = vmul.f32 %v1922_v34, %v1583_v49  ;;  %v1585_v19 = vadd.f32 %v1584_v63, %v1423_v55  ;;  %v2314_v20 = vpop.f32.mrf.mxu0  ;;  %v1888_v14 = vld [vmem:[%s3851_s12 + $0x58] sm:$0xff] }
 0x20f   : > { %v2391_v36 = vpop.f32.mrf.mxu1 }
 0x210   : > { %v1956_v38 = vmul.f32 %v1923_v1, %v1585_v19  ;;  %v2315_v39 = vpop.f32.mrf.mxu0  ;;  %v1891_v1 = vld [vmem:[%s3851_s12 + $0x70] sm:$0xff] }
 0x211   : > { %v2392_v41 = vpop.f32.mrf.mxu1  ;;  %v2316_v50 = vadd.f32 %v2315_v39, %v2314_v20 }
 0x212   : > { %v3915_v57 = vadd.f32 %v1956_v38, %v1940_v17  ;;  %v2393_v62 = vadd.f32 %v2392_v41, %v2391_v36  ;;  %v2317_v15 = vpop.f32.mrf.mxu0 }
 0x213   : > { %v2394_v23 = vpop.f32.mrf.mxu1 }
 0x214   : > { %v1799_v42 = vadd.f32 %v2393_v62, %v2313_v59  ;;  %v2318_v44 = vpop.f32.mrf.mxu0  ;;  %v1894_v62 = vld [vmem:[%s3851_s12 + $0x88] sm:$0xff] }
 0x215   : > { %v2395_v45 = vpop.f32.mrf.mxu1  ;;  %v2319_v9 = vadd.f32 %v2318_v44, %v2317_v15 }
 0x216   : > { %v1973_v8 = vmul.f32 %v1879_v18, %v1799_v42  ;;  %v2396_v10 = vadd.f32 %v2395_v45, %v2394_v23  ;;  %v2320_v40 = vpop.f32.mrf.mxu0 }
 0x217   : > { %v2397_v16 = vpop.f32.mrf.mxu1 }
 0x218   : > { %v3921_v58 = vadd.f32 %v1973_v8, %v3857_v13  ;;  %v1804_v28 = vadd.f32 %v2396_v10, %v2316_v50  ;;  %v2321_v33 = vpop.f32.mrf.mxu0  ;;  %v1897_v10 = vld [vmem:[%s3851_s12 + $0xa0] sm:$0xff] }
 0x219   : > { %v2398_v3 = vpop.f32.mrf.mxu1  ;;  %v2322_v0 = vadd.f32 %v2321_v33, %v2320_v40 }
 0x21a   : > { %2005 = vst [vmem:[%s3923_s13] sm:$0xff] %v3921_v58  ;;  %v1974_v6 = vmul.f32 %v1882_v43, %v1804_v28  ;;  %v2399_v26 = vadd.f32 %v2398_v3, %v2397_v16  ;;  %v2323_v54 = vpop.f32.mrf.mxu0 }
 0x21b   : > { %v2400_v29 = vpop.f32.mrf.mxu1 }
 0x21c   : > { %v3929_v13 = vadd.f32 %v1974_v6, %v3861_v7  ;;  %v1809_v47 = vadd.f32 %v2399_v26, %v2319_v9  ;;  %v2324_v37 = vpop.f32.mrf.mxu0  ;;  %v1900_v26 = vld [vmem:[%s3851_s12 + $0xb8] sm:$0xff] }
 0x21d   : > { %v2401_v24 = vpop.f32.mrf.mxu1  ;;  %v2325_v48 = vadd.f32 %v2324_v37, %v2323_v54 }
 0x21e   : > { %2006 = vst [vmem:[%s3923_s13 + $0x8] sm:$0xff] %v3929_v13  ;;  %v1975_v55 = vmul.f32 %v1885_v12, %v1809_v47  ;;  %v2402_v61 = vadd.f32 %v2401_v24, %v2400_v29  ;;  %v2326_v5 = vpop.f32.mrf.mxu0 }
 0x21f   : > { %v2403_v35 = vpop.f32.mrf.mxu1 }
 0x220   : > { %v3935_v25 = vadd.f32 %v1975_v55, %v3865_v53  ;;  %v1814_v32 = vadd.f32 %v2402_v61, %v2322_v0  ;;  %v2327_v34 = vpop.f32.mrf.mxu0  ;;  %v1903_v61 = vld [vmem:[%s3851_s12 + $0xd0] sm:$0xff] }
 0x221   : > { %v2404_v7 = vpop.f32.mrf.mxu1  ;;  %v2328_v38 = vadd.f32 %v2327_v34, %v2326_v5 }
 0x222   : > { %2007 = vst [vmem:[%s3923_s13 + $0x10] sm:$0xff] %v3935_v25  ;;  %v1976_v49 = vmul.f32 %v1888_v14, %v1814_v32  ;;  %v2405_v51 = vadd.f32 %v2404_v7, %v2403_v35  ;;  %v2329_v63 = vpop.f32.mrf.mxu0 }
 0x223   : > { %v2406_v17 = vpop.f32.mrf.mxu1 }
 0x224   : > { %v3941_v19 = vadd.f32 %v1976_v49, %v3869_v46  ;;  %v1819_v20 = vadd.f32 %v2405_v51, %v2325_v48  ;;  %v2330_v36 = vpop.f32.mrf.mxu0  ;;  %v1906_v51 = vld [vmem:[%s3851_s12 + $0xe8] sm:$0xff] }
 0x225   : > { %v2407_v53 = vpop.f32.mrf.mxu1  ;;  %v2331_v44 = vadd.f32 %v2330_v36, %v2329_v63 }
 0x226   : > { %2008 = vst [vmem:[%s3923_s13 + $0x18] sm:$0xff] %v3941_v19  ;;  %v1977_v39 = vmul.f32 %v1891_v1, %v1819_v20  ;;  %v2408_v41 = vadd.f32 %v2407_v53, %v2406_v17  ;;  %v2332_v59 = vpop.f32.mrf.mxu0 }
 0x227   : > { %v2409_v15 = vpop.f32.mrf.mxu1 }
 0x228   : > { %v3947_v18 = vadd.f32 %v1977_v39, %v3873_v22  ;;  %v1824_v23 = vadd.f32 %v2408_v41, %v2328_v38  ;;  %v2333_v42 = vpop.f32.mrf.mxu0  ;;  %v1909_v41 = vld [vmem:[%s3851_s12 + $0x100] sm:$0xff] }
 0x229   : > { %v2410_v46 = vpop.f32.mrf.mxu1  ;;  %v2334_v33 = vadd.f32 %v2333_v42, %v2332_v59 }
 0x22a   : > { %2009 = vst [vmem:[%s3923_s13 + $0x20] sm:$0xff] %v3947_v18  ;;  %v1978_v45 = vmul.f32 %v1894_v62, %v1824_v23  ;;  %v2411_v50 = vadd.f32 %v2410_v46, %v2409_v15  ;;  %v2335_v8 = vpop.f32.mrf.mxu0 }
 0x22b   : > { %v2412_v40 = vpop.f32.mrf.mxu1 }
 0x22c   : > { %v3953_v43 = vadd.f32 %v1978_v45, %v3877_v21  ;;  %v1829_v16 = vadd.f32 %v2411_v50, %v2331_v44  ;;  %v2336_v28 = vpop.f32.mrf.mxu0  ;;  %v1912_v50 = vld [vmem:[%s3851_s12 + $0x118] sm:$0xff] }
 0x22d   : > { %v2413_v22 = vpop.f32.mrf.mxu1  ;;  %v2337_v37 = vadd.f32 %v2336_v28, %v2335_v8 }
 0x22e   : > { %2010 = vst [vmem:[%s3923_s13 + $0x28] sm:$0xff] %v3953_v43  ;;  %v1979_v3 = vmul.f32 %v1897_v10, %v1829_v16  ;;  %v2414_v9 = vadd.f32 %v2413_v22, %v2412_v40  ;;  %v2338_v6 = vpop.f32.mrf.mxu0 }
 0x22f   : > { %v2415_v54 = vpop.f32.mrf.mxu1 }
 0x230   : > { %v3959_v12 = vadd.f32 %v1979_v3, %v3881_v52  ;;  %v1834_v29 = vadd.f32 %v2414_v9, %v2334_v33  ;;  %v2339_v47 = vpop.f32.mrf.mxu0  ;;  %v1915_v9 = vld [vmem:[%s3851_s12 + $0x130] sm:$0xff] }
 0x231   : > { %v2416_v21 = vpop.f32.mrf.mxu1  ;;  %v2340_v34 = vadd.f32 %v2339_v47, %v2338_v6 }
 0x232   : > { %2011 = vst [vmem:[%s3923_s13 + $0x30] sm:$0xff] %v3959_v12  ;;  %v1980_v24 = vmul.f32 %v1900_v26, %v1834_v29  ;;  %v2417_v0 = vadd.f32 %v2416_v21, %v2415_v54  ;;  %v2341_v55 = vpop.f32.mrf.mxu0 }
 0x233   : > { %v2418_v5 = vpop.f32.mrf.mxu1 }
 0x234   : > { %v3965_v14 = vadd.f32 %v1980_v24, %v3885_v27  ;;  %v1839_v35 = vadd.f32 %v2417_v0, %v2337_v37  ;;  %v2342_v32 = vpop.f32.mrf.mxu0  ;;  %v1918_v24 = vld [vmem:[%s3851_s12 + $0x148] sm:$0xff] }
 0x235   : > { %v2419_v52 = vpop.f32.mrf.mxu1  ;;  %v2343_v36 = vadd.f32 %v2342_v32, %v2341_v55 }
 0x236   : > { %2012 = vst [vmem:[%s3923_s13 + $0x38] sm:$0xff] %v3965_v14  ;;  %v1981_v7 = vmul.f32 %v1903_v61, %v1839_v35  ;;  %v2420_v48 = vadd.f32 %v2419_v52, %v2418_v5  ;;  %v2344_v49 = vpop.f32.mrf.mxu0 }
 0x237   : > { %v2421_v63 = vpop.f32.mrf.mxu1 }
 0x238   : > { %v3971_v1 = vadd.f32 %v1981_v7, %v3889_v30  ;;  %v1844_v17 = vadd.f32 %v2420_v48, %v2340_v34  ;;  %v2345_v20 = vpop.f32.mrf.mxu0  ;;  %v1921_v7 = vld [vmem:[%s3851_s12 + $0x160] sm:$0xff] }
 0x239   : > { %v2422_v27 = vpop.f32.mrf.mxu1  ;;  %v2346_v42 = vadd.f32 %v2345_v20, %v2344_v49 }
 0x23a   : > { %2013 = vst [vmem:[%s3923_s13 + $0x40] sm:$0xff] %v3971_v1  ;;  %v1982_v53 = vmul.f32 %v1906_v51, %v1844_v17  ;;  %v2423_v38 = vadd.f32 %v2422_v27, %v2421_v63  ;;  %v2347_v39 = vpop.f32.mrf.mxu0  ;;  %v1924_v27 = vld [vmem:[%s3851_s12 + $0x178] sm:$0xff] }
 0x23b   : > { %v2424_v59 = vpop.f32.mrf.mxu1 }
 0x23c   : > { %v3977_v62 = vadd.f32 %v1982_v53, %v3893_v2  ;;  %v1849_v15 = vadd.f32 %v2423_v38, %v2343_v36  ;;  %v2348_v23 = vpop.f32.mrf.mxu0 }
 0x23d   : > { %v2425_v30 = vpop.f32.mrf.mxu1  ;;  %v2349_v28 = vadd.f32 %v2348_v23, %v2347_v39 }
 0x23e   : > { %2014 = vst [vmem:[%s3923_s13 + $0x48] sm:$0xff] %v3977_v62  ;;  %v1983_v46 = vmul.f32 %v1909_v41, %v1849_v15  ;;  %v2426_v44 = vadd.f32 %v2425_v30, %v2424_v59  ;;  %v2350_v45 = vpop.f32.mrf.mxu0 }
 0x23f   : > { %v2427_v8 = vpop.f32.mrf.mxu1 }
 0x240   : > { %v3983_v10 = vadd.f32 %v1983_v46, %v3897_v60  ;;  %v1854_v40 = vadd.f32 %v2426_v44, %v2346_v42  ;;  %v2351_v16 = vpop.f32.mrf.mxu0 }
 0x241   : > { %v2428_v2 = vpop.f32.mrf.mxu1  ;;  %v2352_v47 = vadd.f32 %v2351_v16, %v2350_v45 }
 0x242   : > { %2015 = vst [vmem:[%s3923_s13 + $0x50] sm:$0xff] %v3983_v10  ;;  %v1984_v22 = vmul.f32 %v1912_v50, %v1854_v40  ;;  %v2429_v33 = vadd.f32 %v2428_v2, %v2427_v8  ;;  %v2353_v3 = vpop.f32.mrf.mxu0 }
 0x243   : > { %v2430_v6 = vpop.f32.mrf.mxu1 }
 0x244   : > { %v3989_v26 = vadd.f32 %v1984_v22, %v3901_v11  ;;  %v1859_v54 = vadd.f32 %v2429_v33, %v2349_v28  ;;  %v2354_v29 = vpop.f32.mrf.mxu0 }
 0x245   : > { %v2431_v60 = vpop.f32.mrf.mxu1  ;;  %v2355_v11 = vadd.f32 %v2354_v29, %v2353_v3 }
 0x246   : > { %2016 = vst [vmem:[%s3923_s13 + $0x58] sm:$0xff] %v3989_v26  ;;  %v1985_v21 = vmul.f32 %v1915_v9, %v1859_v54  ;;  %v2432_v37 = vadd.f32 %v2431_v60, %v2430_v6  ;;  %v2356_v0 = vpop.f32.mrf.mxu0 }
 0x247   : > { %v2433_v55 = vpop.f32.mrf.mxu1 }
 0x248   : > { %v2001_v61 = vadd.f32 %v1985_v21, %v3905_v56  ;;  %v1864_v5 = vadd.f32 %v2432_v37, %v2352_v47  ;;  %v2357_v34 = vpop.f32.mrf.mxu0 }
 0x249   : > { %v2434_v35 = vpop.f32.mrf.mxu1  ;;  %v2358_v17 = vadd.f32 %v2357_v34, %v2356_v0 }
 0x24a   : > { %2017 = vst [vmem:[%s3923_s13 + $0x60] sm:$0xff] %v2001_v61  ;;  %v1986_v32 = vmul.f32 %v1918_v24, %v1864_v5  ;;  %v2435_v52 = vadd.f32 %v2434_v35, %v2433_v55 }
 0x24b   : > { %v2436_v48 = vpop.f32.mrf.mxu1 }
 0x24c   : > { %v2002_v49 = vadd.f32 %v1986_v32, %v3909_v31  ;;  %v1869_v51 = vadd.f32 %v2435_v52, %v2355_v11 }
 0x24d   : > { %v2437_v63 = vpop.f32.mrf.mxu1 }
 0x24e   : > { %2018 = vst [vmem:[%s3923_s13 + $0x68] sm:$0xff] %v2002_v49  ;;  %v1987_v56 = vmul.f32 %v1921_v7, %v1869_v51  ;;  %v2438_v20 = vadd.f32 %v2437_v63, %v2436_v48 }
 0x250   : > { %v2003_v36 = vadd.f32 %v1987_v56, %v3913_v4  ;;  %v1874_v53 = vadd.f32 %v2438_v20, %v2358_v17 }
 0x252   : > { %2019 = vst [vmem:[%s3923_s13 + $0x70] sm:$0xff] %v2003_v36  ;;  %v1988_v38 = vmul.f32 %v1924_v27, %v1874_v53  ;;  %2024 = sbr.rel (%p2272_p0) target bundleno = 603 (0x25b), region = 82 }
 0x254   : > { %v2004_v39 = vadd.f32 %v1988_v38, %v3915_v57 }
 0x256   : > { %2020 = vst [vmem:[%s3923_s13 + $0x78] sm:$0xff] %v2004_v39 }
 0x257   : > { %v2643_v31 = vmov 0.0  }
 0x258   : > { %2025 = vst [vmem:[%s4172_s5] sm:$0xff] %v2643_v31  ;;  %2026 = vst [vmem:[%s4172_s5 + $0x8] sm:$0xff] %v2643_v31 }
 0x259   : > { %2027 = vst [vmem:[%s4172_s5 + $0x10] sm:$0xff] %v2643_v31  ;;  %2028 = vst [vmem:[%s4172_s5 + $0x18] sm:$0xff] %v2643_v31 }
 0x25a   : > { %2029 = vst [vmem:[%s4172_s5 + $0x20] sm:$0xff] %v2643_v31  ;;  %2030 = vst [vmem:[%s4172_s5 + $0x28] sm:$0xff] %v2643_v31 }
 0x25b PF: > { %2502 = vmatprep.subr.mxu1 %v2004_v39  ;;  %2461 = vmatprep.subr.mxu0 %v2004_v39  ;;  %v2039_v4 = vld [vmem:[%s4006_s15 + $0x10] sm:$0xff]  ;;  %v2040_v57 = vld [vmem:[%s4006_s15 + $0x18] sm:$0xff]  ;;  %s2278_s17 = sshll.u32 %s2703_s25, 11  ;;  %s2167_s28 = sshll.u32 %s3923_s13, 4  ;;  %s4088_s28 = int_to_ptr.vmem [resolvable:$true] %s2167_s28 }
 0x25c   : > { %2518 = vmatpush3.msra.mxu1 %v2004_v39  ;;  %2462 = vmatpush3.msra.mxu0 %v2004_v39  ;;  %s4086_s19 = scalar_lea.hbm %s4173_s6, %s2278_s17  ;;  %s2151_s14 = scalar_lea.sflag [#allocation5], %s3844_s20 }
 0x25d   : > { %2503 = vmatprep.subr.mxu1 %v2003_v36  ;;  %2463 = vmatprep.subr.mxu0 %v2003_v36  ;;  %s2580_s29 = scalar_lea.vmem %s4088_s28, 2048 }
 0x25e   : > { %2519 = vmatpush3.msra.mxu1 %v2003_v36  ;;  %2464 = vmatpush3.msra.mxu0 %v2003_v36  ;;  %p2581_p1 = scmp.ne.s32.totalorder %s4088_s28, %s2580_s29 }
 0x25f   : > { %2504 = vmatprep.subr.mxu1 %v2002_v49  ;;  %2465 = vmatprep.subr.mxu0 %v2002_v49 }
 0x260   : > { %2520 = vmatpush3.msra.mxu1 %v2002_v49  ;;  %2466 = vmatpush3.msra.mxu0 %v2002_v49  ;;  %p2582_p2 = pnand %p2581_p1, %p2721_p6 }
 0x261   : > { %2505 = vmatprep.subr.mxu1 %v2001_v61  ;;  %2467 = vmatprep.subr.mxu0 %v2001_v61 }
 0x262   : > { %2521 = vmatpush3.msra.mxu1 %v2001_v61  ;;  %2468 = vmatpush3.msra.mxu0 %v2001_v61  ;;  %p2583_p3 = pneg %p2582_p2 }
 0x263   : > { %2506 = vmatprep.subr.mxu1 %v3989_v26  ;;  %2469 = vmatprep.subr.mxu0 %v3989_v26 }
 0x264   : > { %2522 = vmatpush3.msra.mxu1 %v3989_v26  ;;  %2470 = vmatpush3.msra.mxu0 %v3989_v26 }
 0x265   : > { %2507 = vmatprep.subr.mxu1 %v3983_v10  ;;  %2471 = vmatprep.subr.mxu0 %v3983_v10 }
 0x266   : > { %2523 = vmatpush3.msra.mxu1 %v3983_v10  ;;  %2472 = vmatpush3.msra.mxu0 %v3983_v10 }
 0x267   : > { %2508 = vmatprep.subr.mxu1 %v3977_v62  ;;  %2473 = vmatprep.subr.mxu0 %v3977_v62 }
 0x268   : > { %2524 = vmatpush3.msra.mxu1 %v3977_v62  ;;  %2474 = vmatpush3.msra.mxu0 %v3977_v62 }
 0x269   : > { %2509 = vmatprep.subr.mxu1 %v3971_v1  ;;  %2475 = vmatprep.subr.mxu0 %v3971_v1 }
 0x26a   : > { %2525 = vmatpush3.msra.mxu1 %v3971_v1  ;;  %2476 = vmatpush3.msra.mxu0 %v3971_v1 }
 0x26b   : > { %2510 = vmatprep.subr.mxu1 %v3965_v14  ;;  %2477 = vmatprep.subr.mxu0 %v3965_v14 }
 0x26c   : > { %2526 = vmatpush3.msra.mxu1 %v3965_v14  ;;  %2478 = vmatpush3.msra.mxu0 %v3965_v14 }
 0x26d   : > { %2511 = vmatprep.subr.mxu1 %v3959_v12  ;;  %2479 = vmatprep.subr.mxu0 %v3959_v12 }
 0x26e   : > { %2527 = vmatpush3.msra.mxu1 %v3959_v12  ;;  %2480 = vmatpush3.msra.mxu0 %v3959_v12 }
 0x26f   : > { %2512 = vmatprep.subr.mxu1 %v3953_v43  ;;  %2481 = vmatprep.subr.mxu0 %v3953_v43 }
 0x270   : > { %2528 = vmatpush3.msra.mxu1 %v3953_v43  ;;  %2482 = vmatpush3.msra.mxu0 %v3953_v43 }
 0x271   : > { %2513 = vmatprep.subr.mxu1 %v3947_v18  ;;  %2483 = vmatprep.subr.mxu0 %v3947_v18 }
 0x272   : > { %2529 = vmatpush3.msra.mxu1 %v3947_v18  ;;  %2484 = vmatpush3.msra.mxu0 %v3947_v18  ;;  %v2041_v18 = vld [vmem:[%s4006_s15 + $0x20] sm:$0xff] }
 0x273   : > { %2514 = vmatprep.subr.mxu1 %v3941_v19  ;;  %2485 = vmatprep.subr.mxu0 %v3941_v19 }
 0x274   : > { %2530 = vmatpush3.msra.mxu1 %v3941_v19  ;;  %2486 = vmatpush3.msra.mxu0 %v3941_v19  ;;  %v2037_v19 = vld [vmem:[%s4006_s15] sm:$0xff] }
 0x275   : > { %2515 = vmatprep.subr.mxu1 %v3935_v25  ;;  %2487 = vmatprep.subr.mxu0 %v3935_v25 }
 0x276   : > { %2531 = vmatpush3.msra.mxu1 %v3935_v25  ;;  %2488 = vmatpush3.msra.mxu0 %v3935_v25  ;;  %v2038_v25 = vld [vmem:[%s4006_s15 + $0x8] sm:$0xff] }
 0x277   : > { %2516 = vmatprep.subr.mxu1 %v3929_v13  ;;  %2489 = vmatprep.subr.mxu0 %v3929_v13 }
 0x278   : > { %2532 = vmatpush3.msra.mxu1 %v3929_v13  ;;  %2490 = vmatpush3.msra.mxu0 %v3929_v13  ;;  %v2042_v13 = vld [vmem:[%s4006_s15 + $0x28] sm:$0xff]  ;;  %s2644_s15 = smov [#allocation4]  }
 0x279   : > { %2517 = vmatprep.subr.mxu1 %v3921_v58  ;;  %2496 = vmatprep.mubr.f32.mxu1 %v2039_v4  ;;  %s2584_s10 = sshll.u32 %s2644_s15, 4  ;;  %s2585_s10 = int_to_ptr.vmem [resolvable:$false] %s2584_s10 }
 0x27a   : > { %2533 = vmatpush3.msra.mxu1 %v3921_v58  ;;  %2491 = vmatprep.subr.mxu0 %v3921_v58  ;;  %s2586_s25 = scalar_lea.vmem %s2585_s10, 4096  ;;  %p2587_p4 = scmp.lt.s32.totalorder %s4088_s28, %s2585_s10 }
 0x27b   : > { %2497 = vmatmul.mubr.f32.vlgmr.msra.gmra.mxu1 %v2040_v57  ;;  %2492 = vmatpush3.msra.mxu0 %v3921_v58  ;;  %p2588_p5 = scmp.lt.s32.totalorder %s2586_s25, %s2580_s29 }
 0x27c   : > { %2493 = vmatprep.mubr.f32.mxu0 %v2037_v19  ;;  %2499 = vmatprep.mubr.f32.mxu1 %v2041_v18 }
 0x27d   : > { %2494 = vmatmul.mubr.f32.vlgmr.msra.gmra.mxu0 %v2038_v25  ;;  %p2589_p7 = por %p2588_p5, %p2587_p4 }
 0x27f   : > { %2500 = vmatmul.mubr.f32.gmra.mxu1 %v2042_v13  ;;  %p2590_p10 = pnand %p2589_p7, %p2583_p3 }
 0x281   : > { %2593 = shalt.err (!%p2590_p10)
}
 0x282   : > { %s2594_s13 = scalar_lea.hbm %s4086_s19, 2048  ;;  %s2598_s12 = scalar_lea.hbm %s4173_s6, 4096 }
 0x283   : > { %p2595_p11 = scmp.ne.s32.totalorder %s4086_s19, %s2594_s13  ;;  %p2599_p0 = scmp.lt.s32.totalorder %s4086_s19, %s4173_s6 }
 0x284   : > { %p2600_p1 = scmp.lt.s32.totalorder %s2598_s12, %s2594_s13 }
 0x285   : > { %p2596_p12 = pnand %p2595_p11, %p2721_p6 }
 0x286   : > { %p2601_p2 = por %p2600_p1, %p2599_p0 }
 0x287   : > { %p2597_p13 = pneg %p2596_p12 }
 0x289   : > { %p2602_p3 = pnand %p2601_p2, %p2597_p13 }
 0x28b   : > { %2605 = shalt.err (!%p2602_p3)
}
 0x28c   : > { %s2645_s16 = smov 128   ;;  %s2646_s18 = smov 8   ;;  %v2034_v58 = vld [vmem:[%s4172_s5 + $0x18] sm:$0xff]  ;;  %v2032_v12 = vld [vmem:[%s4172_s5 + $0x8] sm:$0xff]  ;;  %v2033_v14 = vld [vmem:[%s4172_s5 + $0x10] sm:$0xff] }
 0x28d   : > { %2537 = dma.vmem_to_hbm [thread:$0]  (%p2721_p6), %s4088_s28, 2048, %s4086_s19, %s2151_s14, %s2645_s16, %s2645_s16, %s2646_s18  }
 0x28e   : > { %v2031_v62 = vld [vmem:[%s4172_s5] sm:$0xff]  ;;  %v2036_v15 = vld [vmem:[%s4172_s5 + $0x28] sm:$0xff] }
 0x28f   : > { %v2035_v44 = vld [vmem:[%s4172_s5 + $0x20] sm:$0xff] }
 0x33b   : > { %v2498_v43 = vpop.f32.mrf.mxu1 }
 0x33c   : > { %v2141_v1 = vadd.f32 %v2498_v43, %v2034_v58 }
 0x33d   : > { %v2495_v41 = vpop.f32.mrf.mxu0  ;;  %v2119_v59 = vpop.f32.mrf.mxu1 }
 0x33e   : > { %2147 = vst [vmem:[%s4172_s5 + $0x18] sm:$0xff] %v2141_v1  ;;  %v2139_v23 = vadd.f32 %v2495_v41, %v2032_v12  ;;  %v2140_v30 = vadd.f32 %v2119_v59, %v2033_v14 }
 0x33f   : > { %v2109_v42 = vpop.f32.mrf.mxu0  ;;  %v2501_v46 = vpop.f32.mrf.mxu1 }
 0x340   : > { %2145 = vst [vmem:[%s4172_s5 + $0x8] sm:$0xff] %v2139_v23  ;;  %2146 = vst [vmem:[%s4172_s5 + $0x10] sm:$0xff] %v2140_v30  ;;  %v2138_v45 = vadd.f32 %v2109_v42, %v2031_v62  ;;  %v2143_v50 = vadd.f32 %v2501_v46, %v2036_v15 }
 0x341   : > { %v2129_v8 = vpop.f32.mrf.mxu1 }
 0x342   : > { %2144 = vst [vmem:[%s4172_s5] sm:$0xff] %v2138_v45  ;;  %2149 = vst [vmem:[%s4172_s5 + $0x28] sm:$0xff] %v2143_v50  ;;  %v2142_v10 = vadd.f32 %v2129_v8, %v2035_v44 }
 0x344   : > { %2148 = vst [vmem:[%s4172_s5 + $0x20] sm:$0xff] %v2142_v10 }
 0x345 PF: > { %s2185_s7 = sand.u32 1, %s2628_s21   ;;  %p2540_p6 = pnand %p2264_p9, %p2725_p8 }
 0x346   : > { %s2186_s20 = scalar_lea.sflag [#allocation5], %s2185_s7 }
 0x347   : > { %p2541_p4 = pneg %p2540_p6 }
 0x349   : > { %2623 = dma.done.wait (%p2541_p4), %s2186_s20, 2048  }
 0x34a   : > { %2625 = vsyncadd (%p2541_p4), %s2186_s20, 4294965248  ;;  %p17_p5 = scmp.ge.s32.totalorder %s2707_s27, 4   ;;  %s4222_s21 = smov %s2632_s22 }
 0x34b   : > { %s4223_s22 = smov %s2636_s23  ;;  %s4224_s23 = smov %s2719_s30 }
 0x34c   : > { %s4225_s24 = smov %s2707_s27  ;;  %19 = sbr.rel (!%p17_p5) target bundleno = 3 (0x3), region = 136 }
 0x351   :  { %2191 = vsyncpa [#allocation5], 1 }
 0x352   :  { %2193 = vsyncpa [#allocation5 + $0x1], 1 }

</bundles_post_ra>
